<compile_context>
chip_gen: v7x
topology: tpu7x:2x2x1
jax: 0.10.0
libtpu: 0.0.40
codegen_flags: <defaults>
</compile_context>

<pallas_src>
import math
import random
import numpy as np

import jax
import jax.numpy as jnp
from jax.experimental import pallas as pl
from jax.experimental.pallas import tpu as pltpu


# ----------------------------- config (small, synthetic) -----------------------------
class Config:
    vocab_size = 64
    hidden_size = 32
    num_attention_heads = 4
    intermediate_size = 64
    num_hidden_layers = 2
    max_position_embeddings = 32
    initializer_range = 0.02
    layer_norm_eps = 1e-5
    pad_token_id = 1


SEGMENTS = 4
MASK_ID = 0


# ----------------------------- host-side reference helpers -----------------------------
def create_masked_lm_predictions(tokens, masked_lm_prob, max_predictions_per_seq,
                                 vocab_list, use_ap=False, mask_id=0):
    """Faithful numpy port of the reference function (uses the global `random` module)."""
    origin_tokens = tokens.copy()
    tokens = tokens.copy()
    vocab_list = np.arange(vocab_list).tolist()
    if not use_ap:
        cand_list = np.arange(tokens.shape[1] - 1) + 1
    else:
        cand_list = np.arange(tokens.shape[1])
    num_to_mask = min(max_predictions_per_seq,
                      max(1, int(round(tokens.shape[1] * masked_lm_prob))))
    for bs_index in range(tokens.shape[0]):
        cand_indices = cand_list.tolist()
        random.shuffle(cand_indices)
        mask_indices = sorted(random.sample(cand_indices, num_to_mask))
        for index in mask_indices:
            if random.random() < 0.8:
                masked_token = -1
            elif random.random() < 0.5:
                masked_token = int(tokens[bs_index][index])
            else:
                masked_token = int(random.choice(vocab_list))
            tokens[bs_index][index] = masked_token
            if masked_token == -1:
                origin_tokens[bs_index][index] = mask_id
            else:
                origin_tokens[bs_index][index] = masked_token
    return origin_tokens, tokens


def segment_and_filter(input_ids_np, segments):
    """Reshape (m, n) -> (m*segments, n//segments), drop all-padding rows, count used
    segments per document (equivalent to the reference while-loop)."""
    m, n = input_ids_np.shape
    input_segs = input_ids_np.reshape(m * segments, n // segments)
    all_pad = (input_segs == 1).all(axis=1)
    userows = np.where(~all_pad)[0]
    use_input_ids = input_segs[userows, :]
    use_input_flag = segments - all_pad.reshape(m, segments).sum(axis=1)
    assert int(np.sum(use_input_flag)) == len(use_input_ids)
    return use_input_ids, use_input_flag


# ----------------------------- kernel-side numerics -----------------------------
def _layernorm(x, g, b, eps):
    mu = jnp.mean(x, axis=-1, keepdims=True)
    var = jnp.mean((x - mu) ** 2, axis=-1, keepdims=True)
    return (x - mu) * jax.lax.rsqrt(var + eps) * g + b


def make_layer_kernel(Rb, S, H, NH, eps):
    HD = H // NH
    M = Rb * S
    scale = 1.0 / math.sqrt(HD)

    def kernel(h_ref, bias_ref, wqkv_ref, bqkv_ref, wo_ref, bo_ref,
               g1_ref, be1_ref, w1_ref, bi1_ref, w2_ref, bi2_ref,
               g2_ref, be2_ref, o_ref):
        h = h_ref[...].reshape(M, H)                      # (M, H) f32 (leading-dim merge only)
        bias = bias_ref[...]                              # (Rb, 1, S) f32; -1e9 on padded keys
        wo = wo_ref[...]                                  # (H, H) bf16

        # QKV projection: bf16 MXU inputs, f32 accumulation.
        qkv = jnp.dot(h.astype(jnp.bfloat16), wqkv_ref[...],
                      preferred_element_type=jnp.float32) + bqkv_ref[...]   # (M, 3H) f32

        attn = jnp.zeros((M, H), jnp.float32)
        for hh in range(NH):   # static unrolled head loop; every contraction is batched over Rb rows
            q_h = qkv[:, hh * HD:(hh + 1) * HD].reshape(Rb, S, HD)
            k_h = qkv[:, H + hh * HD:H + (hh + 1) * HD].reshape(Rb, S, HD)
            v_h = qkv[:, 2 * H + hh * HD:2 * H + (hh + 1) * HD].reshape(Rb, S, HD)
            s = jnp.einsum('rqd,rkd->rqk',
                           q_h.astype(jnp.bfloat16), k_h.astype(jnp.bfloat16),
                           preferred_element_type=jnp.float32) * scale      # (Rb, S, S) f32
            s = s + bias                                                     # broadcast over query dim
            # softmax in f32; divide on the EUP via approx reciprocal
            mx = jnp.max(s, axis=-1, keepdims=True)
            e = jnp.exp(s - mx)
            p = e * pl.reciprocal(jnp.sum(e, axis=-1, keepdims=True), approx=True)
            ctx_h = jnp.einsum('rqk,rkd->rqd',
                               p.astype(jnp.bfloat16), v_h.astype(jnp.bfloat16),
                               preferred_element_type=jnp.float32).reshape(M, HD)
            # fold this head straight into the output projection (no head concatenate)
            attn = attn + jnp.dot(ctx_h.astype(jnp.bfloat16), wo[hh * HD:(hh + 1) * HD, :],
                                  preferred_element_type=jnp.float32)
        attn = attn + bo_ref[...]

        h1 = _layernorm(h + attn, g1_ref[...], be1_ref[...], eps)
        ff = jax.nn.gelu(jnp.dot(h1.astype(jnp.bfloat16), w1_ref[...],
                                 preferred_element_type=jnp.float32) + bi1_ref[...])
        ff = jnp.dot(ff.astype(jnp.bfloat16), w2_ref[...],
                     preferred_element_type=jnp.float32) + bi2_ref[...]
        o_ref[...] = _layernorm(h1 + ff, g2_ref[...], be2_ref[...], eps).reshape(Rb, S, H)

    return kernel


def make_lmhead_ce_kernel(Rb, S, H, Vp, eps):
    M = Rb * S

    def kernel(h_ref, lab_ref, wd_ref, bd_ref, g_ref, b_ref, dec_ref, bv_ref, loss_ref):
        h = h_ref[...].reshape(M, H)
        lab = lab_ref[...]                                # (M, 1) int32, -1 == ignore (pad rows)
        x = jnp.dot(h.astype(jnp.bfloat16), wd_ref[...],
                    preferred_element_type=jnp.float32) + bd_ref[...]
        x = jax.nn.gelu(x)
        x = _layernorm(x, g_ref[...], b_ref[...], eps)
        # lane-dense logits: Vp is a multiple of 128; pad columns carry a -1e9 bias.
        logits = jnp.dot(x.astype(jnp.bfloat16), dec_ref[...],
                         preferred_element_type=jnp.float32) + bv_ref[...]   # (M, Vp) f32
        mx = jnp.max(logits, axis=-1, keepdims=True)
        lse = mx + jnp.log(jnp.sum(jnp.exp(logits - mx), axis=-1, keepdims=True))   # (M, 1)
        iota_v = jax.lax.broadcasted_iota(jnp.int32, (M, Vp), 1)
        onehot = (iota_v == lab).astype(jnp.float32)
        picked = jnp.sum(logits * onehot, axis=-1, keepdims=True)                   # (M, 1)
        valid = (lab >= 0).astype(jnp.float32)
        loss_ref[...] = (lse - picked) * valid            # per-token partial losses (summed in JAX)

    return kernel


# ----------------------------- pallas_call wrappers -----------------------------
def _fullspec(arr):
    nd = arr.ndim
    return pl.BlockSpec(arr.shape, lambda g, _nd=nd: (0,) * _nd)


def encoder_layer_pallas(h, attn_bias, lp, cfg, Rb):
    Rp, S, H = h.shape
    G = Rp // Rb
    kernel = make_layer_kernel(Rb, S, H, cfg.num_attention_heads, cfg.layer_norm_eps)
    weights = [lp["wqkv"], lp["bqkv"], lp["wo"], lp["bo"],
               lp["ln1_g"], lp["ln1_b"], lp["w1"], lp["b1"],
               lp["w2"], lp["b2"], lp["ln2_g"], lp["ln2_b"]]
    in_specs = [pl.BlockSpec((Rb, S, H), lambda g: (g, 0, 0)),
                pl.BlockSpec((Rb, 1, S), lambda g: (g, 0, 0))] + [_fullspec(w) for w in weights]
    return pl.pallas_call(
        kernel,
        grid=(G,),
        in_specs=in_specs,
        out_specs=pl.BlockSpec((Rb, S, H), lambda g: (g, 0, 0)),
        out_shape=jax.ShapeDtypeStruct((Rp, S, H), jnp.float32),
        compiler_params=pltpu.CompilerParams(dimension_semantics=("parallel",)),
    )(h, attn_bias, *weights)


def lm_head_ce_pallas(h, labels_flat, lm, cfg, Rb):
    Rp, S, H = h.shape
    Vp = lm["dec"].shape[1]
    G = Rp // Rb
    M = Rb * S
    kernel = make_lmhead_ce_kernel(Rb, S, H, Vp, cfg.layer_norm_eps)
    weights = [lm["wd"], lm["bd"], lm["ln_g"], lm["ln_b"], lm["dec"], lm["bv"]]
    in_specs = [pl.BlockSpec((Rb, S, H), lambda g: (g, 0, 0)),
                pl.BlockSpec((M, 1), lambda g: (g, 0))] + [_fullspec(w) for w in weights]
    return pl.pallas_call(
        kernel,
        grid=(G,),
        in_specs=in_specs,
        out_specs=pl.BlockSpec((M, 1), lambda g: (g, 0)),
        out_shape=jax.ShapeDtypeStruct((Rp * S, 1), jnp.float32),
        compiler_params=pltpu.CompilerParams(dimension_semantics=("parallel",)),
    )(h, labels_flat, *weights)


# ----------------------------- model forward (masked-LM path, finetune=False) -----------------------------
def mlm_forward(params, cfg, x, labels_flat, attn_bias, Rb):
    Rp, S = x.shape
    # embedding gather + embedding LayerNorm (glue, plain JAX — a gather, not the matmul hot path)
    pos = jnp.arange(S, dtype=jnp.int32)
    h = params["word_emb"][x] + params["pos_emb"][pos][None, :, :]
    mu = jnp.mean(h, axis=-1, keepdims=True)
    var = jnp.mean((h - mu) ** 2, axis=-1, keepdims=True)
    h = (h - mu) * jax.lax.rsqrt(var + cfg.layer_norm_eps) * params["emb_ln_g"] + params["emb_ln_b"]
    for lp in params["layers"]:
        h = encoder_layer_pallas(h, attn_bias, lp, cfg, Rb)
    loss_tok = lm_head_ce_pallas(h, labels_flat, params["lm_head"], cfg, Rb)
    cnt = jnp.sum((labels_flat >= 0).astype(jnp.float32))
    return jnp.sum(loss_tok) / jnp.maximum(cnt, 1.0)


def combined_roberta_forward(params, cfg, input_ids_np):
    """Mirrors CombinedRoberta.forward with finetune=False: returns (loss, None)."""
    use_input_ids, use_input_flag = segment_and_filter(input_ids_np, SEGMENTS)
    x_np, masked_lm_labels = create_masked_lm_predictions(
        use_input_ids, masked_lm_prob=0.15,
        max_predictions_per_seq=cfg.max_position_embeddings // SEGMENTS,
        vocab_list=cfg.vocab_size, use_ap=False, mask_id=MASK_ID)
    # The reference writes -1 as the [MASK] sentinel into the corrupted tokens; remap it to
    # MASK_ID before the embedding gather (PyTorch would error on -1, JAX would wrap).
    x_np = np.where(x_np == -1, MASK_ID, x_np).astype(np.int32)
    lab_np = masked_lm_labels.astype(np.int32)

    R, S = x_np.shape
    Rb = max(1, 128 // S)                    # rows per block so flattened M = Rb*S ~= 128
    R_pad = ((R + Rb - 1) // Rb) * Rb
    if R_pad > R:                            # pad with all-padding rows; labels -1 => ignored
        x_np = np.concatenate([x_np, np.full((R_pad - R, S), cfg.pad_token_id, np.int32)], 0)
        lab_np = np.concatenate([lab_np, np.full((R_pad - R, S), -1, np.int32)], 0)

    x = jnp.asarray(x_np, dtype=jnp.int32)                            # (R_pad, S)
    labels_flat = jnp.asarray(lab_np.reshape(R_pad * S, 1), dtype=jnp.int32)
    mask = (x != 1).astype(jnp.float32)                               # attention_mask
    attn_bias = ((1.0 - mask) * -1e9)[:, None, :]                     # (R_pad, 1, S) f32
    del use_input_flag  # TODO(synk): inner model's consumption of seg_flags is undefined
    loss = mlm_forward(params, cfg, x, labels_flat, attn_bias, Rb)
    return loss, None


# ----------------------------- deterministic parameter init -----------------------------
def init_params(key, cfg):
    std = cfg.initializer_range
    H, V, I, P = cfg.hidden_size, cfg.vocab_size, cfg.intermediate_size, cfg.max_position_embeddings
    V_pad = ((V + 127) // 128) * 128        # lane-dense vocab for the LM-head decoder
    keys = iter(jax.random.split(key, 64))
    nrm = lambda shape: jax.random.normal(next(keys), shape, jnp.float32) * std
    word_emb = nrm((V, H)).at[cfg.pad_token_id].set(0.0)   # nn.Embedding padding_idx zeroed
    pos_emb = nrm((P, H))
    layers = []
    for _ in range(cfg.num_hidden_layers):
        layers.append(dict(
            wqkv=nrm((H, 3 * H)).astype(jnp.bfloat16), bqkv=jnp.zeros((1, 3 * H), jnp.float32),
            wo=nrm((H, H)).astype(jnp.bfloat16), bo=jnp.zeros((1, H), jnp.float32),
            ln1_g=jnp.ones((1, H), jnp.float32), ln1_b=jnp.zeros((1, H), jnp.float32),
            w1=nrm((H, I)).astype(jnp.bfloat16), b1=jnp.zeros((1, I), jnp.float32),
            w2=nrm((I, H)).astype(jnp.bfloat16), b2=jnp.zeros((1, H), jnp.float32),
            ln2_g=jnp.ones((1, H), jnp.float32), ln2_b=jnp.zeros((1, H), jnp.float32)))
    dec = jnp.zeros((H, V_pad), jnp.bfloat16).at[:, :V].set(word_emb.T.astype(jnp.bfloat16))
    bv = jnp.full((1, V_pad), -1e9, jnp.float32).at[:, :V].set(0.0)   # mask padded vocab cols
    lm_head = dict(wd=nrm((H, H)).astype(jnp.bfloat16), bd=jnp.zeros((1, H), jnp.float32),
                   ln_g=jnp.ones((1, H), jnp.float32), ln_b=jnp.zeros((1, H), jnp.float32),
                   dec=dec,                              # decoder tied to embeddings
                   bv=bv)
    return dict(word_emb=word_emb, pos_emb=pos_emb,
                emb_ln_g=jnp.ones((1, H), jnp.float32), emb_ln_b=jnp.zeros((1, H), jnp.float32),
                layers=layers, lm_head=lm_head)


# ----------------------------- main -----------------------------
if __name__ == "__main__":
    random.seed(0)
    cfg = Config()
    key = jax.random.PRNGKey(0)
    pkey, dkey = jax.random.split(key)
    params = init_params(pkey, cfg)

    # input_ids: batch m=2, full sequence n=32, segments=4 -> per-segment seq S=8
    m, n = 2, 32
    S = n // SEGMENTS
    ids = jax.random.randint(dkey, (m, n), 2, cfg.vocab_size, dtype=jnp.int32)
    ids_np = np.asarray(ids).copy()
    ids_np[1, -S:] = 1          # make one segment fully padded so filtering is exercised

    loss, score = combined_roberta_forward(params, cfg, ids_np)
    loss = jax.block_until_ready(loss)
    assert np.isfinite(float(loss))
    assert score is None
    print("KERNEL_OK")
</pallas_src>

<mosaic_0001>
module attributes {stable_mosaic.version = 11 : i64} {
  func.func @kernel(%arg0: i32, %arg1: memref<16x8x32xf32, #tpu.memory_space<vmem>>, %arg2: memref<16x1x8xf32, #tpu.memory_space<vmem>>, %arg3: memref<32x96xbf16, #tpu.memory_space<vmem>>, %arg4: memref<1x96xf32, #tpu.memory_space<vmem>>, %arg5: memref<32x32xbf16, #tpu.memory_space<vmem>>, %arg6: memref<1x32xf32, #tpu.memory_space<vmem>>, %arg7: memref<1x32xf32, #tpu.memory_space<vmem>>, %arg8: memref<1x32xf32, #tpu.memory_space<vmem>>, %arg9: memref<32x64xbf16, #tpu.memory_space<vmem>>, %arg10: memref<1x64xf32, #tpu.memory_space<vmem>>, %arg11: memref<64x32xbf16, #tpu.memory_space<vmem>>, %arg12: memref<1x32xf32, #tpu.memory_space<vmem>>, %arg13: memref<1x32xf32, #tpu.memory_space<vmem>>, %arg14: memref<1x32xf32, #tpu.memory_space<vmem>>, %arg15: memref<16x8x32xf32, #tpu.memory_space<vmem>>) attributes {dimension_semantics = [#tpu.dimension_semantics<parallel>], iteration_bounds = array<i64: 1>, scalar_prefetch = 0 : i64, scratch_operands = 0 : i64, tpu.core_type = #tpu.core_type<tc>, window_params = [{transform_indices = @transform_0, window_bounds = array<i64: 16, 8, 32>}, {transform_indices = @transform_1, window_bounds = array<i64: 16, 1, 8>}, {pipeline_mode = #tpu.pipeline_mode<synchronous>, transform_indices = @transform_2, window_bounds = array<i64: 32, 96>}, {pipeline_mode = #tpu.pipeline_mode<synchronous>, transform_indices = @transform_3, window_bounds = array<i64: 1, 96>}, {pipeline_mode = #tpu.pipeline_mode<synchronous>, transform_indices = @transform_4, window_bounds = array<i64: 32, 32>}, {pipeline_mode = #tpu.pipeline_mode<synchronous>, transform_indices = @transform_5, window_bounds = array<i64: 1, 32>}, {pipeline_mode = #tpu.pipeline_mode<synchronous>, transform_indices = @transform_6, window_bounds = array<i64: 1, 32>}, {pipeline_mode = #tpu.pipeline_mode<synchronous>, transform_indices = @transform_7, window_bounds = array<i64: 1, 32>}, {pipeline_mode = #tpu.pipeline_mode<synchronous>, transform_indices = @transform_8, window_bounds = array<i64: 32, 64>}, {pipeline_mode = #tpu.pipeline_mode<synchronous>, transform_indices = @transform_9, window_bounds = array<i64: 1, 64>}, {pipeline_mode = #tpu.pipeline_mode<synchronous>, transform_indices = @transform_10, window_bounds = array<i64: 64, 32>}, {pipeline_mode = #tpu.pipeline_mode<synchronous>, transform_indices = @transform_11, window_bounds = array<i64: 1, 32>}, {pipeline_mode = #tpu.pipeline_mode<synchronous>, transform_indices = @transform_12, window_bounds = array<i64: 1, 32>}, {pipeline_mode = #tpu.pipeline_mode<synchronous>, transform_indices = @transform_13, window_bounds = array<i64: 1, 32>}, {transform_indices = @transform_14, window_bounds = array<i64: 16, 8, 32>}]} {
    %c0 = arith.constant 0 : index
    %c0_0 = arith.constant 0 : index
    %c0_1 = arith.constant 0 : index
    %0 = vector.load %arg1[%c0, %c0_0, %c0_1] : memref<16x8x32xf32, #tpu.memory_space<vmem>>, vector<16x8x32xf32>
    %1 = vector.shape_cast %0 : vector<16x8x32xf32> to vector<128x32xf32>
    %c0_2 = arith.constant 0 : index
    %c0_3 = arith.constant 0 : index
    %c0_4 = arith.constant 0 : index
    %2 = vector.load %arg2[%c0_2, %c0_3, %c0_4] : memref<16x1x8xf32, #tpu.memory_space<vmem>>, vector<16x1x8xf32>
    %c0_5 = arith.constant 0 : index
    %c0_6 = arith.constant 0 : index
    %3 = vector.load %arg5[%c0_5, %c0_6] : memref<32x32xbf16, #tpu.memory_space<vmem>>, vector<32x32xbf16>
    %4 = arith.truncf %1 : vector<128x32xf32> to vector<128x32xbf16>
    %c0_7 = arith.constant 0 : index
    %c0_8 = arith.constant 0 : index
    %5 = vector.load %arg3[%c0_7, %c0_8] : memref<32x96xbf16, #tpu.memory_space<vmem>>, vector<32x96xbf16>
    %cst = arith.constant dense<0.000000e+00> : vector<128x96xf32>
    %6 = tpu.matmul %4, %5, %cst {dimension_numbers = #tpu.dot_dimension_numbers<[1], [0], [0], [1], [0, 0, 1, 1], [], []>} : vector<128x32xbf16>, vector<32x96xbf16>, vector<128x96xf32> -> vector<128x96xf32>
    %c0_9 = arith.constant 0 : index
    %c0_10 = arith.constant 0 : index
    %7 = vector.load %arg4[%c0_9, %c0_10] : memref<1x96xf32, #tpu.memory_space<vmem>>, vector<1x96xf32>
    %8 = vector.broadcast %7 : vector<1x96xf32> to vector<128x96xf32>
    %9 = arith.addf %6, %8 : vector<128x96xf32>
    %cst_11 = arith.constant 0.000000e+00 : f32
    %10 = vector.broadcast %cst_11 : f32 to vector<128x32xf32>
    %11 = vector.extract_strided_slice %9 {offsets = [0, 0], sizes = [128, 8], strides = [1, 1]} : vector<128x96xf32> to vector<128x8xf32>
    %12 = vector.shape_cast %11 : vector<128x8xf32> to vector<16x8x8xf32>
    %13 = vector.extract_strided_slice %9 {offsets = [0, 32], sizes = [128, 8], strides = [1, 1]} : vector<128x96xf32> to vector<128x8xf32>
    %14 = vector.shape_cast %13 : vector<128x8xf32> to vector<16x8x8xf32>
    %15 = vector.extract_strided_slice %9 {offsets = [0, 64], sizes = [128, 8], strides = [1, 1]} : vector<128x96xf32> to vector<128x8xf32>
    %16 = vector.shape_cast %15 : vector<128x8xf32> to vector<16x8x8xf32>
    %17 = arith.truncf %12 : vector<16x8x8xf32> to vector<16x8x8xbf16>
    %18 = arith.truncf %14 : vector<16x8x8xf32> to vector<16x8x8xbf16>
    "tpu.trace_start"() <{level = 10 : i32, message = "rqd,rkd->rqk"}> : () -> ()
    %cst_12 = arith.constant dense<0.000000e+00> : vector<16x8x8xf32>
    %19 = tpu.matmul %17, %18, %cst_12 {dimension_numbers = #tpu.dot_dimension_numbers<[2], [2], [1], [1], [0, 0, 0, 1, 1, 1], [0], [0]>} : vector<16x8x8xbf16>, vector<16x8x8xbf16>, vector<16x8x8xf32> -> vector<16x8x8xf32>
    "tpu.trace_stop"() : () -> ()
    %cst_13 = arith.constant 0.353553385 : f32
    %20 = vector.broadcast %cst_13 : f32 to vector<16x8x8xf32>
    %21 = arith.mulf %19, %20 : vector<16x8x8xf32>
    %22 = vector.broadcast %2 : vector<16x1x8xf32> to vector<16x8x8xf32>
    %23 = arith.addf %21, %22 : vector<16x8x8xf32>
    %cst_14 = arith.constant dense<0xFF800000> : vector<16x8xf32>
    %24 = vector.multi_reduction <maximumf>, %23, %cst_14 [2] : vector<16x8x8xf32> to vector<16x8xf32>
    %25 = vector.shape_cast %24 : vector<16x8xf32> to vector<16x8x1xf32>
    %26 = vector.broadcast %25 : vector<16x8x1xf32> to vector<16x8x8xf32>
    %27 = arith.subf %23, %26 : vector<16x8x8xf32>
    %28 = math.exp %27 : vector<16x8x8xf32>
    %cst_15 = arith.constant dense<0.000000e+00> : vector<16x8xf32>
    %29 = vector.multi_reduction <add>, %28, %cst_15 [2] : vector<16x8x8xf32> to vector<16x8xf32>
    %30 = vector.shape_cast %29 : vector<16x8xf32> to vector<16x8x1xf32>
    %31 = tpu.reciprocal %30 {approx = true} : vector<16x8x1xf32> -> vector<16x8x1xf32>
    %32 = vector.broadcast %31 : vector<16x8x1xf32> to vector<16x8x8xf32>
    %33 = arith.mulf %28, %32 : vector<16x8x8xf32>
    %34 = arith.truncf %33 : vector<16x8x8xf32> to vector<16x8x8xbf16>
    %35 = arith.truncf %16 : vector<16x8x8xf32> to vector<16x8x8xbf16>
    "tpu.trace_start"() <{level = 10 : i32, message = "rqk,rkd->rqd"}> : () -> ()
    %cst_16 = arith.constant dense<0.000000e+00> : vector<16x8x8xf32>
    %36 = tpu.matmul %34, %35, %cst_16 {dimension_numbers = #tpu.dot_dimension_numbers<[2], [1], [1], [2], [0, 0, 0, 1, 1, 2], [0], [0]>} : vector<16x8x8xbf16>, vector<16x8x8xbf16>, vector<16x8x8xf32> -> vector<16x8x8xf32>
    "tpu.trace_stop"() : () -> ()
    %37 = vector.shape_cast %36 : vector<16x8x8xf32> to vector<128x8xf32>
    %38 = arith.truncf %37 : vector<128x8xf32> to vector<128x8xbf16>
    %39 = vector.extract_strided_slice %3 {offsets = [0, 0], sizes = [8, 32], strides = [1, 1]} : vector<32x32xbf16> to vector<8x32xbf16>
    %cst_17 = arith.constant dense<0.000000e+00> : vector<128x32xf32>
    %40 = tpu.matmul %38, %39, %cst_17 {dimension_numbers = #tpu.dot_dimension_numbers<[1], [0], [0], [1], [0, 0, 1, 1], [], []>} : vector<128x8xbf16>, vector<8x32xbf16>, vector<128x32xf32> -> vector<128x32xf32>
    %41 = arith.addf %10, %40 : vector<128x32xf32>
    %42 = vector.extract_strided_slice %9 {offsets = [0, 8], sizes = [128, 8], strides = [1, 1]} : vector<128x96xf32> to vector<128x8xf32>
    %43 = vector.shape_cast %42 : vector<128x8xf32> to vector<16x8x8xf32>
    %44 = vector.extract_strided_slice %9 {offsets = [0, 40], sizes = [128, 8], strides = [1, 1]} : vector<128x96xf32> to vector<128x8xf32>
    %45 = vector.shape_cast %44 : vector<128x8xf32> to vector<16x8x8xf32>
    %46 = vector.extract_strided_slice %9 {offsets = [0, 72], sizes = [128, 8], strides = [1, 1]} : vector<128x96xf32> to vector<128x8xf32>
    %47 = vector.shape_cast %46 : vector<128x8xf32> to vector<16x8x8xf32>
    %48 = arith.truncf %43 : vector<16x8x8xf32> to vector<16x8x8xbf16>
    %49 = arith.truncf %45 : vector<16x8x8xf32> to vector<16x8x8xbf16>
    "tpu.trace_start"() <{level = 10 : i32, message = "rqd,rkd->rqk"}> : () -> ()
    %cst_18 = arith.constant dense<0.000000e+00> : vector<16x8x8xf32>
    %50 = tpu.matmul %48, %49, %cst_18 {dimension_numbers = #tpu.dot_dimension_numbers<[2], [2], [1], [1], [0, 0, 0, 1, 1, 1], [0], [0]>} : vector<16x8x8xbf16>, vector<16x8x8xbf16>, vector<16x8x8xf32> -> vector<16x8x8xf32>
    "tpu.trace_stop"() : () -> ()
    %cst_19 = arith.constant 0.353553385 : f32
    %51 = vector.broadcast %cst_19 : f32 to vector<16x8x8xf32>
    %52 = arith.mulf %50, %51 : vector<16x8x8xf32>
    %53 = vector.broadcast %2 : vector<16x1x8xf32> to vector<16x8x8xf32>
    %54 = arith.addf %52, %53 : vector<16x8x8xf32>
    %cst_20 = arith.constant dense<0xFF800000> : vector<16x8xf32>
    %55 = vector.multi_reduction <maximumf>, %54, %cst_20 [2] : vector<16x8x8xf32> to vector<16x8xf32>
    %56 = vector.shape_cast %55 : vector<16x8xf32> to vector<16x8x1xf32>
    %57 = vector.broadcast %56 : vector<16x8x1xf32> to vector<16x8x8xf32>
    %58 = arith.subf %54, %57 : vector<16x8x8xf32>
    %59 = math.exp %58 : vector<16x8x8xf32>
    %cst_21 = arith.constant dense<0.000000e+00> : vector<16x8xf32>
    %60 = vector.multi_reduction <add>, %59, %cst_21 [2] : vector<16x8x8xf32> to vector<16x8xf32>
    %61 = vector.shape_cast %60 : vector<16x8xf32> to vector<16x8x1xf32>
    %62 = tpu.reciprocal %61 {approx = true} : vector<16x8x1xf32> -> vector<16x8x1xf32>
    %63 = vector.broadcast %62 : vector<16x8x1xf32> to vector<16x8x8xf32>
    %64 = arith.mulf %59, %63 : vector<16x8x8xf32>
    %65 = arith.truncf %64 : vector<16x8x8xf32> to vector<16x8x8xbf16>
    %66 = arith.truncf %47 : vector<16x8x8xf32> to vector<16x8x8xbf16>
    "tpu.trace_start"() <{level = 10 : i32, message = "rqk,rkd->rqd"}> : () -> ()
    %cst_22 = arith.constant dense<0.000000e+00> : vector<16x8x8xf32>
    %67 = tpu.matmul %65, %66, %cst_22 {dimension_numbers = #tpu.dot_dimension_numbers<[2], [1], [1], [2], [0, 0, 0, 1, 1, 2], [0], [0]>} : vector<16x8x8xbf16>, vector<16x8x8xbf16>, vector<16x8x8xf32> -> vector<16x8x8xf32>
    "tpu.trace_stop"() : () -> ()
    %68 = vector.shape_cast %67 : vector<16x8x8xf32> to vector<128x8xf32>
    %69 = arith.truncf %68 : vector<128x8xf32> to vector<128x8xbf16>
    %70 = vector.extract_strided_slice %3 {offsets = [8, 0], sizes = [8, 32], strides = [1, 1]} : vector<32x32xbf16> to vector<8x32xbf16>
    %cst_23 = arith.constant dense<0.000000e+00> : vector<128x32xf32>
    %71 = tpu.matmul %69, %70, %cst_23 {dimension_numbers = #tpu.dot_dimension_numbers<[1], [0], [0], [1], [0, 0, 1, 1], [], []>} : vector<128x8xbf16>, vector<8x32xbf16>, vector<128x32xf32> -> vector<128x32xf32>
    %72 = arith.addf %41, %71 : vector<128x32xf32>
    %73 = vector.extract_strided_slice %9 {offsets = [0, 16], sizes = [128, 8], strides = [1, 1]} : vector<128x96xf32> to vector<128x8xf32>
    %74 = vector.shape_cast %73 : vector<128x8xf32> to vector<16x8x8xf32>
    %75 = vector.extract_strided_slice %9 {offsets = [0, 48], sizes = [128, 8], strides = [1, 1]} : vector<128x96xf32> to vector<128x8xf32>
    %76 = vector.shape_cast %75 : vector<128x8xf32> to vector<16x8x8xf32>
    %77 = vector.extract_strided_slice %9 {offsets = [0, 80], sizes = [128, 8], strides = [1, 1]} : vector<128x96xf32> to vector<128x8xf32>
    %78 = vector.shape_cast %77 : vector<128x8xf32> to vector<16x8x8xf32>
    %79 = arith.truncf %74 : vector<16x8x8xf32> to vector<16x8x8xbf16>
    %80 = arith.truncf %76 : vector<16x8x8xf32> to vector<16x8x8xbf16>
    "tpu.trace_start"() <{level = 10 : i32, message = "rqd,rkd->rqk"}> : () -> ()
    %cst_24 = arith.constant dense<0.000000e+00> : vector<16x8x8xf32>
    %81 = tpu.matmul %79, %80, %cst_24 {dimension_numbers = #tpu.dot_dimension_numbers<[2], [2], [1], [1], [0, 0, 0, 1, 1, 1], [0], [0]>} : vector<16x8x8xbf16>, vector<16x8x8xbf16>, vector<16x8x8xf32> -> vector<16x8x8xf32>
    "tpu.trace_stop"() : () -> ()
    %cst_25 = arith.constant 0.353553385 : f32
    %82 = vector.broadcast %cst_25 : f32 to vector<16x8x8xf32>
    %83 = arith.mulf %81, %82 : vector<16x8x8xf32>
    %84 = vector.broadcast %2 : vector<16x1x8xf32> to vector<16x8x8xf32>
    %85 = arith.addf %83, %84 : vector<16x8x8xf32>
    %cst_26 = arith.constant dense<0xFF800000> : vector<16x8xf32>
    %86 = vector.multi_reduction <maximumf>, %85, %cst_26 [2] : vector<16x8x8xf32> to vector<16x8xf32>
    %87 = vector.shape_cast %86 : vector<16x8xf32> to vector<16x8x1xf32>
    %88 = vector.broadcast %87 : vector<16x8x1xf32> to vector<16x8x8xf32>
    %89 = arith.subf %85, %88 : vector<16x8x8xf32>
    %90 = math.exp %89 : vector<16x8x8xf32>
    %cst_27 = arith.constant dense<0.000000e+00> : vector<16x8xf32>
    %91 = vector.multi_reduction <add>, %90, %cst_27 [2] : vector<16x8x8xf32> to vector<16x8xf32>
    %92 = vector.shape_cast %91 : vector<16x8xf32> to vector<16x8x1xf32>
    %93 = tpu.reciprocal %92 {approx = true} : vector<16x8x1xf32> -> vector<16x8x1xf32>
    %94 = vector.broadcast %93 : vector<16x8x1xf32> to vector<16x8x8xf32>
    %95 = arith.mulf %90, %94 : vector<16x8x8xf32>
    %96 = arith.truncf %95 : vector<16x8x8xf32> to vector<16x8x8xbf16>
    %97 = arith.truncf %78 : vector<16x8x8xf32> to vector<16x8x8xbf16>
    "tpu.trace_start"() <{level = 10 : i32, message = "rqk,rkd->rqd"}> : () -> ()
    %cst_28 = arith.constant dense<0.000000e+00> : vector<16x8x8xf32>
    %98 = tpu.matmul %96, %97, %cst_28 {dimension_numbers = #tpu.dot_dimension_numbers<[2], [1], [1], [2], [0, 0, 0, 1, 1, 2], [0], [0]>} : vector<16x8x8xbf16>, vector<16x8x8xbf16>, vector<16x8x8xf32> -> vector<16x8x8xf32>
    "tpu.trace_stop"() : () -> ()
    %99 = vector.shape_cast %98 : vector<16x8x8xf32> to vector<128x8xf32>
    %100 = arith.truncf %99 : vector<128x8xf32> to vector<128x8xbf16>
    %101 = vector.extract_strided_slice %3 {offsets = [16, 0], sizes = [8, 32], strides = [1, 1]} : vector<32x32xbf16> to vector<8x32xbf16>
    %cst_29 = arith.constant dense<0.000000e+00> : vector<128x32xf32>
    %102 = tpu.matmul %100, %101, %cst_29 {dimension_numbers = #tpu.dot_dimension_numbers<[1], [0], [0], [1], [0, 0, 1, 1], [], []>} : vector<128x8xbf16>, vector<8x32xbf16>, vector<128x32xf32> -> vector<128x32xf32>
    %103 = arith.addf %72, %102 : vector<128x32xf32>
    %104 = vector.extract_strided_slice %9 {offsets = [0, 24], sizes = [128, 8], strides = [1, 1]} : vector<128x96xf32> to vector<128x8xf32>
    %105 = vector.shape_cast %104 : vector<128x8xf32> to vector<16x8x8xf32>
    %106 = vector.extract_strided_slice %9 {offsets = [0, 56], sizes = [128, 8], strides = [1, 1]} : vector<128x96xf32> to vector<128x8xf32>
    %107 = vector.shape_cast %106 : vector<128x8xf32> to vector<16x8x8xf32>
    %108 = vector.extract_strided_slice %9 {offsets = [0, 88], sizes = [128, 8], strides = [1, 1]} : vector<128x96xf32> to vector<128x8xf32>
    %109 = vector.shape_cast %108 : vector<128x8xf32> to vector<16x8x8xf32>
    %110 = arith.truncf %105 : vector<16x8x8xf32> to vector<16x8x8xbf16>
    %111 = arith.truncf %107 : vector<16x8x8xf32> to vector<16x8x8xbf16>
    "tpu.trace_start"() <{level = 10 : i32, message = "rqd,rkd->rqk"}> : () -> ()
    %cst_30 = arith.constant dense<0.000000e+00> : vector<16x8x8xf32>
    %112 = tpu.matmul %110, %111, %cst_30 {dimension_numbers = #tpu.dot_dimension_numbers<[2], [2], [1], [1], [0, 0, 0, 1, 1, 1], [0], [0]>} : vector<16x8x8xbf16>, vector<16x8x8xbf16>, vector<16x8x8xf32> -> vector<16x8x8xf32>
    "tpu.trace_stop"() : () -> ()
    %cst_31 = arith.constant 0.353553385 : f32
    %113 = vector.broadcast %cst_31 : f32 to vector<16x8x8xf32>
    %114 = arith.mulf %112, %113 : vector<16x8x8xf32>
    %115 = vector.broadcast %2 : vector<16x1x8xf32> to vector<16x8x8xf32>
    %116 = arith.addf %114, %115 : vector<16x8x8xf32>
    %cst_32 = arith.constant dense<0xFF800000> : vector<16x8xf32>
    %117 = vector.multi_reduction <maximumf>, %116, %cst_32 [2] : vector<16x8x8xf32> to vector<16x8xf32>
    %118 = vector.shape_cast %117 : vector<16x8xf32> to vector<16x8x1xf32>
    %119 = vector.broadcast %118 : vector<16x8x1xf32> to vector<16x8x8xf32>
    %120 = arith.subf %116, %119 : vector<16x8x8xf32>
    %121 = math.exp %120 : vector<16x8x8xf32>
    %cst_33 = arith.constant dense<0.000000e+00> : vector<16x8xf32>
    %122 = vector.multi_reduction <add>, %121, %cst_33 [2] : vector<16x8x8xf32> to vector<16x8xf32>
    %123 = vector.shape_cast %122 : vector<16x8xf32> to vector<16x8x1xf32>
    %124 = tpu.reciprocal %123 {approx = true} : vector<16x8x1xf32> -> vector<16x8x1xf32>
    %125 = vector.broadcast %124 : vector<16x8x1xf32> to vector<16x8x8xf32>
    %126 = arith.mulf %121, %125 : vector<16x8x8xf32>
    %127 = arith.truncf %126 : vector<16x8x8xf32> to vector<16x8x8xbf16>
    %128 = arith.truncf %109 : vector<16x8x8xf32> to vector<16x8x8xbf16>
    "tpu.trace_start"() <{level = 10 : i32, message = "rqk,rkd->rqd"}> : () -> ()
    %cst_34 = arith.constant dense<0.000000e+00> : vector<16x8x8xf32>
    %129 = tpu.matmul %127, %128, %cst_34 {dimension_numbers = #tpu.dot_dimension_numbers<[2], [1], [1], [2], [0, 0, 0, 1, 1, 2], [0], [0]>} : vector<16x8x8xbf16>, vector<16x8x8xbf16>, vector<16x8x8xf32> -> vector<16x8x8xf32>
    "tpu.trace_stop"() : () -> ()
    %130 = vector.shape_cast %129 : vector<16x8x8xf32> to vector<128x8xf32>
    %131 = arith.truncf %130 : vector<128x8xf32> to vector<128x8xbf16>
    %132 = vector.extract_strided_slice %3 {offsets = [24, 0], sizes = [8, 32], strides = [1, 1]} : vector<32x32xbf16> to vector<8x32xbf16>
    %cst_35 = arith.constant dense<0.000000e+00> : vector<128x32xf32>
    %133 = tpu.matmul %131, %132, %cst_35 {dimension_numbers = #tpu.dot_dimension_numbers<[1], [0], [0], [1], [0, 0, 1, 1], [], []>} : vector<128x8xbf16>, vector<8x32xbf16>, vector<128x32xf32> -> vector<128x32xf32>
    %134 = arith.addf %103, %133 : vector<128x32xf32>
    %c0_36 = arith.constant 0 : index
    %c0_37 = arith.constant 0 : index
    %135 = vector.load %arg6[%c0_36, %c0_37] : memref<1x32xf32, #tpu.memory_space<vmem>>, vector<1x32xf32>
    %136 = vector.broadcast %135 : vector<1x32xf32> to vector<128x32xf32>
    %137 = arith.addf %134, %136 : vector<128x32xf32>
    %138 = arith.addf %1, %137 : vector<128x32xf32>
    %c0_38 = arith.constant 0 : index
    %c0_39 = arith.constant 0 : index
    %139 = vector.load %arg7[%c0_38, %c0_39] : memref<1x32xf32, #tpu.memory_space<vmem>>, vector<1x32xf32>
    %c0_40 = arith.constant 0 : index
    %c0_41 = arith.constant 0 : index
    %140 = vector.load %arg8[%c0_40, %c0_41] : memref<1x32xf32, #tpu.memory_space<vmem>>, vector<1x32xf32>
    %cst_42 = arith.constant dense<0.000000e+00> : vector<128xf32>
    %141 = vector.multi_reduction <add>, %138, %cst_42 [1] : vector<128x32xf32> to vector<128xf32>
    %142 = vector.shape_cast %141 : vector<128xf32> to vector<128x1xf32>
    %cst_43 = arith.constant 3.200000e+01 : f32
    %143 = vector.broadcast %cst_43 : f32 to vector<128x1xf32>
    %144 = arith.divf %142, %143 : vector<128x1xf32>
    %145 = vector.broadcast %144 : vector<128x1xf32> to vector<128x32xf32>
    %146 = arith.subf %138, %145 : vector<128x32xf32>
    %147 = arith.mulf %146, %146 : vector<128x32xf32>
    %cst_44 = arith.constant dense<0.000000e+00> : vector<128xf32>
    %148 = vector.multi_reduction <add>, %147, %cst_44 [1] : vector<128x32xf32> to vector<128xf32>
    %149 = vector.shape_cast %148 : vector<128xf32> to vector<128x1xf32>
    %cst_45 = arith.constant 3.200000e+01 : f32
    %150 = vector.broadcast %cst_45 : f32 to vector<128x1xf32>
    %151 = arith.divf %149, %150 : vector<128x1xf32>
    %152 = vector.broadcast %144 : vector<128x1xf32> to vector<128x32xf32>
    %153 = arith.subf %138, %152 : vector<128x32xf32>
    %cst_46 = arith.constant 9.99999974E-6 : f32
    %154 = vector.broadcast %cst_46 : f32 to vector<128x1xf32>
    %155 = arith.addf %151, %154 : vector<128x1xf32>
    %156 = math.rsqrt %155 : vector<128x1xf32>
    %157 = vector.broadcast %156 : vector<128x1xf32> to vector<128x32xf32>
    %158 = arith.mulf %153, %157 : vector<128x32xf32>
    %159 = vector.broadcast %139 : vector<1x32xf32> to vector<128x32xf32>
    %160 = arith.mulf %158, %159 : vector<128x32xf32>
    %161 = vector.broadcast %140 : vector<1x32xf32> to vector<128x32xf32>
    %162 = arith.addf %160, %161 : vector<128x32xf32>
    %163 = arith.truncf %162 : vector<128x32xf32> to vector<128x32xbf16>
    %c0_47 = arith.constant 0 : index
    %c0_48 = arith.constant 0 : index
    %164 = vector.load %arg9[%c0_47, %c0_48] : memref<32x64xbf16, #tpu.memory_space<vmem>>, vector<32x64xbf16>
    %cst_49 = arith.constant dense<0.000000e+00> : vector<128x64xf32>
    %165 = tpu.matmul %163, %164, %cst_49 {dimension_numbers = #tpu.dot_dimension_numbers<[1], [0], [0], [1], [0, 0, 1, 1], [], []>} : vector<128x32xbf16>, vector<32x64xbf16>, vector<128x64xf32> -> vector<128x64xf32>
    %c0_50 = arith.constant 0 : index
    %c0_51 = arith.constant 0 : index
    %166 = vector.load %arg10[%c0_50, %c0_51] : memref<1x64xf32, #tpu.memory_space<vmem>>, vector<1x64xf32>
    %167 = vector.broadcast %166 : vector<1x64xf32> to vector<128x64xf32>
    %168 = arith.addf %165, %167 : vector<128x64xf32>
    %169 = arith.mulf %168, %168 : vector<128x64xf32>
    %170 = arith.mulf %168, %169 : vector<128x64xf32>
    %cst_52 = arith.constant 4.471500e-02 : f32
    %171 = vector.broadcast %cst_52 : f32 to vector<128x64xf32>
    %172 = arith.mulf %171, %170 : vector<128x64xf32>
    %173 = arith.addf %168, %172 : vector<128x64xf32>
    %cst_53 = arith.constant 0.797884583 : f32
    %174 = vector.broadcast %cst_53 : f32 to vector<128x64xf32>
    %175 = arith.mulf %174, %173 : vector<128x64xf32>
    %176 = math.tanh %175 : vector<128x64xf32>
    %cst_54 = arith.constant 1.000000e+00 : f32
    %177 = vector.broadcast %cst_54 : f32 to vector<128x64xf32>
    %178 = arith.addf %177, %176 : vector<128x64xf32>
    %cst_55 = arith.constant 5.000000e-01 : f32
    %179 = vector.broadcast %cst_55 : f32 to vector<128x64xf32>
    %180 = arith.mulf %179, %178 : vector<128x64xf32>
    %181 = arith.mulf %168, %180 : vector<128x64xf32>
    %182 = arith.truncf %181 : vector<128x64xf32> to vector<128x64xbf16>
    %c0_56 = arith.constant 0 : index
    %c0_57 = arith.constant 0 : index
    %183 = vector.load %arg11[%c0_56, %c0_57] : memref<64x32xbf16, #tpu.memory_space<vmem>>, vector<64x32xbf16>
    %cst_58 = arith.constant dense<0.000000e+00> : vector<128x32xf32>
    %184 = tpu.matmul %182, %183, %cst_58 {dimension_numbers = #tpu.dot_dimension_numbers<[1], [0], [0], [1], [0, 0, 1, 1], [], []>} : vector<128x64xbf16>, vector<64x32xbf16>, vector<128x32xf32> -> vector<128x32xf32>
    %c0_59 = arith.constant 0 : index
    %c0_60 = arith.constant 0 : index
    %185 = vector.load %arg12[%c0_59, %c0_60] : memref<1x32xf32, #tpu.memory_space<vmem>>, vector<1x32xf32>
    %186 = vector.broadcast %185 : vector<1x32xf32> to vector<128x32xf32>
    %187 = arith.addf %184, %186 : vector<128x32xf32>
    %188 = arith.addf %162, %187 : vector<128x32xf32>
    %c0_61 = arith.constant 0 : index
    %c0_62 = arith.constant 0 : index
    %189 = vector.load %arg13[%c0_61, %c0_62] : memref<1x32xf32, #tpu.memory_space<vmem>>, vector<1x32xf32>
    %c0_63 = arith.constant 0 : index
    %c0_64 = arith.constant 0 : index
    %190 = vector.load %arg14[%c0_63, %c0_64] : memref<1x32xf32, #tpu.memory_space<vmem>>, vector<1x32xf32>
    %cst_65 = arith.constant dense<0.000000e+00> : vector<128xf32>
    %191 = vector.multi_reduction <add>, %188, %cst_65 [1] : vector<128x32xf32> to vector<128xf32>
    %192 = vector.shape_cast %191 : vector<128xf32> to vector<128x1xf32>
    %cst_66 = arith.constant 3.200000e+01 : f32
    %193 = vector.broadcast %cst_66 : f32 to vector<128x1xf32>
    %194 = arith.divf %192, %193 : vector<128x1xf32>
    %195 = vector.broadcast %194 : vector<128x1xf32> to vector<128x32xf32>
    %196 = arith.subf %188, %195 : vector<128x32xf32>
    %197 = arith.mulf %196, %196 : vector<128x32xf32>
    %cst_67 = arith.constant dense<0.000000e+00> : vector<128xf32>
    %198 = vector.multi_reduction <add>, %197, %cst_67 [1] : vector<128x32xf32> to vector<128xf32>
    %199 = vector.shape_cast %198 : vector<128xf32> to vector<128x1xf32>
    %cst_68 = arith.constant 3.200000e+01 : f32
    %200 = vector.broadcast %cst_68 : f32 to vector<128x1xf32>
    %201 = arith.divf %199, %200 : vector<128x1xf32>
    %202 = vector.broadcast %194 : vector<128x1xf32> to vector<128x32xf32>
    %203 = arith.subf %188, %202 : vector<128x32xf32>
    %cst_69 = arith.constant 9.99999974E-6 : f32
    %204 = vector.broadcast %cst_69 : f32 to vector<128x1xf32>
    %205 = arith.addf %201, %204 : vector<128x1xf32>
    %206 = math.rsqrt %205 : vector<128x1xf32>
    %207 = vector.broadcast %206 : vector<128x1xf32> to vector<128x32xf32>
    %208 = arith.mulf %203, %207 : vector<128x32xf32>
    %209 = vector.broadcast %189 : vector<1x32xf32> to vector<128x32xf32>
    %210 = arith.mulf %208, %209 : vector<128x32xf32>
    %211 = vector.broadcast %190 : vector<1x32xf32> to vector<128x32xf32>
    %212 = arith.addf %210, %211 : vector<128x32xf32>
    %213 = vector.shape_cast %212 : vector<128x32xf32> to vector<16x8x32xf32>
    %c0_70 = arith.constant 0 : index
    %c0_71 = arith.constant 0 : index
    %c0_72 = arith.constant 0 : index
    %214 = vector.load %arg15[%c0_70, %c0_71, %c0_72] : memref<16x8x32xf32, #tpu.memory_space<vmem>>, vector<16x8x32xf32>
    tpu.vector_store %arg15[%c0_70, %c0_71, %c0_72], %213 {strides = array<i32>} : memref<16x8x32xf32, #tpu.memory_space<vmem>>, vector<16x8x32xf32>,
    return
  }
  func.func @transform_0(%arg0: i32) -> (i32, i32, i32) {
    %c0_i32 = arith.constant 0 : i32
    %c0_i32_0 = arith.constant 0 : i32
    %c0_i32_1 = arith.constant 0 : i32
    return %arg0, %c0_i32, %c0_i32_0 : i32, i32, i32
  }
  func.func @transform_1(%arg0: i32) -> (i32, i32, i32) {
    %c0_i32 = arith.constant 0 : i32
    %c0_i32_0 = arith.constant 0 : i32
    %c0_i32_1 = arith.constant 0 : i32
    return %arg0, %c0_i32, %c0_i32_0 : i32, i32, i32
  }
  func.func @transform_2(%arg0: i32) -> (i32, i32) {
    %c0_i32 = arith.constant 0 : i32
    %c0_i32_0 = arith.constant 0 : i32
    %c0_i32_1 = arith.constant 0 : i32
    return %c0_i32, %c0_i32_0 : i32, i32
  }
  func.func @transform_3(%arg0: i32) -> (i32, i32) {
    %c0_i32 = arith.constant 0 : i32
    %c0_i32_0 = arith.constant 0 : i32
    %c0_i32_1 = arith.constant 0 : i32
    return %c0_i32, %c0_i32_0 : i32, i32
  }
  func.func @transform_4(%arg0: i32) -> (i32, i32) {
    %c0_i32 = arith.constant 0 : i32
    %c0_i32_0 = arith.constant 0 : i32
    %c0_i32_1 = arith.constant 0 : i32
    return %c0_i32, %c0_i32_0 : i32, i32
  }
  func.func @transform_5(%arg0: i32) -> (i32, i32) {
    %c0_i32 = arith.constant 0 : i32
    %c0_i32_0 = arith.constant 0 : i32
    %c0_i32_1 = arith.constant 0 : i32
    return %c0_i32, %c0_i32_0 : i32, i32
  }
  func.func @transform_6(%arg0: i32) -> (i32, i32) {
    %c0_i32 = arith.constant 0 : i32
    %c0_i32_0 = arith.constant 0 : i32
    %c0_i32_1 = arith.constant 0 : i32
    return %c0_i32, %c0_i32_0 : i32, i32
  }
  func.func @transform_7(%arg0: i32) -> (i32, i32) {
    %c0_i32 = arith.constant 0 : i32
    %c0_i32_0 = arith.constant 0 : i32
    %c0_i32_1 = arith.constant 0 : i32
    return %c0_i32, %c0_i32_0 : i32, i32
  }
  func.func @transform_8(%arg0: i32) -> (i32, i32) {
    %c0_i32 = arith.constant 0 : i32
    %c0_i32_0 = arith.constant 0 : i32
    %c0_i32_1 = arith.constant 0 : i32
    return %c0_i32, %c0_i32_0 : i32, i32
  }
  func.func @transform_9(%arg0: i32) -> (i32, i32) {
    %c0_i32 = arith.constant 0 : i32
    %c0_i32_0 = arith.constant 0 : i32
    %c0_i32_1 = arith.constant 0 : i32
    return %c0_i32, %c0_i32_0 : i32, i32
  }
  func.func @transform_10(%arg0: i32) -> (i32, i32) {
    %c0_i32 = arith.constant 0 : i32
    %c0_i32_0 = arith.constant 0 : i32
    %c0_i32_1 = arith.constant 0 : i32
    return %c0_i32, %c0_i32_0 : i32, i32
  }
  func.func @transform_11(%arg0: i32) -> (i32, i32) {
    %c0_i32 = arith.constant 0 : i32
    %c0_i32_0 = arith.constant 0 : i32
    %c0_i32_1 = arith.constant 0 : i32
    return %c0_i32, %c0_i32_0 : i32, i32
  }
  func.func @transform_12(%arg0: i32) -> (i32, i32) {
    %c0_i32 = arith.constant 0 : i32
    %c0_i32_0 = arith.constant 0 : i32
    %c0_i32_1 = arith.constant 0 : i32
    return %c0_i32, %c0_i32_0 : i32, i32
  }
  func.func @transform_13(%arg0: i32) -> (i32, i32) {
    %c0_i32 = arith.constant 0 : i32
    %c0_i32_0 = arith.constant 0 : i32
    %c0_i32_1 = arith.constant 0 : i32
    return %c0_i32, %c0_i32_0 : i32, i32
  }
  func.func @transform_14(%arg0: i32) -> (i32, i32, i32) {
    %c0_i32 = arith.constant 0 : i32
    %c0_i32_0 = arith.constant 0 : i32
    %c0_i32_1 = arith.constant 0 : i32
    return %arg0, %c0_i32, %c0_i32_0 : i32, i32, i32
  }
}

</mosaic_0001>

<bundles_post_ra>
// kernel: tpu_custom_call.1
= control target key start
LH: loop header
LB: loop body
LE: loop exit
PB: predicated region body
PF: predicated region fallthrough
CT: control target
= control target key end

     0   :  { %19 = vsyncpa [#allocation3], 0  ;;  %s14156_s0 = inlined_call_operand.hbm [shape: f32[16,8,32], index: 0, kind: input, shape index: {}]   ;;  %s14157_s1 = inlined_call_operand.vmem [shape: f32[16,1,8], index: 1, kind: input, shape index: {}]   ;;  %s14158_s2 = inlined_call_operand.vmem [shape: bf16[32,96], index: 2, kind: input, shape index: {}]   ;;  %s14159_s3 = inlined_call_operand.vmem [shape: f32[1,96], index: 3, kind: input, shape index: {}]   ;;  %s14160_s4 = inlined_call_operand.vmem [shape: bf16[32,32], index: 4, kind: input, shape index: {}]   ;;  %s14161_s5 = inlined_call_operand.vmem [shape: f32[1,32], index: 5, kind: input, shape index: {}]   ;;  %s14162_s6 = inlined_call_operand.vmem [shape: f32[1,32], index: 6, kind: input, shape index: {}]   ;;  %s14163_s7 = inlined_call_operand.vmem [shape: f32[1,32], index: 7, kind: input, shape index: {}]   ;;  %s14164_s8 = inlined_call_operand.vmem [shape: bf16[32,64], index: 8, kind: input, shape index: {}]   ;;  %s14165_s9 = inlined_call_operand.vmem [shape: f32[1,64], index: 9, kind: input, shape index: {}]   ;;  %s14166_s10 = inlined_call_operand.vmem [shape: bf16[64,32], index: 10, kind: input, shape index: {}]   ;;  %s14167_s11 = inlined_call_operand.vmem [shape: f32[1,32], index: 11, kind: input, shape index: {}]   ;;  %s14168_s12 = inlined_call_operand.vmem [shape: f32[1,32], index: 12, kind: input, shape index: {}]   ;;  %s14169_s13 = inlined_call_operand.vmem [shape: f32[1,32], index: 13, kind: input, shape index: {}]   ;;  %s14170_s14 = inlined_call_operand.hbm [shape: f32[16,8,32], index: 14, kind: output, shape index: {}]  }
   0x1   :  { %20 = vsyncpa [#allocation4], 0  ;;  %s11129_s29 = smov [#allocation2]   ;;  %s11081_s17 = scalar_lea.hbm %s14156_s0, 2048 }
   0x2   :  { %s26_s30 = sshll.u32 %s11129_s29, 4  ;;  %p11082_p0 = scmp.ne.s32.totalorder %s14156_s0, %s11081_s17  ;;  %s27_s30 = int_to_ptr.vmem [resolvable:$true] %s26_s30 }
   0x3   :  { %p11085_p1 = scmp.lt.u32.totalorder %s11081_s17, %s14156_s0 }
   0x5   :  { %p11087_p2 = pnand %p11085_p1, %p11082_p0 }
   0x7   :  { %11090 = shalt.err (!%p11087_p2)
}
   0x8   :  { %s11091_s22 = scalar_lea.vmem %s27_s30, 2048  ;;  %p11096_p4 = scmp.lt.s32.totalorder %s27_s30, %s27_s30 }
   0x9   :  { %p11092_p3 = scmp.ne.s32.totalorder %s27_s30, %s11091_s22  ;;  %p11097_p5 = scmp.lt.s32.totalorder %s11091_s22, %s11091_s22 }
   0xb   :  { %p11098_p6 = por %p11097_p5, %p11096_p4 }
   0xd   :  { %p11099_p7 = pnand %p11098_p6, %p11092_p3 }
   0xf   :  { %11102 = shalt.err (!%p11099_p7)
}
  0x10   :  { %s11130_s23 = smov 128   ;;  %s11131_s24 = smov 8  }
  0x11   :  { %32 = dma.hbm_to_vmem [thread:$0]  %s14156_s0, 2048, %s27_s30, [#allocation3], %s11130_s23, %s11130_s23, %s11131_s24  }
  0x12   :  { %11125 = dma.done.wait [#allocation3], 2048  }
  0x13   :  { %11126 = vsyncadd [#allocation3], 4294965248  ;;  %v10657_v0 = vld [vmem:[%s14158_s2] sm:$0xff]   ;;  %v10658_v1 = vld [vmem:[%s14158_s2 + $0x8] sm:$0xff]   ;;  %vm130_vm0 = vcmask 261120   ;;  %v14171_v26 = vmov 0.0  }
  0x14   :  { %9680 = vmatprep.subr.bf16.mxu0 %v10657_v0  ;;  %v63_v2 = vld [vmem:[#allocation2] sm:$0xff]  ;;  %v64_v3 = vld [vmem:[#allocation2 + $0x8] sm:$0xff]  ;;  %10584 = vmatprep.subr.bf16.mxu1 %v10657_v0  ;;  %v65_v5 = vld [vmem:[#allocation2 + $0x10] sm:$0xff]  ;;  %vm11133_vm1 = vmmov 0   ;;  %s11135_s30 = smov 64   ;;  %vm271_vm2 = vcmask 64512  }
  0x15   :  { %9681 = vmatpush3.bf16.msra.mxu0 %v10657_v0  ;;  %v99_v4 = vpack.c.bf16 %v64_v3, %v63_v2  ;;  %v66_v6 = vld [vmem:[#allocation2 + $0x18] sm:$0xff]  ;;  %10586 = vmatpush3.bf16.msra.mxu1 %v10657_v0  ;;  %v67_v7 = vld [vmem:[#allocation2 + $0x20] sm:$0xff]  ;;  %v68_v8 = vld [vmem:[#allocation2 + $0x28] sm:$0xff]  ;;  %vm1378_vm3 = vcmask 1043456   ;;  %s11136_s16 = smov 88   ;;  %s11137_s17 = smov 120  }
  0x16   :  { %9682 = vmatprep.subr.bf16.mxu0 %v10658_v1  ;;  %10585 = vmatprep.subr.bf16.mxu1 %v10658_v1  ;;  %v71_v9 = vld [vmem:[#allocation2 + $0x40] sm:$0xff]  ;;  %v72_v10 = vld [vmem:[#allocation2 + $0x48] sm:$0xff]  ;;  %v73_v11 = vld [vmem:[#allocation2 + $0x50] sm:$0xff]  ;;  %v100_v13 = vpack.c.bf16 %v66_v6, %v65_v5  ;;  %v101_v18 = vpack.c.bf16 %v68_v8, %v67_v7  ;;  %s11139_s18 = smov 112   ;;  %s11140_s19 = smov 80   ;;  %vm8715_vm4 = vcmask 523264  }
  0x17   :  { %9684 = vmatprep.mubr.msk.bf16.mxu0 %vm130_vm0, %v99_v4  ;;  %v74_v12 = vld [vmem:[#allocation2 + $0x58] sm:$0xff]  ;;  %v103_v14 = vpack.c.bf16 %v72_v10, %v71_v9  ;;  %v75_v16 = vld [vmem:[#allocation2 + $0x60] sm:$0xff]  ;;  %v76_v17 = vld [vmem:[#allocation2 + $0x68] sm:$0xff]  ;;  %s11142_s26 = smov 72   ;;  %s11143_s27 = smov 104  }
  0x18   :  { %v104_v15 = vpack.c.bf16 %v74_v12, %v73_v11  ;;  %v105_v19 = vpack.c.bf16 %v76_v17, %v75_v16  ;;  %v69_v20 = vld [vmem:[#allocation2 + $0x30] sm:$0xff]  ;;  %v70_v21 = vld [vmem:[#allocation2 + $0x38] sm:$0xff]  ;;  %v9140_v27 = vld [vmem:[%s14159_s3] ss:$0 sm:$0xff]  ;;  %s11134_s3 = smov 96   ;;  %s11144_s28 = smov 40  }
  0x19   :  { %9683 = vmatpush3.bf16.msra.mxu0 %v10658_v1  ;;  %10587 = vmatpush3.bf16.msra.mxu1 %v10658_v1  ;;  %v77_v22 = vld [vmem:[#allocation2 + $0x70] sm:$0xff]  ;;  %v78_v23 = vld [vmem:[#allocation2 + $0x78] sm:$0xff]  ;;  %v102_v24 = vpack.c.bf16 %v70_v21, %v69_v20 }
  0x1a   :  { %9692 = vmatprep.mubr.msk.bf16.mxu1 %vm130_vm0, %v103_v14  ;;  %v106_v25 = vpack.c.bf16 %v78_v23, %v77_v22  ;;  %9700 = vmatprep.subr.bf16.mxu1 %v14171_v26 }
  0x1b   :  { %9724 = vmatprep.subr.bf16.mxu0 %v14171_v26 }
  0x1c   :  { %9685 = vmatmul.mubr.msk.bf16.vlgmr.msra.gmra.mrb[0].mxu0 %vm130_vm0, %v100_v13  ;;  %9693 = vmatmul.mubr.msk.bf16.vlgmr.msra.gmra.mrb[0].mxu1 %vm130_vm0, %v104_v15 }
  0x1d   :  { %9688 = vmatprep.mubr.msk.bf16.mxu0 %vm130_vm0, %v101_v18  ;;  %9696 = vmatprep.mubr.msk.bf16.mxu1 %vm130_vm0, %v105_v19 }
  0x24   :  { %9689 = vmatmul.mubr.msk.bf16.gmra.mrb[4].mxu0 %vm130_vm0, %v102_v24  ;;  %9697 = vmatmul.mubr.msk.bf16.gmra.mrb[4].mxu1 %vm130_vm0, %v106_v25 }
  0x25   :  { %9702 = vmatprep.mubr.msk.bf16.mxu1 %vm11133_vm1, %v14171_v26  ;;  %9726 = vmatprep.mubr.msk.bf16.mxu0 %vm11133_vm1, %v14171_v26 }
  0xef   :  { %v9686_v28 = vpop.f32.mrb[0].mxu0  ;;  %v9694_v29 = vpop.f32.mrb[0].mxu1 }
  0xf0   :  { %v198_v30 = vadd.f32 %v9686_v28, %v9140_v27  ;;  %v189_v31 = vpop.f32.mrb[1].mxu0  ;;  %v221_v32 = vpop.f32.mrb[1].mxu1  ;;  %v230_v62 = vadd.f32 %v9694_v29, %v9140_v27 }
  0xf1   :  { %v190_v33 = vadd.f32 %v9140_v27, %v189_v31  ;;  %v9687_v34 = vpop.f32.mrb[2].mxu0  ;;  %v9695_v35 = vpop.f32.mrb[2].mxu1  ;;  %v222_v59 = vadd.f32 %v9140_v27, %v221_v32 }
  0xf2   :  { %v11259_v36 = vpack.c.bf16 %v198_v30, %v198_v30  ;;  %v201_v37 = vadd.f32 %v9687_v34, %v9140_v27  ;;  %v192_v38 = vpop.f32.mrb[3].mxu0  ;;  %v224_v39 = vpop.f32.mrb[3].mxu1  ;;  %v233_v0 = vadd.f32 %v9695_v35, %v9140_v27  ;;  %v11295_v2 = vpack.c.bf16 %v230_v62, %v230_v62 }
  0xf3   :  { %v11261_v40 = vpack.c.bf16 %v190_v33, %v190_v33  ;;  %v193_v41 = vadd.f32 %v9140_v27, %v192_v38  ;;  %v225_v61 = vadd.f32 %v9140_v27, %v224_v39  ;;  %v11287_v63 = vpack.c.bf16 %v222_v59, %v222_v59 }
  0xf4   :  { %368 = vrot.lane.b32.xlu1 %v11259_v36, %s11134_s3  ;;  %v11267_v42 = vpack.c.bf16 %v201_v37, %v201_v37  ;;  %v11299_v4 = vpack.c.bf16 %v233_v0, %v233_v0 }
  0xf5   :  { %269 = vrot.lane.b32.xlu0 %v11261_v40, %s11134_s3  ;;  %v11269_v43 = vpack.c.bf16 %v193_v41, %v193_v41  ;;  %v11291_v1 = vpack.c.bf16 %v225_v61, %v225_v61 }
  0xf7   :  { %v9690_v44 = vpop.f32.mrb[4].mxu0  ;;  %v9698_v45 = vpop.f32.mrb[4].mxu1 }
  0xf8   :  { %417 = vrot.lane.b32.xlu1 %v11267_v42, %s11134_s3  ;;  %v205_v46 = vpop.f32.mrb[5].mxu0  ;;  %v237_v47 = vpop.f32.mrb[5].mxu1  ;;  %v214_v48 = vadd.f32 %v9690_v44, %v9140_v27  ;;  %v246_v6 = vadd.f32 %v9698_v45, %v9140_v27 }
  0xf9   :  { %v206_v49 = vadd.f32 %v9140_v27, %v205_v46  ;;  %v9691_v50 = vpop.f32.mrb[6].mxu0  ;;  %319 = vrot.lane.b32.xlu0 %v11269_v43, %s11134_s3  ;;  %v9699_v51 = vpop.f32.mrb[6].mxu1  ;;  %v238_v3 = vadd.f32 %v9140_v27, %v237_v47 }
  0xfa   :  { %v208_v52 = vpop.f32.mrb[7].mxu0  ;;  %v240_v53 = vpop.f32.mrb[7].mxu1  ;;  %v217_v55 = vadd.f32 %v9691_v50, %v9140_v27  ;;  %v11277_v57 = vpack.c.bf16 %v214_v48, %v214_v48  ;;  %v249_v8 = vadd.f32 %v9699_v51, %v9140_v27  ;;  %v11311_v10 = vpack.c.bf16 %v246_v6, %v246_v6 }
  0xfb   :  { %v11275_v54 = vpack.c.bf16 %v206_v49, %v206_v49  ;;  %v209_v56 = vadd.f32 %v9140_v27, %v208_v52  ;;  %v241_v5 = vadd.f32 %v9140_v27, %v240_v53  ;;  %v11303_v7 = vpack.c.bf16 %v238_v3, %v238_v3 }
  0xfc   :  { %v11283_v60 = vpack.c.bf16 %v217_v55, %v217_v55  ;;  %v11315_v11 = vpack.c.bf16 %v249_v8, %v249_v8  ;;  %v9167_v55 = vld [vmem:[%s14157_s1] ss:$0 sm:$0xff]  ;;  %v9168_v8 = vld [vmem:[%s14157_s1 + $0x1] ss:$0 sm:$0xff] }
  0xfd   :  { %v11279_v58 = vpack.c.bf16 %v209_v56, %v209_v56  ;;  %466 = vrot.lane.b32.xlu0 %v11275_v54, %s11134_s3  ;;  %v11307_v9 = vpack.c.bf16 %v241_v5, %v241_v5 }
  0xff   :  { %515 = vrot.lane.b32.xlu1 %v11279_v58, %s11134_s3 }
 0x101   :  { %564 = vrot.lane.b32.xlu0 %v11277_v57, %s11134_s3 }
 0x103   :  { %613 = vrot.lane.b32.xlu1 %v11283_v60, %s11134_s3 }
 0x105   :  { %662 = vrot.lane.b32.xlu0 %v11287_v63, %s11134_s3 }
 0x107   :  { %711 = vrot.lane.b32.xlu1 %v11291_v1, %s11134_s3 }
 0x109   :  { %760 = vrot.lane.b32.xlu0 %v11295_v2, %s11134_s3 }
 0x10b   :  { %809 = vrot.lane.b32.xlu1 %v11299_v4, %s11134_s3 }
 0x10d   :  { %858 = vrot.lane.b32.xlu0 %v11303_v7, %s11134_s3 }
 0x10f   :  { %907 = vrot.lane.b32.xlu1 %v11307_v9, %s11134_s3 }
 0x111   :  { %956 = vrot.lane.b32.xlu0 %v11311_v10, %s11134_s3 }
 0x113   :  { %1005 = vrot.lane.b32.xlu1 %v11315_v11, %s11134_s3 }
 0x115   :  { %1422 = vrot.lane.b32.xlu0 %v11269_v43, %s11135_s30 }
 0x117   :  { %1373 = vrot.lane.b32.xlu1 %v11261_v40, %s11135_s30 }
 0x119   :  { %1518 = vrot.lane.b32.xlu0 %v11267_v42, %s11135_s30 }
 0x11b   :  { %1470 = vrot.lane.b32.xlu1 %v11259_v36, %s11135_s30 }
 0x11d   :  { %1710 = vrot.lane.b32.xlu0 %v11283_v60, %s11135_s30 }
 0x11f   :  { %1566 = vrot.lane.b32.xlu1 %v11275_v54, %s11135_s30 }
 0x121   :  { %1806 = vrot.lane.b32.xlu0 %v11291_v1, %s11135_s30 }
 0x123   :  { %1662 = vrot.lane.b32.xlu1 %v11277_v57, %s11135_s30 }
 0x125   :  { %1614 = vrot.lane.b32.xlu0 %v11279_v58, %s11135_s30 }
 0x127   :  { %1758 = vrot.lane.b32.xlu1 %v11287_v63, %s11135_s30 }
 0x12b   :  { %1854 = vrot.lane.b32.xlu1 %v11295_v2, %s11135_s30 }
 0x166   :  { %v369_v15 = vpop.permute.xlu1 %368 }
 0x167   :  { %v270_v12 = vpop.permute.xlu0 %269  ;;  %v374_v22 = vsel %vm271_vm2, %v369_v15, 0 }
 0x168   :  { %v276_v13 = vsel %vm271_vm2, %v270_v12, 0  ;;  %v9171_v12 = vld [vmem:[%s14157_s1 + $0x4] ss:$0 sm:$0xff] }
 0x169   :  { %9701 = vmatpush3.bf16.xpose.msra.mxu1 %v276_v13 }
 0x16a   :  { %9706 = vmatprep.subr.bf16.mxu1 %v14171_v26  ;;  %v418_v19 = vpop.permute.xlu1 %417 }
 0x16b   :  { %v320_v14 = vpop.permute.xlu0 %319  ;;  %v423_v28 = vsel %vm271_vm2, %v418_v19, 0 }
 0x16c   :  { %v325_v17 = vsel %vm271_vm2, %v320_v14, 0 }
 0x16f   :  { %v467_v16 = vpop.permute.xlu0 %466 }
 0x170   :  { %v472_v18 = vsel %vm271_vm2, %v467_v16, 0  ;;  %9703 = vmatmul.mubr.msk.bf16.vlgmr.msra.gmra.mrb[8].mxu1 %vm271_vm2, %v11261_v40 }
 0x171   :  { %9707 = vmatpush3.bf16.xpose.msra.mxu1 %v325_v17  ;;  %9725 = vmatpush3.bf16.xpose.msra.mxu0 %v472_v18  ;;  %v516_v23 = vpop.permute.xlu1 %515 }
 0x172   :  { %9708 = vmatprep.mubr.msk.bf16.mxu1 %vm11133_vm1, %v14171_v26  ;;  %9712 = vmatprep.subr.bf16.mxu1 %v14171_v26  ;;  %v521_v32 = vsel %vm271_vm2, %v516_v23, 0 }
 0x173   :  { %9736 = vmatprep.subr.bf16.mxu0 %v14171_v26  ;;  %v565_v20 = vpop.permute.xlu0 %564 }
 0x174   :  { %v570_v21 = vsel %vm271_vm2, %v565_v20, 0 }
 0x175   :  { %v614_v27 = vpop.permute.xlu1 %613 }
 0x176   :  { %v619_v37 = vsel %vm271_vm2, %v614_v27, 0 }
 0x177   :  { %v663_v24 = vpop.permute.xlu0 %662 }
 0x178   :  { %9709 = vmatmul.mubr.msk.bf16.vlgmr.msra.gmra.mrb[12].mxu1 %vm271_vm2, %v11269_v43  ;;  %9727 = vmatmul.mubr.msk.bf16.vlgmr.msra.gmra.mrb[8].mxu0 %vm271_vm2, %v11275_v54  ;;  %v668_v25 = vsel %vm271_vm2, %v663_v24, 0  ;;  %v9169_v24 = vld [vmem:[%s14157_s1 + $0x2] ss:$0 sm:$0xff] }
 0x179   :  { %9713 = vmatpush3.bf16.xpose.msra.mxu1 %v374_v22  ;;  %9737 = vmatpush3.bf16.xpose.msra.mxu0 %v570_v21  ;;  %v712_v29 = vpop.permute.xlu1 %711 }
 0x17a   :  { %9714 = vmatprep.mubr.msk.bf16.mxu1 %vm11133_vm1, %v14171_v26  ;;  %9738 = vmatprep.mubr.msk.bf16.mxu0 %vm11133_vm1, %v14171_v26  ;;  %v717_v45 = vsel %vm271_vm2, %v712_v29, 0  ;;  %v9173_v29 = vld [vmem:[%s14157_s1 + $0x6] ss:$0 sm:$0xff] }
 0x17b   :  { %9718 = vmatprep.subr.bf16.mxu1 %v14171_v26  ;;  %9748 = vmatprep.subr.bf16.mxu0 %v14171_v26  ;;  %v761_v30 = vpop.permute.xlu0 %760 }
 0x17c   :  { %v766_v31 = vsel %vm271_vm2, %v761_v30, 0 }
 0x17d   :  { %v810_v33 = vpop.permute.xlu1 %809 }
 0x17e   :  { %v815_v47 = vsel %vm271_vm2, %v810_v33, 0 }
 0x17f   :  { %v859_v34 = vpop.permute.xlu0 %858 }
 0x180   :  { %9715 = vmatmul.mubr.msk.bf16.vlgmr.msra.gmra.mrb[16].mxu1 %vm271_vm2, %v11259_v36  ;;  %9739 = vmatmul.mubr.msk.bf16.vlgmr.msra.gmra.mrb[12].mxu0 %vm271_vm2, %v11277_v57  ;;  %v864_v35 = vsel %vm271_vm2, %v859_v34, 0 }
 0x181   :  { %9719 = vmatpush3.bf16.xpose.msra.mxu1 %v423_v28  ;;  %9749 = vmatpush3.bf16.xpose.msra.mxu0 %v668_v25  ;;  %v908_v38 = vpop.permute.xlu1 %907 }
 0x182   :  { %9720 = vmatprep.mubr.msk.bf16.mxu1 %vm11133_vm1, %v14171_v26  ;;  %9750 = vmatprep.mubr.msk.bf16.mxu0 %vm11133_vm1, %v14171_v26  ;;  %v913_v49 = vsel %vm271_vm2, %v908_v38, 0 }
 0x183   :  { %9730 = vmatprep.subr.bf16.mxu1 %v14171_v26  ;;  %9760 = vmatprep.subr.bf16.mxu0 %v14171_v26  ;;  %v957_v39 = vpop.permute.xlu0 %956 }
 0x184   :  { %v962_v41 = vsel %vm271_vm2, %v957_v39, 0 }
 0x185   :  { %v1006_v44 = vpop.permute.xlu1 %1005 }
 0x186   :  { %v1011_v50 = vsel %vm271_vm2, %v1006_v44, 0 }
 0x187   :  { %v1423_v51 = vpop.permute.xlu0 %1422 }
 0x188   :  { %9721 = vmatmul.mubr.msk.bf16.vlgmr.msra.gmra.mrb[20].mxu1 %vm271_vm2, %v11267_v42  ;;  %9751 = vmatmul.mubr.msk.bf16.vlgmr.msra.gmra.mrb[16].mxu0 %vm271_vm2, %v11287_v63  ;;  %v1428_v52 = vsel %vm1378_vm3, %v1423_v51, 0 }
 0x189   :  { %9731 = vmatpush3.bf16.xpose.msra.mxu1 %v521_v32  ;;  %9761 = vmatpush3.bf16.xpose.msra.mxu0 %v766_v31  ;;  %v1374_v46 = vpop.permute.xlu1 %1373 }
 0x18a   :  { %9732 = vmatprep.mubr.msk.bf16.mxu1 %vm11133_vm1, %v14171_v26  ;;  %9762 = vmatprep.mubr.msk.bf16.mxu0 %vm11133_vm1, %v14171_v26  ;;  %v1380_v48 = vsel %vm1378_vm3, %v1374_v46, 0 }
 0x18b   :  { %9742 = vmatprep.subr.bf16.mxu1 %v14171_v26  ;;  %9772 = vmatprep.subr.bf16.mxu0 %v14171_v26 }
 0x190   :  { %9733 = vmatmul.mubr.msk.bf16.vlgmr.msra.gmra.mrb[24].mxu1 %vm271_vm2, %v11279_v58  ;;  %9763 = vmatmul.mubr.msk.bf16.vlgmr.msra.gmra.mrb[20].mxu0 %vm271_vm2, %v11295_v2 }
 0x191   :  { %9743 = vmatpush3.bf16.xpose.msra.mxu1 %v619_v37  ;;  %9773 = vmatpush3.bf16.xpose.msra.mxu0 %v864_v35 }
 0x192   :  { %9744 = vmatprep.mubr.msk.bf16.mxu1 %vm11133_vm1, %v14171_v26  ;;  %9774 = vmatprep.mubr.msk.bf16.mxu0 %vm11133_vm1, %v14171_v26 }
 0x193   :  { %9754 = vmatprep.subr.bf16.mxu1 %v14171_v26  ;;  %9784 = vmatprep.subr.bf16.mxu0 %v14171_v26 }
 0x198   :  { %9745 = vmatmul.mubr.msk.bf16.vlgmr.msra.gmra.mrb[28].mxu1 %vm271_vm2, %v11283_v60  ;;  %9775 = vmatmul.mubr.msk.bf16.vlgmr.msra.gmra.mrb[24].mxu0 %vm271_vm2, %v11303_v7 }
 0x199   :  { %9755 = vmatpush3.bf16.xpose.msra.mxu1 %v717_v45  ;;  %9785 = vmatpush3.bf16.xpose.msra.mxu0 %v962_v41 }
 0x19a   :  { %9756 = vmatprep.mubr.msk.bf16.mxu1 %vm11133_vm1, %v14171_v26  ;;  %9786 = vmatprep.mubr.msk.bf16.mxu0 %vm11133_vm1, %v14171_v26 }
 0x19b   :  { %9766 = vmatprep.subr.bf16.mxu1 %v14171_v26  ;;  %9796 = vmatprep.subr.bf16.mxu0 %v14171_v26 }
 0x1a0   :  { %9757 = vmatmul.mubr.msk.bf16.vlgmr.msra.gmra.mrb[32].mxu1 %vm271_vm2, %v11291_v1  ;;  %9787 = vmatmul.mubr.msk.bf16.vlgmr.msra.gmra.mrb[28].mxu0 %vm271_vm2, %v11311_v10 }
 0x1a1   :  { %9767 = vmatpush3.bf16.xpose.msra.mxu1 %v815_v47  ;;  %9797 = vmatpush3.bf16.msra.mxu0 %v1380_v48  ;;  %v9170_v48 = vld [vmem:[%s14157_s1 + $0x3] ss:$0 sm:$0xff] }
 0x1a2   :  { %9768 = vmatprep.mubr.msk.bf16.mxu1 %vm11133_vm1, %v14171_v26  ;;  %9778 = vmatprep.subr.bf16.mxu1 %v14171_v26 }
 0x1a3   :  { %9798 = vmatprep.mubr.msk.bf16.mxu0 %vm11133_vm1, %v14171_v26  ;;  %9808 = vmatprep.subr.bf16.mxu0 %v14171_v26 }
 0x1a8   :  { %9769 = vmatmul.mubr.msk.bf16.vlgmr.msra.gmra.mrb[36].mxu1 %vm271_vm2, %v11299_v4 }
 0x1a9   :  { %9779 = vmatpush3.bf16.xpose.msra.mxu1 %v913_v49  ;;  %9780 = vmatprep.mubr.msk.bf16.mxu1 %vm11133_vm1, %v14171_v26  ;;  %v9175_v49 = vld [vmem:[%s14157_s1 + $0x8] ss:$0 sm:$0xff] }
 0x1aa   :  { %9790 = vmatprep.subr.bf16.mxu1 %v14171_v26 }
 0x1b0   :  { %9781 = vmatmul.mubr.msk.bf16.vlgmr.msra.gmra.mrb[40].mxu1 %vm271_vm2, %v11307_v9 }
 0x1b1   :  { %9791 = vmatpush3.bf16.xpose.msra.mxu1 %v1011_v50  ;;  %9792 = vmatprep.mubr.msk.bf16.mxu1 %vm11133_vm1, %v14171_v26 }
 0x1b2   :  { %9802 = vmatprep.subr.bf16.mxu1 %v14171_v26 }
 0x1b8   :  { %9793 = vmatmul.mubr.msk.bf16.vlgmr.msra.gmra.mrb[44].mxu1 %vm271_vm2, %v11315_v11 }
 0x1b9   :  { %9803 = vmatpush3.bf16.msra.mxu1 %v1428_v52  ;;  %9804 = vmatprep.mubr.msk.bf16.mxu1 %vm11133_vm1, %v14171_v26 }
 0x1ba   :  { %9814 = vmatprep.subr.bf16.mxu1 %v14171_v26 }
 0x243   :  { %v312_v53 = vpop.f32.mrb[8].mxu1 }
 0x244   :  { %v1053_v56 = vmul.f32 0.35355338, %v312_v53  ;;  %v9704_v59 = vpop.f32.mrb[9].mxu1 }
 0x245   :  { %v315_v61 = vpop.f32.mrb[10].mxu1 }
 0x246   :  { %v9705_v62 = vpop.f32.mrb[11].mxu1  ;;  %v11448_v0 = vadd.f32 %v9167_v55, %v1053_v56 }
 0x248   :  { %v1181_v3 = vsel %vm271_vm2, %v11448_v0, -inf }
 0x249   :  { %1182 = vmax.xlane.f32.xlu0 %v1181_v3 }
 0x24b   :  { %v361_v5 = vpop.f32.mrb[12].mxu1  ;;  %v508_v6 = vpop.f32.mrb[8].mxu0 }
 0x24c   :  { %v1054_v13 = vmul.f32 0.35355338, %v361_v5  ;;  %v1057_v14 = vmul.f32 0.35355338, %v508_v6  ;;  %v9710_v15 = vpop.f32.mrb[13].mxu1  ;;  %v9728_v16 = vpop.f32.mrb[9].mxu0 }
 0x24d   :  { %v364_v17 = vpop.f32.mrb[14].mxu1  ;;  %v511_v18 = vpop.f32.mrb[10].mxu0 }
 0x24e   :  { %v9711_v19 = vpop.f32.mrb[15].mxu1  ;;  %v9729_v20 = vpop.f32.mrb[11].mxu0  ;;  %v11458_v21 = vadd.f32 %v9168_v8, %v1054_v13  ;;  %v11460_v22 = vadd.f32 %v9171_v12, %v1057_v14  ;;  %v9172_v13 = vld [vmem:[%s14157_s1 + $0x5] ss:$0 sm:$0xff] }
 0x250   :  { %v1184_v23 = vsel %vm271_vm2, %v11458_v21, -inf  ;;  %v1193_v28 = vsel %vm271_vm2, %v11460_v22, -inf }
 0x251   :  { %1185 = vmax.xlane.f32.xlu1 %v1184_v23 }
 0x253   :  { %v410_v25 = vpop.f32.mrb[16].mxu1  ;;  %v606_v27 = vpop.f32.mrb[12].mxu0 }
 0x254   :  { %v1055_v30 = vmul.f32 0.35355338, %v410_v25  ;;  %v1059_v31 = vmul.f32 0.35355338, %v606_v27  ;;  %v9716_v32 = vpop.f32.mrb[17].mxu1  ;;  %v9740_v33 = vpop.f32.mrb[13].mxu0 }
 0x255   :  { %v413_v34 = vpop.f32.mrb[18].mxu1  ;;  %1194 = vmax.xlane.f32.xlu1 %v1193_v28  ;;  %v609_v35 = vpop.f32.mrb[14].mxu0  ;;  %v9174_v28 = vld [vmem:[%s14157_s1 + $0x7] ss:$0 sm:$0xff] }
 0x256   :  { %v9717_v37 = vpop.f32.mrb[19].mxu1  ;;  %v9741_v38 = vpop.f32.mrb[15].mxu0  ;;  %v11472_v39 = vadd.f32 %v9169_v24, %v1055_v30  ;;  %v11474_v41 = vadd.f32 %v9173_v29, %v1059_v31 }
 0x258   :  { %v1187_v44 = vsel %vm271_vm2, %v11472_v39, -inf  ;;  %v1199_v45 = vsel %vm271_vm2, %v11474_v41, -inf }
 0x259   :  { %1188 = vmax.xlane.f32.xlu0 %v1187_v44  ;;  %1200 = vmax.xlane.f32.xlu1 %v1199_v45 }
 0x25b   :  { %v459_v46 = vpop.f32.mrb[20].mxu1  ;;  %v704_v47 = vpop.f32.mrb[16].mxu0 }
 0x25c   :  { %v1056_v50 = vmul.f32 0.35355338, %v459_v46  ;;  %v1061_v51 = vmul.f32 0.35355338, %v704_v47  ;;  %v9722_v52 = vpop.f32.mrb[21].mxu1  ;;  %v9752_v53 = vpop.f32.mrb[17].mxu0 }
 0x25d   :  { %v462_v55 = vpop.f32.mrb[22].mxu1  ;;  %v707_v56 = vpop.f32.mrb[18].mxu0  ;;  %v9176_v46 = vld [vmem:[%s14157_s1 + $0x9] ss:$0 sm:$0xff] }
 0x25e   :  { %v9723_v59 = vpop.f32.mrb[23].mxu1  ;;  %v9753_v61 = vpop.f32.mrb[19].mxu0  ;;  %v11486_v62 = vadd.f32 %v9170_v48, %v1056_v50  ;;  %v11488_v3 = vadd.f32 %v9175_v49, %v1061_v51 }
 0x25f   :  { %v9178_v61 = vld [vmem:[%s14157_s1 + $0xb] ss:$0 sm:$0xff] }
 0x260   :  { %v1190_v5 = vsel %vm271_vm2, %v11486_v62, -inf  ;;  %v1205_v6 = vsel %vm271_vm2, %v11488_v3, -inf }
 0x261   :  { %1191 = vmax.xlane.f32.xlu0 %v1190_v5  ;;  %1206 = vmax.xlane.f32.xlu1 %v1205_v6 }
 0x263   :  { %v557_v8 = vpop.f32.mrb[24].mxu1  ;;  %v802_v12 = vpop.f32.mrb[20].mxu0 }
 0x264   :  { %v1058_v14 = vmul.f32 0.35355338, %v557_v8  ;;  %v9734_v15 = vpop.f32.mrb[25].mxu1  ;;  %v9764_v16 = vpop.f32.mrb[21].mxu0 }
 0x265   :  { %v560_v17 = vpop.f32.mrb[26].mxu1  ;;  %v805_v18 = vpop.f32.mrb[22].mxu0 }
 0x266   :  { %v9735_v19 = vpop.f32.mrb[27].mxu1  ;;  %v9765_v20 = vpop.f32.mrb[23].mxu0  ;;  %v11497_v23 = vadd.f32 %v9172_v13, %v1058_v14  ;;  %v9180_v17 = vld [vmem:[%s14157_s1 + $0xd] ss:$0 sm:$0xff] }
 0x268   :  { %v1196_v24 = vsel %vm271_vm2, %v11497_v23, -inf }
 0x269   :  { %1197 = vmax.xlane.f32.xlu0 %v1196_v24 }
 0x26b   :  { %v655_v25 = vpop.f32.mrb[28].mxu1  ;;  %v900_v27 = vpop.f32.mrb[24].mxu0 }
 0x26c   :  { %v1060_v29 = vmul.f32 0.35355338, %v655_v25  ;;  %v9746_v30 = vpop.f32.mrb[29].mxu1  ;;  %v9776_v31 = vpop.f32.mrb[25].mxu0 }
 0x26d   :  { %v658_v32 = vpop.f32.mrb[30].mxu1  ;;  %v903_v33 = vpop.f32.mrb[26].mxu0  ;;  %v9182_v30 = vld [vmem:[%s14157_s1 + $0xf] ss:$0 sm:$0xff] }
 0x26e   :  { %v9747_v34 = vpop.f32.mrb[31].mxu1  ;;  %v9777_v35 = vpop.f32.mrb[27].mxu0  ;;  %v11504_v37 = vadd.f32 %v9174_v28, %v1060_v29  ;;  %v1063_v33 = vmul.f32 0.35355338, %v802_v12 }
 0x270   :  { %v1202_v38 = vsel %vm271_vm2, %v11504_v37, -inf }
 0x271   :  { %1203 = vmax.xlane.f32.xlu0 %v1202_v38 }
 0x272   :  { %1902 = vrot.lane.b32.xlu1 %v11299_v4, %s11135_s30 }
 0x273   :  { %v753_v44 = vpop.f32.mrb[32].mxu1  ;;  %v998_v45 = vpop.f32.mrb[28].mxu0 }
 0x274   :  { %v1062_v47 = vmul.f32 0.35355338, %v753_v44  ;;  %v9758_v48 = vpop.f32.mrb[33].mxu1  ;;  %v9788_v49 = vpop.f32.mrb[29].mxu0  ;;  %v9177_v44 = vld [vmem:[%s14157_s1 + $0xa] ss:$0 sm:$0xff] }
 0x275   :  { %v756_v50 = vpop.f32.mrb[34].mxu1  ;;  %v1001_v51 = vpop.f32.mrb[30].mxu0  ;;  %v11541_v48 = vadd.f32 %v9177_v44, %v1063_v33  ;;  %v9179_v49 = vld [vmem:[%s14157_s1 + $0xc] ss:$0 sm:$0xff]  ;;  %v1067_v12 = vmul.f32 0.35355338, %v998_v45 }
 0x276   :  { %v9759_v52 = vpop.f32.mrb[35].mxu1  ;;  %v9789_v53 = vpop.f32.mrb[31].mxu0  ;;  %v11513_v55 = vadd.f32 %v9176_v46, %v1062_v47  ;;  %v1065_v47 = vmul.f32 0.35355338, %v900_v27 }
 0x277   :  { %v1211_v50 = vsel %vm271_vm2, %v11541_v48, -inf  ;;  %v9181_v52 = vld [vmem:[%s14157_s1 + $0xe] ss:$0 sm:$0xff]  ;;  %v11561_v45 = vpop.permute.xlu0 %1518 }
 0x278   :  { %v1208_v56 = vsel %vm271_vm2, %v11513_v55, -inf  ;;  %v11548_v51 = vadd.f32 %v9179_v49, %v1065_v47  ;;  %v11555_v53 = vadd.f32 %v9181_v52, %v1067_v12 }
 0x279   :  { %1209 = vmax.xlane.f32.xlu0 %v1208_v56 }
 0x27a   :  { %v1217_v27 = vsel %vm271_vm2, %v11548_v51, -inf  ;;  %v1223_v56 = vsel %vm271_vm2, %v11555_v53, -inf }
 0x27b   :  { %v851_v59 = vpop.f32.mrb[36].mxu1 }
 0x27c   :  { %v1064_v5 = vmul.f32 0.35355338, %v851_v59  ;;  %v9770_v6 = vpop.f32.mrb[37].mxu1  ;;  %v11563_v59 = vpop.permute.xlu1 %1470 }
 0x27d   :  { %v854_v8 = vpop.f32.mrb[38].mxu1 }
 0x27e   :  { %v9771_v13 = vpop.f32.mrb[39].mxu1  ;;  %v11520_v14 = vadd.f32 %v9178_v61, %v1064_v5  ;;  %v11565_v61 = vpop.permute.xlu0 %1710 }
 0x280   :  { %v1214_v15 = vsel %vm271_vm2, %v11520_v14, -inf  ;;  %v11567_v5 = vpop.permute.xlu1 %1566 }
 0x281   :  { %1215 = vmax.xlane.f32.xlu0 %v1214_v15 }
 0x282   :  { %v11569_v6 = vpop.permute.xlu0 %1806 }
 0x283   :  { %v949_v16 = vpop.f32.mrb[40].mxu1 }
 0x284   :  { %v1066_v18 = vmul.f32 0.35355338, %v949_v16  ;;  %v9782_v19 = vpop.f32.mrb[41].mxu1  ;;  %v11571_v8 = vpop.permute.xlu1 %1662 }
 0x285   :  { %v952_v20 = vpop.f32.mrb[42].mxu1 }
 0x286   :  { %v9783_v24 = vpop.f32.mrb[43].mxu1  ;;  %v11527_v25 = vadd.f32 %v9180_v17, %v1066_v18  ;;  %v11573_v13 = vpop.permute.xlu0 %1614 }
 0x288   :  { %v1220_v28 = vsel %vm271_vm2, %v11527_v25, -inf  ;;  %v11575_v15 = vpop.permute.xlu1 %1758 }
 0x289   :  { %1221 = vmax.xlane.f32.xlu0 %v1220_v28 }
 0x28b   :  { %v1047_v29 = vpop.f32.mrb[44].mxu1 }
 0x28c   :  { %v1068_v31 = vmul.f32 0.35355338, %v1047_v29  ;;  %v9794_v32 = vpop.f32.mrb[45].mxu1  ;;  %v11578_v19 = vpop.permute.xlu1 %1854 }
 0x28d   :  { %v1050_v34 = vpop.f32.mrb[46].mxu1 }
 0x28e   :  { %v9795_v35 = vpop.f32.mrb[47].mxu1  ;;  %v11534_v38 = vadd.f32 %v9182_v30, %v1068_v31 }
 0x290   :  { %v1226_v46 = vsel %vm271_vm2, %v11534_v38, -inf }
 0x291   :  { %1227 = vmax.xlane.f32.xlu0 %v1226_v46 }
 0x296   :  { %1212 = vmax.xlane.f32.xlu1 %v1211_v50 }
 0x29a   :  { %1218 = vmax.xlane.f32.xlu1 %v1217_v27 }
 0x29e   :  { %1224 = vmax.xlane.f32.xlu1 %v1223_v56 }
 0x2a7   :  { %1950 = vrot.lane.b32.xlu0 %v11303_v7, %s11135_s30 }
 0x2d6   :  { %v1183_v16 = vpop.xlane.xlu0 %1182 }
 0x2d7   :  { %v1229_v17 = vsub.f32 %v11448_v0, %v1183_v16 }
 0x2d9   :  { %v1245_v18 = vmul.f32 1.442695, %v1229_v17 }
 0x2db   :  { %10665 = vpow2.f32 %v1245_v18 }
 0x2de   :  { %v1186_v20 = vpop.xlane.xlu1 %1185 }
 0x2df   :  { %v1230_v24 = vsub.f32 %v11458_v21, %v1186_v20 }
 0x2e1   :  { %v1247_v28 = vmul.f32 1.442695, %v1230_v24 }
 0x2e2   :  { %v1195_v29 = vpop.xlane.xlu1 %1194 }
 0x2e3   :  { %10667 = vpow2.f32 %v1247_v28  ;;  %v1233_v30 = vsub.f32 %v11460_v22, %v1195_v29 }
 0x2e5   :  { %v11582_v31 = vpop.eup %10665  ;;  %v1253_v32 = vmul.f32 1.442695, %v1233_v30 }
 0x2e6   :  { %v1189_v33 = vpop.xlane.xlu0 %1188  ;;  %v1277_v34 = vsel %vm271_vm2, %v11582_v31, 0.0 }
 0x2e7   :  { %10669 = vpow2.f32 %v1253_v32  ;;  %v1231_v0 = vsub.f32 %v11472_v39, %v1189_v33  ;;  %1278 = vadd.xlane.f32.xlu1 %v1277_v34 }
 0x2e9   :  { %v1249_v35 = vmul.f32 1.442695, %v1231_v0 }
 0x2eb   :  { %10671 = vpow2.f32 %v1249_v35  ;;  %v1201_v35 = vpop.xlane.xlu1 %1200 }
 0x2ed   :  { %v11587_v44 = vpop.eup %10667 }
 0x2ee   :  { %v1192_v21 = vpop.xlane.xlu0 %1191  ;;  %v1280_v46 = vsel %vm271_vm2, %v11587_v44, 0.0 }
 0x2ef   :  { %v1232_v22 = vsub.f32 %v11486_v62, %v1192_v21  ;;  %1281 = vadd.xlane.f32.xlu0 %v1280_v46 }
 0x2f1   :  { %v11592_v47 = vpop.eup %10669  ;;  %v1251_v49 = vmul.f32 1.442695, %v1232_v22  ;;  %v1235_v22 = vsub.f32 %v11474_v41, %v1201_v35 }
 0x2f2   :  { %v1289_v12 = vsel %vm271_vm2, %v11592_v47, 0.0 }
 0x2f3   :  { %1290 = vadd.xlane.f32.xlu1 %v1289_v12  ;;  %10673 = vpow2.f32 %v1251_v49  ;;  %v1207_v12 = vpop.xlane.xlu1 %1206 }
 0x2f5   :  { %v11596_v39 = vpop.eup %10671 }
 0x2f6   :  { %v1198_v50 = vpop.xlane.xlu0 %1197  ;;  %v1283_v27 = vsel %vm271_vm2, %v11596_v39, 0.0 }
 0x2f7   :  { %v1234_v52 = vsub.f32 %v11497_v23, %v1198_v50  ;;  %1284 = vadd.xlane.f32.xlu1 %v1283_v27 }
 0x2f9   :  { %v1255_v56 = vmul.f32 1.442695, %v1234_v52  ;;  %v1257_v52 = vmul.f32 1.442695, %v1235_v22 }
 0x2fb   :  { %10675 = vpow2.f32 %v1255_v56 }
 0x2fd   :  { %v11601_v62 = vpop.eup %10673 }
 0x2fe   :  { %v1204_v16 = vpop.xlane.xlu0 %1203  ;;  %v1286_v18 = vsel %vm271_vm2, %v11601_v62, 0.0 }
 0x2ff   :  { %v1236_v17 = vsub.f32 %v11504_v37, %v1204_v16  ;;  %1287 = vadd.xlane.f32.xlu0 %v1286_v18 }
 0x301   :  { %v1259_v20 = vmul.f32 1.442695, %v1236_v17  ;;  %v11629_v17 = vpop.permute.xlu1 %1902 }
 0x303   :  { %10677 = vpow2.f32 %v1259_v20 }
 0x305   :  { %v11606_v24 = vpop.eup %10675 }
 0x306   :  { %v1210_v23 = vpop.xlane.xlu0 %1209  ;;  %v1292_v28 = vsel %vm271_vm2, %v11606_v24, 0.0 }
 0x307   :  { %v1238_v29 = vsub.f32 %v11513_v55, %v1210_v23  ;;  %1293 = vadd.xlane.f32.xlu0 %v1292_v28 }
 0x308   :  { %1998 = vrot.lane.b32.xlu1 %v11307_v9, %s11135_s30 }
 0x309   :  { %v1263_v30 = vmul.f32 1.442695, %v1238_v29 }
 0x30b   :  { %10679 = vpow2.f32 %v1263_v30 }
 0x30d   :  { %v11613_v37 = vpop.eup %10677 }
 0x30e   :  { %v1216_v32 = vpop.xlane.xlu0 %1215  ;;  %v1298_v33 = vsel %vm271_vm2, %v11613_v37, 0.0 }
 0x30f   :  { %v1240_v34 = vsub.f32 %v11520_v14, %v1216_v32  ;;  %1299 = vadd.xlane.f32.xlu0 %v1298_v33  ;;  %v1237_v14 = vsub.f32 %v11488_v3, %v1207_v12 }
 0x311   :  { %v1267_v0 = vmul.f32 1.442695, %v1240_v34  ;;  %v1261_v16 = vmul.f32 1.442695, %v1237_v14 }
 0x313   :  { %10681 = vpow2.f32 %v1267_v0 }
 0x315   :  { %v11618_v21 = vpop.eup %10679 }
 0x316   :  { %v1222_v55 = vpop.xlane.xlu0 %1221  ;;  %v1304_v46 = vsel %vm271_vm2, %v11618_v21, 0.0 }
 0x317   :  { %v1242_v49 = vsub.f32 %v11527_v25, %v1222_v55  ;;  %1305 = vadd.xlane.f32.xlu0 %v1304_v46 }
 0x319   :  { %v1271_v50 = vmul.f32 1.442695, %v1242_v49 }
 0x31b   :  { %10683 = vpow2.f32 %v1271_v50 }
 0x31c   :  { %10685 = vpow2.f32 %v1257_v52 }
 0x31d   :  { %v11625_v27 = vpop.eup %10681  ;;  %10687 = vpow2.f32 %v1261_v16 }
 0x31e   :  { %v1310_v56 = vsel %vm271_vm2, %v11625_v27, 0.0  ;;  %v1228_v12 = vpop.xlane.xlu0 %1227 }
 0x31f   :  { %1311 = vadd.xlane.f32.xlu0 %v1310_v56  ;;  %v1244_v50 = vsub.f32 %v11534_v38, %v1228_v12 }
 0x321   :  { %v1275_v52 = vmul.f32 1.442695, %v1244_v50 }
 0x322   :  { %v11691_v16 = vpop.permute.xlu0 %1950 }
 0x323   :  { %v1213_v41 = vpop.xlane.xlu1 %1212 }
 0x324   :  { %v1239_v25 = vsub.f32 %v11541_v48, %v1213_v41 }
 0x325   :  { %v11632_v18 = vpop.eup %10683 }
 0x326   :  { %v1265_v20 = vmul.f32 1.442695, %v1239_v25  ;;  %v1316_v3 = vsel %vm271_vm2, %v11632_v18, 0.0  ;;  %v11637_v29 = vpop.eup %10685 }
 0x327   :  { %v1219_v23 = vpop.xlane.xlu1 %1218  ;;  %1317 = vadd.xlane.f32.xlu0 %v1316_v3  ;;  %v1295_v48 = vsel %vm271_vm2, %v11637_v29, 0.0  ;;  %v11642_v34 = vpop.eup %10687 }
 0x328   :  { %10689 = vpow2.f32 %v1265_v20  ;;  %v1241_v28 = vsub.f32 %v11548_v51, %v1219_v23  ;;  %v1301_v35 = vsel %vm271_vm2, %v11642_v34, 0.0 }
 0x32a   :  { %v1269_v30 = vmul.f32 1.442695, %v1241_v28  ;;  %v1476_v28 = vsel %vm1378_vm3, %v11563_v59, 0 }
 0x32b   :  { %v1225_v32 = vpop.xlane.xlu1 %1224 }
 0x32c   :  { %10691 = vpow2.f32 %v1269_v30  ;;  %v1243_v33 = vsub.f32 %v11555_v53, %v1225_v32  ;;  %1296 = vadd.xlane.f32.xlu1 %v1295_v48 }
 0x32e   :  { %v1273_v0 = vmul.f32 1.442695, %v1243_v33  ;;  %v1524_v33 = vsel %vm1378_vm3, %v11561_v45, 0 }
 0x330   :  { %10693 = vpow2.f32 %v1273_v0  ;;  %1302 = vadd.xlane.f32.xlu1 %v1301_v35 }
 0x331   :  { %10695 = vpow2.f32 %v1275_v52 }
 0x332   :  { %v11646_v51 = vpop.eup %10689 }
 0x333   :  { %v1307_v55 = vsel %vm271_vm2, %v11646_v51, 0.0 }
 0x334   :  { %1308 = vadd.xlane.f32.xlu1 %v1307_v55 }
 0x336   :  { %v11650_v46 = vpop.eup %10691 }
 0x337   :  { %v1313_v53 = vsel %vm271_vm2, %v11650_v46, 0.0 }
 0x338   :  { %1314 = vadd.xlane.f32.xlu1 %v1313_v53  ;;  %v1572_v53 = vsel %vm1378_vm3, %v11567_v5, 0 }
 0x33a   :  { %v11654_v22 = vpop.eup %10693 }
 0x33b   :  { %v1319_v49 = vsel %vm271_vm2, %v11654_v22, 0.0  ;;  %v11667_v14 = vpop.eup %10695 }
 0x33c   :  { %1320 = vadd.xlane.f32.xlu1 %v1319_v49  ;;  %v1322_v38 = vsel %vm271_vm2, %v11667_v14, 0.0 }
 0x33d   :  { %2046 = vrot.lane.b32.xlu0 %v11311_v10, %s11135_s30 }
 0x34d   :  { %2094 = vrot.lane.b32.xlu1 %v11315_v11, %s11135_s30  ;;  %s11138_s30 = smov 56  }
 0x351   :  { %2202 = vrot.lane.b32.xlu1 %v11269_v43, %s11136_s16 }
 0x355   :  { %2200 = vrot.lane.b32.xlu1 %v11269_v43, %s11137_s17 }
 0x359   :  { %2302 = vrot.lane.b32.xlu1 %v11267_v42, %s11136_s16 }
 0x35c   :  { %1323 = vadd.xlane.f32.xlu0 %v1322_v38  ;;  %v1668_v38 = vsel %vm1378_vm3, %v11571_v8, 0 }
 0x35d   :  { %2300 = vrot.lane.b32.xlu1 %v11267_v42, %s11137_s17 }
 0x361   :  { %2402 = vrot.lane.b32.xlu1 %v11279_v58, %s11136_s16 }
 0x365   :  { %2400 = vrot.lane.b32.xlu1 %v11279_v58, %s11137_s17 }
 0x369   :  { %2502 = vrot.lane.b32.xlu1 %v11283_v60, %s11136_s16 }
 0x36d   :  { %2500 = vrot.lane.b32.xlu1 %v11283_v60, %s11137_s17 }
 0x371   :  { %2602 = vrot.lane.b32.xlu1 %v11291_v1, %s11136_s16 }
 0x372   :  { %2152 = vrot.lane.b32.xlu0 %v11261_v40, %s11136_s16 }
 0x374   :  { %v1279_v56 = vpop.xlane.xlu1 %1278 }
 0x375   :  { %10697 = vrcp.f32 %v1279_v56  ;;  %2600 = vrot.lane.b32.xlu1 %v11291_v1, %s11137_s17 }
 0x376   :  { %2150 = vrot.lane.b32.xlu0 %v11261_v40, %s11137_s17 }
 0x379   :  { %2702 = vrot.lane.b32.xlu1 %v11299_v4, %s11136_s16 }
 0x37a   :  { %2252 = vrot.lane.b32.xlu0 %v11259_v36, %s11136_s16 }
 0x37c   :  { %v1282_v41 = vpop.xlane.xlu0 %1281 }
 0x37d   :  { %10699 = vrcp.f32 %v1282_v41  ;;  %2700 = vrot.lane.b32.xlu1 %v11299_v4, %s11137_s17  ;;  %v1716_v41 = vsel %vm1378_vm3, %v11565_v61, 0 }
 0x37e   :  { %2250 = vrot.lane.b32.xlu0 %v11259_v36, %s11137_s17 }
 0x37f   :  { %v10698_v25 = vpop.eup %10697 }
 0x380   :  { %v1291_v20 = vpop.xlane.xlu1 %1290  ;;  %v1341_v3 = vmul.f32 %v10698_v25, %v11582_v31 }
 0x381   :  { %2802 = vrot.lane.b32.xlu1 %v11307_v9, %s11136_s16 }
 0x382   :  { %2352 = vrot.lane.b32.xlu0 %v11275_v54, %s11136_s16  ;;  %v1357_v23 = vpack.c.bf16 %v1341_v3, %v1341_v3  ;;  %v1812_v3 = vsel %vm1378_vm3, %v11569_v6, 0 }
 0x384   :  { %9799 = vmatmul.mubr.msk.bf16.vlgmr.msra.gmra.mrb[32].mxu0 %vm271_vm2, %v1357_v23  ;;  %v1285_v30 = vpop.xlane.xlu1 %1284 }
 0x385   :  { %9809 = vmatpush3.bf16.msra.mxu0 %v1476_v28  ;;  %9810 = vmatprep.mubr.msk.bf16.mxu0 %vm11133_vm1, %v14171_v26  ;;  %10701 = vrcp.f32 %v1285_v30  ;;  %v1908_v30 = vsel %vm1378_vm3, %v11629_v17, 0 }
 0x386   :  { %2800 = vrot.lane.b32.xlu1 %v11307_v9, %s11137_s17  ;;  %2350 = vrot.lane.b32.xlu0 %v11275_v54, %s11137_s17  ;;  %10703 = vrcp.f32 %v1291_v20 }
 0x387   :  { %v10700_v31 = vpop.eup %10699  ;;  %9820 = vmatprep.subr.bf16.mxu0 %v14171_v26 }
 0x388   :  { %v1342_v32 = vmul.f32 %v10700_v31, %v11587_v44  ;;  %v1999_v31 = vpop.permute.xlu1 %1998 }
 0x389   :  { %v2004_v17 = vsel %vm1378_vm3, %v1999_v31, 0 }
 0x38a   :  { %2902 = vrot.lane.b32.xlu1 %v11315_v11, %s11136_s16  ;;  %2452 = vrot.lane.b32.xlu0 %v11277_v57, %s11136_s16  ;;  %v1358_v59 = vpack.c.bf16 %v1342_v32, %v1342_v32 }
 0x38c   :  { %9805 = vmatmul.mubr.msk.bf16.vlgmr.msra.gmra.mrb[48].mxu1 %vm271_vm2, %v1358_v59  ;;  %v1288_v48 = vpop.xlane.xlu0 %1287 }
 0x38d   :  { %9815 = vmatpush3.bf16.msra.mxu1 %v1524_v33  ;;  %9816 = vmatprep.mubr.msk.bf16.mxu1 %vm11133_vm1, %v14171_v26  ;;  %10705 = vrcp.f32 %v1288_v48 }
 0x38e   :  { %2900 = vrot.lane.b32.xlu1 %v11315_v11, %s11137_s17  ;;  %2450 = vrot.lane.b32.xlu0 %v11277_v57, %s11137_s17 }
 0x38f   :  { %9826 = vmatprep.subr.bf16.mxu1 %v14171_v26  ;;  %v10702_v44 = vpop.eup %10701 }
 0x390   :  { %v1343_v0 = vmul.f32 %v10702_v44, %v11596_v39  ;;  %v10704_v35 = vpop.eup %10703 }
 0x391   :  { %v1345_v39 = vmul.f32 %v10704_v35, %v11592_v47  ;;  %v1620_v47 = vsel %vm1378_vm3, %v11573_v13, 0 }
 0x392   :  { %3174 = vrot.lane.b32.xlu1 %v11261_v40, %s11138_s30  ;;  %2552 = vrot.lane.b32.xlu0 %v11287_v63, %s11136_s16  ;;  %v1359_v45 = vpack.c.bf16 %v1343_v0, %v1343_v0 }
 0x393   :  { %v1361_v50 = vpack.c.bf16 %v1345_v39, %v1345_v39 }
 0x394   :  { %v1294_v55 = vpop.xlane.xlu0 %1293  ;;  %9811 = vmatmul.mubr.msk.bf16.vlgmr.msra.gmra.mrb[36].mxu0 %vm271_vm2, %v1359_v45 }
 0x395   :  { %10707 = vrcp.f32 %v1294_v55  ;;  %9821 = vmatpush3.bf16.msra.mxu0 %v1572_v53  ;;  %9822 = vmatprep.mubr.msk.bf16.mxu0 %vm11133_vm1, %v14171_v26 }
 0x396   :  { %3270 = vrot.lane.b32.xlu1 %v11259_v36, %s11138_s30  ;;  %2550 = vrot.lane.b32.xlu0 %v11287_v63, %s11137_s17 }
 0x397   :  { %v10706_v49 = vpop.eup %10705  ;;  %9832 = vmatprep.subr.bf16.mxu0 %v14171_v26 }
 0x398   :  { %v1344_v5 = vmul.f32 %v10706_v49, %v11601_v62 }
 0x39a   :  { %3366 = vrot.lane.b32.xlu1 %v11275_v54, %s11138_s30  ;;  %2652 = vrot.lane.b32.xlu0 %v11295_v2, %s11136_s16  ;;  %v1360_v12 = vpack.c.bf16 %v1344_v5, %v1344_v5  ;;  %v1764_v5 = vsel %vm1378_vm3, %v11575_v15, 0  ;;  %v1860_v15 = vsel %vm1378_vm3, %v11578_v19, 0 }
 0x39c   :  { %v1300_v52 = vpop.xlane.xlu0 %1299  ;;  %9817 = vmatmul.mubr.msk.bf16.vlgmr.msra.gmra.mrb[52].mxu1 %vm271_vm2, %v1360_v12  ;;  %9823 = vmatmul.mubr.msk.bf16.vlgmr.msra.gmra.mrb[40].mxu0 %vm271_vm2, %v1361_v50 }
 0x39d   :  { %10709 = vrcp.f32 %v1300_v52  ;;  %9827 = vmatpush3.bf16.msra.mxu1 %v1620_v47  ;;  %9833 = vmatpush3.bf16.msra.mxu0 %v1668_v38 }
 0x39e   :  { %3462 = vrot.lane.b32.xlu1 %v11277_v57, %s11138_s30  ;;  %2650 = vrot.lane.b32.xlu0 %v11295_v2, %s11137_s17 }
 0x39f   :  { %v10708_v62 = vpop.eup %10707  ;;  %9828 = vmatprep.mubr.msk.bf16.mxu1 %vm11133_vm1, %v14171_v26  ;;  %9838 = vmatprep.subr.bf16.mxu1 %v14171_v26 }
 0x3a0   :  { %v1346_v8 = vmul.f32 %v10708_v62, %v11606_v24  ;;  %9834 = vmatprep.mubr.msk.bf16.mxu0 %vm11133_vm1, %v14171_v26  ;;  %9844 = vmatprep.subr.bf16.mxu0 %v14171_v26 }
 0x3a2   :  { %v1362_v13 = vpack.c.bf16 %v1346_v8, %v1346_v8  ;;  %3558 = vrot.lane.b32.xlu1 %v11287_v63, %s11138_s30  ;;  %2752 = vrot.lane.b32.xlu0 %v11303_v7, %s11136_s16 }
 0x3a4   :  { %v1306_v56 = vpop.xlane.xlu0 %1305  ;;  %9829 = vmatmul.mubr.msk.bf16.vlgmr.msra.gmra.mrb[56].mxu1 %vm271_vm2, %v1362_v13 }
 0x3a5   :  { %10711 = vrcp.f32 %v1306_v56  ;;  %9839 = vmatpush3.bf16.msra.mxu1 %v1716_v41  ;;  %9840 = vmatprep.mubr.msk.bf16.mxu1 %vm11133_vm1, %v14171_v26  ;;  %v1956_v56 = vsel %vm1378_vm3, %v11691_v16, 0 }
 0x3a6   :  { %2750 = vrot.lane.b32.xlu0 %v11303_v7, %s11137_s17  ;;  %9850 = vmatprep.subr.bf16.mxu1 %v14171_v26 }
 0x3a7   :  { %v10710_v24 = vpop.eup %10709 }
 0x3a8   :  { %v1348_v25 = vmul.f32 %v10710_v24, %v11613_v37 }
 0x3aa   :  { %v1364_v20 = vpack.c.bf16 %v1348_v25, %v1348_v25  ;;  %2852 = vrot.lane.b32.xlu0 %v11311_v10, %s11136_s16 }
 0x3ac   :  { %v1312_v61 = vpop.xlane.xlu0 %1311  ;;  %9841 = vmatmul.mubr.msk.bf16.vlgmr.msra.gmra.mrb[60].mxu1 %vm271_vm2, %v1364_v20 }
 0x3ad   :  { %10713 = vrcp.f32 %v1312_v61  ;;  %9851 = vmatpush3.bf16.msra.mxu1 %v1812_v3  ;;  %9852 = vmatprep.mubr.msk.bf16.mxu1 %vm11133_vm1, %v14171_v26 }
 0x3ae   :  { %2850 = vrot.lane.b32.xlu0 %v11311_v10, %s11137_s17  ;;  %9862 = vmatprep.subr.bf16.mxu1 %v14171_v26 }
 0x3af   :  { %v10712_v23 = vpop.eup %10711 }
 0x3b0   :  { %v1350_v37 = vmul.f32 %v10712_v23, %v11618_v21 }
 0x3b2   :  { %v1366_v28 = vpack.c.bf16 %v1350_v37, %v1350_v37  ;;  %3222 = vrot.lane.b32.xlu0 %v11269_v43, %s11138_s30 }
 0x3b4   :  { %v1318_v6 = vpop.xlane.xlu0 %1317  ;;  %9853 = vmatmul.mubr.msk.bf16.vlgmr.msra.gmra.mrb[64].mxu1 %vm271_vm2, %v1366_v28 }
 0x3b5   :  { %10715 = vrcp.f32 %v1318_v6  ;;  %9863 = vmatpush3.bf16.msra.mxu1 %v1908_v30  ;;  %9864 = vmatprep.mubr.msk.bf16.mxu1 %vm11133_vm1, %v14171_v26 }
 0x3b6   :  { %3318 = vrot.lane.b32.xlu0 %v11267_v42, %s11138_s30  ;;  %9874 = vmatprep.subr.bf16.mxu1 %v14171_v26 }
 0x3b7   :  { %v10714_v32 = vpop.eup %10713 }
 0x3b8   :  { %v1352_v21 = vmul.f32 %v10714_v32, %v11625_v27 }
 0x3b9   :  { %v1297_v59 = vpop.xlane.xlu1 %1296 }
 0x3ba   :  { %v1368_v33 = vpack.c.bf16 %v1352_v21, %v1352_v21  ;;  %10717 = vrcp.f32 %v1297_v59  ;;  %3414 = vrot.lane.b32.xlu0 %v11279_v58, %s11138_s30 }
 0x3bc   :  { %9865 = vmatmul.mubr.msk.bf16.vlgmr.msra.gmra.mrb[68].mxu1 %vm271_vm2, %v1368_v33 }
 0x3bd   :  { %9875 = vmatpush3.bf16.msra.mxu1 %v2004_v17  ;;  %v1303_v48 = vpop.xlane.xlu1 %1302  ;;  %9876 = vmatprep.mubr.msk.bf16.mxu1 %vm11133_vm1, %v14171_v26 }
 0x3be   :  { %10719 = vrcp.f32 %v1303_v48  ;;  %3510 = vrot.lane.b32.xlu0 %v11283_v60, %s11138_s30  ;;  %9886 = vmatprep.subr.bf16.mxu1 %v14171_v26 }
 0x3bf   :  { %v10716_v44 = vpop.eup %10715 }
 0x3c0   :  { %v1354_v27 = vmul.f32 %v10716_v44, %v11632_v18 }
 0x3c1   :  { %v1309_v0 = vpop.xlane.xlu1 %1308 }
 0x3c2   :  { %v1370_v45 = vpack.c.bf16 %v1354_v27, %v1354_v27  ;;  %10721 = vrcp.f32 %v1309_v0 }
 0x3c4   :  { %v10718_v35 = vpop.eup %10717  ;;  %9877 = vmatmul.mubr.msk.bf16.vlgmr.msra.gmra.mrb[72].mxu1 %vm271_vm2, %v1370_v45 }
 0x3c5   :  { %v1315_v55 = vpop.xlane.xlu1 %1314  ;;  %v1347_v53 = vmul.f32 %v10718_v35, %v11637_v29  ;;  %9888 = vmatprep.mubr.msk.bf16.mxu1 %vm11133_vm1, %v14171_v26 }
 0x3c6   :  { %10723 = vrcp.f32 %v1315_v55 }
 0x3c7   :  { %v1363_v39 = vpack.c.bf16 %v1347_v53, %v1347_v53 }
 0x3c8   :  { %v10720_v49 = vpop.eup %10719 }
 0x3c9   :  { %9835 = vmatmul.mubr.msk.bf16.vlgmr.msra.gmra.mrb[44].mxu0 %vm271_vm2, %v1363_v39  ;;  %v1321_v18 = vpop.xlane.xlu1 %1320  ;;  %v1349_v29 = vmul.f32 %v10720_v49, %v11642_v34 }
 0x3ca   :  { %9845 = vmatpush3.bf16.msra.mxu0 %v1764_v5  ;;  %9846 = vmatprep.mubr.msk.bf16.mxu0 %vm11133_vm1, %v14171_v26  ;;  %10725 = vrcp.f32 %v1321_v18 }
 0x3cb   :  { %9856 = vmatprep.subr.bf16.mxu0 %v14171_v26  ;;  %v1365_v52 = vpack.c.bf16 %v1349_v29, %v1349_v29 }
 0x3cc   :  { %v10722_v38 = vpop.eup %10721 }
 0x3cd   :  { %v2095_v12 = vpop.permute.xlu1 %2094  ;;  %v1351_v34 = vmul.f32 %v10722_v38, %v11646_v51  ;;  %v2047_v51 = vpop.permute.xlu0 %2046 }
 0x3ce   :  { %v2100_v50 = vsel %vm1378_vm3, %v2095_v12, 0  ;;  %v2052_v61 = vsel %vm1378_vm3, %v2047_v51, 0 }
 0x3cf   :  { %9887 = vmatpush3.bf16.msra.mxu1 %v2100_v50  ;;  %v1367_v8 = vpack.c.bf16 %v1351_v34, %v1351_v34 }
 0x3d0   :  { %9898 = vmatprep.subr.bf16.mxu1 %v14171_v26  ;;  %v10724_v13 = vpop.eup %10723 }
 0x3d1   :  { %9847 = vmatmul.mubr.msk.bf16.vlgmr.msra.gmra.mrb[48].mxu0 %vm271_vm2, %v1365_v52  ;;  %v2203_v47 = vpop.permute.xlu1 %2202  ;;  %v1353_v41 = vmul.f32 %v10724_v13, %v11650_v46 }
 0x3d2   :  { %9857 = vmatpush3.bf16.msra.mxu0 %v1860_v15  ;;  %9858 = vmatprep.mubr.msk.bf16.mxu0 %vm11133_vm1, %v14171_v26  ;;  %v2208_v48 = vsel %vm271_vm2, %v2203_v47, 0 }
 0x3d3   :  { %9868 = vmatprep.subr.bf16.mxu0 %v14171_v26  ;;  %v1369_v25 = vpack.c.bf16 %v1353_v41, %v1353_v41 }
 0x3d4   :  { %v10726_v20 = vpop.eup %10725 }
 0x3d5   :  { %v2201_v62 = vpop.permute.xlu1 %2200  ;;  %v1355_v3 = vmul.f32 %v10726_v20, %v11654_v22 }
 0x3d7   :  { %v1371_v23 = vpack.c.bf16 %v1355_v3, %v1355_v3 }
 0x3d9   :  { %9859 = vmatmul.mubr.msk.bf16.vlgmr.msra.gmra.mrb[52].mxu0 %vm271_vm2, %v1367_v8  ;;  %v2303_v19 = vpop.permute.xlu1 %2302 }
 0x3da   :  { %9869 = vmatpush3.bf16.msra.mxu0 %v1956_v56  ;;  %9870 = vmatprep.mubr.msk.bf16.mxu0 %vm11133_vm1, %v14171_v26  ;;  %v2308_v45 = vsel %vm271_vm2, %v2303_v19, 0 }
 0x3db   :  { %9880 = vmatprep.subr.bf16.mxu0 %v14171_v26 }
 0x3dd   :  { %v2301_v24 = vpop.permute.xlu1 %2300 }
 0x3e1   :  { %9871 = vmatmul.mubr.msk.bf16.vlgmr.msra.gmra.mrb[56].mxu0 %vm271_vm2, %v1369_v25  ;;  %v2403_v16 = vpop.permute.xlu1 %2402 }
 0x3e2   :  { %9881 = vmatpush3.bf16.msra.mxu0 %v2052_v61  ;;  %9882 = vmatprep.mubr.msk.bf16.mxu0 %vm11133_vm1, %v14171_v26  ;;  %v2408_v5 = vsel %vm271_vm2, %v2403_v16, 0 }
 0x3e3   :  { %9892 = vmatprep.subr.bf16.mxu0 %v14171_v26 }
 0x3e5   :  { %v2401_v37 = vpop.permute.xlu1 %2400 }
 0x3e9   :  { %v1324_v46 = vpop.xlane.xlu0 %1323  ;;  %9883 = vmatmul.mubr.msk.bf16.vlgmr.msra.gmra.mrb[60].mxu0 %vm271_vm2, %v1371_v23  ;;  %v2503_v30 = vpop.permute.xlu1 %2502 }
 0x3ea   :  { %10727 = vrcp.f32 %v1324_v46  ;;  %9894 = vmatprep.mubr.msk.bf16.mxu0 %vm11133_vm1, %v14171_v26  ;;  %v2508_v52 = vsel %vm271_vm2, %v2503_v30, 0 }
 0x3ed   :  { %v2153_v28 = vpop.permute.xlu0 %2152  ;;  %v11852_v32 = vpop.permute.xlu1 %2500 }
 0x3ee   :  { %v2158_v6 = vsel %vm271_vm2, %v2153_v28, 0 }
 0x3ef   :  { %9893 = vmatpush3.bf16.xpose.msra.mxu0 %v2158_v6 }
 0x3f0   :  { %9904 = vmatprep.subr.bf16.mxu0 %v14171_v26 }
 0x3f1   :  { %v2151_v31 = vpop.permute.xlu0 %2150 }
 0x3f4   :  { %v10728_v22 = vpop.eup %10727 }
 0x3f5   :  { %v2253_v21 = vpop.permute.xlu0 %2252  ;;  %v1356_v59 = vmul.f32 %v10728_v22, %v11667_v14  ;;  %v2603_v14 = vpop.permute.xlu1 %2602 }
 0x3f6   :  { %v2258_v33 = vsel %vm271_vm2, %v2253_v21, 0  ;;  %9895 = vmatmul.mubr.msk.bf16.vlgmr.msra.gmra.mrb[64].mxu0 %vm271_vm2, %v2151_v31 }
 0x3f7   :  { %9905 = vmatpush3.bf16.xpose.msra.mxu0 %v2258_v33  ;;  %v1372_v17 = vpack.c.bf16 %v1356_v59, %v1356_v59  ;;  %9906 = vmatprep.mubr.msk.bf16.mxu0 %vm11133_vm1, %v14171_v26 }
 0x3f8   :  { %9916 = vmatprep.subr.bf16.mxu0 %v14171_v26 }
 0x3f9   :  { %9889 = vmatmul.mubr.msk.bf16.vlgmr.msra.gmra.mrb[76].mxu1 %vm271_vm2, %v1372_v17  ;;  %v2251_v44 = vpop.permute.xlu0 %2250  ;;  %v2601_v35 = vpop.permute.xlu1 %2600 }
 0x3fa   :  { %9899 = vmatpush3.bf16.xpose.msra.mxu1 %v2208_v48  ;;  %9900 = vmatprep.mubr.msk.bf16.mxu1 %vm11133_vm1, %v14171_v26 }
 0x3fb   :  { %9910 = vmatprep.subr.bf16.mxu1 %v14171_v26 }
 0x3fd   :  { %v2353_v27 = vpop.permute.xlu0 %2352  ;;  %v2703_v49 = vpop.permute.xlu1 %2702 }
 0x3fe   :  { %v2358_v0 = vsel %vm271_vm2, %v2353_v27, 0  ;;  %9907 = vmatmul.mubr.msk.bf16.vlgmr.msra.gmra.mrb[68].mxu0 %vm271_vm2, %v2251_v44 }
 0x3ff   :  { %9917 = vmatpush3.bf16.xpose.msra.mxu0 %v2358_v0  ;;  %9918 = vmatprep.mubr.msk.bf16.mxu0 %vm11133_vm1, %v14171_v26 }
 0x400   :  { %9928 = vmatprep.subr.bf16.mxu0 %v14171_v26 }
 0x401   :  { %9901 = vmatmul.mubr.msk.bf16.vlgmr.msra.gmra.mrb[80].mxu1 %vm271_vm2, %v2201_v62  ;;  %v2351_v55 = vpop.permute.xlu0 %2350  ;;  %v2701_v29 = vpop.permute.xlu1 %2700  ;;  %v2608_v62 = vsel %vm271_vm2, %v2603_v14, 0 }
 0x402   :  { %9911 = vmatpush3.bf16.xpose.msra.mxu1 %v2308_v45  ;;  %9912 = vmatprep.mubr.msk.bf16.mxu1 %vm11133_vm1, %v14171_v26 }
 0x403   :  { %9922 = vmatprep.subr.bf16.mxu1 %v14171_v26 }
 0x405   :  { %v2453_v53 = vpop.permute.xlu0 %2452  ;;  %v2803_v15 = vpop.permute.xlu1 %2802 }
 0x406   :  { %v2458_v39 = vsel %vm271_vm2, %v2453_v53, 0  ;;  %9919 = vmatmul.mubr.msk.bf16.vlgmr.msra.gmra.mrb[72].mxu0 %vm271_vm2, %v2351_v55  ;;  %v2808_v16 = vsel %vm271_vm2, %v2803_v15, 0 }
 0x407   :  { %9929 = vmatpush3.bf16.xpose.msra.mxu0 %v2458_v39  ;;  %9930 = vmatprep.mubr.msk.bf16.mxu0 %vm11133_vm1, %v14171_v26 }
 0x408   :  { %9940 = vmatprep.subr.bf16.mxu0 %v14171_v26 }
 0x409   :  { %9913 = vmatmul.mubr.msk.bf16.vlgmr.msra.gmra.mrb[84].mxu1 %vm271_vm2, %v2301_v24  ;;  %v2451_v18 = vpop.permute.xlu0 %2450  ;;  %v2801_v8 = vpop.permute.xlu1 %2800  ;;  %v2708_v24 = vsel %vm271_vm2, %v2703_v49, 0 }
 0x40a   :  { %9923 = vmatpush3.bf16.xpose.msra.mxu1 %v2408_v5  ;;  %9924 = vmatprep.mubr.msk.bf16.mxu1 %vm11133_vm1, %v14171_v26 }
 0x40b   :  { %9934 = vmatprep.subr.bf16.mxu1 %v14171_v26 }
 0x40d   :  { %v2553_v12 = vpop.permute.xlu0 %2552  ;;  %v2903_v41 = vpop.permute.xlu1 %2902 }
 0x40e   :  { %v2558_v50 = vsel %vm271_vm2, %v2553_v12, 0  ;;  %9931 = vmatmul.mubr.msk.bf16.vlgmr.msra.gmra.mrb[76].mxu0 %vm271_vm2, %v2451_v18  ;;  %v2908_v46 = vsel %vm271_vm2, %v2903_v41, 0 }
 0x40f   :  { %9941 = vmatpush3.bf16.xpose.msra.mxu0 %v2558_v50  ;;  %9942 = vmatprep.mubr.msk.bf16.mxu0 %vm11133_vm1, %v14171_v26 }
 0x410   :  { %9952 = vmatprep.subr.bf16.mxu0 %v14171_v26 }
 0x411   :  { %9925 = vmatmul.mubr.msk.bf16.vlgmr.msra.gmra.mrb[88].mxu1 %vm271_vm2, %v2401_v37  ;;  %v2551_v38 = vpop.permute.xlu0 %2550  ;;  %v2901_v25 = vpop.permute.xlu1 %2900 }
 0x412   :  { %9935 = vmatpush3.bf16.xpose.msra.mxu1 %v2508_v52  ;;  %9936 = vmatprep.mubr.msk.bf16.mxu1 %vm11133_vm1, %v14171_v26 }
 0x413   :  { %9946 = vmatprep.subr.bf16.mxu1 %v14171_v26 }
 0x415   :  { %v2653_v47 = vpop.permute.xlu0 %2652  ;;  %v3175_v3 = vpop.permute.xlu1 %3174 }
 0x416   :  { %v2658_v34 = vsel %vm271_vm2, %v2653_v47, 0  ;;  %9943 = vmatmul.mubr.msk.bf16.vlgmr.msra.gmra.mrb[80].mxu0 %vm271_vm2, %v2551_v38  ;;  %v3180_v37 = vsel %vm1378_vm3, %v3175_v3, 0 }
 0x417   :  { %9953 = vmatpush3.bf16.xpose.msra.mxu0 %v2658_v34  ;;  %9954 = vmatprep.mubr.msk.bf16.mxu0 %vm11133_vm1, %v14171_v26 }
 0x418   :  { %9964 = vmatprep.subr.bf16.mxu0 %v14171_v26 }
 0x419   :  { %9937 = vmatmul.mubr.msk.bf16.vlgmr.msra.gmra.mrb[92].mxu1 %vm271_vm2, %v11852_v32  ;;  %v2651_v13 = vpop.permute.xlu0 %2650 }
 0x41a   :  { %9947 = vmatpush3.bf16.xpose.msra.mxu1 %v2608_v62  ;;  %9948 = vmatprep.mubr.msk.bf16.mxu1 %vm11133_vm1, %v14171_v26 }
 0x41b   :  { %9958 = vmatprep.subr.bf16.mxu1 %v14171_v26 }
 0x41d   :  { %v2753_v56 = vpop.permute.xlu0 %2752 }
 0x41e   :  { %v2758_v19 = vsel %vm271_vm2, %v2753_v56, 0  ;;  %9955 = vmatmul.mubr.msk.bf16.vlgmr.msra.gmra.mrb[84].mxu0 %vm271_vm2, %v2651_v13 }
 0x41f   :  { %9965 = vmatpush3.bf16.xpose.msra.mxu0 %v2758_v19  ;;  %9966 = vmatprep.mubr.msk.bf16.mxu0 %vm11133_vm1, %v14171_v26 }
 0x420   :  { %9976 = vmatprep.subr.bf16.mxu0 %v14171_v26 }
 0x421   :  { %9949 = vmatmul.mubr.msk.bf16.vlgmr.msra.gmra.mrb[96].mxu1 %vm271_vm2, %v2601_v35  ;;  %v2751_v51 = vpop.permute.xlu0 %2750 }
 0x422   :  { %9959 = vmatpush3.bf16.xpose.msra.mxu1 %v2708_v24  ;;  %9960 = vmatprep.mubr.msk.bf16.mxu1 %vm11133_vm1, %v14171_v26 }
 0x423   :  { %9970 = vmatprep.subr.bf16.mxu1 %v14171_v26 }
 0x425   :  { %v2853_v20 = vpop.permute.xlu0 %2852 }
 0x426   :  { %v2858_v61 = vsel %vm271_vm2, %v2853_v20, 0  ;;  %9967 = vmatmul.mubr.msk.bf16.vlgmr.msra.gmra.mrb[88].mxu0 %vm271_vm2, %v2751_v51 }
 0x427   :  { %9977 = vmatpush3.bf16.xpose.msra.mxu0 %v2858_v61  ;;  %9978 = vmatprep.mubr.msk.bf16.mxu0 %vm11133_vm1, %v14171_v26 }
 0x428   :  { %9988 = vmatprep.subr.bf16.mxu0 %v14171_v26 }
 0x429   :  { %9961 = vmatmul.mubr.msk.bf16.vlgmr.msra.gmra.mrb[100].mxu1 %vm271_vm2, %v2701_v29  ;;  %v2851_v23 = vpop.permute.xlu0 %2850 }
 0x42a   :  { %9971 = vmatpush3.bf16.xpose.msra.mxu1 %v2808_v16  ;;  %9972 = vmatprep.mubr.msk.bf16.mxu1 %vm11133_vm1, %v14171_v26 }
 0x42b   :  { %9982 = vmatprep.subr.bf16.mxu1 %v14171_v26 }
 0x42d   :  { %v3223_v28 = vpop.permute.xlu0 %3222 }
 0x42e   :  { %9979 = vmatmul.mubr.msk.bf16.vlgmr.msra.gmra.mrb[92].mxu0 %vm271_vm2, %v2851_v23  ;;  %v3228_v6 = vsel %vm1378_vm3, %v3223_v28, 0 }
 0x42f   :  { %9989 = vmatpush3.bf16.msra.mxu0 %v3180_v37  ;;  %9990 = vmatprep.mubr.msk.bf16.mxu0 %vm11133_vm1, %v14171_v26 }
 0x430   :  { %10000 = vmatprep.subr.bf16.mxu0 %v14171_v26 }
 0x431   :  { %9973 = vmatmul.mubr.msk.bf16.vlgmr.msra.gmra.mrb[104].mxu1 %vm271_vm2, %v2801_v8 }
 0x432   :  { %9983 = vmatpush3.bf16.xpose.msra.mxu1 %v2908_v46  ;;  %9984 = vmatprep.mubr.msk.bf16.mxu1 %vm11133_vm1, %v14171_v26 }
 0x433   :  { %9994 = vmatprep.subr.bf16.mxu1 %v14171_v26 }
 0x439   :  { %9985 = vmatmul.mubr.msk.bf16.vlgmr.msra.gmra.mrb[108].mxu1 %vm271_vm2, %v2901_v25 }
 0x43a   :  { %9995 = vmatpush3.bf16.msra.mxu1 %v3228_v6  ;;  %9996 = vmatprep.mubr.msk.bf16.mxu1 %vm11133_vm1, %v14171_v26 }
 0x43b   :  { %10006 = vmatprep.subr.bf16.mxu1 %v14171_v26 }
 0x457   :  { %v11941_v30 = vpop.f32.mrb[32].mxu0 }
 0x458   :  { %v9800_v31 = vpop.f32.mrb[33].mxu0 }
 0x459   :  { %v1419_v22 = vpop.f32.mrb[34].mxu0 }
 0x45a   :  { %v9801_v32 = vpop.f32.mrb[35].mxu0 }
 0x45f   :  { %v11943_v21 = vpop.f32.mrb[48].mxu1 }
 0x460   :  { %v9806_v33 = vpop.f32.mrb[49].mxu1 }
 0x461   :  { %v1467_v17 = vpop.f32.mrb[50].mxu1 }
 0x462   :  { %v9807_v48 = vpop.f32.mrb[51].mxu1 }
 0x467   :  { %v11947_v44 = vpop.f32.mrb[36].mxu0 }
 0x468   :  { %v9812_v14 = vpop.f32.mrb[37].mxu0 }
 0x469   :  { %v1515_v27 = vpop.f32.mrb[38].mxu0 }
 0x46a   :  { %v9813_v0 = vpop.f32.mrb[39].mxu0 }
 0x46f   :  { %v11949_v45 = vpop.f32.mrb[52].mxu1  ;;  %v11951_v35 = vpop.f32.mrb[40].mxu0 }
 0x470   :  { %v9818_v53 = vpop.f32.mrb[53].mxu1  ;;  %v9824_v39 = vpop.f32.mrb[41].mxu0 }
 0x471   :  { %v1563_v49 = vpop.f32.mrb[54].mxu1  ;;  %v1611_v5 = vpop.f32.mrb[42].mxu0 }
 0x472   :  { %v9819_v18 = vpop.f32.mrb[55].mxu1  ;;  %v9825_v29 = vpop.f32.mrb[43].mxu0 }
 0x477   :  { %v11955_v12 = vpop.f32.mrb[56].mxu1 }
 0x478   :  { %v9830_v52 = vpop.f32.mrb[57].mxu1 }
 0x479   :  { %v1659_v38 = vpop.f32.mrb[58].mxu1 }
 0x47a   :  { %v9831_v15 = vpop.f32.mrb[59].mxu1 }
 0x47f   :  { %v11959_v47 = vpop.f32.mrb[60].mxu1 }
 0x480   :  { %v9842_v34 = vpop.f32.mrb[61].mxu1 }
 0x481   :  { %v1755_v62 = vpop.f32.mrb[62].mxu1 }
 0x482   :  { %v9843_v8 = vpop.f32.mrb[63].mxu1 }
 0x487   :  { %v11961_v13 = vpop.f32.mrb[64].mxu1 }
 0x488   :  { %v9854_v56 = vpop.f32.mrb[65].mxu1 }
 0x489   :  { %v1851_v19 = vpop.f32.mrb[66].mxu1 }
 0x48a   :  { %v9855_v41 = vpop.f32.mrb[67].mxu1 }
 0x48f   :  { %v11963_v24 = vpop.f32.mrb[68].mxu1 }
 0x490   :  { %v9866_v51 = vpop.f32.mrb[69].mxu1 }
 0x491   :  { %v1947_v25 = vpop.f32.mrb[70].mxu1  ;;  %v11017_v51 = vld [vmem:[%s14157_s1] ss:$0 sm:$0xff] }
 0x492   :  { %v9867_v20 = vpop.f32.mrb[71].mxu1 }
 0x497   :  { %v11965_v61 = vpop.f32.mrb[72].mxu1 }
 0x498   :  { %v9878_v16 = vpop.f32.mrb[73].mxu1 }
 0x499   :  { %v2043_v3 = vpop.f32.mrb[74].mxu1 }
 0x49a   :  { %v9879_v23 = vpop.f32.mrb[75].mxu1 }
 0x49c   :  { %v11967_v37 = vpop.f32.mrb[44].mxu0 }
 0x49d   :  { %v9836_v28 = vpop.f32.mrb[45].mxu0 }
 0x49e   :  { %v1707_v6 = vpop.f32.mrb[46].mxu0 }
 0x49f   :  { %v9837_v31 = vpop.f32.mrb[47].mxu0 }
 0x4a4   :  { %v11971_v22 = vpop.f32.mrb[48].mxu0 }
 0x4a5   :  { %v9848_v33 = vpop.f32.mrb[49].mxu0 }
 0x4a6   :  { %v1803_v17 = vpop.f32.mrb[50].mxu0 }
 0x4a7   :  { %v9849_v48 = vpop.f32.mrb[51].mxu0 }
 0x4ac   :  { %v11975_v14 = vpop.f32.mrb[52].mxu0 }
 0x4ad   :  { %v9860_v0 = vpop.f32.mrb[53].mxu0 }
 0x4ae   :  { %v1899_v53 = vpop.f32.mrb[54].mxu0 }
 0x4af   :  { %v9861_v39 = vpop.f32.mrb[55].mxu0  ;;  %v11018_v53 = vld [vmem:[%s14157_s1 + $0x2] ss:$0 sm:$0xff] }
 0x4b4   :  { %v11979_v49 = vpop.f32.mrb[56].mxu0 }
 0x4b5   :  { %14176 = vst [vmem:[#allocation8_spill] sm:$0xff] %v11979_v49  ;;  %v9872_v18 = vpop.f32.mrb[57].mxu0 }
 0x4b6   :  { %v1995_v29 = vpop.f32.mrb[58].mxu0 }
 0x4b7   :  { %v9873_v52 = vpop.f32.mrb[59].mxu0 }
 0x4bc   :  { %v11983_v38 = vpop.f32.mrb[60].mxu0 }
 0x4bd   :  { %14177 = vst [vmem:[#allocation9_spill] sm:$0xff] %v11983_v38  ;;  %v9884_v15 = vpop.f32.mrb[61].mxu0 }
 0x4be   :  { %v2091_v34 = vpop.f32.mrb[62].mxu0 }
 0x4bf   :  { %v9885_v62 = vpop.f32.mrb[63].mxu0 }
 0x4c9   :  { %v2194_v8 = vpop.f32.mrb[64].mxu0 }
 0x4ca   :  { %v2950_v56 = vmul.f32 0.35355338, %v2194_v8  ;;  %v9896_v19 = vpop.f32.mrb[65].mxu0  ;;  %v11019_v8 = vld [vmem:[%s14157_s1 + $0x1] ss:$0 sm:$0xff] }
 0x4cb   :  { %v2197_v41 = vpop.f32.mrb[66].mxu0 }
 0x4cc   :  { %v11988_v25 = vadd.f32 %v11017_v51, %v2950_v56  ;;  %v11990_v20 = vpop.f32.mrb[76].mxu1  ;;  %v9897_v16 = vpop.f32.mrb[67].mxu0 }
 0x4cd   :  { %14178 = vst [vmem:[#allocation10_spill] sm:$0xff] %v11990_v20  ;;  %v9890_v23 = vpop.f32.mrb[77].mxu1 }
 0x4ce   :  { %v2139_v28 = vpop.f32.mrb[78].mxu1  ;;  %v2982_v6 = vsel %vm271_vm2, %v11988_v25, -inf }
 0x4cf   :  { %v9891_v31 = vpop.f32.mrb[79].mxu1  ;;  %2983 = vmax.xlane.f32.xlu0 %v2982_v6  ;;  %v11020_v6 = vld [vmem:[%s14157_s1 + $0x4] ss:$0 sm:$0xff] }
 0x4d1   :  { %v2294_v33 = vpop.f32.mrb[68].mxu0 }
 0x4d2   :  { %v2952_v17 = vmul.f32 0.35355338, %v2294_v33  ;;  %v9908_v48 = vpop.f32.mrb[69].mxu0 }
 0x4d3   :  { %v2297_v0 = vpop.f32.mrb[70].mxu0 }
 0x4d4   :  { %v11999_v39 = vadd.f32 %v11018_v53, %v2952_v17  ;;  %v2244_v18 = vpop.f32.mrb[80].mxu1  ;;  %v9909_v29 = vpop.f32.mrb[71].mxu0 }
 0x4d5   :  { %v2951_v52 = vmul.f32 0.35355338, %v2244_v18  ;;  %v9902_v15 = vpop.f32.mrb[81].mxu1  ;;  %v11021_v29 = vld [vmem:[%s14157_s1 + $0x3] ss:$0 sm:$0xff] }
 0x4d6   :  { %v2247_v34 = vpop.f32.mrb[82].mxu1  ;;  %v2988_v62 = vsel %vm271_vm2, %v11999_v39, -inf }
 0x4d7   :  { %v12006_v56 = vadd.f32 %v11019_v8, %v2951_v52  ;;  %v9903_v19 = vpop.f32.mrb[83].mxu1  ;;  %2989 = vmax.xlane.f32.xlu0 %v2988_v62 }
 0x4d9   :  { %v2394_v41 = vpop.f32.mrb[72].mxu0  ;;  %v2985_v51 = vsel %vm271_vm2, %v12006_v56, -inf }
 0x4da   :  { %v2954_v16 = vmul.f32 0.35355338, %v2394_v41  ;;  %2986 = vmax.xlane.f32.xlu1 %v2985_v51  ;;  %v9920_v23 = vpop.f32.mrb[73].mxu0  ;;  %v11022_v51 = vld [vmem:[%s14157_s1 + $0x6] ss:$0 sm:$0xff] }
 0x4db   :  { %v2397_v28 = vpop.f32.mrb[74].mxu0 }
 0x4dc   :  { %v12013_v31 = vadd.f32 %v11020_v6, %v2954_v16  ;;  %v2344_v33 = vpop.f32.mrb[84].mxu1  ;;  %v9921_v17 = vpop.f32.mrb[75].mxu0 }
 0x4dd   :  { %v2953_v48 = vmul.f32 0.35355338, %v2344_v33  ;;  %v9914_v0 = vpop.f32.mrb[85].mxu1 }
 0x4de   :  { %v2347_v53 = vpop.f32.mrb[86].mxu1  ;;  %v2994_v18 = vsel %vm271_vm2, %v12013_v31, -inf  ;;  %v11023_v0 = vld [vmem:[%s14157_s1 + $0x5] ss:$0 sm:$0xff] }
 0x4df   :  { %v12020_v52 = vadd.f32 %v11021_v29, %v2953_v48  ;;  %v9915_v15 = vpop.f32.mrb[87].mxu1  ;;  %2995 = vmax.xlane.f32.xlu1 %v2994_v18 }
 0x4e1   :  { %v2494_v34 = vpop.f32.mrb[76].mxu0  ;;  %v2991_v62 = vsel %vm271_vm2, %v12020_v52, -inf }
 0x4e2   :  { %v2956_v8 = vmul.f32 0.35355338, %v2494_v34  ;;  %2992 = vmax.xlane.f32.xlu0 %v2991_v62  ;;  %v9932_v19 = vpop.f32.mrb[77].mxu0 }
 0x4e3   :  { %v2497_v41 = vpop.f32.mrb[78].mxu0  ;;  %v11024_v19 = vld [vmem:[%s14157_s1 + $0x8] ss:$0 sm:$0xff] }
 0x4e4   :  { %v12027_v16 = vadd.f32 %v11022_v51, %v2956_v8  ;;  %v2444_v23 = vpop.f32.mrb[88].mxu1  ;;  %v9933_v28 = vpop.f32.mrb[79].mxu0 }
 0x4e5   :  { %v2955_v6 = vmul.f32 0.35355338, %v2444_v23  ;;  %v9926_v33 = vpop.f32.mrb[89].mxu1 }
 0x4e6   :  { %v2447_v17 = vpop.f32.mrb[90].mxu1  ;;  %v3000_v48 = vsel %vm271_vm2, %v12027_v16, -inf }
 0x4e7   :  { %v12034_v53 = vadd.f32 %v11023_v0, %v2955_v6  ;;  %v9927_v18 = vpop.f32.mrb[91].mxu1  ;;  %3001 = vmax.xlane.f32.xlu1 %v3000_v48  ;;  %v11025_v48 = vld [vmem:[%s14157_s1 + $0x7] ss:$0 sm:$0xff] }
 0x4e9   :  { %v2594_v29 = vpop.f32.mrb[80].mxu0  ;;  %v2997_v15 = vsel %vm271_vm2, %v12034_v53, -inf }
 0x4ea   :  { %v2958_v34 = vmul.f32 0.35355338, %v2594_v29  ;;  %2998 = vmax.xlane.f32.xlu0 %v2997_v15  ;;  %v9944_v62 = vpop.f32.mrb[81].mxu0 }
 0x4eb   :  { %v2597_v8 = vpop.f32.mrb[82].mxu0 }
 0x4ec   :  { %v12041_v41 = vadd.f32 %v11024_v19, %v2958_v34  ;;  %v2544_v51 = vpop.f32.mrb[92].mxu1  ;;  %v9945_v23 = vpop.f32.mrb[83].mxu0  ;;  %v11026_v19 = vld [vmem:[%s14157_s1 + $0xa] ss:$0 sm:$0xff] }
 0x4ed   :  { %v2957_v28 = vmul.f32 0.35355338, %v2544_v51  ;;  %v9938_v6 = vpop.f32.mrb[93].mxu1 }
 0x4ee   :  { %v2547_v33 = vpop.f32.mrb[94].mxu1  ;;  %v3006_v17 = vsel %vm271_vm2, %v12041_v41, -inf }
 0x4ef   :  { %v12048_v0 = vadd.f32 %v11025_v48, %v2957_v28  ;;  %v9939_v18 = vpop.f32.mrb[95].mxu1  ;;  %3007 = vmax.xlane.f32.xlu1 %v3006_v17 }
 0x4f0   :  { %v11027_v18 = vld [vmem:[%s14157_s1 + $0x9] ss:$0 sm:$0xff] }
 0x4f1   :  { %v2694_v29 = vpop.f32.mrb[84].mxu0  ;;  %v3003_v15 = vsel %vm271_vm2, %v12048_v0, -inf }
 0x4f2   :  { %v2960_v34 = vmul.f32 0.35355338, %v2694_v29  ;;  %3004 = vmax.xlane.f32.xlu0 %v3003_v15  ;;  %v9956_v62 = vpop.f32.mrb[85].mxu0 }
 0x4f3   :  { %v2697_v8 = vpop.f32.mrb[86].mxu0 }
 0x4f4   :  { %v12055_v51 = vadd.f32 %v11026_v19, %v2960_v34  ;;  %v2644_v23 = vpop.f32.mrb[96].mxu1  ;;  %v9957_v6 = vpop.f32.mrb[87].mxu0 }
 0x4f5   :  { %v2959_v28 = vmul.f32 0.35355338, %v2644_v23  ;;  %v9950_v33 = vpop.f32.mrb[97].mxu1  ;;  %v11028_v6 = vld [vmem:[%s14157_s1 + $0xc] ss:$0 sm:$0xff] }
 0x4f6   :  { %v2647_v48 = vpop.f32.mrb[98].mxu1  ;;  %v3012_v17 = vsel %vm271_vm2, %v12055_v51, -inf }
 0x4f7   :  { %v12062_v29 = vadd.f32 %v11027_v18, %v2959_v28  ;;  %v9951_v15 = vpop.f32.mrb[99].mxu1  ;;  %3013 = vmax.xlane.f32.xlu1 %v3012_v17 }
 0x4f9   :  { %v2794_v62 = vpop.f32.mrb[88].mxu0  ;;  %v3009_v34 = vsel %vm271_vm2, %v12062_v29, -inf }
 0x4fa   :  { %v2962_v8 = vmul.f32 0.35355338, %v2794_v62  ;;  %3010 = vmax.xlane.f32.xlu0 %v3009_v34  ;;  %v9968_v19 = vpop.f32.mrb[89].mxu0  ;;  %v11029_v62 = vld [vmem:[%s14157_s1 + $0xb] ss:$0 sm:$0xff] }
 0x4fb   :  { %v2797_v23 = vpop.f32.mrb[90].mxu0 }
 0x4fc   :  { %v12069_v33 = vadd.f32 %v11028_v6, %v2962_v8  ;;  %v2744_v48 = vpop.f32.mrb[100].mxu1  ;;  %v9969_v3 = vpop.f32.mrb[91].mxu0 }
 0x4fd   :  { %v2961_v28 = vmul.f32 0.35355338, %v2744_v48  ;;  %v9962_v18 = vpop.f32.mrb[101].mxu1 }
 0x4fe   :  { %v2747_v15 = vpop.f32.mrb[102].mxu1  ;;  %v3018_v17 = vsel %vm271_vm2, %v12069_v33, -inf  ;;  %v11030_v18 = vld [vmem:[%s14157_s1 + $0xe] ss:$0 sm:$0xff] }
 0x4ff   :  { %v12076_v34 = vadd.f32 %v11029_v62, %v2961_v28  ;;  %v9963_v19 = vpop.f32.mrb[103].mxu1  ;;  %3019 = vmax.xlane.f32.xlu1 %v3018_v17 }
 0x501   :  { %v2894_v23 = vpop.f32.mrb[92].mxu0  ;;  %v3015_v8 = vsel %vm271_vm2, %v12076_v34, -inf }
 0x502   :  { %v2964_v6 = vmul.f32 0.35355338, %v2894_v23  ;;  %3016 = vmax.xlane.f32.xlu0 %v3015_v8  ;;  %v9980_v3 = vpop.f32.mrb[93].mxu0  ;;  %v11031_v23 = vld [vmem:[%s14157_s1 + $0xd] ss:$0 sm:$0xff] }
 0x503   :  { %v2897_v48 = vpop.f32.mrb[94].mxu0 }
 0x504   :  { %v12083_v15 = vadd.f32 %v11030_v18, %v2964_v6  ;;  %v2844_v5 = vpop.f32.mrb[104].mxu1  ;;  %v9981_v27 = vpop.f32.mrb[95].mxu0 }
 0x505   :  { %v2963_v28 = vmul.f32 0.35355338, %v2844_v5  ;;  %v9974_v62 = vpop.f32.mrb[105].mxu1 }
 0x506   :  { %v2847_v19 = vpop.f32.mrb[106].mxu1  ;;  %v3024_v17 = vsel %vm271_vm2, %v12083_v15, -inf  ;;  %v11032_v62 = vld [vmem:[%s14157_s1 + $0xf] ss:$0 sm:$0xff] }
 0x507   :  { %v12090_v8 = vadd.f32 %v11031_v23, %v2963_v28  ;;  %v9975_v3 = vpop.f32.mrb[107].mxu1  ;;  %3025 = vmax.xlane.f32.xlu1 %v3024_v17  ;;  %v12107_v17 = vpop.permute.xlu0 %3318 }
 0x508   :  { %v12109_v23 = vpop.permute.xlu1 %3270 }
 0x509   :  { %v3021_v6 = vsel %vm271_vm2, %v12090_v8, -inf }
 0x50a   :  { %3022 = vmax.xlane.f32.xlu0 %v3021_v6 }
 0x50b   :  { %v12111_v3 = vpop.permute.xlu0 %3414 }
 0x50c   :  { %v2944_v48 = vpop.f32.mrb[108].mxu1 }
 0x50d   :  { %v2965_v27 = vmul.f32 0.35355338, %v2944_v48  ;;  %v9986_v5 = vpop.f32.mrb[109].mxu1 }
 0x50e   :  { %v2947_v18 = vpop.f32.mrb[110].mxu1 }
 0x50f   :  { %v12097_v19 = vadd.f32 %v11032_v62, %v2965_v27  ;;  %v9987_v32 = vpop.f32.mrb[111].mxu1  ;;  %v12115_v6 = vpop.permute.xlu0 %3510 }
 0x510   :  { %v12113_v32 = vpop.permute.xlu1 %3366 }
 0x511   :  { %v3027_v28 = vsel %vm271_vm2, %v12097_v19, -inf }
 0x512   :  { %3028 = vmax.xlane.f32.xlu0 %v3027_v28 }
 0x514   :  { %v12117_v27 = vpop.permute.xlu1 %3462 }
 0x518   :  { %3654 = vrot.lane.b32.xlu1 %v11295_v2, %s11138_s30  ;;  %v12120_v62 = vpop.permute.xlu1 %3558 }
 0x51c   :  { %3702 = vrot.lane.b32.xlu1 %v11299_v4, %s11138_s30 }
 0x528   :  { %3606 = vrot.lane.b32.xlu0 %v11291_v1, %s11138_s30 }
 0x55c   :  { %v2984_v48 = vpop.xlane.xlu0 %2983 }
 0x55d   :  { %v3030_v5 = vsub.f32 %v11988_v25, %v2984_v48 }
 0x55f   :  { %v3046_v18 = vmul.f32 1.442695, %v3030_v5 }
 0x561   :  { %10729 = vpow2.f32 %v3046_v18 }
 0x564   :  { %v2990_v28 = vpop.xlane.xlu0 %2989 }
 0x565   :  { %v3032_v46 = vsub.f32 %v11999_v39, %v2990_v28 }
 0x567   :  { %v3050_v50 = vmul.f32 1.442695, %v3032_v46  ;;  %v2987_v55 = vpop.xlane.xlu1 %2986 }
 0x568   :  { %v3031_v59 = vsub.f32 %v12006_v56, %v2987_v55 }
 0x569   :  { %10731 = vpow2.f32 %v3050_v50 }
 0x56a   :  { %v3048_v26 = vmul.f32 1.442695, %v3031_v59 }
 0x56b   :  { %v12124_v38 = vpop.eup %10729 }
 0x56c   :  { %10733 = vpow2.f32 %v3048_v26  ;;  %v2996_v20 = vpop.xlane.xlu1 %2995  ;;  %v3078_v25 = vsel %vm271_vm2, %v12124_v38, 0.0 }
 0x56d   :  { %v3034_v48 = vsub.f32 %v12013_v31, %v2996_v20  ;;  %3079 = vadd.xlane.f32.xlu1 %v3078_v25 }
 0x56f   :  { %v3054_v5 = vmul.f32 1.442695, %v3034_v48  ;;  %v2993_v18 = vpop.xlane.xlu0 %2992 }
 0x570   :  { %v3033_v39 = vsub.f32 %v12020_v52, %v2993_v18 }
 0x571   :  { %10735 = vpow2.f32 %v3054_v5 }
 0x572   :  { %v3052_v46 = vmul.f32 1.442695, %v3033_v39 }
 0x573   :  { %v12130_v28 = vpop.eup %10731 }
 0x574   :  { %10737 = vpow2.f32 %v3052_v46  ;;  %v3002_v59 = vpop.xlane.xlu1 %3001  ;;  %v3084_v26 = vsel %vm271_vm2, %v12130_v28, 0.0 }
 0x575   :  { %v3036_v55 = vsub.f32 %v12027_v16, %v3002_v59  ;;  %3085 = vadd.xlane.f32.xlu1 %v3084_v26 }
 0x576   :  { %v12135_v50 = vpop.eup %10733 }
 0x577   :  { %v3058_v20 = vmul.f32 1.442695, %v3036_v55  ;;  %v2999_v56 = vpop.xlane.xlu0 %2998  ;;  %v3081_v31 = vsel %vm271_vm2, %v12135_v50, 0.0 }
 0x578   :  { %v3035_v52 = vsub.f32 %v12034_v53, %v2999_v56  ;;  %3082 = vadd.xlane.f32.xlu0 %v3081_v31 }
 0x579   :  { %10739 = vpow2.f32 %v3058_v20 }
 0x57a   :  { %v3056_v25 = vmul.f32 1.442695, %v3035_v52 }
 0x57b   :  { %v12140_v48 = vpop.eup %10735 }
 0x57c   :  { %10741 = vpow2.f32 %v3056_v25  ;;  %v3008_v5 = vpop.xlane.xlu1 %3007  ;;  %v3090_v16 = vsel %vm271_vm2, %v12140_v48, 0.0 }
 0x57d   :  { %v3038_v18 = vsub.f32 %v12041_v41, %v3008_v5  ;;  %3091 = vadd.xlane.f32.xlu1 %v3090_v16 }
 0x57e   :  { %v12145_v39 = vpop.eup %10737 }
 0x57f   :  { %v3062_v46 = vmul.f32 1.442695, %v3038_v18  ;;  %v3005_v59 = vpop.xlane.xlu0 %3004  ;;  %v3087_v53 = vsel %vm271_vm2, %v12145_v39, 0.0 }
 0x580   :  { %v3037_v26 = vsub.f32 %v12048_v0, %v3005_v59  ;;  %3088 = vadd.xlane.f32.xlu0 %v3087_v53 }
 0x581   :  { %10743 = vpow2.f32 %v3062_v46 }
 0x582   :  { %v3060_v55 = vmul.f32 1.442695, %v3037_v26 }
 0x583   :  { %v12150_v20 = vpop.eup %10739 }
 0x584   :  { %10745 = vpow2.f32 %v3060_v55  ;;  %v3014_v56 = vpop.xlane.xlu1 %3013  ;;  %v3096_v41 = vsel %vm271_vm2, %v12150_v20, 0.0 }
 0x585   :  { %v3040_v31 = vsub.f32 %v12055_v51, %v3014_v56  ;;  %3097 = vadd.xlane.f32.xlu1 %v3096_v41 }
 0x586   :  { %v12155_v52 = vpop.eup %10741 }
 0x587   :  { %v3066_v25 = vmul.f32 1.442695, %v3040_v31  ;;  %v3011_v5 = vpop.xlane.xlu0 %3010  ;;  %v3093_v0 = vsel %vm271_vm2, %v12155_v52, 0.0 }
 0x588   :  { %v3039_v16 = vsub.f32 %v12062_v29, %v3011_v5  ;;  %3094 = vadd.xlane.f32.xlu0 %v3093_v0 }
 0x589   :  { %10747 = vpow2.f32 %v3066_v25 }
 0x58a   :  { %v3064_v18 = vmul.f32 1.442695, %v3039_v16 }
 0x58b   :  { %v12160_v46 = vpop.eup %10743 }
 0x58c   :  { %10749 = vpow2.f32 %v3064_v18  ;;  %v3102_v59 = vsel %vm271_vm2, %v12160_v46, 0.0  ;;  %v3020_v0 = vpop.xlane.xlu1 %3019 }
 0x58d   :  { %3103 = vadd.xlane.f32.xlu1 %v3102_v59  ;;  %v3042_v16 = vsub.f32 %v12069_v33, %v3020_v0 }
 0x58e   :  { %v12164_v51 = vpop.eup %10745 }
 0x58f   :  { %v3017_v53 = vpop.xlane.xlu0 %3016  ;;  %v3099_v26 = vsel %vm271_vm2, %v12164_v51, 0.0  ;;  %v3070_v59 = vmul.f32 1.442695, %v3042_v16 }
 0x590   :  { %v3041_v55 = vsub.f32 %v12076_v34, %v3017_v53  ;;  %3100 = vadd.xlane.f32.xlu0 %v3099_v26 }
 0x592   :  { %v3068_v29 = vmul.f32 1.442695, %v3041_v55 }
 0x593   :  { %v12169_v56 = vpop.eup %10747 }
 0x594   :  { %10751 = vpow2.f32 %v3068_v29  ;;  %v3108_v41 = vsel %vm271_vm2, %v12169_v56, 0.0  ;;  %v3026_v18 = vpop.xlane.xlu1 %3025 }
 0x595   :  { %3109 = vadd.xlane.f32.xlu1 %v3108_v41  ;;  %v3044_v53 = vsub.f32 %v12083_v15, %v3026_v18  ;;  %10753 = vpow2.f32 %v3070_v59 }
 0x596   :  { %v12173_v31 = vpop.eup %10749 }
 0x597   :  { %v3105_v25 = vsel %vm271_vm2, %v12173_v31, 0.0  ;;  %v3074_v26 = vmul.f32 1.442695, %v3044_v53  ;;  %v3023_v55 = vpop.xlane.xlu0 %3022 }
 0x598   :  { %3106 = vadd.xlane.f32.xlu0 %v3105_v25  ;;  %v3043_v29 = vsub.f32 %v12090_v8, %v3023_v55  ;;  %v12217_v53 = vpop.permute.xlu1 %3654 }
 0x599   :  { %10755 = vpow2.f32 %v3074_v26 }
 0x59a   :  { %v3072_v25 = vmul.f32 1.442695, %v3043_v29 }
 0x59c   :  { %10757 = vpow2.f32 %v3072_v25  ;;  %v12223_v26 = vpop.permute.xlu1 %3702 }
 0x59e   :  { %v12177_v5 = vpop.eup %10751 }
 0x59f   :  { %v3111_v34 = vsel %vm271_vm2, %v12177_v5, 0.0  ;;  %v3029_v41 = vpop.xlane.xlu0 %3028  ;;  %v12189_v49 = vpop.eup %10753 }
 0x5a0   :  { %3112 = vadd.xlane.f32.xlu0 %v3111_v34  ;;  %v3045_v34 = vsub.f32 %v12097_v19, %v3029_v41  ;;  %v3114_v0 = vsel %vm271_vm2, %v12189_v49, 0.0 }
 0x5a2   :  { %v3076_v33 = vmul.f32 1.442695, %v3045_v34 }
 0x5a3   :  { %v12193_v16 = vpop.eup %10755  ;;  %v12237_v29 = vpop.permute.xlu0 %3606 }
 0x5a4   :  { %10759 = vpow2.f32 %v3076_v33  ;;  %v3120_v15 = vsel %vm271_vm2, %v12193_v16, 0.0 }
 0x5a6   :  { %3798 = vrot.lane.b32.xlu1 %v11307_v9, %s11138_s30  ;;  %v12197_v8 = vpop.eup %10757 }
 0x5a7   :  { %v3117_v19 = vsel %vm271_vm2, %v12197_v8, 0.0 }
 0x5ae   :  { %v12201_v18 = vpop.eup %10759 }
 0x5af   :  { %v3123_v59 = vsel %vm271_vm2, %v12201_v18, 0.0 }
 0x5b6   :  { %3750 = vrot.lane.b32.xlu0 %v11303_v7, %s11138_s30 }
 0x5ca   :  { %3115 = vadd.xlane.f32.xlu1 %v3114_v0 }
 0x5ce   :  { %3121 = vadd.xlane.f32.xlu1 %v3120_v15  ;;  %v3276_v15 = vsel %vm1378_vm3, %v12109_v23, 0 }
 0x5d5   :  { %3118 = vadd.xlane.f32.xlu0 %v3117_v19 }
 0x5d9   :  { %3124 = vadd.xlane.f32.xlu0 %v3123_v59 }
 0x5df   :  { %3894 = vrot.lane.b32.xlu1 %v11315_v11, %s11138_s30 }
 0x5e3   :  { %4198 = vrot.lane.b32.xlu1 %v11261_v40, %s11139_s18 }
 0x5e7   :  { %4248 = vrot.lane.b32.xlu1 %v11269_v43, %s11139_s18 }
 0x5eb   :  { %4298 = vrot.lane.b32.xlu1 %v11259_v36, %s11139_s18 }
 0x5ef   :  { %4348 = vrot.lane.b32.xlu1 %v11267_v42, %s11139_s18  ;;  %3846 = vrot.lane.b32.xlu0 %v11311_v10, %s11138_s30  ;;  %s11141_s30 = smov 48  }
 0x5f3   :  { %4398 = vrot.lane.b32.xlu1 %v11275_v54, %s11139_s18  ;;  %4200 = vrot.lane.b32.xlu0 %v11261_v40, %s11140_s19 }
 0x5f7   :  { %4448 = vrot.lane.b32.xlu1 %v11279_v58, %s11139_s18  ;;  %4250 = vrot.lane.b32.xlu0 %v11269_v43, %s11140_s19 }
 0x5fa   :  { %v3080_v55 = vpop.xlane.xlu1 %3079 }
 0x5fb   :  { %10761 = vrcp.f32 %v3080_v55  ;;  %4498 = vrot.lane.b32.xlu1 %v11277_v57, %s11139_s18  ;;  %4300 = vrot.lane.b32.xlu0 %v11259_v36, %s11140_s19 }
 0x5ff   :  { %4548 = vrot.lane.b32.xlu1 %v11283_v60, %s11139_s18  ;;  %4350 = vrot.lane.b32.xlu0 %v11267_v42, %s11140_s19 }
 0x602   :  { %v3086_v41 = vpop.xlane.xlu1 %3085 }
 0x603   :  { %10763 = vrcp.f32 %v3086_v41  ;;  %4650 = vrot.lane.b32.xlu1 %v11291_v1, %s11140_s19  ;;  %4400 = vrot.lane.b32.xlu0 %v11275_v54, %s11140_s19 }
 0x605   :  { %v10762_v25 = vpop.eup %10761  ;;  %v3083_v34 = vpop.xlane.xlu0 %3082 }
 0x606   :  { %10765 = vrcp.f32 %v3083_v34  ;;  %v3142_v33 = vmul.f32 %v10762_v25, %v12124_v38  ;;  %v14179_v38 = vmov 0.0  }
 0x607   :  { %4648 = vrot.lane.b32.xlu1 %v11291_v1, %s11139_s18  ;;  %4450 = vrot.lane.b32.xlu0 %v11279_v58, %s11140_s19 }
 0x608   :  { %v3158_v0 = vpack.c.bf16 %v3142_v33, %v3142_v33  ;;  %v3372_v33 = vsel %vm1378_vm3, %v12113_v32, 0 }
 0x60a   :  { %9991 = vmatmul.mubr.msk.bf16.vlgmr.msra.gmra.mrb[96].mxu0 %vm271_vm2, %v3158_v0  ;;  %v3092_v19 = vpop.xlane.xlu1 %3091 }
 0x60b   :  { %10001 = vmatpush3.bf16.msra.mxu0 %v3276_v15  ;;  %10767 = vrcp.f32 %v3092_v19  ;;  %4750 = vrot.lane.b32.xlu1 %v11299_v4, %s11140_s19 }
 0x60c   :  { %4500 = vrot.lane.b32.xlu0 %v11277_v57, %s11140_s19  ;;  %10002 = vmatprep.mubr.msk.bf16.mxu0 %vm11133_vm1, %v14179_v38 }
 0x60d   :  { %v10764_v59 = vpop.eup %10763  ;;  %v3089_v55 = vpop.xlane.xlu0 %3088  ;;  %10012 = vmatprep.subr.bf16.mxu0 %v14179_v38 }
 0x60e   :  { %10769 = vrcp.f32 %v3089_v55  ;;  %v3144_v23 = vmul.f32 %v10764_v59, %v12130_v28 }
 0x60f   :  { %4748 = vrot.lane.b32.xlu1 %v11299_v4, %s11139_s18 }
 0x610   :  { %v10766_v41 = vpop.eup %10765  ;;  %4550 = vrot.lane.b32.xlu0 %v11283_v60, %s11140_s19  ;;  %v3160_v25 = vpack.c.bf16 %v3144_v23, %v3144_v23  ;;  %v3468_v23 = vsel %vm1378_vm3, %v12117_v27, 0 }
 0x611   :  { %v3143_v34 = vmul.f32 %v10766_v41, %v12135_v50  ;;  %v3324_v50 = vsel %vm1378_vm3, %v12107_v17, 0 }
 0x612   :  { %10003 = vmatmul.mubr.msk.bf16.vlgmr.msra.gmra.mrb[100].mxu0 %vm271_vm2, %v3160_v25  ;;  %v3098_v0 = vpop.xlane.xlu1 %3097 }
 0x613   :  { %10013 = vmatpush3.bf16.msra.mxu0 %v3372_v33  ;;  %10771 = vrcp.f32 %v3098_v0  ;;  %4850 = vrot.lane.b32.xlu1 %v11307_v9, %s11140_s19  ;;  %v3159_v28 = vpack.c.bf16 %v3143_v34, %v3143_v34 }
 0x614   :  { %4600 = vrot.lane.b32.xlu0 %v11287_v63, %s11140_s19  ;;  %10014 = vmatprep.mubr.msk.bf16.mxu0 %vm11133_vm1, %v14179_v38 }
 0x615   :  { %v10768_v15 = vpop.eup %10767  ;;  %9997 = vmatmul.mubr.msk.bf16.vlgmr.msra.gmra.mrb[112].mxu1 %vm271_vm2, %v3159_v28  ;;  %v3095_v32 = vpop.xlane.xlu0 %3094  ;;  %10024 = vmatprep.subr.bf16.mxu0 %v14179_v38  ;;  %v3564_v28 = vsel %vm1378_vm3, %v12120_v62, 0  ;;  %v3516_v62 = vsel %vm1378_vm3, %v12115_v6, 0 }
 0x616   :  { %10007 = vmatpush3.bf16.msra.mxu1 %v3324_v50  ;;  %10773 = vrcp.f32 %v3095_v32  ;;  %v3146_v19 = vmul.f32 %v10768_v15, %v12140_v48  ;;  %10008 = vmatprep.mubr.msk.bf16.mxu1 %vm11133_vm1, %v14179_v38 }
 0x617   :  { %4848 = vrot.lane.b32.xlu1 %v11307_v9, %s11139_s18  ;;  %10018 = vmatprep.subr.bf16.mxu1 %v14179_v38 }
 0x618   :  { %v10770_v59 = vpop.eup %10769  ;;  %4598 = vrot.lane.b32.xlu0 %v11287_v63, %s11139_s18  ;;  %v3162_v17 = vpack.c.bf16 %v3146_v19, %v3146_v19 }
 0x619   :  { %v3145_v55 = vmul.f32 %v10770_v59, %v12145_v39  ;;  %v3420_v39 = vsel %vm1378_vm3, %v12111_v3, 0 }
 0x61a   :  { %10015 = vmatmul.mubr.msk.bf16.vlgmr.msra.gmra.mrb[104].mxu0 %vm271_vm2, %v3162_v17  ;;  %v3104_v48 = vpop.xlane.xlu1 %3103  ;;  %v3660_v17 = vsel %vm1378_vm3, %v12217_v53, 0 }
 0x61b   :  { %10025 = vmatpush3.bf16.msra.mxu0 %v3468_v23  ;;  %10775 = vrcp.f32 %v3104_v48  ;;  %4950 = vrot.lane.b32.xlu1 %v11315_v11, %s11140_s19  ;;  %v3161_v41 = vpack.c.bf16 %v3145_v55, %v3145_v55 }
 0x61c   :  { %4700 = vrot.lane.b32.xlu0 %v11295_v2, %s11140_s19  ;;  %10026 = vmatprep.mubr.msk.bf16.mxu0 %vm11133_vm1, %v14179_v38 }
 0x61d   :  { %v10772_v25 = vpop.eup %10771  ;;  %10009 = vmatmul.mubr.msk.bf16.vlgmr.msra.gmra.mrb[116].mxu1 %vm271_vm2, %v3161_v41  ;;  %v3101_v27 = vpop.xlane.xlu0 %3100  ;;  %10036 = vmatprep.subr.bf16.mxu0 %v14179_v38 }
 0x61e   :  { %10019 = vmatpush3.bf16.msra.mxu1 %v3420_v39  ;;  %10777 = vrcp.f32 %v3101_v27  ;;  %v3148_v34 = vmul.f32 %v10772_v25, %v12150_v20  ;;  %10020 = vmatprep.mubr.msk.bf16.mxu1 %vm11133_vm1, %v14179_v38  ;;  %v3708_v27 = vsel %vm1378_vm3, %v12223_v26, 0 }
 0x61f   :  { %4948 = vrot.lane.b32.xlu1 %v11315_v11, %s11139_s18  ;;  %10030 = vmatprep.subr.bf16.mxu1 %v14179_v38 }
 0x620   :  { %v10774_v33 = vpop.eup %10773  ;;  %4698 = vrot.lane.b32.xlu0 %v11295_v2, %s11139_s18  ;;  %v3164_v3 = vpack.c.bf16 %v3148_v34, %v3148_v34 }
 0x621   :  { %v3147_v0 = vmul.f32 %v10774_v33, %v12155_v52 }
 0x622   :  { %10027 = vmatmul.mubr.msk.bf16.vlgmr.msra.gmra.mrb[108].mxu0 %vm271_vm2, %v3164_v3  ;;  %v3110_v20 = vpop.xlane.xlu1 %3109 }
 0x623   :  { %10037 = vmatpush3.bf16.msra.mxu0 %v3564_v28  ;;  %10779 = vrcp.f32 %v3110_v20  ;;  %5222 = vrot.lane.b32.xlu1 %v11261_v40, %s11141_s30  ;;  %v3163_v15 = vpack.c.bf16 %v3147_v0, %v3147_v0 }
 0x624   :  { %4800 = vrot.lane.b32.xlu0 %v11303_v7, %s11140_s19  ;;  %10038 = vmatprep.mubr.msk.bf16.mxu0 %vm11133_vm1, %v14179_v38 }
 0x625   :  { %v10776_v52 = vpop.eup %10775  ;;  %10021 = vmatmul.mubr.msk.bf16.vlgmr.msra.gmra.mrb[120].mxu1 %vm271_vm2, %v3163_v15  ;;  %v3107_v50 = vpop.xlane.xlu0 %3106  ;;  %10048 = vmatprep.subr.bf16.mxu0 %v14179_v38 }
 0x626   :  { %10031 = vmatpush3.bf16.msra.mxu1 %v3516_v62  ;;  %10781 = vrcp.f32 %v3107_v50  ;;  %v3150_v32 = vmul.f32 %v10776_v52, %v12160_v46  ;;  %10032 = vmatprep.mubr.msk.bf16.mxu1 %vm11133_vm1, %v14179_v38  ;;  %v3799_v33 = vpop.permute.xlu1 %3798 }
 0x627   :  { %5318 = vrot.lane.b32.xlu1 %v11259_v36, %s11141_s30  ;;  %10042 = vmatprep.subr.bf16.mxu1 %v14179_v38  ;;  %v3804_v26 = vsel %vm1378_vm3, %v3799_v33, 0 }
 0x628   :  { %v10778_v19 = vpop.eup %10777  ;;  %4798 = vrot.lane.b32.xlu0 %v11303_v7, %s11139_s18  ;;  %v3166_v6 = vpack.c.bf16 %v3150_v32, %v3150_v32 }
 0x629   :  { %v3149_v59 = vmul.f32 %v10778_v19, %v12164_v51  ;;  %v3612_v51 = vsel %vm1378_vm3, %v12237_v29, 0 }
 0x62a   :  { %10039 = vmatmul.mubr.msk.bf16.vlgmr.msra.gmra.mrb[112].mxu0 %vm271_vm2, %v3166_v6 }
 0x62b   :  { %10049 = vmatpush3.bf16.msra.mxu0 %v3660_v17  ;;  %5414 = vrot.lane.b32.xlu1 %v11275_v54, %s11141_s30  ;;  %v3165_v46 = vpack.c.bf16 %v3149_v59, %v3149_v59 }
 0x62c   :  { %4900 = vrot.lane.b32.xlu0 %v11311_v10, %s11140_s19  ;;  %10050 = vmatprep.mubr.msk.bf16.mxu0 %vm11133_vm1, %v14179_v38 }
 0x62d   :  { %v10780_v55 = vpop.eup %10779  ;;  %10033 = vmatmul.mubr.msk.bf16.vlgmr.msra.gmra.mrb[124].mxu1 %vm271_vm2, %v3165_v46  ;;  %v3113_v53 = vpop.xlane.xlu0 %3112  ;;  %10060 = vmatprep.subr.bf16.mxu0 %v14179_v38 }
 0x62e   :  { %10043 = vmatpush3.bf16.msra.mxu1 %v3612_v51  ;;  %10783 = vrcp.f32 %v3113_v53  ;;  %v3152_v23 = vmul.f32 %v10780_v55, %v12169_v56  ;;  %10044 = vmatprep.mubr.msk.bf16.mxu1 %vm11133_vm1, %v14179_v38  ;;  %v96_v55 = vld [vmem:[%s14160_s4 + $0x4] sm:$0xf] }
 0x62f   :  { %5510 = vrot.lane.b32.xlu1 %v11277_v57, %s11141_s30  ;;  %10054 = vmatprep.subr.bf16.mxu1 %v14179_v38 }
 0x630   :  { %v10782_v48 = vpop.eup %10781  ;;  %4898 = vrot.lane.b32.xlu0 %v11311_v10, %s11139_s18  ;;  %v3168_v29 = vpack.c.bf16 %v3152_v23, %v3152_v23 }
 0x631   :  { %v3751_v41 = vpop.permute.xlu0 %3750  ;;  %v3151_v25 = vmul.f32 %v10782_v48, %v12173_v31 }
 0x632   :  { %v3756_v39 = vsel %vm1378_vm3, %v3751_v41, 0  ;;  %10051 = vmatmul.mubr.msk.bf16.vlgmr.msra.gmra.mrb[116].mxu0 %vm271_vm2, %v3168_v29 }
 0x633   :  { %10061 = vmatpush3.bf16.msra.mxu0 %v3756_v39  ;;  %v3167_v56 = vpack.c.bf16 %v3151_v25, %v3151_v25  ;;  %10062 = vmatprep.mubr.msk.bf16.mxu0 %vm11133_vm1, %v14179_v38 }
 0x634   :  { %5270 = vrot.lane.b32.xlu0 %v11269_v43, %s11141_s30  ;;  %10072 = vmatprep.subr.bf16.mxu0 %v14179_v38 }
 0x635   :  { %10045 = vmatmul.mubr.msk.bf16.vlgmr.msra.gmra.mrb[128].mxu1 %vm271_vm2, %v3167_v56 }
 0x636   :  { %10055 = vmatpush3.bf16.msra.mxu1 %v3708_v27  ;;  %10056 = vmatprep.mubr.msk.bf16.mxu1 %vm11133_vm1, %v14179_v38 }
 0x637   :  { %10066 = vmatprep.subr.bf16.mxu1 %v14179_v38 }
 0x638   :  { %v10784_v31 = vpop.eup %10783  ;;  %5366 = vrot.lane.b32.xlu0 %v11267_v42, %s11141_s30 }
 0x639   :  { %v3153_v34 = vmul.f32 %v10784_v31, %v12177_v5 }
 0x63b   :  { %v3169_v3 = vpack.c.bf16 %v3153_v34, %v3153_v34 }
 0x63c   :  { %5462 = vrot.lane.b32.xlu0 %v11279_v58, %s11141_s30 }
 0x63d   :  { %10057 = vmatmul.mubr.msk.bf16.vlgmr.msra.gmra.mrb[132].mxu1 %vm271_vm2, %v3169_v3 }
 0x63e   :  { %10067 = vmatpush3.bf16.msra.mxu1 %v3804_v26  ;;  %10068 = vmatprep.mubr.msk.bf16.mxu1 %vm11133_vm1, %v14179_v38 }
 0x63f   :  { %10078 = vmatprep.subr.bf16.mxu1 %v14179_v38 }
 0x657   :  { %v3116_v0 = vpop.xlane.xlu1 %3115 }
 0x658   :  { %10785 = vrcp.f32 %v3116_v0 }
 0x65b   :  { %v3122_v28 = vpop.xlane.xlu1 %3121 }
 0x65c   :  { %10787 = vrcp.f32 %v3122_v28 }
 0x662   :  { %v10786_v5 = vpop.eup %10785  ;;  %v3119_v20 = vpop.xlane.xlu0 %3118 }
 0x663   :  { %10789 = vrcp.f32 %v3119_v20  ;;  %v3154_v15 = vmul.f32 %v10786_v5, %v12189_v49  ;;  %v3895_v49 = vpop.permute.xlu1 %3894 }
 0x664   :  { %v3900_v23 = vsel %vm1378_vm3, %v3895_v49, 0 }
 0x665   :  { %v3170_v52 = vpack.c.bf16 %v3154_v15, %v3154_v15 }
 0x666   :  { %v10788_v62 = vpop.eup %10787  ;;  %v3125_v50 = vpop.xlane.xlu0 %3124 }
 0x667   :  { %10791 = vrcp.f32 %v3125_v50  ;;  %10063 = vmatmul.mubr.msk.bf16.vlgmr.msra.gmra.mrb[120].mxu0 %vm271_vm2, %v3170_v52  ;;  %v3156_v32 = vmul.f32 %v10788_v62, %v12193_v16  ;;  %v3975_v16 = vsel %vm1378_vm3, %v96_v55, 0  ;;  %v4199_v25 = vpop.permute.xlu1 %4198 }
 0x668   :  { %10074 = vmatprep.mubr.msk.bf16.mxu0 %vm11133_vm1, %v14179_v38 }
 0x669   :  { %v3172_v17 = vpack.c.bf16 %v3156_v32, %v3156_v32 }
 0x66a   :  { %v3847_v19 = vpop.permute.xlu0 %3846 }
 0x66b   :  { %v3852_v6 = vsel %vm1378_vm3, %v3847_v19, 0  ;;  %v4249_v56 = vpop.permute.xlu1 %4248 }
 0x66c   :  { %10073 = vmatpush3.bf16.msra.mxu0 %v3852_v6 }
 0x66d   :  { %v10790_v59 = vpop.eup %10789  ;;  %10636 = vmatprep.subr.msk.bf16.mxu0 %vm1378_vm3, %v96_v55 }
 0x66e   :  { %v3155_v46 = vmul.f32 %v10790_v59, %v12197_v8  ;;  %v4201_v48 = vpop.permute.xlu0 %4200 }
 0x66f   :  { %10075 = vmatmul.mubr.msk.bf16.vlgmr.msra.gmra.mrb[124].mxu0 %vm271_vm2, %v3172_v17  ;;  %v4206_v41 = vsel %vm271_vm2, %v4201_v48, 0  ;;  %v4299_v31 = vpop.permute.xlu1 %4298 }
 0x670   :  { %v3171_v51 = vpack.c.bf16 %v3155_v46, %v3155_v46  ;;  %10085 = vmatpush3.bf16.msra.mxu0 %v3975_v16 }
 0x671   :  { %v10792_v53 = vpop.eup %10791 }
 0x672   :  { %10069 = vmatmul.mubr.msk.bf16.vlgmr.msra.gmra.mrb[136].mxu1 %vm271_vm2, %v3171_v51  ;;  %v3157_v8 = vmul.f32 %v10792_v53, %v12201_v18  ;;  %v4251_v39 = vpop.permute.xlu0 %4250 }
 0x673   :  { %10079 = vmatpush3.bf16.msra.mxu1 %v3900_v23  ;;  %10080 = vmatprep.mubr.msk.bf16.mxu1 %vm11133_vm1, %v14179_v38  ;;  %v4256_v27 = vsel %vm271_vm2, %v4251_v39, 0  ;;  %v4349_v3 = vpop.permute.xlu1 %4348 }
 0x674   :  { %10120 = vmatprep.subr.bf16.mxu1 %v14179_v38  ;;  %v3173_v29 = vpack.c.bf16 %v3157_v8, %v3157_v8 }
 0x676   :  { %v4301_v18 = vpop.permute.xlu0 %4300 }
 0x677   :  { %v4306_v33 = vsel %vm271_vm2, %v4301_v18, 0  ;;  %v4399_v28 = vpop.permute.xlu1 %4398  ;;  %v95_v18 = vld [vmem:[%s14160_s4] sm:$0xf] }
 0x678   :  { %10637 = vmatprep.subr.msk.bf16.mxu0 %vm1378_vm3, %v95_v18 }
 0x67a   :  { %10081 = vmatmul.mubr.msk.bf16.vlgmr.msra.gmra.mrb[140].mxu1 %vm271_vm2, %v3173_v29  ;;  %v4351_v34 = vpop.permute.xlu0 %4350 }
 0x67b   :  { %10122 = vmatprep.mubr.msk.bf16.mxu1 %vm11133_vm1, %v14179_v38  ;;  %v4356_v0 = vsel %vm271_vm2, %v4351_v34, 0  ;;  %v4449_v20 = vpop.permute.xlu1 %4448 }
 0x67c   :  { %10121 = vmatpush3.bf16.xpose.msra.mxu1 %v4206_v41 }
 0x67d   :  { %10126 = vmatprep.subr.bf16.mxu1 %v14179_v38 }
 0x67e   :  { %v4401_v26 = vpop.permute.xlu0 %4400 }
 0x67f   :  { %v4406_v15 = vsel %vm271_vm2, %v4401_v26, 0  ;;  %v4499_v62 = vpop.permute.xlu1 %4498 }
 0x682   :  { %v4451_v5 = vpop.permute.xlu0 %4450 }
 0x683   :  { %10123 = vmatmul.mubr.msk.bf16.vlgmr.msra.gmra.mrb[144].mxu1 %vm271_vm2, %v4199_v25  ;;  %v4456_v32 = vsel %vm271_vm2, %v4451_v5, 0  ;;  %v4549_v19 = vpop.permute.xlu1 %4548 }
 0x684   :  { %10127 = vmatpush3.bf16.xpose.msra.mxu1 %v4256_v27  ;;  %10128 = vmatprep.mubr.msk.bf16.mxu1 %vm11133_vm1, %v14179_v38 }
 0x685   :  { %10132 = vmatprep.subr.bf16.mxu1 %v14179_v38 }
 0x686   :  { %v4501_v52 = vpop.permute.xlu0 %4500 }
 0x687   :  { %v4506_v59 = vsel %vm271_vm2, %v4501_v52, 0  ;;  %v4651_v17 = vpop.permute.xlu1 %4650 }
 0x688   :  { %v4656_v23 = vsel %vm271_vm2, %v4651_v17, 0 }
 0x68a   :  { %v4551_v50 = vpop.permute.xlu0 %4550 }
 0x68b   :  { %10129 = vmatmul.mubr.msk.bf16.vlgmr.msra.gmra.mrb[148].mxu1 %vm271_vm2, %v4249_v56  ;;  %v4649_v49 = vpop.permute.xlu1 %4648  ;;  %v4556_v55 = vsel %vm271_vm2, %v4551_v50, 0 }
 0x68c   :  { %10133 = vmatpush3.bf16.xpose.msra.mxu1 %v4306_v33  ;;  %10134 = vmatprep.mubr.msk.bf16.mxu1 %vm11133_vm1, %v14179_v38 }
 0x68d   :  { %10138 = vmatprep.subr.bf16.mxu1 %v14179_v38 }
 0x68e   :  { %v12424_v6 = vpop.permute.xlu0 %4600 }
 0x68f   :  { %v4751_v53 = vpop.permute.xlu1 %4750 }
 0x690   :  { %v4756_v29 = vsel %vm271_vm2, %v4751_v53, 0 }
 0x692   :  { %v12431_v46 = vpop.permute.xlu0 %4598 }
 0x693   :  { %10135 = vmatmul.mubr.msk.bf16.vlgmr.msra.gmra.mrb[152].mxu1 %vm271_vm2, %v4299_v31  ;;  %v4749_v8 = vpop.permute.xlu1 %4748 }
 0x694   :  { %10139 = vmatpush3.bf16.xpose.msra.mxu1 %v4356_v0  ;;  %10140 = vmatprep.mubr.msk.bf16.mxu1 %vm11133_vm1, %v14179_v38 }
 0x695   :  { %10144 = vmatprep.subr.bf16.mxu1 %v14179_v38 }
 0x696   :  { %v12435_v51 = vpop.permute.xlu0 %4700 }
 0x697   :  { %v4851_v41 = vpop.permute.xlu1 %4850 }
 0x698   :  { %v4856_v56 = vsel %vm271_vm2, %v4851_v41, 0 }
 0x69a   :  { %v12440_v16 = vpop.permute.xlu0 %4698 }
 0x69b   :  { %10141 = vmatmul.mubr.msk.bf16.vlgmr.msra.gmra.mrb[156].mxu1 %vm271_vm2, %v4349_v3  ;;  %v4849_v39 = vpop.permute.xlu1 %4848 }
 0x69c   :  { %10145 = vmatpush3.bf16.xpose.msra.mxu1 %v4406_v15  ;;  %10146 = vmatprep.mubr.msk.bf16.mxu1 %vm11133_vm1, %v14179_v38 }
 0x69d   :  { %10150 = vmatprep.subr.bf16.mxu1 %v14179_v38 }
 0x69e   :  { %v12447_v48 = vpop.permute.xlu0 %4800 }
 0x69f   :  { %v4951_v31 = vpop.permute.xlu1 %4950 }
 0x6a0   :  { %v4956_v33 = vsel %vm271_vm2, %v4951_v31, 0  ;;  %v4099_v31 = vsel %vm1378_vm3, %v95_v18, 0 }
 0x6a2   :  { %v12454_v25 = vpop.permute.xlu0 %4798 }
 0x6a3   :  { %10147 = vmatmul.mubr.msk.bf16.vlgmr.msra.gmra.mrb[160].mxu1 %vm271_vm2, %v4399_v28  ;;  %v4949_v26 = vpop.permute.xlu1 %4948 }
 0x6a4   :  { %10151 = vmatpush3.bf16.xpose.msra.mxu1 %v4456_v32  ;;  %10152 = vmatprep.mubr.msk.bf16.mxu1 %vm11133_vm1, %v14179_v38 }
 0x6a5   :  { %10156 = vmatprep.subr.bf16.mxu1 %v14179_v38 }
 0x6a6   :  { %v12458_v27 = vpop.permute.xlu0 %4900 }
 0x6aa   :  { %v12467_v34 = vpop.permute.xlu0 %4898 }
 0x6ab   :  { %10153 = vmatmul.mubr.msk.bf16.vlgmr.msra.gmra.mrb[164].mxu1 %vm271_vm2, %v4449_v20 }
 0x6ac   :  { %10157 = vmatpush3.bf16.xpose.msra.mxu1 %v4506_v59  ;;  %10158 = vmatprep.mubr.msk.bf16.mxu1 %vm11133_vm1, %v14179_v38 }
 0x6ad   :  { %10162 = vmatprep.subr.bf16.mxu1 %v14179_v38 }
 0x6ae   :  { %v5271_v3 = vpop.permute.xlu0 %5270 }
 0x6af   :  { %v5276_v0 = vsel %vm1378_vm3, %v5271_v3, 0 }
 0x6b3   :  { %10159 = vmatmul.mubr.msk.bf16.vlgmr.msra.gmra.mrb[168].mxu1 %vm271_vm2, %v4499_v62 }
 0x6b4   :  { %10163 = vmatpush3.bf16.xpose.msra.mxu1 %v4556_v55  ;;  %10164 = vmatprep.mubr.msk.bf16.mxu1 %vm11133_vm1, %v14179_v38 }
 0x6b5   :  { %10174 = vmatprep.subr.bf16.mxu1 %v14179_v38 }
 0x6bb   :  { %10165 = vmatmul.mubr.msk.bf16.vlgmr.msra.gmra.mrb[172].mxu1 %vm271_vm2, %v4549_v19 }
 0x6bc   :  { %10175 = vmatpush3.bf16.xpose.msra.mxu1 %v4656_v23  ;;  %10176 = vmatprep.mubr.msk.bf16.mxu1 %vm11133_vm1, %v14179_v38 }
 0x6bd   :  { %10186 = vmatprep.subr.bf16.mxu1 %v14179_v38 }
 0x6c3   :  { %10177 = vmatmul.mubr.msk.bf16.vlgmr.msra.gmra.mrb[176].mxu1 %vm271_vm2, %v4649_v49 }
 0x6c4   :  { %10187 = vmatpush3.bf16.xpose.msra.mxu1 %v4756_v29  ;;  %10188 = vmatprep.mubr.msk.bf16.mxu1 %vm11133_vm1, %v14179_v38 }
 0x6c5   :  { %10198 = vmatprep.subr.bf16.mxu1 %v14179_v38 }
 0x6cb   :  { %10189 = vmatmul.mubr.msk.bf16.vlgmr.msra.gmra.mrb[180].mxu1 %vm271_vm2, %v4749_v8 }
 0x6cc   :  { %10199 = vmatpush3.bf16.xpose.msra.mxu1 %v4856_v56  ;;  %10200 = vmatprep.mubr.msk.bf16.mxu1 %vm11133_vm1, %v14179_v38 }
 0x6cd   :  { %10210 = vmatprep.subr.bf16.mxu1 %v14179_v38 }
 0x6d3   :  { %10201 = vmatmul.mubr.msk.bf16.vlgmr.msra.gmra.mrb[184].mxu1 %vm271_vm2, %v4849_v39 }
 0x6d4   :  { %10211 = vmatpush3.bf16.xpose.msra.mxu1 %v4956_v33  ;;  %10212 = vmatprep.mubr.msk.bf16.mxu1 %vm11133_vm1, %v14179_v38 }
 0x6d5   :  { %10222 = vmatprep.subr.bf16.mxu1 %v14179_v38 }
 0x6db   :  { %10213 = vmatmul.mubr.msk.bf16.vlgmr.msra.gmra.mrb[188].mxu1 %vm271_vm2, %v4949_v26 }
 0x6dc   :  { %10223 = vmatpush3.bf16.msra.mxu1 %v5276_v0  ;;  %10224 = vmatprep.mubr.msk.bf16.mxu1 %vm11133_vm1, %v14179_v38 }
 0x6dd   :  { %v3216_v28 = vpop.f32.mrb[96].mxu0  ;;  %10234 = vmatprep.subr.bf16.mxu1 %v14179_v38 }
 0x6de   :  { %v9992_v5 = vpop.f32.mrb[97].mxu0 }
 0x6df   :  { %v3219_v20 = vpop.f32.mrb[98].mxu0 }
 0x6e0   :  { %v9993_v15 = vpop.f32.mrb[99].mxu0 }
 0x6e5   :  { %v3312_v52 = vpop.f32.mrb[100].mxu0 }
 0x6e6   :  { %v10004_v62 = vpop.f32.mrb[101].mxu0 }
 0x6e7   :  { %v3315_v50 = vpop.f32.mrb[102].mxu0 }
 0x6e8   :  { %v3264_v32 = vpop.f32.mrb[112].mxu1  ;;  %v10005_v19 = vpop.f32.mrb[103].mxu0 }
 0x6e9   :  { %v3942_v59 = vpack.c.bf16 %v3264_v32, %v3216_v28  ;;  %v9998_v17 = vpop.f32.mrb[113].mxu1 }
 0x6ea   :  { %v3267_v49 = vpop.f32.mrb[114].mxu1 }
 0x6eb   :  { %v9999_v55 = vpop.f32.mrb[115].mxu1  ;;  %10086 = vmatprep.mubr.msk.bf16.mxu0 %vm271_vm2, %v3942_v59 }
 0x6ed   :  { %v3408_v53 = vpop.f32.mrb[104].mxu0 }
 0x6ee   :  { %v10016_v23 = vpop.f32.mrb[105].mxu0 }
 0x6ef   :  { %v3411_v8 = vpop.f32.mrb[106].mxu0 }
 0x6f0   :  { %v3360_v29 = vpop.f32.mrb[116].mxu1  ;;  %v10017_v41 = vpop.f32.mrb[107].mxu0 }
 0x6f1   :  { %v3943_v39 = vpack.c.bf16 %v3360_v29, %v3312_v52  ;;  %v10010_v56 = vpop.f32.mrb[117].mxu1 }
 0x6f2   :  { %v3363_v33 = vpop.f32.mrb[118].mxu1 }
 0x6f3   :  { %v10011_v3 = vpop.f32.mrb[119].mxu1  ;;  %10087 = vmatmul.mubr.msk.bf16.vlgmr.msra.gmra.mrb[128].mxu0 %vm271_vm2, %v3943_v39 }
 0x6f4   :  { %10103 = vmatpush3.bf16.msra.mxu0 %v4099_v31 }
 0x6f5   :  { %v3504_v26 = vpop.f32.mrb[108].mxu0  ;;  %10168 = vmatprep.subr.bf16.mxu0 %v14179_v38 }
 0x6f6   :  { %v10028_v0 = vpop.f32.mrb[109].mxu0 }
 0x6f7   :  { %v3507_v28 = vpop.f32.mrb[110].mxu0 }
 0x6f8   :  { %v3456_v5 = vpop.f32.mrb[120].mxu1  ;;  %v10029_v20 = vpop.f32.mrb[111].mxu0 }
 0x6f9   :  { %v3944_v15 = vpack.c.bf16 %v3456_v5, %v3408_v53  ;;  %v10022_v62 = vpop.f32.mrb[121].mxu1 }
 0x6fa   :  { %v3459_v50 = vpop.f32.mrb[122].mxu1 }
 0x6fb   :  { %v10023_v32 = vpop.f32.mrb[123].mxu1  ;;  %10090 = vmatprep.mubr.msk.bf16.mxu0 %vm271_vm2, %v3944_v15 }
 0x6fd   :  { %v3600_v52 = vpop.f32.mrb[112].mxu0 }
 0x6fe   :  { %v10040_v18 = vpop.f32.mrb[113].mxu0 }
 0x6ff   :  { %v3603_v19 = vpop.f32.mrb[114].mxu0 }
 0x700   :  { %v3552_v59 = vpop.f32.mrb[124].mxu1  ;;  %v10041_v17 = vpop.f32.mrb[115].mxu0 }
 0x701   :  { %v3945_v49 = vpack.c.bf16 %v3552_v59, %v3504_v26  ;;  %v10034_v55 = vpop.f32.mrb[125].mxu1 }
 0x702   :  { %v3555_v23 = vpop.f32.mrb[126].mxu1 }
 0x703   :  { %v10035_v8 = vpop.f32.mrb[127].mxu1  ;;  %10091 = vmatmul.mubr.msk.bf16.gmra.mrb[132].mxu0 %vm271_vm2, %v3945_v49 }
 0x705   :  { %v3696_v29 = vpop.f32.mrb[116].mxu0 }
 0x706   :  { %v10052_v41 = vpop.f32.mrb[117].mxu0 }
 0x707   :  { %v3699_v39 = vpop.f32.mrb[118].mxu0 }
 0x708   :  { %v3648_v53 = vpop.f32.mrb[128].mxu1  ;;  %v10053_v56 = vpop.f32.mrb[119].mxu0 }
 0x709   :  { %v3946_v31 = vpack.c.bf16 %v3648_v53, %v3600_v52  ;;  %v10046_v33 = vpop.f32.mrb[129].mxu1 }
 0x70a   :  { %v3651_v3 = vpop.f32.mrb[130].mxu1  ;;  %v14180_v33 = vpack.c.bf16 %v11943_v21, %v11941_v30  ;;  %v14182_v21 = vpack.c.bf16 %v11955_v12, %v11951_v35  ;;  %v11034_v35 = vld [vmem:[%s14157_s1 + $0x1] ss:$0 sm:$0xff] }
 0x70b   :  { %v10047_v0 = vpop.f32.mrb[131].mxu1  ;;  %10094 = vmatprep.mubr.msk.bf16.mxu0 %vm271_vm2, %v3946_v31 }
 0x710   :  { %v3744_v28 = vpop.f32.mrb[132].mxu1 }
 0x711   :  { %v3947_v5 = vpack.c.bf16 %v3744_v28, %v3696_v29  ;;  %v10058_v20 = vpop.f32.mrb[133].mxu1 }
 0x712   :  { %v3747_v26 = vpop.f32.mrb[134].mxu1 }
 0x713   :  { %v10059_v15 = vpop.f32.mrb[135].mxu1  ;;  %10095 = vmatmul.mubr.msk.bf16.gmra.mrb[136].mxu0 %vm271_vm2, %v3947_v5  ;;  %v4606_v5 = vsel %vm271_vm2, %v12424_v6, 0  ;;  %v14181_v26 = vpack.c.bf16 %v11949_v45, %v11947_v44 }
 0x714   :  { %v11033_v15 = vld [vmem:[%s14157_s1] ss:$0 sm:$0xff] }
 0x73a   :  { %v3792_v62 = vpop.f32.mrb[120].mxu0 }
 0x73b   :  { %v10064_v50 = vpop.f32.mrb[121].mxu0 }
 0x73c   :  { %v3795_v32 = vpop.f32.mrb[122].mxu0 }
 0x73d   :  { %v10065_v18 = vpop.f32.mrb[123].mxu0 }
 0x73e   :  { %v14183_v18 = vpack.c.bf16 %v11959_v47, %v11967_v37 }
 0x742   :  { %v3888_v19 = vpop.f32.mrb[124].mxu0 }
 0x743   :  { %v10076_v59 = vpop.f32.mrb[125].mxu0 }
 0x744   :  { %v3891_v17 = vpop.f32.mrb[126].mxu0  ;;  %v14184_v59 = vpack.c.bf16 %v11961_v13, %v11971_v22 }
 0x745   :  { %v3840_v52 = vpop.f32.mrb[136].mxu1  ;;  %v10077_v49 = vpop.f32.mrb[127].mxu0 }
 0x746   :  { %v3948_v55 = vpack.c.bf16 %v3840_v52, %v3792_v62  ;;  %v10070_v23 = vpop.f32.mrb[137].mxu1 }
 0x747   :  { %v3843_v8 = vpop.f32.mrb[138].mxu1  ;;  %v11035_v23 = vld [vmem:[%s14157_s1 + $0x2] ss:$0 sm:$0xff] }
 0x748   :  { %v10071_v41 = vpop.f32.mrb[139].mxu1  ;;  %10098 = vmatprep.mubr.msk.bf16.mxu0 %vm271_vm2, %v3948_v55  ;;  %v14185_v55 = vpack.c.bf16 %v11963_v24, %v11975_v14  ;;  %v14186_v8 = vld [vmem:[#allocation8_spill] sm:$0xff] }
 0x749   :  { %v14187_v41 = vpack.c.bf16 %v11965_v61, %v14186_v8 }
 0x74d   :  { %v3936_v29 = vpop.f32.mrb[140].mxu1 }
 0x74e   :  { %v3949_v39 = vpack.c.bf16 %v3936_v29, %v3888_v19  ;;  %v10082_v53 = vpop.f32.mrb[141].mxu1 }
 0x74f   :  { %v3939_v56 = vpop.f32.mrb[142].mxu1 }
 0x750   :  { %v10083_v31 = vpop.f32.mrb[143].mxu1  ;;  %10099 = vmatmul.mubr.msk.bf16.gmra.mrb[140].mxu0 %vm271_vm2, %v3949_v39  ;;  %v14188_v56 = vld [vmem:[#allocation10_spill] sm:$0xff] }
 0x751   :  { %10104 = vmatprep.mubr.msk.bf16.mxu0 %vm271_vm2, %v14180_v33  ;;  %v14189_v31 = vld [vmem:[#allocation9_spill] sm:$0xff] }
 0x752   :  { %v14190_v33 = vpack.c.bf16 %v14188_v56, %v14189_v31 }
 0x756   :  { %v4242_v3 = vpop.f32.mrb[144].mxu1 }
 0x757   :  { %v4998_v0 = vmul.f32 0.35355338, %v4242_v3  ;;  %v10124_v28 = vpop.f32.mrb[145].mxu1  ;;  %v11036_v3 = vld [vmem:[%s14157_s1 + $0x3] ss:$0 sm:$0xff] }
 0x758   :  { %v4245_v20 = vpop.f32.mrb[146].mxu1  ;;  %10105 = vmatmul.mubr.msk.bf16.vlgmr.msra.gmra.mrb[128].mxu0 %vm271_vm2, %v14181_v26 }
 0x759   :  { %v12502_v62 = vadd.f32 %v11033_v15, %v4998_v0  ;;  %v10125_v30 = vpop.f32.mrb[147].mxu1  ;;  %10169 = vmatpush3.bf16.xpose.msra.mxu0 %v4606_v5  ;;  %10108 = vmatprep.mubr.msk.bf16.mxu0 %vm271_vm2, %v14182_v21  ;;  %v4706_v15 = vsel %vm271_vm2, %v12435_v51, 0  ;;  %v11037_v21 = vld [vmem:[%s14157_s1 + $0x4] ss:$0 sm:$0xff] }
 0x75a   :  { %10180 = vmatprep.subr.bf16.mxu0 %v14179_v38 }
 0x75b   :  { %v5030_v44 = vsel %vm271_vm2, %v12502_v62, -inf }
 0x75c   :  { %5031 = vmax.xlane.f32.xlu0 %v5030_v44 }
 0x75e   :  { %v4292_v45 = vpop.f32.mrb[148].mxu1 }
 0x75f   :  { %v4999_v6 = vmul.f32 0.35355338, %v4292_v45  ;;  %v10130_v50 = vpop.f32.mrb[149].mxu1 }
 0x760   :  { %v4295_v32 = vpop.f32.mrb[150].mxu1  ;;  %10109 = vmatmul.mubr.msk.bf16.gmra.mrb[132].mxu0 %vm271_vm2, %v14183_v18 }
 0x761   :  { %v12518_v12 = vadd.f32 %v11034_v35, %v4999_v6  ;;  %v10131_v19 = vpop.f32.mrb[151].mxu1  ;;  %10112 = vmatprep.mubr.msk.bf16.mxu0 %vm271_vm2, %v14184_v59  ;;  %v4806_v32 = vsel %vm271_vm2, %v12447_v48, 0  ;;  %v11038_v35 = vld [vmem:[%s14157_s1 + $0x5] ss:$0 sm:$0xff] }
 0x763   :  { %v5033_v17 = vsel %vm271_vm2, %v12518_v12, -inf }
 0x764   :  { %5034 = vmax.xlane.f32.xlu1 %v5033_v17 }
 0x766   :  { %v4342_v52 = vpop.f32.mrb[152].mxu1 }
 0x767   :  { %v5000_v47 = vmul.f32 0.35355338, %v4342_v52  ;;  %v10136_v37 = vpop.f32.mrb[153].mxu1 }
 0x768   :  { %v4345_v49 = vpop.f32.mrb[154].mxu1  ;;  %10113 = vmatmul.mubr.msk.bf16.gmra.mrb[136].mxu0 %vm271_vm2, %v14185_v55 }
 0x769   :  { %v12533_v13 = vadd.f32 %v11035_v23, %v5000_v47  ;;  %v10137_v22 = vpop.f32.mrb[155].mxu1  ;;  %10116 = vmatprep.mubr.msk.bf16.mxu0 %vm271_vm2, %v14187_v41  ;;  %v4906_v47 = vsel %vm271_vm2, %v12458_v27, 0  ;;  %v11039_v49 = vld [vmem:[%s14157_s1 + $0x6] ss:$0 sm:$0xff] }
 0x76a   :  { %v5223_v22 = vpop.permute.xlu1 %5222 }
 0x76b   :  { %v5036_v29 = vsel %vm271_vm2, %v12533_v13, -inf }
 0x76c   :  { %5037 = vmax.xlane.f32.xlu0 %v5036_v29  ;;  %v5228_v29 = vsel %vm1378_vm3, %v5223_v22, 0 }
 0x76e   :  { %v4392_v39 = vpop.f32.mrb[156].mxu1 }
 0x76f   :  { %v5001_v24 = vmul.f32 0.35355338, %v4392_v39  ;;  %v10142_v14 = vpop.f32.mrb[157].mxu1 }
 0x770   :  { %v4395_v53 = vpop.f32.mrb[158].mxu1  ;;  %10117 = vmatmul.mubr.msk.bf16.gmra.mrb[140].mxu0 %vm271_vm2, %v14190_v33 }
 0x771   :  { %v12548_v61 = vadd.f32 %v11036_v3, %v5001_v24  ;;  %v10143_v0 = vpop.f32.mrb[159].mxu1  ;;  %10170 = vmatprep.mubr.msk.bf16.mxu0 %vm11133_vm1, %v14179_v38  ;;  %v11040_v24 = vld [vmem:[%s14157_s1 + $0x7] ss:$0 sm:$0xff] }
 0x772   :  { %v11041_v0 = vld [vmem:[%s14157_s1 + $0x9] ss:$0 sm:$0xff] }
 0x773   :  { %v5039_v28 = vsel %vm271_vm2, %v12548_v61, -inf }
 0x774   :  { %5040 = vmax.xlane.f32.xlu0 %v5039_v28 }
 0x776   :  { %v4442_v5 = vpop.f32.mrb[160].mxu1 }
 0x777   :  { %v5002_v20 = vmul.f32 0.35355338, %v4442_v5  ;;  %v10148_v26 = vpop.f32.mrb[161].mxu1 }
 0x778   :  { %v4445_v30 = vpop.f32.mrb[162].mxu1  ;;  %10171 = vmatmul.mubr.msk.bf16.vlgmr.msra.gmra.mrb[144].mxu0 %vm271_vm2, %v12431_v46 }
 0x779   :  { %v12561_v44 = vadd.f32 %v11037_v21, %v5002_v20  ;;  %v10149_v45 = vpop.f32.mrb[163].mxu1  ;;  %10181 = vmatpush3.bf16.xpose.msra.mxu0 %v4706_v15  ;;  %10182 = vmatprep.mubr.msk.bf16.mxu0 %vm11133_vm1, %v14179_v38 }
 0x77a   :  { %10192 = vmatprep.subr.bf16.mxu0 %v14179_v38  ;;  %v11042_v45 = vld [vmem:[%s14157_s1 + $0xb] ss:$0 sm:$0xff] }
 0x77b   :  { %v5042_v51 = vsel %vm271_vm2, %v12561_v44, -inf }
 0x77c   :  { %5043 = vmax.xlane.f32.xlu1 %v5042_v51 }
 0x77e   :  { %v4492_v6 = vpop.f32.mrb[164].mxu1 }
 0x77f   :  { %v5003_v50 = vmul.f32 0.35355338, %v4492_v6  ;;  %v10154_v46 = vpop.f32.mrb[165].mxu1 }
 0x780   :  { %v4495_v18 = vpop.f32.mrb[166].mxu1  ;;  %10183 = vmatmul.mubr.msk.bf16.vlgmr.msra.gmra.mrb[148].mxu0 %vm271_vm2, %v12440_v16 }
 0x781   :  { %v12575_v19 = vadd.f32 %v11038_v35, %v5003_v50  ;;  %v10155_v59 = vpop.f32.mrb[167].mxu1  ;;  %10193 = vmatpush3.bf16.xpose.msra.mxu0 %v4806_v32  ;;  %10194 = vmatprep.mubr.msk.bf16.mxu0 %vm11133_vm1, %v14179_v38 }
 0x782   :  { %10204 = vmatprep.subr.bf16.mxu0 %v14179_v38 }
 0x783   :  { %v5045_v48 = vsel %vm271_vm2, %v12575_v19, -inf }
 0x784   :  { %5046 = vmax.xlane.f32.xlu0 %v5045_v48 }
 0x786   :  { %v4542_v17 = vpop.f32.mrb[168].mxu1 }
 0x787   :  { %v5004_v52 = vmul.f32 0.35355338, %v4542_v17  ;;  %v10160_v16 = vpop.f32.mrb[169].mxu1 }
 0x788   :  { %v4545_v37 = vpop.f32.mrb[170].mxu1  ;;  %10195 = vmatmul.mubr.msk.bf16.vlgmr.msra.gmra.mrb[152].mxu0 %vm271_vm2, %v12454_v25 }
 0x789   :  { %v12589_v55 = vadd.f32 %v11039_v49, %v5004_v52  ;;  %v10161_v23 = vpop.f32.mrb[171].mxu1  ;;  %10205 = vmatpush3.bf16.xpose.msra.mxu0 %v4906_v47  ;;  %10206 = vmatprep.mubr.msk.bf16.mxu0 %vm11133_vm1, %v14179_v38  ;;  %v11043_v47 = vld [vmem:[%s14157_s1 + $0xd] ss:$0 sm:$0xff] }
 0x78a   :  { %10216 = vmatprep.subr.bf16.mxu0 %v14179_v38  ;;  %v11044_v23 = vld [vmem:[%s14157_s1 + $0xf] ss:$0 sm:$0xff] }
 0x78b   :  { %v5048_v27 = vsel %vm271_vm2, %v12589_v55, -inf }
 0x78c   :  { %5049 = vmax.xlane.f32.xlu1 %v5048_v27 }
 0x78e   :  { %v4592_v8 = vpop.f32.mrb[172].mxu1 }
 0x78f   :  { %v5005_v25 = vmul.f32 0.35355338, %v4592_v8  ;;  %v10166_v41 = vpop.f32.mrb[173].mxu1 }
 0x790   :  { %v4595_v39 = vpop.f32.mrb[174].mxu1  ;;  %10207 = vmatmul.mubr.msk.bf16.vlgmr.msra.gmra.mrb[156].mxu0 %vm271_vm2, %v12467_v34  ;;  %v12643_v41 = vpop.permute.xlu1 %5318 }
 0x791   :  { %v12602_v14 = vadd.f32 %v11040_v24, %v5005_v25  ;;  %v10167_v53 = vpop.f32.mrb[175].mxu1  ;;  %10217 = vmatpush3.bf16.msra.mxu0 %v5228_v29  ;;  %10218 = vmatprep.mubr.msk.bf16.mxu0 %vm11133_vm1, %v14179_v38  ;;  %v12641_v25 = vpop.permute.xlu0 %5366 }
 0x792   :  { %10228 = vmatprep.subr.bf16.mxu0 %v14179_v38 }
 0x793   :  { %v5051_v56 = vsel %vm271_vm2, %v12602_v14, -inf }
 0x794   :  { %5052 = vmax.xlane.f32.xlu0 %v5051_v56  ;;  %v12647_v39 = vpop.permute.xlu1 %5414 }
 0x795   :  { %v12645_v29 = vpop.permute.xlu0 %5462 }
 0x796   :  { %v4692_v31 = vpop.f32.mrb[176].mxu1 }
 0x797   :  { %v5007_v33 = vmul.f32 0.35355338, %v4692_v31  ;;  %v10178_v34 = vpop.f32.mrb[177].mxu1 }
 0x798   :  { %v4695_v3 = vpop.f32.mrb[178].mxu1  ;;  %v12650_v31 = vpop.permute.xlu1 %5510 }
 0x799   :  { %v12612_v28 = vadd.f32 %v11041_v0, %v5007_v33  ;;  %v10179_v5 = vpop.f32.mrb[179].mxu1 }
 0x79b   :  { %v5057_v20 = vsel %vm271_vm2, %v12612_v28, -inf }
 0x79c   :  { %5058 = vmax.xlane.f32.xlu0 %v5057_v20 }
 0x79d   :  { %5606 = vrot.lane.b32.xlu1 %v11287_v63, %s11141_s30 }
 0x79e   :  { %v4792_v26 = vpop.f32.mrb[180].mxu1 }
 0x79f   :  { %v5009_v15 = vmul.f32 0.35355338, %v4792_v26  ;;  %v10190_v30 = vpop.f32.mrb[181].mxu1 }
 0x7a0   :  { %v4795_v21 = vpop.f32.mrb[182].mxu1 }
 0x7a1   :  { %v12621_v51 = vadd.f32 %v11042_v45, %v5009_v15  ;;  %v10191_v6 = vpop.f32.mrb[183].mxu1 }
 0x7a3   :  { %v5063_v50 = vsel %vm271_vm2, %v12621_v51, -inf }
 0x7a4   :  { %5064 = vmax.xlane.f32.xlu0 %v5063_v50 }
 0x7a6   :  { %v4892_v46 = vpop.f32.mrb[184].mxu1 }
 0x7a7   :  { %v10202_v32 = vpop.f32.mrb[185].mxu1  ;;  %v5011_v16 = vmul.f32 0.35355338, %v4892_v46 }
 0x7a8   :  { %v4895_v18 = vpop.f32.mrb[186].mxu1 }
 0x7a9   :  { %v10203_v35 = vpop.f32.mrb[187].mxu1  ;;  %v12630_v37 = vadd.f32 %v11043_v47, %v5011_v16 }
 0x7ab   :  { %v5069_v22 = vsel %vm271_vm2, %v12630_v37, -inf }
 0x7ae   :  { %v4992_v59 = vpop.f32.mrb[188].mxu1 }
 0x7af   :  { %v10214_v48 = vpop.f32.mrb[189].mxu1  ;;  %v5013_v49 = vmul.f32 0.35355338, %v4992_v59 }
 0x7b0   :  { %v4995_v17 = vpop.f32.mrb[190].mxu1 }
 0x7b1   :  { %v10215_v52 = vpop.f32.mrb[191].mxu1  ;;  %v12635_v27 = vadd.f32 %v11044_v23, %v5013_v49 }
 0x7b3   :  { %v5075_v8 = vsel %vm271_vm2, %v12635_v27, -inf }
 0x7ba   :  { %5558 = vrot.lane.b32.xlu0 %v11283_v60, %s11141_s30 }
 0x7d9   :  { %5070 = vmax.xlane.f32.xlu0 %v5069_v22 }
 0x7dd   :  { %5076 = vmax.xlane.f32.xlu0 %v5075_v8 }
 0x7e9   :  { %v5032_v24 = vpop.xlane.xlu0 %5031 }
 0x7ea   :  { %v5078_v53 = vsub.f32 %v12502_v62, %v5032_v24 }
 0x7ec   :  { %v5094_v56 = vmul.f32 1.442695, %v5078_v53 }
 0x7ee   :  { %10793 = vpow2.f32 %v5094_v56 }
 0x7f1   :  { %v5035_v33 = vpop.xlane.xlu1 %5034 }
 0x7f2   :  { %v5079_v34 = vsub.f32 %v12518_v12, %v5035_v33 }
 0x7f4   :  { %v5096_v3 = vmul.f32 1.442695, %v5079_v34 }
 0x7f6   :  { %10795 = vpow2.f32 %v5096_v3 }
 0x7f8   :  { %v12653_v0 = vpop.eup %10793 }
 0x7f9   :  { %v5038_v5 = vpop.xlane.xlu0 %5037  ;;  %v5126_v20 = vsel %vm271_vm2, %v12653_v0, 0.0 }
 0x7fa   :  { %v5080_v26 = vsub.f32 %v12533_v13, %v5038_v5  ;;  %5127 = vadd.xlane.f32.xlu1 %v5126_v20 }
 0x7fc   :  { %v5098_v15 = vmul.f32 1.442695, %v5080_v26 }
 0x7fe   :  { %10797 = vpow2.f32 %v5098_v15 }
 0x800   :  { %v12658_v62 = vpop.eup %10795 }
 0x801   :  { %v5041_v30 = vpop.xlane.xlu0 %5040  ;;  %v5129_v21 = vsel %vm271_vm2, %v12658_v62, 0.0 }
 0x802   :  { %v5081_v12 = vsub.f32 %v12548_v61, %v5041_v30  ;;  %5130 = vadd.xlane.f32.xlu0 %v5129_v21 }
 0x804   :  { %v5100_v45 = vmul.f32 1.442695, %v5081_v12 }
 0x806   :  { %10799 = vpow2.f32 %v5100_v45 }
 0x808   :  { %v12663_v6 = vpop.eup %10797 }
 0x809   :  { %v5044_v50 = vpop.xlane.xlu1 %5043  ;;  %v5132_v13 = vsel %vm271_vm2, %v12663_v6, 0.0 }
 0x80a   :  { %v5082_v46 = vsub.f32 %v12561_v44, %v5044_v50  ;;  %5133 = vadd.xlane.f32.xlu1 %v5132_v13 }
 0x80c   :  { %v5102_v32 = vmul.f32 1.442695, %v5082_v46 }
 0x80e   :  { %10801 = vpow2.f32 %v5102_v32  ;;  %v11045_v32 = vld [vmem:[%s14157_s1 + $0x8] ss:$0 sm:$0xff] }
 0x810   :  { %v12668_v18 = vpop.eup %10799 }
 0x811   :  { %v5047_v35 = vpop.xlane.xlu0 %5046  ;;  %v5135_v61 = vsel %vm271_vm2, %v12668_v18, 0.0 }
 0x812   :  { %v5083_v59 = vsub.f32 %v12575_v19, %v5047_v35  ;;  %5136 = vadd.xlane.f32.xlu0 %v5135_v61 }
 0x814   :  { %v5104_v48 = vmul.f32 1.442695, %v5083_v59 }
 0x816   :  { %10803 = vpow2.f32 %v5104_v48 }
 0x818   :  { %v12673_v17 = vpop.eup %10801 }
 0x819   :  { %v5050_v52 = vpop.xlane.xlu1 %5049  ;;  %v5138_v44 = vsel %vm271_vm2, %v12673_v17, 0.0 }
 0x81a   :  { %v5084_v16 = vsub.f32 %v12589_v55, %v5050_v52  ;;  %5139 = vadd.xlane.f32.xlu1 %v5138_v44 }
 0x81c   :  { %v5106_v47 = vmul.f32 1.442695, %v5084_v16 }
 0x81e   :  { %10805 = vpow2.f32 %v5106_v47 }
 0x820   :  { %v12678_v49 = vpop.eup %10803 }
 0x821   :  { %v5053_v23 = vpop.xlane.xlu0 %5052  ;;  %v5141_v19 = vsel %vm271_vm2, %v12678_v49, 0.0 }
 0x822   :  { %v5085_v22 = vsub.f32 %v12602_v14, %v5053_v23  ;;  %5142 = vadd.xlane.f32.xlu0 %v5141_v19  ;;  %v11047_v19 = vld [vmem:[%s14157_s1 + $0xc] ss:$0 sm:$0xff] }
 0x824   :  { %v5108_v8 = vmul.f32 1.442695, %v5085_v22 }
 0x826   :  { %10807 = vpow2.f32 %v5108_v8 }
 0x828   :  { %v12683_v24 = vpop.eup %10805 }
 0x829   :  { %v5144_v53 = vsel %vm271_vm2, %v12683_v24, 0.0  ;;  %v5059_v3 = vpop.xlane.xlu0 %5058 }
 0x82a   :  { %5145 = vadd.xlane.f32.xlu1 %v5144_v53  ;;  %v5087_v20 = vsub.f32 %v12612_v28, %v5059_v3  ;;  %v11048_v3 = vld [vmem:[%s14157_s1 + $0xe] ss:$0 sm:$0xff] }
 0x82c   :  { %v5112_v21 = vmul.f32 1.442695, %v5087_v20 }
 0x82e   :  { %10809 = vpow2.f32 %v5112_v21 }
 0x830   :  { %v12687_v55 = vpop.eup %10807 }
 0x831   :  { %v5147_v56 = vsel %vm271_vm2, %v12687_v55, 0.0  ;;  %v5065_v26 = vpop.xlane.xlu0 %5064 }
 0x832   :  { %5148 = vadd.xlane.f32.xlu0 %v5147_v56  ;;  %v5089_v12 = vsub.f32 %v12621_v51, %v5065_v26  ;;  %v11046_v51 = vld [vmem:[%s14157_s1 + $0xa] ss:$0 sm:$0xff] }
 0x834   :  { %v5116_v46 = vmul.f32 1.442695, %v5089_v12 }
 0x835   :  { %v12709_v23 = vpop.permute.xlu0 %5558 }
 0x836   :  { %10811 = vpow2.f32 %v5116_v46 }
 0x838   :  { %v12718_v53 = vpop.eup %10809 }
 0x83b   :  { %5702 = vrot.lane.b32.xlu1 %v11295_v2, %s11141_s30 }
 0x840   :  { %v12729_v21 = vpop.eup %10811 }
 0x841   :  { %v5159_v46 = vsel %vm271_vm2, %v12729_v21, 0.0 }
 0x848   :  { %5654 = vrot.lane.b32.xlu0 %v11291_v1, %s11141_s30 }
 0x84b   :  { %v4642_v14 = vpop.f32.mrb[144].mxu0 }
 0x84c   :  { %v10172_v33 = vpop.f32.mrb[145].mxu0  ;;  %v5006_v50 = vmul.f32 0.35355338, %v4642_v14 }
 0x84d   :  { %v4645_v34 = vpop.f32.mrb[146].mxu0 }
 0x84e   :  { %v10173_v5 = vpop.f32.mrb[147].mxu0  ;;  %v12700_v35 = vadd.f32 %v11045_v32, %v5006_v50 }
 0x850   :  { %v5054_v47 = vsel %vm271_vm2, %v12700_v35, -inf }
 0x853   :  { %v4742_v15 = vpop.f32.mrb[148].mxu0 }
 0x854   :  { %v10184_v30 = vpop.f32.mrb[149].mxu0  ;;  %v5008_v61 = vmul.f32 0.35355338, %v4742_v15 }
 0x855   :  { %v4745_v45 = vpop.f32.mrb[150].mxu0  ;;  %v5153_v30 = vsel %vm271_vm2, %v12718_v53, 0.0 }
 0x856   :  { %v10185_v13 = vpop.f32.mrb[151].mxu0  ;;  %v12705_v52 = vadd.f32 %v11046_v51, %v5008_v61 }
 0x858   :  { %v5060_v8 = vsel %vm271_vm2, %v12705_v52, -inf }
 0x85b   :  { %v4842_v59 = vpop.f32.mrb[152].mxu0 }
 0x85c   :  { %v10196_v28 = vpop.f32.mrb[153].mxu0  ;;  %v5010_v44 = vmul.f32 0.35355338, %v4842_v59 }
 0x85d   :  { %v4845_v48 = vpop.f32.mrb[154].mxu0 }
 0x85e   :  { %v10197_v16 = vpop.f32.mrb[155].mxu0  ;;  %v12714_v22 = vadd.f32 %v11047_v19, %v5010_v44 }
 0x85f   :  { %5055 = vmax.xlane.f32.xlu1 %v5054_v47 }
 0x860   :  { %v5066_v15 = vsel %vm271_vm2, %v12714_v22, -inf }
 0x863   :  { %5061 = vmax.xlane.f32.xlu1 %v5060_v8  ;;  %v4942_v56 = vpop.f32.mrb[156].mxu0  ;;  %v5324_v8 = vsel %vm1378_vm3, %v12643_v41, 0 }
 0x864   :  { %v5012_v14 = vmul.f32 0.35355338, %v4942_v56  ;;  %v10208_v33 = vpop.f32.mrb[157].mxu0 }
 0x865   :  { %v4945_v34 = vpop.f32.mrb[158].mxu0  ;;  %v5372_v33 = vsel %vm1378_vm3, %v12641_v25, 0 }
 0x866   :  { %v12723_v5 = vadd.f32 %v11048_v3, %v5012_v14  ;;  %v5071_v20 = vpop.xlane.xlu0 %5070  ;;  %v10209_v26 = vpop.f32.mrb[159].mxu0 }
 0x867   :  { %v5091_v12 = vsub.f32 %v12630_v37, %v5071_v20  ;;  %5067 = vmax.xlane.f32.xlu1 %v5066_v15  ;;  %5154 = vadd.xlane.f32.xlu0 %v5153_v30  ;;  %v5420_v20 = vsel %vm1378_vm3, %v12647_v39, 0  ;;  %v5468_v30 = vsel %vm1378_vm3, %v12645_v29, 0 }
 0x868   :  { %v5072_v45 = vsel %vm271_vm2, %v12723_v5, -inf }
 0x869   :  { %v5120_v50 = vmul.f32 1.442695, %v5091_v12 }
 0x86a   :  { %v5077_v13 = vpop.xlane.xlu0 %5076 }
 0x86b   :  { %10813 = vpow2.f32 %v5120_v50  ;;  %v5093_v32 = vsub.f32 %v12635_v27, %v5077_v13  ;;  %5073 = vmax.xlane.f32.xlu1 %v5072_v45  ;;  %5160 = vadd.xlane.f32.xlu0 %v5159_v46  ;;  %v12747_v27 = vpop.permute.xlu1 %5606  ;;  %v5516_v50 = vsel %vm1378_vm3, %v12650_v31, 0 }
 0x86d   :  { %v5124_v61 = vmul.f32 1.442695, %v5093_v32  ;;  %v5564_v32 = vsel %vm1378_vm3, %v12709_v23, 0 }
 0x86f   :  { %10815 = vpow2.f32 %v5124_v61 }
 0x875   :  { %v12737_v59 = vpop.eup %10813 }
 0x876   :  { %v5165_v37 = vsel %vm271_vm2, %v12737_v59, 0.0 }
 0x877   :  { %5166 = vadd.xlane.f32.xlu0 %v5165_v37 }
 0x879   :  { %v12741_v28 = vpop.eup %10815 }
 0x87a   :  { %v5171_v48 = vsel %vm271_vm2, %v12741_v28, 0.0 }
 0x87b   :  { %5172 = vadd.xlane.f32.xlu0 %v5171_v48  ;;  %v5612_v48 = vsel %vm1378_vm3, %v12747_v27, 0 }
 0x87c   :  { %5750 = vrot.lane.b32.xlu1 %v11299_v4, %s11141_s30 }
 0x887   :  { %v5128_v51 = vpop.xlane.xlu1 %5127 }
 0x888   :  { %10817 = vrcp.f32 %v5128_v51 }
 0x88f   :  { %v5131_v44 = vpop.xlane.xlu0 %5130 }
 0x890   :  { %10819 = vrcp.f32 %v5131_v44 }
 0x891   :  { %5798 = vrot.lane.b32.xlu0 %v11303_v7, %s11141_s30 }
 0x892   :  { %v10818_v16 = vpop.eup %10817 }
 0x893   :  { %v5190_v47 = vmul.f32 %v10818_v16, %v12653_v0 }
 0x895   :  { %5894 = vrot.lane.b32.xlu0 %v11311_v10, %s11141_s30  ;;  %v5206_v19 = vpack.c.bf16 %v5190_v47, %v5190_v47 }
 0x897   :  { %10219 = vmatmul.mubr.msk.bf16.vlgmr.msra.gmra.mrb[160].mxu0 %vm271_vm2, %v5206_v19  ;;  %v5134_v56 = vpop.xlane.xlu1 %5133 }
 0x898   :  { %10229 = vmatpush3.bf16.msra.mxu0 %v5324_v8  ;;  %10821 = vrcp.f32 %v5134_v56  ;;  %10230 = vmatprep.mubr.msk.bf16.mxu0 %vm11133_vm1, %v14179_v38 }
 0x899   :  { %6140 = vrot.lane.b32.xlu0 %v11261_v40, %s11142_s26  ;;  %10240 = vmatprep.subr.bf16.mxu0 %v14179_v38 }
 0x89a   :  { %v10820_v0 = vpop.eup %10819 }
 0x89b   :  { %v5191_v14 = vmul.f32 %v10820_v0, %v12658_v62 }
 0x89d   :  { %6190 = vrot.lane.b32.xlu0 %v11269_v43, %s11142_s26  ;;  %v5207_v41 = vpack.c.bf16 %v5191_v14, %v5191_v14 }
 0x89f   :  { %10225 = vmatmul.mubr.msk.bf16.vlgmr.msra.gmra.mrb[192].mxu1 %vm271_vm2, %v5207_v41  ;;  %v5137_v34 = vpop.xlane.xlu0 %5136 }
 0x8a0   :  { %10235 = vmatpush3.bf16.msra.mxu1 %v5372_v33  ;;  %10823 = vrcp.f32 %v5137_v34  ;;  %10236 = vmatprep.mubr.msk.bf16.mxu1 %vm11133_vm1, %v14179_v38 }
 0x8a1   :  { %6240 = vrot.lane.b32.xlu0 %v11259_v36, %s11142_s26  ;;  %10246 = vmatprep.subr.bf16.mxu1 %v14179_v38 }
 0x8a2   :  { %v10822_v62 = vpop.eup %10821 }
 0x8a3   :  { %v5192_v3 = vmul.f32 %v10822_v62, %v12663_v6 }
 0x8a5   :  { %6290 = vrot.lane.b32.xlu0 %v11267_v42, %s11142_s26  ;;  %v5208_v25 = vpack.c.bf16 %v5192_v3, %v5192_v3 }
 0x8a7   :  { %10231 = vmatmul.mubr.msk.bf16.vlgmr.msra.gmra.mrb[164].mxu0 %vm271_vm2, %v5208_v25  ;;  %v5140_v26 = vpop.xlane.xlu1 %5139 }
 0x8a8   :  { %10241 = vmatpush3.bf16.msra.mxu0 %v5420_v20  ;;  %10825 = vrcp.f32 %v5140_v26  ;;  %10242 = vmatprep.mubr.msk.bf16.mxu0 %vm11133_vm1, %v14179_v38 }
 0x8a9   :  { %6340 = vrot.lane.b32.xlu0 %v11275_v54, %s11142_s26  ;;  %10252 = vmatprep.subr.bf16.mxu0 %v14179_v38 }
 0x8aa   :  { %v10824_v6 = vpop.eup %10823 }
 0x8ab   :  { %v5193_v15 = vmul.f32 %v10824_v6, %v12668_v18 }
 0x8ad   :  { %6338 = vrot.lane.b32.xlu0 %v11275_v54, %s11143_s27  ;;  %v5209_v39 = vpack.c.bf16 %v5193_v15, %v5193_v15 }
 0x8af   :  { %10237 = vmatmul.mubr.msk.bf16.vlgmr.msra.gmra.mrb[196].mxu1 %vm271_vm2, %v5209_v39  ;;  %v5143_v12 = vpop.xlane.xlu0 %5142 }
 0x8b0   :  { %10247 = vmatpush3.bf16.msra.mxu1 %v5468_v30  ;;  %10827 = vrcp.f32 %v5143_v12  ;;  %10248 = vmatprep.mubr.msk.bf16.mxu1 %vm11133_vm1, %v14179_v38 }
 0x8b1   :  { %6440 = vrot.lane.b32.xlu0 %v11277_v57, %s11142_s26  ;;  %10258 = vmatprep.subr.bf16.mxu1 %v14179_v38 }
 0x8b2   :  { %v10826_v18 = vpop.eup %10825 }
 0x8b3   :  { %v5194_v45 = vmul.f32 %v10826_v18, %v12673_v17 }
 0x8b5   :  { %6438 = vrot.lane.b32.xlu0 %v11277_v57, %s11143_s27  ;;  %v5210_v29 = vpack.c.bf16 %v5194_v45, %v5194_v45 }
 0x8b7   :  { %10243 = vmatmul.mubr.msk.bf16.vlgmr.msra.gmra.mrb[168].mxu0 %vm271_vm2, %v5210_v29  ;;  %v5146_v13 = vpop.xlane.xlu1 %5145 }
 0x8b8   :  { %10253 = vmatpush3.bf16.msra.mxu0 %v5516_v50  ;;  %10829 = vrcp.f32 %v5146_v13  ;;  %10254 = vmatprep.mubr.msk.bf16.mxu0 %vm11133_vm1, %v14179_v38 }
 0x8b9   :  { %6540 = vrot.lane.b32.xlu0 %v11287_v63, %s11142_s26  ;;  %10264 = vmatprep.subr.bf16.mxu0 %v14179_v38 }
 0x8ba   :  { %v10828_v17 = vpop.eup %10827 }
 0x8bb   :  { %v5195_v46 = vmul.f32 %v10828_v17, %v12678_v49 }
 0x8bd   :  { %6538 = vrot.lane.b32.xlu0 %v11287_v63, %s11143_s27  ;;  %v5211_v31 = vpack.c.bf16 %v5195_v46, %v5195_v46 }
 0x8bf   :  { %10249 = vmatmul.mubr.msk.bf16.vlgmr.msra.gmra.mrb[200].mxu1 %vm271_vm2, %v5211_v31  ;;  %v5149_v61 = vpop.xlane.xlu0 %5148 }
 0x8c0   :  { %10259 = vmatpush3.bf16.msra.mxu1 %v5564_v32  ;;  %10831 = vrcp.f32 %v5149_v61  ;;  %10260 = vmatprep.mubr.msk.bf16.mxu1 %vm11133_vm1, %v14179_v38 }
 0x8c1   :  { %6640 = vrot.lane.b32.xlu0 %v11295_v2, %s11142_s26  ;;  %10270 = vmatprep.subr.bf16.mxu1 %v14179_v38 }
 0x8c2   :  { %v10830_v49 = vpop.eup %10829 }
 0x8c3   :  { %v5196_v37 = vmul.f32 %v10830_v49, %v12683_v24  ;;  %v5655_v44 = vpop.permute.xlu0 %5654 }
 0x8c4   :  { %v5660_v27 = vsel %vm1378_vm3, %v5655_v44, 0 }
 0x8c5   :  { %6638 = vrot.lane.b32.xlu0 %v11295_v2, %s11143_s27  ;;  %v5212_v23 = vpack.c.bf16 %v5196_v37, %v5196_v37 }
 0x8c7   :  { %10255 = vmatmul.mubr.msk.bf16.vlgmr.msra.gmra.mrb[172].mxu0 %vm271_vm2, %v5212_v23 }
 0x8c8   :  { %10265 = vmatpush3.bf16.msra.mxu0 %v5612_v48  ;;  %10266 = vmatprep.mubr.msk.bf16.mxu0 %vm11133_vm1, %v14179_v38 }
 0x8c9   :  { %6740 = vrot.lane.b32.xlu0 %v11303_v7, %s11142_s26  ;;  %10276 = vmatprep.subr.bf16.mxu0 %v14179_v38 }
 0x8ca   :  { %v10832_v51 = vpop.eup %10831 }
 0x8cb   :  { %v5197_v24 = vmul.f32 %v10832_v51, %v12687_v55  ;;  %v12846_v55 = vpop.permute.xlu1 %5702 }
 0x8cd   :  { %6738 = vrot.lane.b32.xlu0 %v11303_v7, %s11143_s27  ;;  %v5213_v16 = vpack.c.bf16 %v5197_v24, %v5197_v24 }
 0x8cf   :  { %10261 = vmatmul.mubr.msk.bf16.vlgmr.msra.gmra.mrb[204].mxu1 %vm271_vm2, %v5213_v16 }
 0x8d0   :  { %10271 = vmatpush3.bf16.msra.mxu1 %v5660_v27  ;;  %10272 = vmatprep.mubr.msk.bf16.mxu1 %vm11133_vm1, %v14179_v38 }
 0x8d1   :  { %6840 = vrot.lane.b32.xlu0 %v11311_v10, %s11142_s26  ;;  %10282 = vmatprep.subr.bf16.mxu1 %v14179_v38 }
 0x8d5   :  { %6838 = vrot.lane.b32.xlu0 %v11311_v10, %s11143_s27 }
 0x8d9   :  { %7210 = vrot.lane.b32.xlu0 %v11269_v43, %s11144_s28 }
 0x8dd   :  { %7306 = vrot.lane.b32.xlu0 %v11267_v42, %s11144_s28 }
 0x8e1   :  { %7402 = vrot.lane.b32.xlu0 %v11279_v58, %s11144_s28 }
 0x8ec   :  { %v5056_v47 = vpop.xlane.xlu1 %5055 }
 0x8ed   :  { %v5086_v19 = vsub.f32 %v12700_v35, %v5056_v47 }
 0x8ef   :  { %v5110_v8 = vmul.f32 1.442695, %v5086_v19 }
 0x8f0   :  { %v5062_v56 = vpop.xlane.xlu1 %5061 }
 0x8f1   :  { %10833 = vpow2.f32 %v5110_v8 }
 0x8f4   :  { %v5155_v0 = vpop.xlane.xlu0 %5154  ;;  %v5068_v14 = vpop.xlane.xlu1 %5067 }
 0x8f5   :  { %10835 = vrcp.f32 %v5155_v0  ;;  %v5090_v12 = vsub.f32 %v12714_v22, %v5068_v14 }
 0x8f7   :  { %v5118_v18 = vmul.f32 1.442695, %v5090_v12 }
 0x8f8   :  { %v5161_v41 = vpop.xlane.xlu0 %5160  ;;  %v5074_v34 = vpop.xlane.xlu1 %5073 }
 0x8f9   :  { %10837 = vrcp.f32 %v5161_v41 }
 0x8fb   :  { %v12849_v33 = vpop.eup %10833 }
 0x8fc   :  { %v5150_v62 = vsel %vm271_vm2, %v12849_v33, 0.0  ;;  %v5751_v20 = vpop.permute.xlu1 %5750 }
 0x8fd   :  { %5151 = vadd.xlane.f32.xlu1 %v5150_v62  ;;  %v5756_v6 = vsel %vm1378_vm3, %v5751_v20, 0 }
 0x8ff   :  { %v10836_v3 = vpop.eup %10835 }
 0x900   :  { %v5199_v25 = vmul.f32 %v10836_v3, %v12718_v53  ;;  %v5088_v53 = vsub.f32 %v12705_v52, %v5062_v56 }
 0x902   :  { %v5215_v35 = vpack.c.bf16 %v5199_v25, %v5199_v25  ;;  %v5114_v30 = vmul.f32 1.442695, %v5088_v53 }
 0x903   :  { %v10838_v26 = vpop.eup %10837 }
 0x904   :  { %10273 = vmatmul.mubr.msk.bf16.vlgmr.msra.gmra.mrb[208].mxu1 %vm271_vm2, %v5215_v35  ;;  %v5201_v15 = vmul.f32 %v10838_v26, %v12729_v21  ;;  %10839 = vpow2.f32 %v5114_v30  ;;  %v5092_v21 = vsub.f32 %v12723_v5, %v5074_v34  ;;  %v5167_v51 = vpop.xlane.xlu0 %5166  ;;  %v5708_v30 = vsel %vm1378_vm3, %v12846_v55, 0 }
 0x905   :  { %10283 = vmatpush3.bf16.msra.mxu1 %v5756_v6  ;;  %10284 = vmatprep.mubr.msk.bf16.mxu1 %vm11133_vm1, %v14179_v38  ;;  %10841 = vpow2.f32 %v5118_v18 }
 0x906   :  { %10294 = vmatprep.subr.bf16.mxu1 %v14179_v38  ;;  %v5217_v39 = vpack.c.bf16 %v5201_v15, %v5201_v15  ;;  %v5122_v45 = vmul.f32 1.442695, %v5092_v21 }
 0x908   :  { %10843 = vpow2.f32 %v5122_v45 }
 0x909   :  { %10845 = vrcp.f32 %v5167_v51 }
 0x90c   :  { %10285 = vmatmul.mubr.msk.bf16.vlgmr.msra.gmra.mrb[212].mxu1 %vm271_vm2, %v5217_v39 }
 0x90d   :  { %10296 = vmatprep.mubr.msk.bf16.mxu1 %vm11133_vm1, %v14179_v38 }
 0x90e   :  { %5846 = vrot.lane.b32.xlu1 %v11307_v9, %s11141_s30  ;;  %v12868_v29 = vpop.eup %10839 }
 0x90f   :  { %v5156_v50 = vsel %vm271_vm2, %v12868_v29, 0.0  ;;  %v12872_v13 = vpop.eup %10841 }
 0x910   :  { %v5162_v52 = vsel %vm271_vm2, %v12872_v13, 0.0 }
 0x912   :  { %v12876_v17 = vpop.eup %10843 }
 0x913   :  { %v5168_v22 = vsel %vm271_vm2, %v12876_v17, 0.0  ;;  %v10846_v8 = vpop.eup %10845 }
 0x914   :  { %v5203_v62 = vmul.f32 %v10846_v8, %v12737_v59 }
 0x916   :  { %v5219_v20 = vpack.c.bf16 %v5203_v62, %v5203_v62 }
 0x932   :  { %5157 = vadd.xlane.f32.xlu1 %v5156_v50 }
 0x936   :  { %5163 = vadd.xlane.f32.xlu1 %v5162_v52  ;;  %v5173_v52 = vpop.xlane.xlu0 %5172 }
 0x93a   :  { %5169 = vadd.xlane.f32.xlu1 %v5168_v22  ;;  %v5799_v22 = vpop.permute.xlu0 %5798 }
 0x94b   :  { %5942 = vrot.lane.b32.xlu1 %v11315_v11, %s11141_s30 }
 0x94f   :  { %6138 = vrot.lane.b32.xlu1 %v11261_v40, %s11143_s27 }
 0x953   :  { %6188 = vrot.lane.b32.xlu1 %v11269_v43, %s11143_s27 }
 0x957   :  { %6238 = vrot.lane.b32.xlu1 %v11259_v36, %s11143_s27 }
 0x95b   :  { %6288 = vrot.lane.b32.xlu1 %v11267_v42, %s11143_s27 }
 0x95f   :  { %6390 = vrot.lane.b32.xlu1 %v11279_v58, %s11142_s26 }
 0x963   :  { %6388 = vrot.lane.b32.xlu1 %v11279_v58, %s11143_s27 }
 0x967   :  { %6490 = vrot.lane.b32.xlu1 %v11283_v60, %s11142_s26 }
 0x96a   :  { %v12896_v5 = vpop.f32.mrb[160].mxu0 }
 0x96b   :  { %v10220_v46 = vpop.f32.mrb[161].mxu0  ;;  %6488 = vrot.lane.b32.xlu1 %v11283_v60, %s11143_s27 }
 0x96c   :  { %v5267_v43 = vpop.f32.mrb[162].mxu0  ;;  %v5895_v46 = vpop.permute.xlu0 %5894 }
 0x96d   :  { %v10221_v31 = vpop.f32.mrb[163].mxu0 }
 0x96f   :  { %6590 = vrot.lane.b32.xlu1 %v11291_v1, %s11142_s26 }
 0x970   :  { %v6141_v43 = vpop.permute.xlu0 %6140 }
 0x971   :  { %v6146_v62 = vsel %vm271_vm2, %v6141_v43, 0 }
 0x972   :  { %v12902_v42 = vpop.f32.mrb[192].mxu1 }
 0x973   :  { %v5990_v32 = vpack.c.bf16 %v12902_v42, %v12896_v5  ;;  %6588 = vrot.lane.b32.xlu1 %v11291_v1, %s11143_s27  ;;  %v10226_v58 = vpop.f32.mrb[193].mxu1 }
 0x974   :  { %v5315_v61 = vpop.f32.mrb[194].mxu1 }
 0x975   :  { %v10227_v49 = vpop.f32.mrb[195].mxu1 }
 0x976   :  { %v6191_v49 = vpop.permute.xlu0 %6190 }
 0x977   :  { %6690 = vrot.lane.b32.xlu1 %v11299_v4, %s11142_s26 }
 0x97a   :  { %v12910_v37 = vpop.f32.mrb[164].mxu0  ;;  %v6241_v8 = vpop.permute.xlu0 %6240 }
 0x97b   :  { %v10232_v23 = vpop.f32.mrb[165].mxu0  ;;  %6688 = vrot.lane.b32.xlu1 %v11299_v4, %s11143_s27  ;;  %v6246_v43 = vsel %vm271_vm2, %v6241_v8, 0 }
 0x97c   :  { %v5363_v48 = vpop.f32.mrb[166].mxu0 }
 0x97d   :  { %v10233_v24 = vpop.f32.mrb[167].mxu0 }
 0x97f   :  { %6790 = vrot.lane.b32.xlu1 %v11307_v9, %s11142_s26 }
 0x982   :  { %v12916_v44 = vpop.f32.mrb[196].mxu1 }
 0x983   :  { %v5991_v16 = vpack.c.bf16 %v12916_v44, %v12910_v37  ;;  %6788 = vrot.lane.b32.xlu1 %v11307_v9, %s11143_s27  ;;  %v10238_v27 = vpop.f32.mrb[197].mxu1 }
 0x984   :  { %v5411_v47 = vpop.f32.mrb[198].mxu1 }
 0x985   :  { %v10239_v19 = vpop.f32.mrb[199].mxu1 }
 0x987   :  { %6890 = vrot.lane.b32.xlu1 %v11315_v11, %s11142_s26 }
 0x98a   :  { %v12924_v56 = vpop.f32.mrb[168].mxu0  ;;  %v5152_v0 = vpop.xlane.xlu1 %5151 }
 0x98b   :  { %10847 = vrcp.f32 %v5152_v0  ;;  %v10244_v14 = vpop.f32.mrb[169].mxu0  ;;  %6888 = vrot.lane.b32.xlu1 %v11315_v11, %s11143_s27 }
 0x98c   :  { %v5459_v41 = vpop.f32.mrb[170].mxu0  ;;  %10849 = vrcp.f32 %v5173_v52  ;;  %v5804_v14 = vsel %vm1378_vm3, %v5799_v22, 0 }
 0x98d   :  { %v10245_v34 = vpop.f32.mrb[171].mxu0 }
 0x98e   :  { %v5847_v3 = vpop.permute.xlu1 %5846  ;;  %v6291_v34 = vpop.permute.xlu0 %6290 }
 0x98f   :  { %v5852_v25 = vsel %vm1378_vm3, %v5847_v3, 0  ;;  %7162 = vrot.lane.b32.xlu1 %v11261_v40, %s11144_s28 }
 0x990   :  { %10295 = vmatpush3.bf16.msra.mxu1 %v5852_v25 }
 0x991   :  { %10306 = vmatprep.subr.bf16.mxu1 %v14179_v38 }
 0x992   :  { %v12933_v35 = vpop.f32.mrb[200].mxu1 }
 0x993   :  { %v5992_v26 = vpack.c.bf16 %v12933_v35, %v12924_v56  ;;  %7258 = vrot.lane.b32.xlu1 %v11259_v36, %s11144_s28  ;;  %v10250_v6 = vpop.f32.mrb[201].mxu1  ;;  %10297 = vmatmul.mubr.msk.bf16.vlgmr.msra.gmra.mrb[216].mxu1 %vm271_vm2, %v5219_v20  ;;  %v97_v20 = vld [vmem:[%s14160_s4 + $0x8] sm:$0xf] }
 0x994   :  { %v5507_v59 = vpop.f32.mrb[202].mxu1  ;;  %10308 = vmatprep.mubr.msk.bf16.mxu1 %vm11133_vm1, %v14179_v38  ;;  %v5900_v6 = vsel %vm1378_vm3, %v5895_v46, 0 }
 0x995   :  { %v10848_v40 = vpop.eup %10847  ;;  %v10251_v15 = vpop.f32.mrb[203].mxu1 }
 0x996   :  { %v5198_v39 = vmul.f32 %v10848_v40, %v12849_v33  ;;  %v10850_v58 = vpop.eup %10849 }
 0x997   :  { %7354 = vrot.lane.b32.xlu1 %v11275_v54, %s11144_s28  ;;  %v5205_v48 = vmul.f32 %v10850_v58, %v12741_v28  ;;  %v6296_v58 = vsel %vm271_vm2, %v6291_v34, 0 }
 0x998   :  { %v5214_v53 = vpack.c.bf16 %v5198_v39, %v5198_v39  ;;  %v6341_v39 = vpop.permute.xlu0 %6340 }
 0x999   :  { %v5221_v0 = vpack.c.bf16 %v5205_v48, %v5205_v48  ;;  %v6346_v5 = vsel %vm271_vm2, %v6341_v39, 0 }
 0x99a   :  { %v12947_v12 = vpop.f32.mrb[172].mxu0  ;;  %10267 = vmatmul.mubr.msk.bf16.vlgmr.msra.gmra.mrb[176].mxu0 %vm271_vm2, %v5214_v53 }
 0x99b   :  { %10277 = vmatpush3.bf16.msra.mxu0 %v5708_v30  ;;  %v10256_v36 = vpop.f32.mrb[173].mxu0  ;;  %7450 = vrot.lane.b32.xlu1 %v11277_v57, %s11144_s28 }
 0x99c   :  { %v5555_v18 = vpop.f32.mrb[174].mxu0  ;;  %10278 = vmatprep.mubr.msk.bf16.mxu0 %vm11133_vm1, %v14179_v38  ;;  %10288 = vmatprep.subr.bf16.mxu0 %v14179_v38 }
 0x99d   :  { %v10257_v54 = vpop.f32.mrb[175].mxu0  ;;  %v6196_v18 = vsel %vm271_vm2, %v6191_v49, 0 }
 0x9a2   :  { %v12955_v33 = vpop.f32.mrb[204].mxu1 }
 0x9a3   :  { %v5993_v55 = vpack.c.bf16 %v12955_v33, %v12947_v12  ;;  %v10262_v21 = vpop.f32.mrb[205].mxu1 }
 0x9a4   :  { %v5603_v45 = vpop.f32.mrb[206].mxu1  ;;  %v6023_v21 = vsel %vm1378_vm3, %v97_v20, 0 }
 0x9a5   :  { %v10263_v50 = vpop.f32.mrb[207].mxu1 }
 0x9bf   :  { %v5158_v57 = vpop.xlane.xlu1 %5157 }
 0x9c0   :  { %10851 = vrcp.f32 %v5158_v57 }
 0x9c3   :  { %v5164_v31 = vpop.xlane.xlu1 %5163 }
 0x9c4   :  { %10853 = vrcp.f32 %v5164_v31 }
 0x9c7   :  { %v5170_v61 = vpop.xlane.xlu1 %5169 }
 0x9c8   :  { %10855 = vrcp.f32 %v5170_v61 }
 0x9ca   :  { %v10852_v23 = vpop.eup %10851 }
 0x9cb   :  { %v5943_v51 = vpop.permute.xlu1 %5942  ;;  %v5200_v24 = vmul.f32 %v10852_v23, %v12868_v29 }
 0x9cc   :  { %v5948_v27 = vsel %vm1378_vm3, %v5943_v51, 0 }
 0x9cd   :  { %10307 = vmatpush3.bf16.msra.mxu1 %v5948_v27  ;;  %v5216_v47 = vpack.c.bf16 %v5200_v24, %v5200_v24 }
 0x9ce   :  { %v10854_v19 = vpop.eup %10853  ;;  %10330 = vmatprep.subr.bf16.mxu1 %v14179_v38 }
 0x9cf   :  { %10279 = vmatmul.mubr.msk.bf16.vlgmr.msra.gmra.mrb[180].mxu0 %vm271_vm2, %v5216_v47  ;;  %v6139_v41 = vpop.permute.xlu1 %6138  ;;  %v5202_v28 = vmul.f32 %v10854_v19, %v12872_v13 }
 0x9d0   :  { %10289 = vmatpush3.bf16.msra.mxu0 %v5804_v14  ;;  %10309 = vmatmul.mubr.msk.bf16.vlgmr.msra.gmra.mrb[220].mxu1 %vm271_vm2, %v5221_v0 }
 0x9d1   :  { %10290 = vmatprep.mubr.msk.bf16.mxu0 %vm11133_vm1, %v14179_v38  ;;  %10300 = vmatprep.subr.bf16.mxu0 %v14179_v38  ;;  %v5218_v3 = vpack.c.bf16 %v5202_v28, %v5202_v28 }
 0x9d2   :  { %10332 = vmatprep.mubr.msk.bf16.mxu1 %vm11133_vm1, %v14179_v38  ;;  %v10856_v25 = vpop.eup %10855 }
 0x9d3   :  { %v6189_v29 = vpop.permute.xlu1 %6188  ;;  %v5204_v15 = vmul.f32 %v10856_v25, %v12876_v17  ;;  %v12992_v17 = vpop.permute.xlu0 %6338 }
 0x9d5   :  { %v5220_v54 = vpack.c.bf16 %v5204_v15, %v5204_v15 }
 0x9d6   :  { %10331 = vmatpush3.bf16.xpose.msra.mxu1 %v6146_v62 }
 0x9d7   :  { %v6239_v59 = vpop.permute.xlu1 %6238  ;;  %10291 = vmatmul.mubr.msk.bf16.vlgmr.msra.gmra.mrb[184].mxu0 %vm271_vm2, %v5218_v3  ;;  %10336 = vmatprep.subr.bf16.mxu1 %v14179_v38  ;;  %v12979_v13 = vpop.f32.mrb[208].mxu1 }
 0x9d8   :  { %10301 = vmatpush3.bf16.msra.mxu0 %v5900_v6  ;;  %10302 = vmatprep.mubr.msk.bf16.mxu0 %vm11133_vm1, %v14179_v38  ;;  %v10274_v40 = vpop.f32.mrb[209].mxu1  ;;  %v13003_v31 = vpop.permute.xlu0 %6440 }
 0x9d9   :  { %10638 = vmatprep.subr.msk.bf16.mxu0 %vm1378_vm3, %v97_v20  ;;  %v5699_v53 = vpop.f32.mrb[210].mxu1 }
 0x9da   :  { %v10275_v30 = vpop.f32.mrb[211].mxu1 }
 0x9db   :  { %v6289_v36 = vpop.permute.xlu1 %6288 }
 0x9dd   :  { %10333 = vmatmul.mubr.msk.bf16.vlgmr.msra.gmra.mrb[224].mxu1 %vm271_vm2, %v6139_v41 }
 0x9de   :  { %10337 = vmatpush3.bf16.xpose.msra.mxu1 %v6196_v18  ;;  %10338 = vmatprep.mubr.msk.bf16.mxu1 %vm11133_vm1, %v14179_v38 }
 0x9df   :  { %v6391_v45 = vpop.permute.xlu1 %6390  ;;  %10303 = vmatmul.mubr.msk.bf16.vlgmr.msra.gmra.mrb[188].mxu0 %vm271_vm2, %v5220_v54  ;;  %10342 = vmatprep.subr.bf16.mxu1 %v14179_v38  ;;  %v12994_v50 = vpop.f32.mrb[212].mxu1 }
 0x9e0   :  { %10313 = vmatpush3.bf16.msra.mxu0 %v6023_v21  ;;  %10314 = vmatprep.mubr.msk.bf16.mxu0 %vm271_vm2, %v5990_v32  ;;  %v10286_v52 = vpop.f32.mrb[213].mxu1  ;;  %v13018_v32 = vpop.permute.xlu0 %6438 }
 0x9e1   :  { %10354 = vmatprep.subr.bf16.mxu0 %v14179_v38  ;;  %v5795_v22 = vpop.f32.mrb[214].mxu1 }
 0x9e2   :  { %v10287_v46 = vpop.f32.mrb[215].mxu1 }
 0x9e3   :  { %v6389_v57 = vpop.permute.xlu1 %6388 }
 0x9e4   :  { %v13029_v44 = vpop.permute.xlu0 %6540 }
 0x9e5   :  { %10339 = vmatmul.mubr.msk.bf16.vlgmr.msra.gmra.mrb[228].mxu1 %vm271_vm2, %v6189_v29 }
 0x9e6   :  { %10343 = vmatpush3.bf16.xpose.msra.mxu1 %v6246_v43  ;;  %10344 = vmatprep.mubr.msk.bf16.mxu1 %vm11133_vm1, %v14179_v38 }
 0x9e7   :  { %10315 = vmatmul.mubr.msk.bf16.vlgmr.msra.gmra.mrb[128].mxu0 %vm271_vm2, %v5991_v16  ;;  %10348 = vmatprep.subr.bf16.mxu1 %v14179_v38  ;;  %v6491_v42 = vpop.permute.xlu1 %6490  ;;  %v6396_v16 = vsel %vm271_vm2, %v6391_v45, 0 }
 0x9e8   :  { %10318 = vmatprep.mubr.msk.bf16.mxu0 %vm271_vm2, %v5992_v26  ;;  %v13036_v35 = vpop.permute.xlu0 %6538  ;;  %v6496_v12 = vsel %vm271_vm2, %v6491_v42, 0 }
 0x9e9   :  { %10355 = vmatpush3.bf16.xpose.msra.mxu0 %v6346_v5 }
 0x9ea   :  { %10366 = vmatprep.subr.bf16.mxu0 %v14179_v38 }
 0x9eb   :  { %v6489_v37 = vpop.permute.xlu1 %6488 }
 0x9ec   :  { %v13040_v33 = vpop.permute.xlu0 %6640 }
 0x9ed   :  { %10345 = vmatmul.mubr.msk.bf16.vlgmr.msra.gmra.mrb[232].mxu1 %vm271_vm2, %v6239_v59 }
 0x9ee   :  { %10349 = vmatpush3.bf16.xpose.msra.mxu1 %v6296_v58  ;;  %10350 = vmatprep.mubr.msk.bf16.mxu1 %vm11133_vm1, %v14179_v38 }
 0x9ef   :  { %10319 = vmatmul.mubr.msk.bf16.gmra.mrb[132].mxu0 %vm271_vm2, %v5993_v55  ;;  %10360 = vmatprep.subr.bf16.mxu1 %v14179_v38  ;;  %v6591_v56 = vpop.permute.xlu1 %6590 }
 0x9f0   :  { %v13045_v61 = vpop.permute.xlu0 %6638  ;;  %v6596_v49 = vsel %vm271_vm2, %v6591_v56, 0  ;;  %v11049_v56 = vld [vmem:[%s14157_s1] ss:$0 sm:$0xff] }
 0x9f3   :  { %v6589_v26 = vpop.permute.xlu1 %6588 }
 0x9f4   :  { %v13052_v48 = vpop.permute.xlu0 %6740 }
 0x9f5   :  { %10351 = vmatmul.mubr.msk.bf16.vlgmr.msra.gmra.mrb[236].mxu1 %vm271_vm2, %v6289_v36 }
 0x9f6   :  { %10361 = vmatpush3.bf16.xpose.msra.mxu1 %v6396_v16  ;;  %10362 = vmatprep.mubr.msk.bf16.mxu1 %vm11133_vm1, %v14179_v38 }
 0x9f7   :  { %10372 = vmatprep.subr.bf16.mxu1 %v14179_v38  ;;  %v6691_v55 = vpop.permute.xlu1 %6690 }
 0x9f8   :  { %v6696_v51 = vsel %vm271_vm2, %v6691_v55, 0  ;;  %v13059_v27 = vpop.permute.xlu0 %6738 }
 0x9fb   :  { %v6689_v23 = vpop.permute.xlu1 %6688 }
 0x9fc   :  { %v13063_v8 = vpop.permute.xlu0 %6840 }
 0x9fd   :  { %10363 = vmatmul.mubr.msk.bf16.vlgmr.msra.gmra.mrb[240].mxu1 %vm271_vm2, %v6389_v57 }
 0x9fe   :  { %10373 = vmatpush3.bf16.xpose.msra.mxu1 %v6496_v12  ;;  %10374 = vmatprep.mubr.msk.bf16.mxu1 %vm11133_vm1, %v14179_v38 }
 0x9ff   :  { %10384 = vmatprep.subr.bf16.mxu1 %v14179_v38  ;;  %v6791_v24 = vpop.permute.xlu1 %6790 }
 0xa00   :  { %v6796_v19 = vsel %vm271_vm2, %v6791_v24, 0  ;;  %v13068_v14 = vpop.permute.xlu0 %6838 }
 0xa03   :  { %v6789_v47 = vpop.permute.xlu1 %6788 }
 0xa04   :  { %v7211_v28 = vpop.permute.xlu0 %7210 }
 0xa05   :  { %10375 = vmatmul.mubr.msk.bf16.vlgmr.msra.gmra.mrb[244].mxu1 %vm271_vm2, %v6489_v37  ;;  %v7216_v34 = vsel %vm1378_vm3, %v7211_v28, 0  ;;  %v11050_v28 = vld [vmem:[%s14157_s1 + $0x1] ss:$0 sm:$0xff] }
 0xa06   :  { %10385 = vmatpush3.bf16.xpose.msra.mxu1 %v6596_v49  ;;  %10386 = vmatprep.mubr.msk.bf16.mxu1 %vm11133_vm1, %v14179_v38 }
 0xa07   :  { %10396 = vmatprep.subr.bf16.mxu1 %v14179_v38  ;;  %v6891_v0 = vpop.permute.xlu1 %6890 }
 0xa08   :  { %v6896_v41 = vsel %vm271_vm2, %v6891_v0, 0 }
 0xa0b   :  { %v6889_v29 = vpop.permute.xlu1 %6888 }
 0xa0d   :  { %10387 = vmatmul.mubr.msk.bf16.vlgmr.msra.gmra.mrb[248].mxu1 %vm271_vm2, %v6589_v26 }
 0xa0e   :  { %10397 = vmatpush3.bf16.xpose.msra.mxu1 %v6696_v51  ;;  %10398 = vmatprep.mubr.msk.bf16.mxu1 %vm11133_vm1, %v14179_v38 }
 0xa0f   :  { %10408 = vmatprep.subr.bf16.mxu1 %v14179_v38 }
 0xa15   :  { %10399 = vmatmul.mubr.msk.bf16.vlgmr.msra.gmra.mrb[252].mxu1 %vm271_vm2, %v6689_v23 }
 0xa16   :  { %10409 = vmatpush3.bf16.xpose.msra.mxu1 %v6796_v19  ;;  %10410 = vmatprep.mubr.msk.bf16.mxu1 %vm11133_vm1, %v14179_v38 }
 0xa17   :  { %10420 = vmatprep.subr.bf16.mxu1 %v14179_v38 }
 0xa1d   :  { %10411 = vmatmul.mubr.msk.bf16.vlgmr.msra.gmra.mrb[0].mxu1 %vm271_vm2, %v6789_v47 }
 0xa1e   :  { %10421 = vmatpush3.bf16.xpose.msra.mxu1 %v6896_v41  ;;  %10422 = vmatprep.mubr.msk.bf16.mxu1 %vm11133_vm1, %v14179_v38 }
 0xa1f   :  { %10432 = vmatprep.subr.bf16.mxu1 %v14179_v38 }
 0xa25   :  { %10423 = vmatmul.mubr.msk.bf16.vlgmr.msra.gmra.mrb[4].mxu1 %vm271_vm2, %v6889_v29 }
 0xa26   :  { %10433 = vmatpush3.bf16.msra.mxu1 %v7216_v34  ;;  %10434 = vmatprep.mubr.msk.bf16.mxu1 %vm11133_vm1, %v14179_v38 }
 0xa27   :  { %10444 = vmatprep.subr.bf16.mxu1 %v14179_v38 }
 0xa66   :  { %v5888_v62 = vpop.f32.mrb[216].mxu1 }
 0xa67   :  { %v10298_v3 = vpop.f32.mrb[217].mxu1 }
 0xa68   :  { %v5891_v25 = vpop.f32.mrb[218].mxu1 }
 0xa69   :  { %v10299_v20 = vpop.f32.mrb[219].mxu1 }
 0xa6d   :  { %v5648_v6 = vpop.f32.mrb[176].mxu0 }
 0xa6e   :  { %v5994_v59 = vpack.c.bf16 %v12979_v13, %v5648_v6  ;;  %v10268_v40 = vpop.f32.mrb[177].mxu0 }
 0xa6f   :  { %v5651_v15 = vpop.f32.mrb[178].mxu0 }
 0xa70   :  { %v10269_v39 = vpop.f32.mrb[179].mxu0  ;;  %10322 = vmatprep.mubr.msk.bf16.mxu0 %vm271_vm2, %v5994_v59  ;;  %v6546_v15 = vsel %vm271_vm2, %v13029_v44, 0  ;;  %v11052_v44 = vld [vmem:[%s14157_s1 + $0x3] ss:$0 sm:$0xff] }
 0xaa2   :  { %v5744_v53 = vpop.f32.mrb[180].mxu0 }
 0xaa3   :  { %v5995_v30 = vpack.c.bf16 %v12994_v50, %v5744_v53  ;;  %v10280_v36 = vpop.f32.mrb[181].mxu0  ;;  %v5984_v18 = vpop.f32.mrb[220].mxu1 }
 0xaa4   :  { %v5747_v54 = vpop.f32.mrb[182].mxu0  ;;  %v10310_v21 = vpop.f32.mrb[221].mxu1 }
 0xaa5   :  { %v10281_v45 = vpop.f32.mrb[183].mxu0  ;;  %v5987_v52 = vpop.f32.mrb[222].mxu1  ;;  %10323 = vmatmul.mubr.msk.bf16.gmra.mrb[136].mxu0 %vm271_vm2, %v5995_v30  ;;  %v6646_v21 = vsel %vm271_vm2, %v13040_v33, 0 }
 0xaa6   :  { %v10311_v22 = vpop.f32.mrb[223].mxu1 }
 0xaaa   :  { %v5840_v46 = vpop.f32.mrb[184].mxu0 }
 0xaab   :  { %v5996_v57 = vpack.c.bf16 %v5888_v62, %v5840_v46  ;;  %v10292_v13 = vpop.f32.mrb[185].mxu0  ;;  %v6446_v62 = vsel %vm271_vm2, %v13003_v31, 0  ;;  %v11051_v31 = vld [vmem:[%s14157_s1 + $0x2] ss:$0 sm:$0xff] }
 0xaac   :  { %v5843_v43 = vpop.f32.mrb[186].mxu0 }
 0xaad   :  { %v10293_v5 = vpop.f32.mrb[187].mxu0  ;;  %10326 = vmatprep.mubr.msk.bf16.mxu0 %vm271_vm2, %v5996_v57  ;;  %v6746_v43 = vsel %vm271_vm2, %v13052_v48, 0  ;;  %v11054_v48 = vld [vmem:[%s14157_s1 + $0x7] ss:$0 sm:$0xff] }
 0xab0   :  { %v6182_v42 = vpop.f32.mrb[224].mxu1 }
 0xab1   :  { %v6938_v58 = vmul.f32 0.35355338, %v6182_v42  ;;  %v10334_v37 = vpop.f32.mrb[225].mxu1 }
 0xab2   :  { %v5936_v50 = vpop.f32.mrb[188].mxu0  ;;  %v6185_v16 = vpop.f32.mrb[226].mxu1 }
 0xab3   :  { %v13088_v26 = vadd.f32 %v11049_v56, %v6938_v58  ;;  %v5997_v12 = vpack.c.bf16 %v5984_v18, %v5936_v50  ;;  %v10304_v55 = vpop.f32.mrb[189].mxu0  ;;  %v10335_v49 = vpop.f32.mrb[227].mxu1  ;;  %v6846_v16 = vsel %vm271_vm2, %v13063_v8, 0  ;;  %v11055_v8 = vld [vmem:[%s14157_s1 + $0x9] ss:$0 sm:$0xff] }
 0xab4   :  { %v5939_v23 = vpop.f32.mrb[190].mxu0 }
 0xab5   :  { %v10305_v51 = vpop.f32.mrb[191].mxu0  ;;  %10327 = vmatmul.mubr.msk.bf16.gmra.mrb[140].mxu0 %vm271_vm2, %v5997_v12  ;;  %v6970_v24 = vsel %vm271_vm2, %v13088_v26, -inf  ;;  %v7163_v23 = vpop.permute.xlu1 %7162 }
 0xab6   :  { %6971 = vmax.xlane.f32.xlu0 %v6970_v24  ;;  %10356 = vmatprep.mubr.msk.bf16.mxu0 %vm11133_vm1, %v14179_v38 }
 0xab8   :  { %v6232_v47 = vpop.f32.mrb[228].mxu1 }
 0xab9   :  { %v6939_v19 = vmul.f32 0.35355338, %v6232_v47  ;;  %v10340_v0 = vpop.f32.mrb[229].mxu1  ;;  %v7168_v47 = vsel %vm1378_vm3, %v7163_v23, 0 }
 0xaba   :  { %v6235_v41 = vpop.f32.mrb[230].mxu1 }
 0xabb   :  { %v13098_v29 = vadd.f32 %v11050_v28, %v6939_v19  ;;  %v10341_v34 = vpop.f32.mrb[231].mxu1 }
 0xabd   :  { %10357 = vmatmul.mubr.msk.bf16.vlgmr.msra.gmra.mrb[192].mxu0 %vm271_vm2, %v12992_v17  ;;  %v6973_v3 = vsel %vm271_vm2, %v13098_v29, -inf }
 0xabe   :  { %10367 = vmatpush3.bf16.xpose.msra.mxu0 %v6446_v62  ;;  %6974 = vmax.xlane.f32.xlu1 %v6973_v3  ;;  %v11056_v62 = vld [vmem:[%s14157_s1 + $0xb] ss:$0 sm:$0xff] }
 0xabf   :  { %10368 = vmatprep.mubr.msk.bf16.mxu0 %vm11133_vm1, %v14179_v38  ;;  %10378 = vmatprep.subr.bf16.mxu0 %v14179_v38 }
 0xac0   :  { %v6282_v25 = vpop.f32.mrb[232].mxu1 }
 0xac1   :  { %v6940_v20 = vmul.f32 0.35355338, %v6282_v25  ;;  %v10346_v6 = vpop.f32.mrb[233].mxu1 }
 0xac2   :  { %v6285_v59 = vpop.f32.mrb[234].mxu1 }
 0xac3   :  { %v13112_v40 = vadd.f32 %v11051_v31, %v6940_v20  ;;  %v10347_v17 = vpop.f32.mrb[235].mxu1 }
 0xac5   :  { %10369 = vmatmul.mubr.msk.bf16.vlgmr.msra.gmra.mrb[196].mxu0 %vm271_vm2, %v13018_v32  ;;  %v6976_v39 = vsel %vm271_vm2, %v13112_v40, -inf }
 0xac6   :  { %10379 = vmatpush3.bf16.xpose.msra.mxu0 %v6546_v15  ;;  %6977 = vmax.xlane.f32.xlu0 %v6976_v39 }
 0xac7   :  { %10380 = vmatprep.mubr.msk.bf16.mxu0 %vm11133_vm1, %v14179_v38  ;;  %10390 = vmatprep.subr.bf16.mxu0 %v14179_v38 }
 0xac8   :  { %v6332_v53 = vpop.f32.mrb[236].mxu1 }
 0xac9   :  { %v6941_v30 = vmul.f32 0.35355338, %v6332_v53  ;;  %v10352_v36 = vpop.f32.mrb[237].mxu1 }
 0xaca   :  { %v6335_v18 = vpop.f32.mrb[238].mxu1  ;;  %v11057_v36 = vld [vmem:[%s14157_s1 + $0xd] ss:$0 sm:$0xff] }
 0xacb   :  { %v13126_v54 = vadd.f32 %v11052_v44, %v6941_v30  ;;  %v10353_v32 = vpop.f32.mrb[239].mxu1 }
 0xacc   :  { %v11058_v32 = vld [vmem:[%s14157_s1 + $0xf] ss:$0 sm:$0xff] }
 0xacd   :  { %10381 = vmatmul.mubr.msk.bf16.vlgmr.msra.gmra.mrb[200].mxu0 %vm271_vm2, %v13036_v35  ;;  %v6979_v45 = vsel %vm271_vm2, %v13126_v54, -inf  ;;  %v11053_v35 = vld [vmem:[%s14157_s1 + $0x5] ss:$0 sm:$0xff] }
 0xace   :  { %10391 = vmatpush3.bf16.xpose.msra.mxu0 %v6646_v21  ;;  %6980 = vmax.xlane.f32.xlu0 %v6979_v45 }
 0xacf   :  { %7546 = vrot.lane.b32.xlu1 %v11287_v63, %s11144_s28  ;;  %10392 = vmatprep.mubr.msk.bf16.mxu0 %vm11133_vm1, %v14179_v38 }
 0xad0   :  { %v6432_v52 = vpop.f32.mrb[240].mxu1  ;;  %10402 = vmatprep.subr.bf16.mxu0 %v14179_v38 }
 0xad1   :  { %v6943_v22 = vmul.f32 0.35355338, %v6432_v52  ;;  %v10364_v46 = vpop.f32.mrb[241].mxu1  ;;  %v13203_v52 = vpop.permute.xlu0 %7306 }
 0xad2   :  { %v6435_v33 = vpop.f32.mrb[242].mxu1 }
 0xad3   :  { %v13142_v57 = vadd.f32 %v11053_v35, %v6943_v22  ;;  %v10365_v13 = vpop.f32.mrb[243].mxu1  ;;  %v13205_v22 = vpop.permute.xlu1 %7258 }
 0xad5   :  { %10393 = vmatmul.mubr.msk.bf16.vlgmr.msra.gmra.mrb[204].mxu0 %vm271_vm2, %v13045_v61  ;;  %v6985_v63 = vsel %vm271_vm2, %v13142_v57, -inf  ;;  %v13207_v46 = vpop.permute.xlu0 %7402 }
 0xad6   :  { %10403 = vmatpush3.bf16.xpose.msra.mxu0 %v6746_v43  ;;  %6986 = vmax.xlane.f32.xlu0 %v6985_v63 }
 0xad7   :  { %10404 = vmatprep.mubr.msk.bf16.mxu0 %vm11133_vm1, %v14179_v38  ;;  %10414 = vmatprep.subr.bf16.mxu0 %v14179_v38  ;;  %v13209_v33 = vpop.permute.xlu1 %7354 }
 0xad8   :  { %v6532_v5 = vpop.f32.mrb[244].mxu1 }
 0xad9   :  { %v6945_v42 = vmul.f32 0.35355338, %v6532_v5  ;;  %v10376_v58 = vpop.f32.mrb[245].mxu1 }
 0xada   :  { %v6535_v37 = vpop.f32.mrb[246].mxu1 }
 0xadb   :  { %v13156_v50 = vadd.f32 %v11054_v48, %v6945_v42  ;;  %v10377_v61 = vpop.f32.mrb[247].mxu1  ;;  %v13212_v63 = vpop.permute.xlu1 %7450 }
 0xadd   :  { %10405 = vmatmul.mubr.msk.bf16.vlgmr.msra.gmra.mrb[208].mxu0 %vm271_vm2, %v13059_v27  ;;  %v6991_v56 = vsel %vm271_vm2, %v13156_v50, -inf }
 0xade   :  { %10415 = vmatpush3.bf16.xpose.msra.mxu0 %v6846_v16  ;;  %6992 = vmax.xlane.f32.xlu0 %v6991_v56 }
 0xadf   :  { %10416 = vmatprep.mubr.msk.bf16.mxu0 %vm11133_vm1, %v14179_v38  ;;  %10426 = vmatprep.subr.bf16.mxu0 %v14179_v38 }
 0xae0   :  { %v6632_v12 = vpop.f32.mrb[248].mxu1 }
 0xae1   :  { %v6947_v55 = vmul.f32 0.35355338, %v6632_v12  ;;  %v10388_v49 = vpop.f32.mrb[249].mxu1 }
 0xae2   :  { %v6635_v51 = vpop.f32.mrb[250].mxu1 }
 0xae3   :  { %v13170_v27 = vadd.f32 %v11055_v8, %v6947_v55  ;;  %v10389_v24 = vpop.f32.mrb[251].mxu1 }
 0xae5   :  { %10417 = vmatmul.mubr.msk.bf16.vlgmr.msra.gmra.mrb[212].mxu0 %vm271_vm2, %v13068_v14  ;;  %v6997_v19 = vsel %vm271_vm2, %v13170_v27, -inf }
 0xae6   :  { %10427 = vmatpush3.bf16.msra.mxu0 %v7168_v47  ;;  %6998 = vmax.xlane.f32.xlu0 %v6997_v19 }
 0xae7   :  { %10428 = vmatprep.mubr.msk.bf16.mxu0 %vm11133_vm1, %v14179_v38  ;;  %10438 = vmatprep.subr.bf16.mxu0 %v14179_v38 }
 0xae8   :  { %v6732_v0 = vpop.f32.mrb[252].mxu1 }
 0xae9   :  { %v6949_v41 = vmul.f32 0.35355338, %v6732_v0  ;;  %v10400_v28 = vpop.f32.mrb[253].mxu1 }
 0xaea   :  { %v6735_v34 = vpop.f32.mrb[254].mxu1 }
 0xaeb   :  { %v13183_v3 = vadd.f32 %v11056_v62, %v6949_v41  ;;  %v10401_v14 = vpop.f32.mrb[255].mxu1 }
 0xaed   :  { %v7003_v25 = vsel %vm271_vm2, %v13183_v3, -inf }
 0xaee   :  { %7004 = vmax.xlane.f32.xlu0 %v7003_v25 }
 0xaf0   :  { %v6832_v20 = vpop.f32.mrb[0].mxu1 }
 0xaf1   :  { %v10412_v6 = vpop.f32.mrb[1].mxu1  ;;  %v6951_v30 = vmul.f32 0.35355338, %v6832_v20 }
 0xaf2   :  { %v6835_v59 = vpop.f32.mrb[2].mxu1 }
 0xaf3   :  { %v10413_v31 = vpop.f32.mrb[3].mxu1  ;;  %v13192_v18 = vadd.f32 %v11057_v36, %v6951_v30  ;;  %v11059_v59 = vld [vmem:[%s14157_s1 + $0x4] ss:$0 sm:$0xff] }
 0xaf5   :  { %v7009_v45 = vsel %vm271_vm2, %v13192_v18, -inf }
 0xaf8   :  { %v6932_v17 = vpop.f32.mrb[4].mxu1 }
 0xaf9   :  { %v10424_v15 = vpop.f32.mrb[5].mxu1  ;;  %v6953_v44 = vmul.f32 0.35355338, %v6932_v17 }
 0xafa   :  { %v6935_v39 = vpop.f32.mrb[6].mxu1 }
 0xafb   :  { %v10425_v53 = vpop.f32.mrb[7].mxu1  ;;  %v13197_v21 = vadd.f32 %v11058_v32, %v6953_v44 }
 0xb04   :  { %7498 = vrot.lane.b32.xlu0 %v11283_v60, %s11144_s28  ;;  %v7015_v60 = vsel %vm271_vm2, %v13197_v21, -inf }
 0xb23   :  { %7010 = vmax.xlane.f32.xlu0 %v7009_v45 }
 0xb27   :  { %7016 = vmax.xlane.f32.xlu0 %v7015_v60 }
 0xb43   :  { %v6972_v35 = vpop.xlane.xlu0 %6971 }
 0xb44   :  { %v7018_v13 = vsub.f32 %v13088_v26, %v6972_v35 }
 0xb46   :  { %v7034_v43 = vmul.f32 1.442695, %v7018_v13 }
 0xb48   :  { %10857 = vpow2.f32 %v7034_v43 }
 0xb4b   :  { %v6975_v5 = vpop.xlane.xlu1 %6974 }
 0xb4c   :  { %v7019_v42 = vsub.f32 %v13098_v29, %v6975_v5 }
 0xb4e   :  { %v7036_v58 = vmul.f32 1.442695, %v7019_v42 }
 0xb50   :  { %10859 = vpow2.f32 %v7036_v58 }
 0xb52   :  { %v13215_v37 = vpop.eup %10857 }
 0xb53   :  { %v6978_v48 = vpop.xlane.xlu0 %6977  ;;  %v7066_v61 = vsel %vm271_vm2, %v13215_v37, 0.0 }
 0xb54   :  { %v7020_v16 = vsub.f32 %v13112_v40, %v6978_v48  ;;  %7067 = vadd.xlane.f32.xlu1 %v7066_v61  ;;  %v11061_v48 = vld [vmem:[%s14157_s1 + $0x8] ss:$0 sm:$0xff] }
 0xb56   :  { %v7038_v56 = vmul.f32 1.442695, %v7020_v16 }
 0xb58   :  { %10861 = vpow2.f32 %v7038_v56 }
 0xb5a   :  { %v13220_v26 = vpop.eup %10859 }
 0xb5b   :  { %v6981_v12 = vpop.xlane.xlu0 %6980  ;;  %v7069_v55 = vsel %vm271_vm2, %v13220_v26, 0.0 }
 0xb5c   :  { %v7021_v29 = vsub.f32 %v13126_v54, %v6981_v12  ;;  %7070 = vadd.xlane.f32.xlu0 %v7069_v55 }
 0xb5e   :  { %v7040_v49 = vmul.f32 1.442695, %v7021_v29 }
 0xb60   :  { %10863 = vpow2.f32 %v7040_v49  ;;  %v11062_v49 = vld [vmem:[%s14157_s1 + $0xa] ss:$0 sm:$0xff] }
 0xb62   :  { %v13225_v23 = vpop.eup %10861 }
 0xb63   :  { %v6987_v51 = vpop.xlane.xlu0 %6986  ;;  %v7072_v40 = vsel %vm271_vm2, %v13225_v23, 0.0 }
 0xb64   :  { %v7023_v8 = vsub.f32 %v13142_v57, %v6987_v51  ;;  %7073 = vadd.xlane.f32.xlu1 %v7072_v40 }
 0xb66   :  { %v7044_v24 = vmul.f32 1.442695, %v7023_v8 }
 0xb68   :  { %10865 = vpow2.f32 %v7044_v24 }
 0xb6a   :  { %v13230_v47 = vpop.eup %10863 }
 0xb6b   :  { %v6993_v19 = vpop.xlane.xlu0 %6992  ;;  %v7075_v54 = vsel %vm271_vm2, %v13230_v47, 0.0 }
 0xb6c   :  { %v7025_v0 = vsub.f32 %v13156_v50, %v6993_v19  ;;  %7076 = vadd.xlane.f32.xlu0 %v7075_v54 }
 0xb6e   :  { %v7048_v41 = vmul.f32 1.442695, %v7025_v0 }
 0xb70   :  { %10867 = vpow2.f32 %v7048_v41 }
 0xb72   :  { %v13235_v28 = vpop.eup %10865 }
 0xb73   :  { %v7081_v34 = vsel %vm271_vm2, %v13235_v28, 0.0 }
 0xb74   :  { %7082 = vadd.xlane.f32.xlu0 %v7081_v34 }
 0xb75   :  { %7642 = vrot.lane.b32.xlu1 %v11295_v2, %s11144_s28  ;;  %v6999_v2 = vpop.xlane.xlu0 %6998 }
 0xb76   :  { %v7027_v36 = vsub.f32 %v13170_v27, %v6999_v2 }
 0xb78   :  { %v7052_v35 = vmul.f32 1.442695, %v7027_v36 }
 0xb7a   :  { %v13241_v57 = vpop.eup %10867  ;;  %10869 = vpow2.f32 %v7052_v35 }
 0xb7b   :  { %v7087_v62 = vsel %vm271_vm2, %v13241_v57, 0.0  ;;  %v7005_v45 = vpop.xlane.xlu0 %7004 }
 0xb7c   :  { %7088 = vadd.xlane.f32.xlu0 %v7087_v62  ;;  %v7029_v13 = vsub.f32 %v13183_v3, %v7005_v45  ;;  %v11064_v45 = vld [vmem:[%s14157_s1 + $0xe] ss:$0 sm:$0xff] }
 0xb7e   :  { %v7056_v27 = vmul.f32 1.442695, %v7029_v13 }
 0xb7f   :  { %v13275_v8 = vpop.permute.xlu0 %7498 }
 0xb80   :  { %10871 = vpow2.f32 %v7056_v27 }
 0xb84   :  { %v13277_v24 = vpop.eup %10869 }
 0xb85   :  { %v7093_v41 = vsel %vm271_vm2, %v13277_v24, 0.0 }
 0xb8a   :  { %v13283_v34 = vpop.eup %10871 }
 0xb90   :  { %v6382_v14 = vpop.f32.mrb[192].mxu0 }
 0xb91   :  { %v6942_v50 = vmul.f32 0.35355338, %v6382_v14  ;;  %v10358_v25 = vpop.f32.mrb[193].mxu0 }
 0xb92   :  { %v6385_v20 = vpop.f32.mrb[194].mxu0  ;;  %7594 = vrot.lane.b32.xlu0 %v11291_v1, %s11144_s28  ;;  %v11060_v1 = vld [vmem:[%s14157_s1 + $0x6] ss:$0 sm:$0xff] }
 0xb93   :  { %v10359_v6 = vpop.f32.mrb[195].mxu0  ;;  %v13250_v31 = vadd.f32 %v11059_v59, %v6942_v50  ;;  %v11063_v20 = vld [vmem:[%s14157_s1 + $0xc] ss:$0 sm:$0xff] }
 0xb95   :  { %v6982_v15 = vsel %vm271_vm2, %v13250_v31, -inf }
 0xb98   :  { %v6482_v17 = vpop.f32.mrb[196].mxu0 }
 0xb99   :  { %v6944_v39 = vmul.f32 0.35355338, %v6482_v17  ;;  %v10370_v53 = vpop.f32.mrb[197].mxu0  ;;  %6983 = vmax.xlane.f32.xlu1 %v6982_v15  ;;  %v7099_v15 = vsel %vm271_vm2, %v13283_v34, 0.0 }
 0xb9a   :  { %v6485_v30 = vpop.f32.mrb[198].mxu0 }
 0xb9b   :  { %v13258_v44 = vadd.f32 %v11060_v1, %v6944_v39  ;;  %v10371_v32 = vpop.f32.mrb[199].mxu0 }
 0xb9d   :  { %v6988_v60 = vsel %vm271_vm2, %v13258_v44, -inf }
 0xb9e   :  { %6989 = vmax.xlane.f32.xlu1 %v6988_v60 }
 0xba0   :  { %v6582_v43 = vpop.f32.mrb[200].mxu0 }
 0xba1   :  { %v6946_v5 = vmul.f32 0.35355338, %v6582_v43  ;;  %v10382_v42 = vpop.f32.mrb[201].mxu0 }
 0xba2   :  { %v6585_v58 = vpop.f32.mrb[202].mxu0 }
 0xba3   :  { %v13266_v61 = vadd.f32 %v11061_v48, %v6946_v5  ;;  %v10383_v16 = vpop.f32.mrb[203].mxu0  ;;  %v13315_v58 = vpop.permute.xlu1 %7546 }
 0xba5   :  { %v6994_v56 = vsel %vm271_vm2, %v13266_v61, -inf }
 0xba6   :  { %6995 = vmax.xlane.f32.xlu1 %v6994_v56 }
 0xba8   :  { %v6682_v12 = vpop.f32.mrb[204].mxu0 }
 0xba9   :  { %v6948_v3 = vmul.f32 0.35355338, %v6682_v12  ;;  %v10394_v55 = vpop.f32.mrb[205].mxu0 }
 0xbaa   :  { %v6685_v29 = vpop.f32.mrb[206].mxu0 }
 0xbab   :  { %v13273_v51 = vadd.f32 %v11062_v49, %v6948_v3  ;;  %v10395_v40 = vpop.f32.mrb[207].mxu0  ;;  %v7264_v3 = vsel %vm1378_vm3, %v13205_v22, 0 }
 0xbad   :  { %v7000_v19 = vsel %vm271_vm2, %v13273_v51, -inf }
 0xbae   :  { %7001 = vmax.xlane.f32.xlu1 %v7000_v19 }
 0xbb0   :  { %v6782_v54 = vpop.f32.mrb[208].mxu0  ;;  %v7011_v0 = vpop.xlane.xlu0 %7010 }
 0xbb1   :  { %v6950_v62 = vmul.f32 0.35355338, %v6782_v54  ;;  %v7031_v14 = vsub.f32 %v13192_v18, %v7011_v0  ;;  %v10406_v50 = vpop.f32.mrb[209].mxu0  ;;  %7094 = vadd.xlane.f32.xlu0 %v7093_v41 }
 0xbb2   :  { %v6785_v25 = vpop.f32.mrb[210].mxu0 }
 0xbb3   :  { %v13289_v6 = vadd.f32 %v11063_v20, %v6950_v62  ;;  %v7060_v59 = vmul.f32 1.442695, %v7031_v14  ;;  %v10407_v2 = vpop.f32.mrb[211].mxu0 }
 0xbb4   :  { %v7017_v17 = vpop.xlane.xlu0 %7016 }
 0xbb5   :  { %10873 = vpow2.f32 %v7060_v59  ;;  %v7033_v39 = vsub.f32 %v13197_v21, %v7017_v17  ;;  %7100 = vadd.xlane.f32.xlu0 %v7099_v15  ;;  %v7006_v18 = vsel %vm271_vm2, %v13289_v6, -inf }
 0xbb6   :  { %7007 = vmax.xlane.f32.xlu1 %v7006_v18 }
 0xbb7   :  { %v7064_v53 = vmul.f32 1.442695, %v7033_v39 }
 0xbb8   :  { %v6882_v30 = vpop.f32.mrb[212].mxu0 }
 0xbb9   :  { %10875 = vpow2.f32 %v7064_v53  ;;  %v6952_v36 = vmul.f32 0.35355338, %v6882_v30  ;;  %v10418_v1 = vpop.f32.mrb[213].mxu0 }
 0xbba   :  { %v6885_v32 = vpop.f32.mrb[214].mxu0 }
 0xbbb   :  { %v13299_v60 = vadd.f32 %v11064_v45, %v6952_v36  ;;  %v10419_v35 = vpop.f32.mrb[215].mxu0 }
 0xbbd   :  { %v7012_v21 = vsel %vm271_vm2, %v13299_v60, -inf }
 0xbbe   :  { %7013 = vmax.xlane.f32.xlu1 %v7012_v21 }
 0xbbf   :  { %v13303_v13 = vpop.eup %10873 }
 0xbc0   :  { %v7105_v43 = vsel %vm271_vm2, %v13303_v13, 0.0 }
 0xbc1   :  { %7106 = vadd.xlane.f32.xlu0 %v7105_v43 }
 0xbc3   :  { %v13307_v5 = vpop.eup %10875 }
 0xbc4   :  { %v7111_v42 = vsel %vm271_vm2, %v13307_v5, 0.0 }
 0xbc5   :  { %7112 = vadd.xlane.f32.xlu0 %v7111_v42 }
 0xbcf   :  { %7690 = vrot.lane.b32.xlu1 %v11299_v4, %s11144_s28 }
 0xbdb   :  { %7738 = vrot.lane.b32.xlu0 %v11303_v7, %s11144_s28 }
 0xbdf   :  { %7834 = vrot.lane.b32.xlu0 %v11311_v10, %s11144_s28 }
 0xbe1   :  { %v7068_v27 = vpop.xlane.xlu1 %7067 }
 0xbe2   :  { %10877 = vrcp.f32 %v7068_v27 }
 0xbe9   :  { %v7071_v48 = vpop.xlane.xlu0 %7070 }
 0xbea   :  { %10879 = vrcp.f32 %v7071_v48 }
 0xbec   :  { %v10878_v16 = vpop.eup %10877 }
 0xbed   :  { %v7130_v56 = vmul.f32 %v10878_v16, %v13215_v37  ;;  %v7312_v37 = vsel %vm1378_vm3, %v13203_v52, 0 }
 0xbef   :  { %v7146_v12 = vpack.c.bf16 %v7130_v56, %v7130_v56 }
 0xbf1   :  { %10429 = vmatmul.mubr.msk.bf16.vlgmr.msra.gmra.mrb[216].mxu0 %vm271_vm2, %v7146_v12  ;;  %v7074_v4 = vpop.xlane.xlu1 %7073 }
 0xbf2   :  { %10439 = vmatpush3.bf16.msra.mxu0 %v7264_v3  ;;  %10881 = vrcp.f32 %v7074_v4  ;;  %10440 = vmatprep.mubr.msk.bf16.mxu0 %vm11133_vm1, %v14179_v38 }
 0xbf3   :  { %10450 = vmatprep.subr.bf16.mxu0 %v14179_v38 }
 0xbf4   :  { %v10880_v7 = vpop.eup %10879 }
 0xbf5   :  { %v7131_v10 = vmul.f32 %v10880_v7, %v13220_v26  ;;  %v7360_v26 = vsel %vm1378_vm3, %v13209_v33, 0 }
 0xbf7   :  { %v7147_v55 = vpack.c.bf16 %v7131_v10, %v7131_v10 }
 0xbf9   :  { %10435 = vmatmul.mubr.msk.bf16.vlgmr.msra.gmra.mrb[8].mxu1 %vm271_vm2, %v7147_v55  ;;  %v7077_v22 = vpop.xlane.xlu0 %7076 }
 0xbfa   :  { %10445 = vmatpush3.bf16.msra.mxu1 %v7312_v37  ;;  %10883 = vrcp.f32 %v7077_v22  ;;  %10446 = vmatprep.mubr.msk.bf16.mxu1 %vm11133_vm1, %v14179_v38 }
 0xbfb   :  { %10456 = vmatprep.subr.bf16.mxu1 %v14179_v38 }
 0xbfc   :  { %v10882_v29 = vpop.eup %10881 }
 0xbfd   :  { %v7132_v49 = vmul.f32 %v10882_v29, %v13225_v23  ;;  %v7408_v23 = vsel %vm1378_vm3, %v13207_v46, 0 }
 0xbff   :  { %v7148_v40 = vpack.c.bf16 %v7132_v49, %v7132_v49 }
 0xc01   :  { %10441 = vmatmul.mubr.msk.bf16.vlgmr.msra.gmra.mrb[220].mxu0 %vm271_vm2, %v7148_v40  ;;  %v7083_v52 = vpop.xlane.xlu0 %7082 }
 0xc02   :  { %10451 = vmatpush3.bf16.msra.mxu0 %v7360_v26  ;;  %10885 = vrcp.f32 %v7083_v52  ;;  %10452 = vmatprep.mubr.msk.bf16.mxu0 %vm11133_vm1, %v14179_v38 }
 0xc03   :  { %10462 = vmatprep.subr.bf16.mxu0 %v14179_v38 }
 0xc04   :  { %v10884_v19 = vpop.eup %10883 }
 0xc05   :  { %v7133_v54 = vmul.f32 %v10884_v19, %v13230_v47  ;;  %v7504_v47 = vsel %vm1378_vm3, %v13275_v8, 0 }
 0xc07   :  { %v7149_v0 = vpack.c.bf16 %v7133_v54, %v7133_v54 }
 0xc09   :  { %10447 = vmatmul.mubr.msk.bf16.vlgmr.msra.gmra.mrb[12].mxu1 %vm271_vm2, %v7149_v0  ;;  %v7089_v33 = vpop.xlane.xlu0 %7088 }
 0xc0a   :  { %10457 = vmatpush3.bf16.msra.mxu1 %v7408_v23  ;;  %10887 = vrcp.f32 %v7089_v33  ;;  %10458 = vmatprep.mubr.msk.bf16.mxu1 %vm11133_vm1, %v14179_v38 }
 0xc0b   :  { %10468 = vmatprep.subr.bf16.mxu1 %v14179_v38 }
 0xc0c   :  { %v10886_v41 = vpop.eup %10885 }
 0xc0d   :  { %v7135_v62 = vmul.f32 %v10886_v41, %v13235_v28  ;;  %v7595_v25 = vpop.permute.xlu0 %7594  ;;  %v13360_v28 = vpop.permute.xlu1 %7642 }
 0xc0e   :  { %v7600_v59 = vsel %vm1378_vm3, %v7595_v25, 0 }
 0xc0f   :  { %v7151_v14 = vpack.c.bf16 %v7135_v62, %v7135_v62 }
 0xc11   :  { %10459 = vmatmul.mubr.msk.bf16.vlgmr.msra.gmra.mrb[16].mxu1 %vm271_vm2, %v7151_v14 }
 0xc12   :  { %10469 = vmatpush3.bf16.msra.mxu1 %v7504_v47  ;;  %10470 = vmatprep.mubr.msk.bf16.mxu1 %vm11133_vm1, %v14179_v38 }
 0xc13   :  { %10480 = vmatprep.subr.bf16.mxu1 %v14179_v38 }
 0xc14   :  { %v10888_v46 = vpop.eup %10887 }
 0xc15   :  { %v7137_v50 = vmul.f32 %v10888_v46, %v13241_v57 }
 0xc17   :  { %v7153_v20 = vpack.c.bf16 %v7137_v50, %v7137_v50 }
 0xc19   :  { %10471 = vmatmul.mubr.msk.bf16.vlgmr.msra.gmra.mrb[20].mxu1 %vm271_vm2, %v7153_v20 }
 0xc1a   :  { %10481 = vmatpush3.bf16.msra.mxu1 %v7600_v59  ;;  %10482 = vmatprep.mubr.msk.bf16.mxu1 %vm11133_vm1, %v14179_v38 }
 0xc1b   :  { %10492 = vmatprep.subr.bf16.mxu1 %v14179_v38 }
 0xc26   :  { %v6984_v8 = vpop.xlane.xlu1 %6983 }
 0xc27   :  { %v7022_v2 = vsub.f32 %v13250_v31, %v6984_v8  ;;  %v7456_v8 = vsel %vm1378_vm3, %v13212_v63, 0 }
 0xc29   :  { %v7042_v17 = vmul.f32 1.442695, %v7022_v2 }
 0xc2b   :  { %10889 = vpow2.f32 %v7042_v17  ;;  %v6990_v57 = vpop.xlane.xlu1 %6989 }
 0xc2c   :  { %v7024_v15 = vsub.f32 %v13258_v44, %v6990_v57 }
 0xc2e   :  { %v7046_v39 = vmul.f32 1.442695, %v7024_v15 }
 0xc30   :  { %10891 = vpow2.f32 %v7046_v39 }
 0xc33   :  { %v6996_v18 = vpop.xlane.xlu1 %6995 }
 0xc34   :  { %v7026_v53 = vsub.f32 %v13266_v61, %v6996_v18 }
 0xc35   :  { %v13365_v30 = vpop.eup %10889 }
 0xc36   :  { %v7050_v36 = vmul.f32 1.442695, %v7026_v53  ;;  %v7078_v1 = vsel %vm271_vm2, %v13365_v30, 0.0 }
 0xc37   :  { %7079 = vadd.xlane.f32.xlu1 %v7078_v1  ;;  %v7552_v1 = vsel %vm1378_vm3, %v13315_v58, 0  ;;  %v7648_v58 = vsel %vm1378_vm3, %v13360_v28, 0 }
 0xc38   :  { %10893 = vpow2.f32 %v7050_v36 }
 0xc3a   :  { %v13369_v32 = vpop.eup %10891 }
 0xc3b   :  { %v7084_v31 = vsel %vm271_vm2, %v13369_v32, 0.0  ;;  %v7002_v61 = vpop.xlane.xlu1 %7001 }
 0xc3c   :  { %7085 = vadd.xlane.f32.xlu1 %v7084_v31 }
 0xc3e   :  { %v7095_v44 = vpop.xlane.xlu0 %7094 }
 0xc3f   :  { %10895 = vrcp.f32 %v7095_v44 }
 0xc42   :  { %v13373_v45 = vpop.eup %10893  ;;  %v7101_v35 = vpop.xlane.xlu0 %7100 }
 0xc43   :  { %10897 = vrcp.f32 %v7101_v35  ;;  %v7090_v21 = vsel %vm271_vm2, %v13373_v45, 0.0  ;;  %v7008_v43 = vpop.xlane.xlu1 %7007 }
 0xc44   :  { %7091 = vadd.xlane.f32.xlu1 %v7090_v21  ;;  %v7030_v55 = vsub.f32 %v13289_v6, %v7008_v43 }
 0xc49   :  { %v10896_v42 = vpop.eup %10895 }
 0xc4a   :  { %v7139_v27 = vmul.f32 %v10896_v42, %v13277_v24  ;;  %v7028_v24 = vsub.f32 %v13273_v51, %v7002_v61 }
 0xc4b   :  { %v7014_v48 = vpop.xlane.xlu1 %7013 }
 0xc4c   :  { %v7155_v16 = vpack.c.bf16 %v7139_v27, %v7139_v27  ;;  %v7054_v10 = vmul.f32 1.442695, %v7028_v24  ;;  %v7032_v37 = vsub.f32 %v13299_v60, %v7014_v48 }
 0xc4d   :  { %v10898_v56 = vpop.eup %10897 }
 0xc4e   :  { %10483 = vmatmul.mubr.msk.bf16.vlgmr.msra.gmra.mrb[24].mxu1 %vm271_vm2, %v7155_v16  ;;  %v7141_v3 = vmul.f32 %v10898_v56, %v13283_v34  ;;  %10899 = vpow2.f32 %v7054_v10  ;;  %v7058_v34 = vmul.f32 1.442695, %v7030_v55  ;;  %v7062_v22 = vmul.f32 1.442695, %v7032_v37  ;;  %v7107_v60 = vpop.xlane.xlu0 %7106 }
 0xc4f   :  { %v7691_v12 = vpop.permute.xlu1 %7690  ;;  %10494 = vmatprep.mubr.msk.bf16.mxu1 %vm11133_vm1, %v14179_v38 }
 0xc50   :  { %v7696_v4 = vsel %vm1378_vm3, %v7691_v12, 0  ;;  %v7157_v7 = vpack.c.bf16 %v7141_v3, %v7141_v3  ;;  %10901 = vpow2.f32 %v7058_v34 }
 0xc51   :  { %10493 = vmatpush3.bf16.msra.mxu1 %v7696_v4  ;;  %10903 = vpow2.f32 %v7062_v22 }
 0xc52   :  { %10504 = vmatprep.subr.bf16.mxu1 %v14179_v38  ;;  %v7113_v4 = vpop.xlane.xlu0 %7112 }
 0xc55   :  { %7786 = vrot.lane.b32.xlu1 %v11307_v9, %s11144_s28 }
 0xc56   :  { %10495 = vmatmul.mubr.msk.bf16.vlgmr.msra.gmra.mrb[28].mxu1 %vm271_vm2, %v7157_v7 }
 0xc57   :  { %10506 = vmatprep.mubr.msk.bf16.mxu1 %vm11133_vm1, %v14179_v38 }
 0xc58   :  { %v13392_v29 = vpop.eup %10899 }
 0xc59   :  { %v7096_v9 = vsel %vm271_vm2, %v13392_v29, 0.0 }
 0xc5a   :  { %v13396_v49 = vpop.eup %10901 }
 0xc5b   :  { %v7102_v51 = vsel %vm271_vm2, %v13396_v49, 0.0  ;;  %v13400_v40 = vpop.eup %10903 }
 0xc5c   :  { %v7108_v6 = vsel %vm271_vm2, %v13400_v40, 0.0 }
 0xc79   :  { %7097 = vadd.xlane.f32.xlu1 %v7096_v9  ;;  %v7739_v9 = vpop.permute.xlu0 %7738 }
 0xc7d   :  { %7103 = vadd.xlane.f32.xlu1 %v7102_v51 }
 0xc81   :  { %7109 = vadd.xlane.f32.xlu1 %v7108_v6 }
 0xc92   :  { %7882 = vrot.lane.b32.xlu1 %v11315_v11, %s11144_s28 }
 0xcc4   :  { %v13406_v26 = vpop.f32.mrb[216].mxu0  ;;  %v7080_v52 = vpop.xlane.xlu1 %7079 }
 0xcc5   :  { %10905 = vrcp.f32 %v7080_v52  ;;  %v10430_v19 = vpop.f32.mrb[217].mxu0 }
 0xcc6   :  { %v7207_v54 = vpop.f32.mrb[218].mxu0  ;;  %10907 = vrcp.f32 %v7107_v60  ;;  %v7744_v19 = vsel %vm1378_vm3, %v7739_v9, 0 }
 0xcc7   :  { %v10431_v0 = vpop.f32.mrb[219].mxu0 }
 0xcc9   :  { %v7086_v23 = vpop.xlane.xlu1 %7085 }
 0xcca   :  { %10909 = vrcp.f32 %v7086_v23  ;;  %v98_v23 = vld [vmem:[%s14160_s4 + $0xc] sm:$0xf] }
 0xccc   :  { %v13408_v33 = vpop.f32.mrb[8].mxu1 }
 0xccd   :  { %v7930_v41 = vpack.c.bf16 %v13408_v33, %v13406_v26  ;;  %v10436_v62 = vpop.f32.mrb[9].mxu1 }
 0xcce   :  { %v7255_v14 = vpop.f32.mrb[10].mxu1 }
 0xccf   :  { %v10906_v47 = vpop.eup %10905  ;;  %v10437_v11 = vpop.f32.mrb[11].mxu1 }
 0xcd0   :  { %v7134_v46 = vmul.f32 %v10906_v47, %v13365_v30  ;;  %v10908_v50 = vpop.eup %10907 }
 0xcd1   :  { %v7092_v25 = vpop.xlane.xlu1 %7091  ;;  %v7143_v2 = vmul.f32 %v10908_v50, %v13303_v13 }
 0xcd2   :  { %10911 = vrcp.f32 %v7092_v25  ;;  %v7150_v20 = vpack.c.bf16 %v7134_v46, %v7134_v46  ;;  %v7963_v25 = vsel %vm1378_vm3, %v98_v23, 0 }
 0xcd3   :  { %v7159_v13 = vpack.c.bf16 %v7143_v2, %v7143_v2  ;;  %10913 = vrcp.f32 %v7113_v4 }
 0xcd4   :  { %v10910_v59 = vpop.eup %10909  ;;  %v13416_v17 = vpop.f32.mrb[220].mxu0  ;;  %10453 = vmatmul.mubr.msk.bf16.vlgmr.msra.gmra.mrb[224].mxu0 %vm271_vm2, %v7150_v20 }
 0xcd5   :  { %10463 = vmatpush3.bf16.msra.mxu0 %v7456_v8  ;;  %v10442_v57 = vpop.f32.mrb[221].mxu0  ;;  %v7787_v15 = vpop.permute.xlu1 %7786  ;;  %10464 = vmatprep.mubr.msk.bf16.mxu0 %vm11133_vm1, %v14179_v38  ;;  %v7136_v39 = vmul.f32 %v10910_v59, %v13369_v32 }
 0xcd6   :  { %v7792_v18 = vsel %vm1378_vm3, %v7787_v15, 0  ;;  %v7303_v53 = vpop.f32.mrb[222].mxu0  ;;  %10474 = vmatprep.subr.bf16.mxu0 %v14179_v38 }
 0xcd7   :  { %v10443_v63 = vpop.f32.mrb[223].mxu0  ;;  %10505 = vmatpush3.bf16.msra.mxu1 %v7792_v18  ;;  %v7152_v30 = vpack.c.bf16 %v7136_v39, %v7136_v39 }
 0xcd8   :  { %10516 = vmatprep.subr.bf16.mxu1 %v14179_v38 }
 0xcda   :  { %10507 = vmatmul.mubr.msk.bf16.vlgmr.msra.gmra.mrb[32].mxu1 %vm271_vm2, %v7159_v13 }
 0xcdb   :  { %10518 = vmatprep.mubr.msk.bf16.mxu1 %vm11133_vm1, %v14179_v38 }
 0xcdc   :  { %v10912_v36 = vpop.eup %10911  ;;  %v13430_v32 = vpop.f32.mrb[12].mxu1  ;;  %10465 = vmatmul.mubr.msk.bf16.vlgmr.msra.gmra.mrb[228].mxu0 %vm271_vm2, %v7152_v30 }
 0xcdd   :  { %v7931_v31 = vpack.c.bf16 %v13430_v32, %v13416_v17  ;;  %10475 = vmatpush3.bf16.msra.mxu0 %v7552_v1  ;;  %v10448_v44 = vpop.f32.mrb[13].mxu1  ;;  %10476 = vmatprep.mubr.msk.bf16.mxu0 %vm11133_vm1, %v14179_v38  ;;  %v7138_v35 = vmul.f32 %v10912_v36, %v13373_v45  ;;  %v10914_v24 = vpop.eup %10913 }
 0xcde   :  { %v7351_v61 = vpop.f32.mrb[14].mxu1  ;;  %10486 = vmatprep.subr.bf16.mxu0 %v14179_v38  ;;  %v7145_v34 = vmul.f32 %v10914_v24, %v13307_v5 }
 0xcdf   :  { %v10449_v21 = vpop.f32.mrb[15].mxu1  ;;  %v7154_v43 = vpack.c.bf16 %v7138_v35, %v7138_v35 }
 0xce0   :  { %v7161_v52 = vpack.c.bf16 %v7145_v34, %v7145_v34  ;;  %v13489_v34 = vld [vmem:[%s14161_s5] ss:$0 sm:$0xff] }
 0xce4   :  { %v13441_v42 = vpop.f32.mrb[16].mxu1  ;;  %10477 = vmatmul.mubr.msk.bf16.vlgmr.msra.gmra.mrb[232].mxu0 %vm271_vm2, %v7154_v43 }
 0xce5   :  { %10487 = vmatpush3.bf16.msra.mxu0 %v7648_v58  ;;  %v10460_v27 = vpop.f32.mrb[17].mxu1  ;;  %10488 = vmatprep.mubr.msk.bf16.mxu0 %vm11133_vm1, %v14179_v38 }
 0xce6   :  { %v7447_v48 = vpop.f32.mrb[18].mxu1  ;;  %10498 = vmatprep.subr.bf16.mxu0 %v14179_v38 }
 0xce7   :  { %v10461_v45 = vpop.f32.mrb[19].mxu1 }
 0xcec   :  { %v13447_v16 = vpop.f32.mrb[20].mxu1 }
 0xced   :  { %v10472_v56 = vpop.f32.mrb[21].mxu1 }
 0xcee   :  { %v7543_v12 = vpop.f32.mrb[22].mxu1 }
 0xcef   :  { %v10473_v3 = vpop.f32.mrb[23].mxu1 }
 0xd06   :  { %v7098_v28 = vpop.xlane.xlu1 %7097 }
 0xd07   :  { %10915 = vrcp.f32 %v7098_v28 }
 0xd0a   :  { %v7104_v7 = vpop.xlane.xlu1 %7103 }
 0xd0b   :  { %10917 = vrcp.f32 %v7104_v7 }
 0xd0e   :  { %v7110_v10 = vpop.xlane.xlu1 %7109 }
 0xd0f   :  { %10919 = vrcp.f32 %v7110_v10 }
 0xd11   :  { %v10916_v55 = vpop.eup %10915 }
 0xd12   :  { %v7140_v37 = vmul.f32 %v10916_v55, %v13392_v29  ;;  %v7883_v22 = vpop.permute.xlu1 %7882  ;;  %v7835_v29 = vpop.permute.xlu0 %7834 }
 0xd13   :  { %v7888_v51 = vsel %vm1378_vm3, %v7883_v22, 0  ;;  %v7840_v62 = vsel %vm1378_vm3, %v7835_v29, 0  ;;  %v11066_v29 = vld [vmem:[#allocation2 + $0x10] sm:$0xff] }
 0xd14   :  { %10517 = vmatpush3.bf16.msra.mxu1 %v7888_v51  ;;  %v7156_v6 = vpack.c.bf16 %v7140_v37, %v7140_v37 }
 0xd15   :  { %v10918_v60 = vpop.eup %10917 }
 0xd16   :  { %10489 = vmatmul.mubr.msk.bf16.vlgmr.msra.gmra.mrb[236].mxu0 %vm271_vm2, %v7156_v6  ;;  %v7142_v5 = vmul.f32 %v10918_v60, %v13396_v49 }
 0xd17   :  { %10499 = vmatpush3.bf16.msra.mxu0 %v7744_v19  ;;  %10519 = vmatmul.mubr.msk.bf16.vlgmr.msra.gmra.mrb[36].mxu1 %vm271_vm2, %v7161_v52  ;;  %v11065_v52 = vld [vmem:[#allocation2] sm:$0xff] }
 0xd18   :  { %10500 = vmatprep.mubr.msk.bf16.mxu0 %vm11133_vm1, %v14179_v38  ;;  %10510 = vmatprep.subr.bf16.mxu0 %v14179_v38  ;;  %v7158_v54 = vpack.c.bf16 %v7142_v5, %v7142_v5 }
 0xd19   :  { %v10920_v0 = vpop.eup %10919 }
 0xd1a   :  { %v7144_v49 = vmul.f32 %v10920_v0, %v13400_v40 }
 0xd1c   :  { %v7160_v50 = vpack.c.bf16 %v7144_v49, %v7144_v49 }
 0xd1e   :  { %10501 = vmatmul.mubr.msk.bf16.vlgmr.msra.gmra.mrb[240].mxu0 %vm271_vm2, %v7158_v54 }
 0xd1f   :  { %10511 = vmatpush3.bf16.msra.mxu0 %v7840_v62  ;;  %10512 = vmatprep.mubr.msk.bf16.mxu0 %vm11133_vm1, %v14179_v38 }
 0xd20   :  { %10639 = vmatprep.subr.msk.bf16.mxu0 %vm1378_vm3, %v98_v23  ;;  %v11067_v23 = vld [vmem:[#allocation2 + $0x8] sm:$0xff] }
 0xd21   :  { %v7636_v14 = vpop.f32.mrb[24].mxu1 }
 0xd22   :  { %v10484_v47 = vpop.f32.mrb[25].mxu1 }
 0xd23   :  { %v7639_v11 = vpop.f32.mrb[26].mxu1  ;;  %v11068_v47 = vld [vmem:[#allocation2 + $0x18] sm:$0xff] }
 0xd24   :  { %v10485_v46 = vpop.f32.mrb[27].mxu1 }
 0xd26   :  { %10513 = vmatmul.mubr.msk.bf16.vlgmr.msra.gmra.mrb[244].mxu0 %vm271_vm2, %v7160_v50 }
 0xd27   :  { %10524 = vmatprep.mubr.msk.bf16.mxu0 %vm271_vm2, %v7930_v41  ;;  %10523 = vmatpush3.bf16.msra.mxu0 %v7963_v25 }
 0xd29   :  { %v7732_v38 = vpop.f32.mrb[28].mxu1 }
 0xd2a   :  { %v10496_v20 = vpop.f32.mrb[29].mxu1 }
 0xd2b   :  { %v7735_v40 = vpop.f32.mrb[30].mxu1 }
 0xd2c   :  { %v10497_v59 = vpop.f32.mrb[31].mxu1 }
 0xd2e   :  { %10525 = vmatmul.mubr.msk.bf16.vlgmr.msra.gmra.mrb[128].mxu0 %vm271_vm2, %v7931_v31 }
 0xda7   :  { %v7396_v8 = vpop.f32.mrb[224].mxu0 }
 0xda8   :  { %v7932_v2 = vpack.c.bf16 %v13441_v42, %v7396_v8  ;;  %v10454_v57 = vpop.f32.mrb[225].mxu0 }
 0xda9   :  { %v7399_v15 = vpop.f32.mrb[226].mxu0 }
 0xdaa   :  { %v10455_v39 = vpop.f32.mrb[227].mxu0  ;;  %10528 = vmatprep.mubr.msk.bf16.mxu0 %vm271_vm2, %v7932_v2  ;;  %v11069_v2 = vld [vmem:[#allocation2 + $0x20] sm:$0xff] }
 0xdad   :  { %v7828_v26 = vpop.f32.mrb[32].mxu1 }
 0xdae   :  { %v10508_v33 = vpop.f32.mrb[33].mxu1 }
 0xdaf   :  { %v7492_v41 = vpop.f32.mrb[228].mxu0  ;;  %v7831_v18 = vpop.f32.mrb[34].mxu1 }
 0xdb0   :  { %v7933_v53 = vpack.c.bf16 %v13447_v16, %v7492_v41  ;;  %v10466_v63 = vpop.f32.mrb[229].mxu0  ;;  %v10509_v13 = vpop.f32.mrb[35].mxu1  ;;  %v11071_v41 = vld [vmem:[#allocation2 + $0x28] sm:$0xff] }
 0xdb1   :  { %v7495_v30 = vpop.f32.mrb[230].mxu0  ;;  %v11072_v63 = vld [vmem:[#allocation2 + $0x38] sm:$0xff] }
 0xdb2   :  { %v10467_v17 = vpop.f32.mrb[231].mxu0  ;;  %10529 = vmatmul.mubr.msk.bf16.gmra.mrb[132].mxu0 %vm271_vm2, %v7933_v53 }
 0xdb7   :  { %v7588_v36 = vpop.f32.mrb[232].mxu0 }
 0xdb8   :  { %v7934_v1 = vpack.c.bf16 %v7636_v14, %v7588_v36  ;;  %v10478_v32 = vpop.f32.mrb[233].mxu0 }
 0xdb9   :  { %v7591_v31 = vpop.f32.mrb[234].mxu0 }
 0xdba   :  { %v10479_v44 = vpop.f32.mrb[235].mxu0  ;;  %10532 = vmatprep.mubr.msk.bf16.mxu0 %vm271_vm2, %v7934_v1 }
 0xde9   :  { %v7684_v35 = vpop.f32.mrb[236].mxu0 }
 0xdea   :  { %v7935_v61 = vpack.c.bf16 %v7732_v38, %v7684_v35  ;;  %v10490_v21 = vpop.f32.mrb[237].mxu0  ;;  %v7924_v43 = vpop.f32.mrb[36].mxu1 }
 0xdeb   :  { %v7687_v58 = vpop.f32.mrb[238].mxu0  ;;  %v10520_v42 = vpop.f32.mrb[37].mxu1  ;;  %v11073_v21 = vld [vmem:[#allocation2 + $0x40] sm:$0xff] }
 0xdec   :  { %v10491_v27 = vpop.f32.mrb[239].mxu0  ;;  %v7927_v48 = vpop.f32.mrb[38].mxu1  ;;  %10533 = vmatmul.mubr.msk.bf16.gmra.mrb[136].mxu0 %vm271_vm2, %v7935_v61 }
 0xded   :  { %v10521_v45 = vpop.f32.mrb[39].mxu1  ;;  %v11074_v27 = vld [vmem:[#allocation2 + $0x50] sm:$0xff] }
 0xdee   :  { %v11075_v45 = vld [vmem:[#allocation2 + $0x48] sm:$0xff] }
 0xdf1   :  { %v7780_v16 = vpop.f32.mrb[240].mxu0 }
 0xdf2   :  { %v7936_v56 = vpack.c.bf16 %v7828_v26, %v7780_v16  ;;  %v10502_v12 = vpop.f32.mrb[241].mxu0  ;;  %v11070_v26 = vld [vmem:[#allocation2 + $0x30] sm:$0xff] }
 0xdf3   :  { %v7783_v3 = vpop.f32.mrb[242].mxu0  ;;  %v11076_v12 = vld [vmem:[#allocation2 + $0x58] sm:$0xff] }
 0xdf4   :  { %v10503_v4 = vpop.f32.mrb[243].mxu0  ;;  %10536 = vmatprep.mubr.msk.bf16.mxu0 %vm271_vm2, %v7936_v56 }
 0xdf9   :  { %v7876_v28 = vpop.f32.mrb[244].mxu0 }
 0xdfa   :  { %v7937_v7 = vpack.c.bf16 %v7924_v43, %v7876_v28  ;;  %v10514_v24 = vpop.f32.mrb[245].mxu0 }
 0xdfb   :  { %v7879_v10 = vpop.f32.mrb[246].mxu0 }
 0xdfc   :  { %v10515_v55 = vpop.f32.mrb[247].mxu0  ;;  %10537 = vmatmul.mubr.msk.bf16.gmra.mrb[140].mxu0 %vm271_vm2, %v7937_v7 }
 0xe01   :  { %v10526_v37 = vpop.f32.mrb[128].mxu0 }
 0xe02   :  { %v7999_v22 = vpop.f32.mrb[129].mxu0  ;;  %v8087_v9 = vadd.f32 %v10526_v37, %v13489_v34 }
 0xe03   :  { %v8085_v51 = vadd.f32 %v13489_v34, %v7999_v22  ;;  %v10527_v6 = vpop.f32.mrb[130].mxu0 }
 0xe04   :  { %v8002_v60 = vpop.f32.mrb[131].mxu0  ;;  %v13496_v54 = vadd.f32 %v11066_v29, %v8087_v9  ;;  %v8088_v0 = vadd.f32 %v10527_v6, %v13489_v34  ;;  %v11077_v29 = vld [vmem:[#allocation2 + $0x60] sm:$0xff] }
 0xe05   :  { %v13493_v19 = vadd.f32 %v11065_v52, %v8085_v51  ;;  %v8086_v5 = vadd.f32 %v13489_v34, %v8002_v60 }
 0xe06   :  { %v13505_v11 = vadd.f32 %v11068_v47, %v8088_v0  ;;  %v8125_v46 = vsel %vm130_vm0, %v13496_v54, 0.0 }
 0xe07   :  { %v13499_v62 = vadd.f32 %v11067_v23, %v8086_v5  ;;  %v8119_v49 = vsel %vm130_vm0, %v13493_v19, 0.0 }
 0xe08   :  { %8120 = vadd.xlane.f32.xlu0 %v8119_v49  ;;  %v8128_v50 = vsel %vm130_vm0, %v13505_v11, 0.0 }
 0xe09   :  { %v8122_v14 = vsel %vm130_vm0, %v13499_v62, 0.0 }
 0xe0a   :  { %8123 = vadd.xlane.f32.xlu1 %v8122_v14 }
 0xe0c   :  { %8126 = vadd.xlane.f32.xlu0 %v8125_v46 }
 0xe10   :  { %8129 = vadd.xlane.f32.xlu0 %v8128_v50  ;;  %v11078_v50 = vld [vmem:[#allocation2 + $0x70] sm:$0xff] }
 0xe85   :  { %v10530_v25 = vpop.f32.mrb[132].mxu0 }
 0xe86   :  { %v8015_v38 = vpop.f32.mrb[133].mxu0  ;;  %v8091_v20 = vadd.f32 %v10530_v25, %v13489_v34 }
 0xe87   :  { %v8089_v40 = vadd.f32 %v13489_v34, %v8015_v38  ;;  %v10531_v59 = vpop.f32.mrb[134].mxu0  ;;  %v11079_v38 = vld [vmem:[#allocation2 + $0x68] sm:$0xff] }
 0xe88   :  { %v8018_v8 = vpop.f32.mrb[135].mxu0  ;;  %v8092_v15 = vadd.f32 %v10531_v59, %v13489_v34  ;;  %v13517_v33 = vadd.f32 %v11070_v26, %v8091_v20 }
 0xe89   :  { %v13513_v57 = vadd.f32 %v11069_v2, %v8089_v40  ;;  %v8090_v39 = vadd.f32 %v13489_v34, %v8018_v8 }
 0xe8a   :  { %v13523_v13 = vadd.f32 %v11072_v63, %v8092_v15  ;;  %v8137_v17 = vsel %vm130_vm0, %v13517_v33, 0.0 }
 0xe8b   :  { %v13519_v18 = vadd.f32 %v11071_v41, %v8090_v39  ;;  %v8131_v53 = vsel %vm130_vm0, %v13513_v57, 0.0 }
 0xe8c   :  { %8132 = vadd.xlane.f32.xlu1 %v8131_v53  ;;  %v8140_v36 = vsel %vm130_vm0, %v13523_v13, 0.0 }
 0xe8d   :  { %v8134_v30 = vsel %vm130_vm0, %v13519_v18, 0.0 }
 0xe8e   :  { %8135 = vadd.xlane.f32.xlu0 %v8134_v30 }
 0xe90   :  { %8138 = vadd.xlane.f32.xlu1 %v8137_v17 }
 0xe92   :  { %8141 = vadd.xlane.f32.xlu0 %v8140_v36 }
 0xe95   :  { %v8121_v28 = vpop.xlane.xlu0 %8120 }
 0xe96   :  { %v8168_v37 = vmul.f32 0.03125, %v8121_v28 }
 0xe97   :  { %v8124_v22 = vpop.xlane.xlu1 %8123 }
 0xe98   :  { %v8169_v5 = vmul.f32 0.03125, %v8124_v22  ;;  %v13558_v14 = vsub.f32 %v13493_v19, %v8168_v37 }
 0xe99   :  { %v8127_v10 = vpop.xlane.xlu0 %8126 }
 0xe9a   :  { %v8170_v46 = vmul.f32 0.03125, %v8127_v10  ;;  %v13567_v59 = vsub.f32 %v13499_v62, %v8169_v5  ;;  %v8200_v26 = vmul.f32 %v13558_v14, %v13558_v14 }
 0xe9c   :  { %v13574_v15 = vsub.f32 %v13496_v54, %v8170_v46  ;;  %v8201_v53 = vmul.f32 %v13567_v59, %v13567_v59  ;;  %v8216_v54 = vsel %vm130_vm0, %v8200_v26, 0.0 }
 0xe9d   :  { %v8130_v47 = vpop.xlane.xlu0 %8129 }
 0xe9e   :  { %v8171_v8 = vmul.f32 0.03125, %v8130_v47  ;;  %v8202_v63 = vmul.f32 %v13574_v15, %v13574_v15  ;;  %v8219_v30 = vsel %vm130_vm0, %v8201_v53, 0.0 }
 0xea0   :  { %v13581_v62 = vsub.f32 %v13505_v11, %v8171_v8  ;;  %v8222_v11 = vsel %vm130_vm0, %v8202_v63, 0.0 }
 0xea2   :  { %v8203_v17 = vmul.f32 %v13581_v62, %v13581_v62 }
 0xea4   :  { %v8225_v36 = vsel %vm130_vm0, %v8203_v17, 0.0 }
 0xebf   :  { %v10534_v1 = vpop.f32.mrb[136].mxu0 }
 0xec0   :  { %v8031_v32 = vpop.f32.mrb[137].mxu0  ;;  %v8095_v31 = vadd.f32 %v10534_v1, %v13489_v34  ;;  %v10659_v1 = vld [vmem:[%s14164_s8] sm:$0xff]  }
 0xec1   :  { %v8093_v44 = vadd.f32 %v13489_v34, %v8031_v32  ;;  %v10535_v35 = vpop.f32.mrb[138].mxu0  ;;  %10540 = vmatprep.subr.bf16.mxu1 %v10659_v1  ;;  %v10660_v32 = vld [vmem:[%s14164_s8 + $0x8] sm:$0xff]  }
 0xec2   :  { %v8034_v61 = vpop.f32.mrb[139].mxu0  ;;  %v8096_v58 = vadd.f32 %v10535_v35, %v13489_v34  ;;  %v13537_v48 = vadd.f32 %v11074_v27, %v8095_v31  ;;  %10541 = vmatpush3.bf16.msra.mxu1 %v10659_v1 }
 0xec3   :  { %v13533_v43 = vadd.f32 %v11073_v21, %v8093_v44  ;;  %v8094_v42 = vadd.f32 %v13489_v34, %v8034_v61  ;;  %10542 = vmatprep.subr.bf16.mxu1 %v10660_v32 }
 0xec4   :  { %v13543_v3 = vadd.f32 %v11076_v12, %v8096_v58  ;;  %v8149_v7 = vsel %vm130_vm0, %v13537_v48, 0.0 }
 0xec5   :  { %v13539_v16 = vadd.f32 %v11075_v45, %v8094_v42  ;;  %v8143_v56 = vsel %vm130_vm0, %v13533_v43, 0.0 }
 0xec6   :  { %8144 = vadd.xlane.f32.xlu1 %v8143_v56  ;;  %v8152_v24 = vsel %vm130_vm0, %v13543_v3, 0.0  ;;  %10543 = vmatpush3.bf16.msra.mxu1 %v10660_v32 }
 0xec7   :  { %v8146_v4 = vsel %vm130_vm0, %v13539_v16, 0.0 }
 0xec8   :  { %8147 = vadd.xlane.f32.xlu0 %v8146_v4 }
 0xeca   :  { %8150 = vadd.xlane.f32.xlu1 %v8149_v7 }
 0xecc   :  { %8153 = vadd.xlane.f32.xlu0 %v8152_v24 }
 0xecf   :  { %v10538_v55 = vpop.f32.mrb[140].mxu0 }
 0xed0   :  { %v8047_v9 = vpop.f32.mrb[141].mxu0  ;;  %v8099_v51 = vadd.f32 %v10538_v55, %v13489_v34 }
 0xed1   :  { %v8097_v6 = vadd.f32 %v13489_v34, %v8047_v9  ;;  %v10539_v60 = vpop.f32.mrb[142].mxu0 }
 0xed2   :  { %v8050_v52 = vpop.f32.mrb[143].mxu0  ;;  %v8100_v23 = vadd.f32 %v10539_v60, %v13489_v34  ;;  %v13560_v25 = vadd.f32 %v11078_v50, %v8099_v51 }
 0xed3   :  { %v13553_v0 = vadd.f32 %v11077_v29, %v8097_v6  ;;  %v8098_v49 = vadd.f32 %v13489_v34, %v8050_v52  ;;  %v11080_v34 = vld [vmem:[#allocation2 + $0x78] sm:$0xff] }
 0xed4   :  { %v13569_v2 = vadd.f32 %v11080_v34, %v8100_v23  ;;  %v8161_v39 = vsel %vm130_vm0, %v13560_v25, 0.0 }
 0xed5   :  { %v13562_v20 = vadd.f32 %v11079_v38, %v8098_v49  ;;  %v8155_v40 = vsel %vm130_vm0, %v13553_v0, 0.0 }
 0xed6   :  { %8156 = vadd.xlane.f32.xlu1 %v8155_v40  ;;  %v8164_v41 = vsel %vm130_vm0, %v13569_v2, 0.0 }
 0xed7   :  { %v8158_v19 = vsel %vm130_vm0, %v13562_v20, 0.0 }
 0xed8   :  { %8159 = vadd.xlane.f32.xlu0 %v8158_v19 }
 0xeda   :  { %8162 = vadd.xlane.f32.xlu1 %v8161_v39 }
 0xedc   :  { %8165 = vadd.xlane.f32.xlu0 %v8164_v41 }
 0xede   :  { %8217 = vadd.xlane.f32.xlu1 %v8216_v54 }
 0xee0   :  { %8220 = vadd.xlane.f32.xlu0 %v8219_v30 }
 0xee2   :  { %8223 = vadd.xlane.f32.xlu1 %v8222_v11 }
 0xee4   :  { %8226 = vadd.xlane.f32.xlu0 %v8225_v36 }
 0xf19   :  { %v8133_v31 = vpop.xlane.xlu1 %8132 }
 0xf1a   :  { %v8172_v44 = vmul.f32 0.03125, %v8133_v31 }
 0xf1b   :  { %v8136_v35 = vpop.xlane.xlu0 %8135 }
 0xf1c   :  { %v13602_v61 = vsub.f32 %v13513_v57, %v8172_v44  ;;  %v8173_v21 = vmul.f32 0.03125, %v8136_v35 }
 0xf1d   :  { %v8139_v58 = vpop.xlane.xlu1 %8138 }
 0xf1e   :  { %v13605_v42 = vsub.f32 %v13519_v18, %v8173_v21  ;;  %v8174_v27 = vmul.f32 0.03125, %v8139_v58  ;;  %v8204_v45 = vmul.f32 %v13602_v61, %v13602_v61 }
 0xf1f   :  { %v8142_v56 = vpop.xlane.xlu0 %8141 }
 0xf20   :  { %v13610_v12 = vsub.f32 %v13517_v33, %v8174_v27  ;;  %v8175_v4 = vmul.f32 0.03125, %v8142_v56  ;;  %v8228_v28 = vsel %vm130_vm0, %v8204_v45, 0.0  ;;  %v8205_v57 = vmul.f32 %v13605_v42, %v13605_v42 }
 0xf21   :  { %8229 = vadd.xlane.f32.xlu1 %v8228_v28 }
 0xf22   :  { %v13616_v7 = vsub.f32 %v13523_v13, %v8175_v4  ;;  %v8231_v18 = vsel %vm130_vm0, %v8205_v57, 0.0  ;;  %v8206_v24 = vmul.f32 %v13610_v12, %v13610_v12 }
 0xf23   :  { %8232 = vadd.xlane.f32.xlu0 %v8231_v18 }
 0xf24   :  { %v8234_v10 = vsel %vm130_vm0, %v8206_v24, 0.0  ;;  %v8207_v33 = vmul.f32 %v13616_v7, %v13616_v7 }
 0xf25   :  { %8235 = vadd.xlane.f32.xlu1 %v8234_v10  ;;  %v13676_v10 = vld [vmem:[%s14162_s6] ss:$0 sm:$0xff] }
 0xf26   :  { %v8237_v55 = vsel %vm130_vm0, %v8207_v33, 0.0 }
 0xf27   :  { %8238 = vadd.xlane.f32.xlu0 %v8237_v55 }
 0xf53   :  { %v8145_v37 = vpop.xlane.xlu1 %8144 }
 0xf54   :  { %v8176_v22 = vmul.f32 0.03125, %v8145_v37 }
 0xf55   :  { %v8148_v9 = vpop.xlane.xlu0 %8147 }
 0xf56   :  { %v13626_v13 = vsub.f32 %v13533_v43, %v8176_v22  ;;  %v8177_v51 = vmul.f32 0.03125, %v8148_v9 }
 0xf57   :  { %v8151_v6 = vpop.xlane.xlu1 %8150 }
 0xf58   :  { %v13629_v60 = vsub.f32 %v13539_v16, %v8177_v51  ;;  %v8178_v52 = vmul.f32 0.03125, %v8151_v6  ;;  %v8208_v5 = vmul.f32 %v13626_v13, %v13626_v13  ;;  %v13684_v51 = vld [vmem:[%s14163_s7] ss:$0 sm:$0xff] }
 0xf59   :  { %v8154_v29 = vpop.xlane.xlu0 %8153 }
 0xf5a   :  { %v13634_v23 = vsub.f32 %v13537_v48, %v8178_v52  ;;  %v8179_v49 = vmul.f32 0.03125, %v8154_v29  ;;  %v8240_v47 = vsel %vm130_vm0, %v8208_v5, 0.0  ;;  %v8209_v43 = vmul.f32 %v13629_v60, %v13629_v60 }
 0xf5b   :  { %8241 = vadd.xlane.f32.xlu1 %v8240_v47 }
 0xf5c   :  { %v13640_v46 = vsub.f32 %v13543_v3, %v8179_v49  ;;  %v8243_v16 = vsel %vm130_vm0, %v8209_v43, 0.0  ;;  %v8210_v50 = vmul.f32 %v13634_v23, %v13634_v23 }
 0xf5d   :  { %8244 = vadd.xlane.f32.xlu0 %v8243_v16 }
 0xf5e   :  { %v8246_v38 = vsel %vm130_vm0, %v8210_v50, 0.0  ;;  %v8211_v48 = vmul.f32 %v13640_v46, %v13640_v46 }
 0xf5f   :  { %8247 = vadd.xlane.f32.xlu1 %v8246_v38 }
 0xf60   :  { %v8249_v40 = vsel %vm130_vm0, %v8211_v48, 0.0 }
 0xf61   :  { %8250 = vadd.xlane.f32.xlu0 %v8249_v40 }
 0xf63   :  { %v8157_v8 = vpop.xlane.xlu1 %8156 }
 0xf64   :  { %v8180_v34 = vmul.f32 0.03125, %v8157_v8 }
 0xf65   :  { %v8160_v19 = vpop.xlane.xlu0 %8159 }
 0xf66   :  { %v13650_v3 = vsub.f32 %v13553_v0, %v8180_v34  ;;  %v8181_v39 = vmul.f32 0.03125, %v8160_v19 }
 0xf67   :  { %v8163_v26 = vpop.xlane.xlu1 %8162 }
 0xf68   :  { %v13653_v41 = vsub.f32 %v13562_v20, %v8181_v39  ;;  %v8182_v53 = vmul.f32 0.03125, %v8163_v26  ;;  %v8212_v54 = vmul.f32 %v13650_v3, %v13650_v3 }
 0xf69   :  { %v8166_v63 = vpop.xlane.xlu0 %8165 }
 0xf6a   :  { %v13658_v30 = vsub.f32 %v13560_v25, %v8182_v53  ;;  %v8183_v17 = vmul.f32 0.03125, %v8166_v63  ;;  %v8252_v11 = vsel %vm130_vm0, %v8212_v54, 0.0  ;;  %v8213_v0 = vmul.f32 %v13653_v41, %v13653_v41 }
 0xf6b   :  { %8253 = vadd.xlane.f32.xlu1 %v8252_v11  ;;  %v8218_v36 = vpop.xlane.xlu1 %8217 }
 0xf6c   :  { %v13664_v1 = vsub.f32 %v13569_v2, %v8183_v17  ;;  %v8264_v20 = vmul.f32 0.03125, %v8218_v36  ;;  %v8255_v32 = vsel %vm130_vm0, %v8213_v0, 0.0  ;;  %v8214_v31 = vmul.f32 %v13658_v30, %v13658_v30 }
 0xf6d   :  { %8256 = vadd.xlane.f32.xlu0 %v8255_v32  ;;  %v8221_v25 = vpop.xlane.xlu0 %8220 }
 0xf6e   :  { %v8280_v44 = vadd.f32 1e-05, %v8264_v20  ;;  %v8265_v35 = vmul.f32 0.03125, %v8221_v25  ;;  %v8258_v21 = vsel %vm130_vm0, %v8214_v31, 0.0  ;;  %v8215_v58 = vmul.f32 %v13664_v1, %v13664_v1 }
 0xf6f   :  { %8259 = vadd.xlane.f32.xlu1 %v8258_v21  ;;  %v8224_v27 = vpop.xlane.xlu1 %8223 }
 0xf70   :  { %10921 = vrsqrt.f32 %v8280_v44  ;;  %v8281_v2 = vadd.f32 1e-05, %v8265_v35  ;;  %v8266_v45 = vmul.f32 0.03125, %v8224_v27  ;;  %v8261_v56 = vsel %vm130_vm0, %v8215_v58, 0.0 }
 0xf71   :  { %8262 = vadd.xlane.f32.xlu0 %v8261_v56  ;;  %v8227_v4 = vpop.xlane.xlu0 %8226 }
 0xf72   :  { %10923 = vrsqrt.f32 %v8281_v2  ;;  %v8282_v28 = vadd.f32 1e-05, %v8266_v45  ;;  %v8267_v57 = vmul.f32 0.03125, %v8227_v4 }
 0xf74   :  { %10925 = vrsqrt.f32 %v8282_v28  ;;  %v8283_v18 = vadd.f32 1e-05, %v8267_v57 }
 0xf76   :  { %10927 = vrsqrt.f32 %v8283_v18 }
 0xf7a   :  { %v10922_v24 = vpop.eup %10921 }
 0xf7b   :  { %v8312_v33 = vmul.f32 %v10922_v24, %v13558_v14 }
 0xf7c   :  { %v10924_v55 = vpop.eup %10923 }
 0xf7d   :  { %v8313_v37 = vmul.f32 %v10924_v55, %v13567_v59  ;;  %v8334_v22 = vmul.f32 %v13676_v10, %v8312_v33 }
 0xf7e   :  { %v10926_v9 = vpop.eup %10925 }
 0xf7f   :  { %v8314_v6 = vmul.f32 %v10926_v9, %v13574_v15  ;;  %v8335_v52 = vmul.f32 %v13676_v10, %v8313_v37  ;;  %v13691_v49 = vadd.f32 %v13684_v51, %v8334_v22  ;;  %v10661_v9 = vld [vmem:[%s14166_s10] sm:$0xff]  }
 0xf80   :  { %v10928_v5 = vpop.eup %10927  ;;  %10560 = vmatprep.subr.bf16.mxu0 %v10661_v9 }
 0xf81   :  { %v8336_v29 = vmul.f32 %v13676_v10, %v8314_v6  ;;  %v8315_v14 = vmul.f32 %v10928_v5, %v13581_v62  ;;  %v13694_v59 = vadd.f32 %v13684_v51, %v8335_v52  ;;  %10561 = vmatpush3.bf16.msra.mxu0 %v10661_v9  ;;  %v10662_v52 = vld [vmem:[%s14166_s10 + $0x8] sm:$0xff]  }
 0xf82   :  { %10562 = vmatprep.subr.bf16.mxu0 %v10662_v52 }
 0xf83   :  { %v8337_v47 = vmul.f32 %v13676_v10, %v8315_v14  ;;  %v8372_v43 = vpack.c.bf16 %v13694_v59, %v13691_v49  ;;  %v13700_v15 = vadd.f32 %v13684_v51, %v8336_v29 }
 0xf85   :  { %v13703_v16 = vadd.f32 %v13684_v51, %v8337_v47  ;;  %10544 = vmatprep.mubr.msk.bf16.mxu1 %vm130_vm0, %v8372_v43  ;;  %10563 = vmatpush3.bf16.msra.mxu0 %v10662_v52  ;;  %v10663_v47 = vld [vmem:[%s14166_s10 + $0x10] sm:$0xff]  }
 0xf86   :  { %10564 = vmatprep.subr.bf16.mxu0 %v10663_v47 }
 0xf87   :  { %v8373_v62 = vpack.c.bf16 %v13703_v16, %v13700_v15 }
 0xf89   :  { %10545 = vmatmul.mubr.msk.bf16.vlgmr.msra.gmra.mrb[40].mxu1 %vm130_vm0, %v8373_v62  ;;  %10565 = vmatpush3.bf16.msra.mxu0 %v10663_v47 }
 0xfae   :  { %v8230_v50 = vpop.xlane.xlu1 %8229 }
 0xfaf   :  { %v8268_v38 = vmul.f32 0.03125, %v8230_v50 }
 0xfb0   :  { %v8233_v48 = vpop.xlane.xlu0 %8232 }
 0xfb1   :  { %v8284_v40 = vadd.f32 1e-05, %v8268_v38  ;;  %v8269_v8 = vmul.f32 0.03125, %v8233_v48 }
 0xfb2   :  { %v8236_v34 = vpop.xlane.xlu1 %8235 }
 0xfb3   :  { %10929 = vrsqrt.f32 %v8284_v40  ;;  %v8285_v19 = vadd.f32 1e-05, %v8269_v8  ;;  %v8270_v39 = vmul.f32 0.03125, %v8236_v34 }
 0xfb4   :  { %v8239_v26 = vpop.xlane.xlu0 %8238 }
 0xfb5   :  { %10931 = vrsqrt.f32 %v8285_v19  ;;  %v8286_v53 = vadd.f32 1e-05, %v8270_v39  ;;  %v8271_v54 = vmul.f32 0.03125, %v8239_v26  ;;  %v10664_v26 = vld [vmem:[%s14166_s10 + $0x18] sm:$0xff]  }
 0xfb6   :  { %10566 = vmatprep.subr.bf16.mxu0 %v10664_v26 }
 0xfb7   :  { %10933 = vrsqrt.f32 %v8286_v53  ;;  %v8287_v63 = vadd.f32 1e-05, %v8271_v54  ;;  %10567 = vmatpush3.bf16.msra.mxu0 %v10664_v26 }
 0xfb9   :  { %10935 = vrsqrt.f32 %v8287_v63 }
 0xfbd   :  { %v10930_v17 = vpop.eup %10929 }
 0xfbe   :  { %v8316_v11 = vmul.f32 %v10930_v17, %v13602_v61 }
 0xfbf   :  { %v10932_v0 = vpop.eup %10931 }
 0xfc0   :  { %v8317_v36 = vmul.f32 %v10932_v0, %v13605_v42  ;;  %v8338_v20 = vmul.f32 %v13676_v10, %v8316_v11 }
 0xfc1   :  { %v10934_v32 = vpop.eup %10933 }
 0xfc2   :  { %v8318_v31 = vmul.f32 %v10934_v32, %v13610_v12  ;;  %v8339_v25 = vmul.f32 %v13676_v10, %v8317_v36  ;;  %v13717_v58 = vadd.f32 %v13684_v51, %v8338_v20 }
 0xfc3   :  { %v10936_v44 = vpop.eup %10935 }
 0xfc4   :  { %v8340_v35 = vmul.f32 %v13676_v10, %v8318_v31  ;;  %v8319_v21 = vmul.f32 %v10936_v44, %v13616_v7  ;;  %v13720_v61 = vadd.f32 %v13684_v51, %v8339_v25 }
 0xfc6   :  { %v8341_v42 = vmul.f32 %v13676_v10, %v8319_v21  ;;  %v8374_v27 = vpack.c.bf16 %v13720_v61, %v13717_v58  ;;  %v13726_v12 = vadd.f32 %v13684_v51, %v8340_v35 }
 0xfc8   :  { %v13729_v2 = vadd.f32 %v13684_v51, %v8341_v42  ;;  %10548 = vmatprep.mubr.msk.bf16.mxu1 %vm130_vm0, %v8374_v27 }
 0xfca   :  { %v8375_v7 = vpack.c.bf16 %v13729_v2, %v13726_v12 }
 0xfcc   :  { %10549 = vmatmul.mubr.msk.bf16.gmra.mrb[44].mxu1 %vm130_vm0, %v8375_v7 }
 0xfe8   :  { %v8242_v45 = vpop.xlane.xlu1 %8241 }
 0xfe9   :  { %v8272_v56 = vmul.f32 0.03125, %v8242_v45 }
 0xfea   :  { %v8245_v4 = vpop.xlane.xlu0 %8244 }
 0xfeb   :  { %v8288_v28 = vadd.f32 1e-05, %v8272_v56  ;;  %v8273_v57 = vmul.f32 0.03125, %v8245_v4 }
 0xfec   :  { %v8248_v18 = vpop.xlane.xlu1 %8247 }
 0xfed   :  { %10937 = vrsqrt.f32 %v8288_v28  ;;  %v8289_v24 = vadd.f32 1e-05, %v8273_v57  ;;  %v8274_v33 = vmul.f32 0.03125, %v8248_v18 }
 0xfee   :  { %v8251_v55 = vpop.xlane.xlu0 %8250 }
 0xfef   :  { %10939 = vrsqrt.f32 %v8289_v24  ;;  %v8290_v37 = vadd.f32 1e-05, %v8274_v33  ;;  %v8275_v22 = vmul.f32 0.03125, %v8251_v55 }
 0xff1   :  { %10941 = vrsqrt.f32 %v8290_v37  ;;  %v8291_v6 = vadd.f32 1e-05, %v8275_v22 }
 0xff3   :  { %10943 = vrsqrt.f32 %v8291_v6 }
 0xff7   :  { %v10938_v5 = vpop.eup %10937 }
 0xff8   :  { %v8320_v29 = vmul.f32 %v10938_v5, %v13626_v13  ;;  %v8254_v14 = vpop.xlane.xlu1 %8253 }
 0xff9   :  { %v10940_v43 = vpop.eup %10939  ;;  %v8276_v62 = vmul.f32 0.03125, %v8254_v14 }
 0xffa   :  { %v8321_v50 = vmul.f32 %v10940_v43, %v13629_v60  ;;  %v8257_v38 = vpop.xlane.xlu0 %8256  ;;  %v8342_v48 = vmul.f32 %v13676_v10, %v8320_v29 }
 0xffb   :  { %v10942_v40 = vpop.eup %10941  ;;  %v8292_v8 = vadd.f32 1e-05, %v8276_v62  ;;  %v8277_v34 = vmul.f32 0.03125, %v8257_v38 }
 0xffc   :  { %v8322_v19 = vmul.f32 %v10942_v40, %v13634_v23  ;;  %v8260_v13 = vpop.xlane.xlu1 %8259  ;;  %v8343_v39 = vmul.f32 %v13676_v10, %v8321_v50  ;;  %v13755_v0 = vadd.f32 %v13684_v51, %v8342_v48 }
 0xffd   :  { %v10944_v53 = vpop.eup %10943  ;;  %10945 = vrsqrt.f32 %v8292_v8  ;;  %v8293_v60 = vadd.f32 1e-05, %v8277_v34  ;;  %v8278_v54 = vmul.f32 0.03125, %v8260_v13 }
 0xffe   :  { %v8344_v63 = vmul.f32 %v13676_v10, %v8322_v19  ;;  %v8323_v17 = vmul.f32 %v10944_v53, %v13640_v46  ;;  %v8263_v11 = vpop.xlane.xlu0 %8262  ;;  %v13758_v23 = vadd.f32 %v13684_v51, %v8343_v39 }
 0xfff   :  { %10947 = vrsqrt.f32 %v8293_v60  ;;  %v8294_v36 = vadd.f32 1e-05, %v8278_v54  ;;  %v8279_v20 = vmul.f32 0.03125, %v8263_v11 }
0x1000   :  { %v8345_v32 = vmul.f32 %v13676_v10, %v8323_v17  ;;  %v8376_v31 = vpack.c.bf16 %v13758_v23, %v13755_v0  ;;  %v13764_v46 = vadd.f32 %v13684_v51, %v8344_v63 }
0x1001   :  { %10949 = vrsqrt.f32 %v8294_v36  ;;  %v8295_v25 = vadd.f32 1e-05, %v8279_v20 }
0x1002   :  { %v13767_v44 = vadd.f32 %v13684_v51, %v8345_v32  ;;  %10552 = vmatprep.mubr.msk.bf16.mxu1 %vm130_vm0, %v8376_v31 }
0x1003   :  { %10951 = vrsqrt.f32 %v8295_v25 }
0x1004   :  { %v8377_v35 = vpack.c.bf16 %v13767_v44, %v13764_v46 }
0x1006   :  { %10553 = vmatmul.mubr.msk.bf16.gmra.mrb[48].mxu1 %vm130_vm0, %v8377_v35 }
0x1007   :  { %v10946_v21 = vpop.eup %10945 }
0x1008   :  { %v8324_v42 = vmul.f32 %v10946_v21, %v13650_v3 }
0x1009   :  { %v10948_v27 = vpop.eup %10947 }
0x100a   :  { %v8325_v7 = vmul.f32 %v10948_v27, %v13653_v41  ;;  %v8346_v45 = vmul.f32 %v13676_v10, %v8324_v42 }
0x100b   :  { %v10950_v56 = vpop.eup %10949 }
0x100c   :  { %v8326_v4 = vmul.f32 %v10950_v56, %v13658_v30  ;;  %v8347_v28 = vmul.f32 %v13676_v10, %v8325_v7  ;;  %v13781_v33 = vadd.f32 %v13684_v51, %v8346_v45 }
0x100d   :  { %v10952_v57 = vpop.eup %10951 }
0x100e   :  { %v8348_v18 = vmul.f32 %v13676_v10, %v8326_v4  ;;  %v8327_v24 = vmul.f32 %v10952_v57, %v13664_v1  ;;  %v13784_v3 = vadd.f32 %v13684_v51, %v8347_v28 }
0x1010   :  { %v8349_v41 = vmul.f32 %v13676_v10, %v8327_v24  ;;  %v8378_v55 = vpack.c.bf16 %v13784_v3, %v13781_v33  ;;  %v13790_v30 = vadd.f32 %v13684_v51, %v8348_v18  ;;  %v13802_v10 = vld [vmem:[%s14165_s9] ss:$0 sm:$0xff] }
0x1012   :  { %v13793_v37 = vadd.f32 %v13684_v51, %v8349_v41  ;;  %10556 = vmatprep.mubr.msk.bf16.mxu1 %vm130_vm0, %v8378_v55 }
0x1014   :  { %v8379_v1 = vpack.c.bf16 %v13793_v37, %v13790_v30 }
0x1016   :  { %10557 = vmatmul.mubr.msk.bf16.gmra.mrb[52].mxu1 %vm130_vm0, %v8379_v1 }
0x105c   :  { %v10546_v22 = vpop.f32.mrb[40].mxu1 }
0x105d   :  { %v8470_v9 = vadd.f32 %v10546_v22, %v13802_v10  ;;  %v8461_v6 = vpop.f32.mrb[41].mxu1 }
0x105e   :  { %v8462_v52 = vadd.f32 %v13802_v10, %v8461_v6  ;;  %v10547_v51 = vpop.f32.mrb[42].mxu1 }
0x105f   :  { %v8526_v5 = vmul.f32 %v8470_v9, %v8470_v9  ;;  %v8473_v29 = vadd.f32 %v10547_v51, %v13802_v10  ;;  %v8464_v14 = vpop.f32.mrb[43].mxu1 }
0x1060   :  { %v8524_v47 = vmul.f32 %v8462_v52, %v8462_v52  ;;  %v8465_v43 = vadd.f32 %v13802_v10, %v8464_v14 }
0x1061   :  { %v8542_v62 = vmul.f32 %v8526_v5, %v8470_v9  ;;  %v8527_v50 = vmul.f32 %v8473_v29, %v8473_v29 }
0x1062   :  { %v8540_v38 = vmul.f32 %v8524_v47, %v8462_v52  ;;  %v8525_v48 = vmul.f32 %v8465_v43, %v8465_v43 }
0x1063   :  { %v8558_v40 = vmul.f32 0.044715, %v8542_v62  ;;  %v8543_v8 = vmul.f32 %v8527_v50, %v8473_v29 }
0x1064   :  { %v8556_v34 = vmul.f32 0.044715, %v8540_v38  ;;  %v8541_v19 = vmul.f32 %v8525_v48, %v8465_v43 }
0x1065   :  { %v8574_v13 = vadd.f32 %v8558_v40, %v8470_v9  ;;  %v8559_v39 = vmul.f32 0.044715, %v8543_v8 }
0x1066   :  { %v8572_v26 = vadd.f32 %v8556_v34, %v8462_v52  ;;  %v8557_v53 = vmul.f32 0.044715, %v8541_v19 }
0x1067   :  { %v8590_v60 = vmul.f32 0.7978846, %v8574_v13  ;;  %v8575_v54 = vadd.f32 %v8559_v39, %v8473_v29 }
0x1068   :  { %v8588_v63 = vmul.f32 0.7978846, %v8572_v26  ;;  %v8573_v17 = vadd.f32 %v8557_v53, %v8465_v43 }
0x1069   :  { %10953 = vtanh.f32 %v8590_v60  ;;  %v8591_v11 = vmul.f32 0.7978846, %v8575_v54 }
0x106a   :  { %10955 = vtanh.f32 %v8588_v63  ;;  %v8589_v36 = vmul.f32 0.7978846, %v8573_v17 }
0x106b   :  { %10957 = vtanh.f32 %v8591_v11 }
0x106c   :  { %10959 = vtanh.f32 %v8589_v36 }
0x1073   :  { %v10954_v20 = vpop.eup %10953 }
0x1074   :  { %v10956_v32 = vpop.eup %10955  ;;  %v8622_v31 = vadd.f32 1.0, %v10954_v20 }
0x1075   :  { %v10958_v25 = vpop.eup %10957  ;;  %v8620_v35 = vadd.f32 1.0, %v10956_v32 }
0x1076   :  { %v10960_v21 = vpop.eup %10959  ;;  %v8638_v42 = vmul.f32 0.5, %v8622_v31  ;;  %v8623_v27 = vadd.f32 1.0, %v10958_v25 }
0x1077   :  { %v8636_v7 = vmul.f32 0.5, %v8620_v35  ;;  %v8621_v45 = vadd.f32 1.0, %v10960_v21 }
0x1078   :  { %v8639_v56 = vmul.f32 0.5, %v8623_v27  ;;  %v8654_v28 = vmul.f32 %v8638_v42, %v8470_v9 }
0x1079   :  { %v8637_v4 = vmul.f32 0.5, %v8621_v45  ;;  %v8652_v18 = vmul.f32 %v8636_v7, %v8462_v52 }
0x107a   :  { %v8655_v57 = vmul.f32 %v8639_v56, %v8473_v29 }
0x107b   :  { %v8653_v24 = vmul.f32 %v8637_v4, %v8465_v43 }
0x107c   :  { %v8669_v41 = vpack.c.bf16 %v8655_v57, %v8654_v28 }
0x107d   :  { %v8668_v55 = vpack.c.bf16 %v8653_v24, %v8652_v18 }
0x107f   :  { %10568 = vmatprep.mubr.msk.bf16.mxu0 %vm8715_vm4, %v8668_v55 }
0x1080   :  { %10569 = vmatmul.mubr.msk.bf16.vlgmr.msra.gmra.mrb[248].mxu0 %vm8715_vm4, %v8669_v41 }
0x109f   :  { %v10550_v1 = vpop.f32.mrb[44].mxu1 }
0x10a0   :  { %v8486_v22 = vadd.f32 %v10550_v1, %v13802_v10  ;;  %v8477_v6 = vpop.f32.mrb[45].mxu1 }
0x10a1   :  { %v8478_v51 = vadd.f32 %v13802_v10, %v8477_v6  ;;  %v10551_v5 = vpop.f32.mrb[46].mxu1 }
0x10a2   :  { %v8530_v14 = vmul.f32 %v8486_v22, %v8486_v22  ;;  %v8489_v9 = vadd.f32 %v10551_v5, %v13802_v10  ;;  %v8480_v29 = vpop.f32.mrb[47].mxu1 }
0x10a3   :  { %v8528_v52 = vmul.f32 %v8478_v51, %v8478_v51  ;;  %v8481_v47 = vadd.f32 %v13802_v10, %v8480_v29 }
0x10a4   :  { %v8546_v43 = vmul.f32 %v8530_v14, %v8486_v22  ;;  %v8531_v62 = vmul.f32 %v8489_v9, %v8489_v9 }
0x10a5   :  { %v8544_v50 = vmul.f32 %v8528_v52, %v8478_v51  ;;  %v8529_v38 = vmul.f32 %v8481_v47, %v8481_v47 }
0x10a6   :  { %v8562_v48 = vmul.f32 0.044715, %v8546_v43  ;;  %v8547_v40 = vmul.f32 %v8531_v62, %v8489_v9 }
0x10a7   :  { %v8560_v8 = vmul.f32 0.044715, %v8544_v50  ;;  %v8545_v34 = vmul.f32 %v8529_v38, %v8481_v47 }
0x10a8   :  { %v8578_v19 = vadd.f32 %v8562_v48, %v8486_v22  ;;  %v8563_v13 = vmul.f32 0.044715, %v8547_v40 }
0x10a9   :  { %v8576_v39 = vadd.f32 %v8560_v8, %v8478_v51  ;;  %v8561_v26 = vmul.f32 0.044715, %v8545_v34 }
0x10aa   :  { %v8594_v53 = vmul.f32 0.7978846, %v8578_v19  ;;  %v8579_v60 = vadd.f32 %v8563_v13, %v8489_v9 }
0x10ab   :  { %v8592_v54 = vmul.f32 0.7978846, %v8576_v39  ;;  %v8577_v63 = vadd.f32 %v8561_v26, %v8481_v47 }
0x10ac   :  { %10961 = vtanh.f32 %v8594_v53  ;;  %v8595_v17 = vmul.f32 0.7978846, %v8579_v60 }
0x10ad   :  { %10963 = vtanh.f32 %v8592_v54  ;;  %v8593_v11 = vmul.f32 0.7978846, %v8577_v63 }
0x10ae   :  { %10965 = vtanh.f32 %v8595_v17 }
0x10af   :  { %10967 = vtanh.f32 %v8593_v11 }
0x10b6   :  { %v10962_v36 = vpop.eup %10961 }
0x10b7   :  { %v10964_v20 = vpop.eup %10963  ;;  %v8626_v32 = vadd.f32 1.0, %v10962_v36 }
0x10b8   :  { %v10966_v31 = vpop.eup %10965  ;;  %v8624_v25 = vadd.f32 1.0, %v10964_v20 }
0x10b9   :  { %v10968_v35 = vpop.eup %10967  ;;  %v8642_v21 = vmul.f32 0.5, %v8626_v32  ;;  %v8627_v42 = vadd.f32 1.0, %v10966_v31 }
0x10ba   :  { %v8640_v27 = vmul.f32 0.5, %v8624_v25  ;;  %v8625_v7 = vadd.f32 1.0, %v10968_v35 }
0x10bb   :  { %v8643_v45 = vmul.f32 0.5, %v8627_v42  ;;  %v8658_v4 = vmul.f32 %v8642_v21, %v8486_v22 }
0x10bc   :  { %v8641_v56 = vmul.f32 0.5, %v8625_v7  ;;  %v8656_v57 = vmul.f32 %v8640_v27, %v8478_v51 }
0x10bd   :  { %v8659_v28 = vmul.f32 %v8643_v45, %v8489_v9 }
0x10be   :  { %v8657_v18 = vmul.f32 %v8641_v56, %v8481_v47 }
0x10bf   :  { %v8671_v24 = vpack.c.bf16 %v8659_v28, %v8658_v4 }
0x10c0   :  { %v8670_v41 = vpack.c.bf16 %v8657_v18, %v8656_v57 }
0x10c2   :  { %10572 = vmatprep.mubr.msk.bf16.mxu0 %vm8715_vm4, %v8670_v41 }
0x10c3   :  { %10573 = vmatmul.mubr.msk.bf16.gmra.mrb[252].mxu0 %vm8715_vm4, %v8671_v24 }
0x10d9   :  { %v10554_v55 = vpop.f32.mrb[48].mxu1 }
0x10da   :  { %v13817_v1 = vadd.f32 %v10554_v55, %v13802_v10  ;;  %v8493_v6 = vpop.f32.mrb[49].mxu1 }
0x10db   :  { %v13820_v5 = vadd.f32 %v13802_v10, %v8493_v6  ;;  %v10555_v14 = vpop.f32.mrb[50].mxu1 }
0x10dc   :  { %v8534_v22 = vmul.f32 %v13817_v1, %v13817_v1  ;;  %v13825_v51 = vadd.f32 %v10555_v14, %v13802_v10  ;;  %v8496_v9 = vpop.f32.mrb[51].mxu1 }
0x10dd   :  { %v8532_v29 = vmul.f32 %v13820_v5, %v13820_v5  ;;  %v13830_v52 = vadd.f32 %v13802_v10, %v8496_v9 }
0x10de   :  { %v8550_v47 = vmul.f32 %v8534_v22, %v13817_v1  ;;  %v8535_v43 = vmul.f32 %v13825_v51, %v13825_v51 }
0x10df   :  { %v8548_v62 = vmul.f32 %v8532_v29, %v13820_v5  ;;  %v8533_v50 = vmul.f32 %v13830_v52, %v13830_v52 }
0x10e0   :  { %v8566_v38 = vmul.f32 0.044715, %v8550_v47  ;;  %v8551_v48 = vmul.f32 %v8535_v43, %v13825_v51 }
0x10e1   :  { %v8564_v40 = vmul.f32 0.044715, %v8548_v62  ;;  %v8549_v8 = vmul.f32 %v8533_v50, %v13830_v52 }
0x10e2   :  { %v8582_v34 = vadd.f32 %v8566_v38, %v13817_v1  ;;  %v8567_v19 = vmul.f32 0.044715, %v8551_v48 }
0x10e3   :  { %v8580_v13 = vadd.f32 %v8564_v40, %v13820_v5  ;;  %v8565_v39 = vmul.f32 0.044715, %v8549_v8 }
0x10e4   :  { %v8598_v26 = vmul.f32 0.7978846, %v8582_v34  ;;  %v8583_v53 = vadd.f32 %v8567_v19, %v13825_v51 }
0x10e5   :  { %v8596_v60 = vmul.f32 0.7978846, %v8580_v13  ;;  %v8581_v54 = vadd.f32 %v8565_v39, %v13830_v52 }
0x10e6   :  { %10969 = vtanh.f32 %v8598_v26  ;;  %v8599_v63 = vmul.f32 0.7978846, %v8583_v53 }
0x10e7   :  { %10971 = vtanh.f32 %v8596_v60  ;;  %v8597_v17 = vmul.f32 0.7978846, %v8581_v54 }
0x10e8   :  { %10973 = vtanh.f32 %v8599_v63 }
0x10e9   :  { %10975 = vtanh.f32 %v8597_v17  ;;  %v10558_v11 = vpop.f32.mrb[52].mxu1 }
0x10ea   :  { %v13845_v36 = vadd.f32 %v10558_v11, %v13802_v10  ;;  %v8509_v20 = vpop.f32.mrb[53].mxu1 }
0x10eb   :  { %v13848_v32 = vadd.f32 %v13802_v10, %v8509_v20  ;;  %v10559_v31 = vpop.f32.mrb[54].mxu1 }
0x10ec   :  { %v8538_v25 = vmul.f32 %v13845_v36, %v13845_v36  ;;  %v8521_v35 = vadd.f32 %v10559_v31, %v13802_v10  ;;  %v8512_v21 = vpop.f32.mrb[55].mxu1 }
0x10ed   :  { %v8536_v42 = vmul.f32 %v13848_v32, %v13848_v32  ;;  %v8513_v27 = vadd.f32 %v13802_v10, %v8512_v21 }
0x10ee   :  { %v8554_v7 = vmul.f32 %v8538_v25, %v13845_v36  ;;  %v8539_v45 = vmul.f32 %v8521_v35, %v8521_v35 }
0x10ef   :  { %v8552_v56 = vmul.f32 %v8536_v42, %v13848_v32  ;;  %v8537_v4 = vmul.f32 %v8513_v27, %v8513_v27 }
0x10f0   :  { %v10970_v28 = vpop.eup %10969  ;;  %v8570_v57 = vmul.f32 0.044715, %v8554_v7  ;;  %v8555_v18 = vmul.f32 %v8539_v45, %v8521_v35 }
0x10f1   :  { %v10972_v24 = vpop.eup %10971  ;;  %v8630_v41 = vadd.f32 1.0, %v10970_v28  ;;  %v8568_v55 = vmul.f32 0.044715, %v8552_v56  ;;  %v8553_v6 = vmul.f32 %v8537_v4, %v8513_v27 }
0x10f2   :  { %v10974_v14 = vpop.eup %10973  ;;  %v8628_v22 = vadd.f32 1.0, %v10972_v24  ;;  %v8586_v9 = vadd.f32 %v8570_v57, %v13845_v36  ;;  %v8571_v29 = vmul.f32 0.044715, %v8555_v18 }
0x10f3   :  { %v10976_v47 = vpop.eup %10975  ;;  %v8646_v10 = vmul.f32 0.5, %v8630_v41  ;;  %v8631_v43 = vadd.f32 1.0, %v10974_v14  ;;  %v8584_v62 = vadd.f32 %v8568_v55, %v13848_v32  ;;  %v8569_v50 = vmul.f32 0.044715, %v8553_v6  ;;  %v13873_v6 = vld [vmem:[%s14167_s11] ss:$0 sm:$0xff] }
0x10f4   :  { %v8644_v38 = vmul.f32 0.5, %v8628_v22  ;;  %v8629_v48 = vadd.f32 1.0, %v10976_v47  ;;  %v8602_v40 = vmul.f32 0.7978846, %v8586_v9  ;;  %v8587_v8 = vadd.f32 %v8571_v29, %v8521_v35 }
0x10f5   :  { %v8647_v34 = vmul.f32 0.5, %v8631_v43  ;;  %v8600_v19 = vmul.f32 0.7978846, %v8584_v62  ;;  %v8585_v13 = vadd.f32 %v8569_v50, %v8513_v27  ;;  %v8662_v53 = vmul.f32 %v8646_v10, %v13817_v1 }
0x10f6   :  { %v8645_v39 = vmul.f32 0.5, %v8629_v48  ;;  %10977 = vtanh.f32 %v8602_v40  ;;  %v8603_v26 = vmul.f32 0.7978846, %v8587_v8  ;;  %v8660_v63 = vmul.f32 %v8644_v38, %v13820_v5 }
0x10f7   :  { %v8663_v60 = vmul.f32 %v8647_v34, %v13825_v51  ;;  %10979 = vtanh.f32 %v8600_v19  ;;  %v8601_v54 = vmul.f32 0.7978846, %v8585_v13 }
0x10f8   :  { %v8661_v17 = vmul.f32 %v8645_v39, %v13830_v52  ;;  %10981 = vtanh.f32 %v8603_v26 }
0x10f9   :  { %v8673_v11 = vpack.c.bf16 %v8663_v60, %v8662_v53  ;;  %10983 = vtanh.f32 %v8601_v54 }
0x10fa   :  { %v8672_v20 = vpack.c.bf16 %v8661_v17, %v8660_v63 }
0x10fc   :  { %10576 = vmatprep.mubr.msk.bf16.mxu0 %vm8715_vm4, %v8672_v20 }
0x10fd   :  { %10577 = vmatmul.mubr.msk.bf16.gmra.mrb[0].mxu0 %vm8715_vm4, %v8673_v11 }
0x1100   :  { %v10978_v31 = vpop.eup %10977 }
0x1101   :  { %v10980_v25 = vpop.eup %10979  ;;  %v8634_v21 = vadd.f32 1.0, %v10978_v31 }
0x1102   :  { %v10982_v1 = vpop.eup %10981  ;;  %v8632_v42 = vadd.f32 1.0, %v10980_v25 }
0x1103   :  { %v10984_v51 = vpop.eup %10983  ;;  %v8650_v7 = vmul.f32 0.5, %v8634_v21  ;;  %v8635_v45 = vadd.f32 1.0, %v10982_v1 }
0x1104   :  { %v8648_v56 = vmul.f32 0.5, %v8632_v42  ;;  %v8633_v5 = vadd.f32 1.0, %v10984_v51 }
0x1105   :  { %v8651_v4 = vmul.f32 0.5, %v8635_v45  ;;  %v8666_v28 = vmul.f32 %v8650_v7, %v13845_v36 }
0x1106   :  { %v8649_v52 = vmul.f32 0.5, %v8633_v5  ;;  %v8664_v18 = vmul.f32 %v8648_v56, %v13848_v32 }
0x1107   :  { %v8667_v57 = vmul.f32 %v8651_v4, %v8521_v35 }
0x1108   :  { %v8665_v24 = vmul.f32 %v8649_v52, %v8513_v27 }
0x1109   :  { %v8675_v41 = vpack.c.bf16 %v8667_v57, %v8666_v28 }
0x110a   :  { %v8674_v55 = vpack.c.bf16 %v8665_v24, %v8664_v18 }
0x110c   :  { %10580 = vmatprep.mubr.msk.bf16.mxu0 %vm8715_vm4, %v8674_v55 }
0x110d   :  { %10581 = vmatmul.mubr.msk.bf16.gmra.mrb[4].mxu0 %vm8715_vm4, %v8675_v41 }
0x1153   :  { %v10570_v14 = vpop.f32.mrb[248].mxu0 }
0x1154   :  { %v8783_v22 = vadd.f32 %v10570_v14, %v13873_v6  ;;  %v8774_v9 = vpop.f32.mrb[249].mxu0 }
0x1155   :  { %v8775_v36 = vadd.f32 %v13873_v6, %v8774_v9  ;;  %v10571_v35 = vpop.f32.mrb[250].mxu0 }
0x1156   :  { %v13878_v32 = vadd.f32 %v8783_v22, %v13700_v15  ;;  %v8786_v27 = vadd.f32 %v10571_v35, %v13873_v6  ;;  %v8777_v29 = vpop.f32.mrb[251].mxu0 }
0x1157   :  { %v8778_v47 = vadd.f32 %v13873_v6, %v8777_v29  ;;  %v13883_v10 = vadd.f32 %v8775_v36, %v13691_v49 }
0x1158   :  { %v13886_v43 = vadd.f32 %v8786_v27, %v13703_v16  ;;  %v8861_v62 = vsel %vm130_vm0, %v13878_v32, 0.0 }
0x1159   :  { %8862 = vadd.xlane.f32.xlu1 %v8861_v62  ;;  %v13891_v50 = vadd.f32 %v8778_v47, %v13694_v59  ;;  %v8855_v38 = vsel %vm130_vm0, %v13883_v10, 0.0 }
0x115a   :  { %v8864_v15 = vsel %vm130_vm0, %v13886_v43, 0.0 }
0x115b   :  { %8865 = vadd.xlane.f32.xlu0 %v8864_v15  ;;  %v8858_v49 = vsel %vm130_vm0, %v13891_v50, 0.0 }
0x115d   :  { %8856 = vadd.xlane.f32.xlu1 %v8855_v38 }
0x115f   :  { %8859 = vadd.xlane.f32.xlu0 %v8858_v49 }
0x1196   :  { %v10574_v16 = vpop.f32.mrb[252].mxu0 }
0x1197   :  { %v8799_v48 = vadd.f32 %v10574_v16, %v13873_v6  ;;  %v8790_v40 = vpop.f32.mrb[253].mxu0 }
0x1198   :  { %v8791_v8 = vadd.f32 %v13873_v6, %v8790_v40  ;;  %v10575_v59 = vpop.f32.mrb[254].mxu0 }
0x1199   :  { %v13902_v34 = vadd.f32 %v8799_v48, %v13726_v12  ;;  %v8802_v19 = vadd.f32 %v10575_v59, %v13873_v6  ;;  %v8793_v13 = vpop.f32.mrb[255].mxu0 }
0x119a   :  { %v8794_v39 = vadd.f32 %v13873_v6, %v8793_v13  ;;  %v13907_v26 = vadd.f32 %v8791_v8, %v13717_v58 }
0x119b   :  { %v13910_v53 = vadd.f32 %v8802_v19, %v13729_v2  ;;  %v8873_v60 = vsel %vm130_vm0, %v13902_v34, 0.0 }
0x119c   :  { %8874 = vadd.xlane.f32.xlu1 %v8873_v60  ;;  %v13915_v54 = vadd.f32 %v8794_v39, %v13720_v61  ;;  %v8867_v63 = vsel %vm130_vm0, %v13907_v26, 0.0 }
0x119d   :  { %v8876_v12 = vsel %vm130_vm0, %v13910_v53, 0.0 }
0x119e   :  { %8877 = vadd.xlane.f32.xlu0 %v8876_v12  ;;  %v8870_v58 = vsel %vm130_vm0, %v13915_v54, 0.0 }
0x11a0   :  { %8868 = vadd.xlane.f32.xlu1 %v8867_v63 }
0x11a2   :  { %8871 = vadd.xlane.f32.xlu0 %v8870_v58 }
0x11d0   :  { %v10578_v2 = vpop.f32.mrb[0].mxu0 }
0x11d1   :  { %v8815_v17 = vadd.f32 %v10578_v2, %v13873_v6  ;;  %v8806_v11 = vpop.f32.mrb[1].mxu0 }
0x11d2   :  { %v8807_v20 = vadd.f32 %v13873_v6, %v8806_v11  ;;  %v10579_v61 = vpop.f32.mrb[2].mxu0 }
0x11d3   :  { %v13926_v31 = vadd.f32 %v8815_v17, %v13764_v46  ;;  %v8818_v25 = vadd.f32 %v10579_v61, %v13873_v6  ;;  %v8809_v21 = vpop.f32.mrb[3].mxu0 }
0x11d4   :  { %v8810_v1 = vadd.f32 %v13873_v6, %v8809_v21  ;;  %v13931_v42 = vadd.f32 %v8807_v20, %v13755_v0 }
0x11d5   :  { %v13934_v51 = vadd.f32 %v8818_v25, %v13767_v44  ;;  %v8885_v7 = vsel %vm130_vm0, %v13926_v31, 0.0 }
0x11d6   :  { %8886 = vadd.xlane.f32.xlu1 %v8885_v7  ;;  %v13939_v45 = vadd.f32 %v8810_v1, %v13758_v23  ;;  %v8879_v56 = vsel %vm130_vm0, %v13931_v42, 0.0 }
0x11d7   :  { %v8888_v46 = vsel %vm130_vm0, %v13934_v51, 0.0 }
0x11d8   :  { %8889 = vadd.xlane.f32.xlu0 %v8888_v46  ;;  %v8882_v0 = vsel %vm130_vm0, %v13939_v45, 0.0 }
0x11da   :  { %8880 = vadd.xlane.f32.xlu1 %v8879_v56 }
0x11dc   :  { %8883 = vadd.xlane.f32.xlu0 %v8882_v0 }
0x11e0   :  { %v10582_v44 = vpop.f32.mrb[4].mxu0 }
0x11e1   :  { %v8822_v5 = vpop.f32.mrb[5].mxu0  ;;  %v8831_v4 = vadd.f32 %v10582_v44, %v13873_v6 }
0x11e2   :  { %v8823_v52 = vadd.f32 %v13873_v6, %v8822_v5  ;;  %v10583_v23 = vpop.f32.mrb[6].mxu0 }
0x11e3   :  { %v8825_v28 = vpop.f32.mrb[7].mxu0  ;;  %v8834_v18 = vadd.f32 %v10583_v23, %v13873_v6  ;;  %v13955_v41 = vadd.f32 %v8831_v4, %v13790_v30 }
0x11e4   :  { %v13950_v57 = vadd.f32 %v8823_v52, %v13781_v33  ;;  %v8826_v24 = vadd.f32 %v13873_v6, %v8825_v28 }
0x11e5   :  { %v13963_v9 = vadd.f32 %v8834_v18, %v13793_v37  ;;  %v8897_v30 = vsel %vm130_vm0, %v13955_v41, 0.0 }
0x11e6   :  { %v13958_v55 = vadd.f32 %v8826_v24, %v13784_v3  ;;  %v8863_v14 = vpop.xlane.xlu1 %8862  ;;  %v8891_v22 = vsel %vm130_vm0, %v13950_v57, 0.0 }
0x11e7   :  { %8892 = vadd.xlane.f32.xlu1 %v8891_v22  ;;  %v8905_v35 = vmul.f32 0.03125, %v8863_v14  ;;  %v8900_v47 = vsel %vm130_vm0, %v13963_v9, 0.0 }
0x11e8   :  { %v8866_v33 = vpop.xlane.xlu0 %8865  ;;  %v8894_v36 = vsel %vm130_vm0, %v13958_v55, 0.0 }
0x11e9   :  { %8895 = vadd.xlane.f32.xlu0 %v8894_v36  ;;  %v8906_v3 = vmul.f32 0.03125, %v8866_v33  ;;  %v13972_v37 = vsub.f32 %v13878_v32, %v8905_v35 }
0x11ea   :  { %v8857_v6 = vpop.xlane.xlu1 %8856 }
0x11eb   :  { %v8903_v27 = vmul.f32 0.03125, %v8857_v6  ;;  %8898 = vadd.xlane.f32.xlu1 %v8897_v30  ;;  %v13978_v38 = vsub.f32 %v13886_v43, %v8906_v3 }
0x11ec   :  { %v8860_v29 = vpop.xlane.xlu0 %8859 }
0x11ed   :  { %v13975_v62 = vsub.f32 %v13883_v10, %v8903_v27  ;;  %v8904_v15 = vmul.f32 0.03125, %v8860_v29  ;;  %8901 = vadd.xlane.f32.xlu0 %v8900_v47  ;;  %v8937_v10 = vmul.f32 %v13972_v37, %v13972_v37  ;;  %v8938_v43 = vmul.f32 %v13978_v38, %v13978_v38 }
0x11ef   :  { %v13981_v49 = vsub.f32 %v13891_v50, %v8904_v15  ;;  %v8935_v16 = vmul.f32 %v13975_v62, %v13975_v62  ;;  %v8957_v50 = vsel %vm130_vm0, %v8937_v10, 0.0  ;;  %v8960_v8 = vsel %vm130_vm0, %v8938_v43, 0.0 }
0x11f1   :  { %v8951_v48 = vsel %vm130_vm0, %v8935_v16, 0.0  ;;  %v8936_v32 = vmul.f32 %v13981_v49, %v13981_v49 }
0x11f2   :  { %8952 = vadd.xlane.f32.xlu1 %v8951_v48 }
0x11f3   :  { %v8954_v40 = vsel %vm130_vm0, %v8936_v32, 0.0 }
0x11f4   :  { %8955 = vadd.xlane.f32.xlu0 %v8954_v40 }
0x11f6   :  { %8958 = vadd.xlane.f32.xlu1 %v8957_v50 }
0x11f8   :  { %8961 = vadd.xlane.f32.xlu0 %v8960_v8 }
0x1229   :  { %v8875_v59 = vpop.xlane.xlu1 %8874 }
0x122a   :  { %v8909_v19 = vmul.f32 0.03125, %v8875_v59 }
0x122b   :  { %v8878_v13 = vpop.xlane.xlu0 %8877 }
0x122c   :  { %v13996_v39 = vsub.f32 %v13902_v34, %v8909_v19  ;;  %v8910_v60 = vmul.f32 0.03125, %v8878_v13 }
0x122d   :  { %v8869_v12 = vpop.xlane.xlu1 %8868 }
0x122e   :  { %v13999_v63 = vsub.f32 %v13910_v53, %v8910_v60  ;;  %v8907_v58 = vmul.f32 0.03125, %v8869_v12  ;;  %v8941_v2 = vmul.f32 %v13996_v39, %v13996_v39 }
0x122f   :  { %v8872_v17 = vpop.xlane.xlu0 %8871 }
0x1230   :  { %v14004_v11 = vsub.f32 %v13907_v26, %v8907_v58  ;;  %v8908_v20 = vmul.f32 0.03125, %v8872_v17  ;;  %v8969_v61 = vsel %vm130_vm0, %v8941_v2, 0.0  ;;  %v8942_v34 = vmul.f32 %v13999_v63, %v13999_v63 }
0x1231   :  { %8970 = vadd.xlane.f32.xlu1 %v8969_v61 }
0x1232   :  { %v14010_v25 = vsub.f32 %v13915_v54, %v8908_v20  ;;  %v8972_v53 = vsel %vm130_vm0, %v8942_v34, 0.0  ;;  %v8939_v21 = vmul.f32 %v14004_v11, %v14004_v11 }
0x1233   :  { %8973 = vadd.xlane.f32.xlu0 %v8972_v53 }
0x1234   :  { %v8963_v1 = vsel %vm130_vm0, %v8939_v21, 0.0  ;;  %v8940_v26 = vmul.f32 %v14010_v25, %v14010_v25 }
0x1235   :  { %8964 = vadd.xlane.f32.xlu1 %v8963_v1  ;;  %v14070_v1 = vld [vmem:[%s14168_s12] ss:$0 sm:$0xff]  ;;  %s11145_s12 = smov [#allocation5]  }
0x1236   :  { %v8966_v7 = vsel %vm130_vm0, %v8940_v26, 0.0 }
0x1237   :  { %8967 = vadd.xlane.f32.xlu0 %v8966_v7 }
0x1263   :  { %v8887_v46 = vpop.xlane.xlu1 %8886 }
0x1264   :  { %v8913_v56 = vmul.f32 0.03125, %v8887_v46  ;;  %v14076_v46 = vld [vmem:[%s14169_s13] ss:$0 sm:$0xff]  ;;  %s9128_s13 = sshll.u32 %s11145_s12, 4  ;;  %s9129_s13 = int_to_ptr.vmem [resolvable:$true] %s9128_s13 }
0x1265   :  { %v8890_v0 = vpop.xlane.xlu0 %8889  ;;  %s11103_s4 = scalar_lea.vmem %s9129_s13, 2048  ;;  %p11108_p9 = scmp.lt.s32.totalorder %s9129_s13, %s9129_s13 }
0x1266   :  { %v14020_v54 = vsub.f32 %v13926_v31, %v8913_v56  ;;  %v8914_v44 = vmul.f32 0.03125, %v8890_v0  ;;  %p11104_p8 = scmp.ne.s32.totalorder %s9129_s13, %s11103_s4  ;;  %p11109_p10 = scmp.lt.s32.totalorder %s11103_s4, %s11103_s4 }
0x1267   :  { %v8881_v5 = vpop.xlane.xlu1 %8880 }
0x1268   :  { %v14023_v4 = vsub.f32 %v13934_v51, %v8914_v44  ;;  %v8911_v52 = vmul.f32 0.03125, %v8881_v5  ;;  %v8945_v23 = vmul.f32 %v14020_v54, %v14020_v54  ;;  %p11110_p11 = por %p11109_p10, %p11108_p9 }
0x1269   :  { %v8884_v28 = vpop.xlane.xlu0 %8883 }
0x126a   :  { %v14028_v18 = vsub.f32 %v13931_v42, %v8911_v52  ;;  %v8912_v24 = vmul.f32 0.03125, %v8884_v28  ;;  %v8981_v14 = vsel %vm130_vm0, %v8945_v23, 0.0  ;;  %v8946_v31 = vmul.f32 %v14023_v4, %v14023_v4  ;;  %p11111_p12 = pnand %p11110_p11, %p11104_p8 }
0x126b   :  { %8982 = vadd.xlane.f32.xlu1 %v8981_v14 }
0x126c   :  { %v14034_v22 = vsub.f32 %v13939_v45, %v8912_v24  ;;  %v8984_v51 = vsel %vm130_vm0, %v8946_v31, 0.0  ;;  %v8943_v33 = vmul.f32 %v14028_v18, %v14028_v18 }
0x126d   :  { %8985 = vadd.xlane.f32.xlu0 %v8984_v51 }
0x126e   :  { %v8975_v36 = vsel %vm130_vm0, %v8943_v33, 0.0  ;;  %v8944_v42 = vmul.f32 %v14034_v22, %v14034_v22 }
0x126f   :  { %8976 = vadd.xlane.f32.xlu1 %v8975_v36 }
0x1270   :  { %v8978_v35 = vsel %vm130_vm0, %v8944_v42, 0.0 }
0x1271   :  { %8979 = vadd.xlane.f32.xlu0 %v8978_v35 }
0x1274   :  { %v8893_v6 = vpop.xlane.xlu1 %8892 }
0x1275   :  { %v8915_v30 = vmul.f32 0.03125, %v8893_v6 }
0x1276   :  { %v8896_v3 = vpop.xlane.xlu0 %8895 }
0x1277   :  { %v14044_v45 = vsub.f32 %v13950_v57, %v8915_v30  ;;  %v8916_v27 = vmul.f32 0.03125, %v8896_v3 }
0x1278   :  { %v8899_v29 = vpop.xlane.xlu1 %8898 }
0x1279   :  { %v14047_v47 = vsub.f32 %v13958_v55, %v8916_v27  ;;  %v8917_v15 = vmul.f32 0.03125, %v8899_v29  ;;  %v8947_v16 = vmul.f32 %v14044_v45, %v14044_v45 }
0x127a   :  { %v8902_v48 = vpop.xlane.xlu0 %8901 }
0x127b   :  { %v14052_v32 = vsub.f32 %v13955_v41, %v8917_v15  ;;  %v8918_v10 = vmul.f32 0.03125, %v8902_v48  ;;  %v8987_v40 = vsel %vm130_vm0, %v8947_v16, 0.0  ;;  %v8948_v57 = vmul.f32 %v14047_v47, %v14047_v47 }
0x127c   :  { %8988 = vadd.xlane.f32.xlu1 %v8987_v40 }
0x127d   :  { %v14058_v43 = vsub.f32 %v13963_v9, %v8918_v10  ;;  %v8990_v55 = vsel %vm130_vm0, %v8948_v57, 0.0  ;;  %v8949_v50 = vmul.f32 %v14052_v32, %v14052_v32 }
0x127e   :  { %8991 = vadd.xlane.f32.xlu0 %v8990_v55 }
0x127f   :  { %v8953_v8 = vpop.xlane.xlu1 %8952  ;;  %v8993_v41 = vsel %vm130_vm0, %v8949_v50, 0.0  ;;  %v8950_v59 = vmul.f32 %v14058_v43, %v14058_v43 }
0x1280   :  { %v8999_v19 = vmul.f32 0.03125, %v8953_v8  ;;  %8994 = vadd.xlane.f32.xlu1 %v8993_v41 }
0x1281   :  { %v8956_v13 = vpop.xlane.xlu0 %8955  ;;  %v8996_v60 = vsel %vm130_vm0, %v8950_v59, 0.0 }
0x1282   :  { %v9015_v12 = vadd.f32 1e-05, %v8999_v19  ;;  %v9000_v9 = vmul.f32 0.03125, %v8956_v13  ;;  %8997 = vadd.xlane.f32.xlu0 %v8996_v60 }
0x1283   :  { %v8959_v58 = vpop.xlane.xlu1 %8958 }
0x1284   :  { %10985 = vrsqrt.f32 %v9015_v12  ;;  %v9016_v2 = vadd.f32 1e-05, %v9000_v9  ;;  %v9001_v17 = vmul.f32 0.03125, %v8959_v58 }
0x1285   :  { %v8962_v20 = vpop.xlane.xlu0 %8961 }
0x1286   :  { %10987 = vrsqrt.f32 %v9016_v2  ;;  %v9017_v61 = vadd.f32 1e-05, %v9001_v17  ;;  %v9002_v34 = vmul.f32 0.03125, %v8962_v20 }
0x1288   :  { %10989 = vrsqrt.f32 %v9017_v61  ;;  %v9018_v53 = vadd.f32 1e-05, %v9002_v34 }
0x128a   :  { %10991 = vrsqrt.f32 %v9018_v53 }
0x128e   :  { %v10986_v21 = vpop.eup %10985 }
0x128f   :  { %v9047_v26 = vmul.f32 %v10986_v21, %v13975_v62 }
0x1290   :  { %v10988_v7 = vpop.eup %10987 }
0x1291   :  { %v9069_v56 = vmul.f32 %v14070_v1, %v9047_v26  ;;  %v9048_v0 = vmul.f32 %v10988_v7, %v13981_v49 }
0x1292   :  { %v10990_v44 = vpop.eup %10989 }
0x1293   :  { %v9091_v5 = vadd.f32 %v14076_v46, %v9069_v56  ;;  %v9070_v52 = vmul.f32 %v14070_v1, %v9048_v0  ;;  %v9049_v23 = vmul.f32 %v10990_v44, %v13972_v37 }
0x1294   :  { %v10992_v28 = vpop.eup %10991 }
0x1295   :  { %9107 = vst.msk [vmem:[#allocation5] sm:$0xff] %vm130_vm0, %v9091_v5  ;;  %v9092_v62 = vadd.f32 %v14076_v46, %v9070_v52  ;;  %v9071_v24 = vmul.f32 %v14070_v1, %v9049_v23  ;;  %v9050_v14 = vmul.f32 %v10992_v28, %v13978_v38 }
0x1297   :  { %9108 = vst.msk [vmem:[#allocation5 + $0x8] sm:$0xff] %vm130_vm0, %v9092_v62  ;;  %v9093_v49 = vadd.f32 %v14076_v46, %v9071_v24  ;;  %v9072_v31 = vmul.f32 %v14070_v1, %v9050_v14 }
0x1299   :  { %9109 = vst.msk [vmem:[#allocation5 + $0x10] sm:$0xff] %vm130_vm0, %v9093_v49  ;;  %v9094_v51 = vadd.f32 %v14076_v46, %v9072_v31 }
0x129b   :  { %9110 = vst.msk [vmem:[#allocation5 + $0x18] sm:$0xff] %vm130_vm0, %v9094_v51 }
0x12be   :  { %v8971_v37 = vpop.xlane.xlu1 %8970 }
0x12bf   :  { %v9005_v33 = vmul.f32 0.03125, %v8971_v37 }
0x12c0   :  { %v8974_v36 = vpop.xlane.xlu0 %8973 }
0x12c1   :  { %v9021_v42 = vadd.f32 1e-05, %v9005_v33  ;;  %v9006_v35 = vmul.f32 0.03125, %v8974_v36 }
0x12c2   :  { %v8965_v6 = vpop.xlane.xlu1 %8964 }
0x12c3   :  { %10993 = vrsqrt.f32 %v9021_v42  ;;  %v9022_v38 = vadd.f32 1e-05, %v9006_v35  ;;  %v9003_v30 = vmul.f32 0.03125, %v8965_v6 }
0x12c4   :  { %v8968_v3 = vpop.xlane.xlu0 %8967 }
0x12c5   :  { %10995 = vrsqrt.f32 %v9022_v38  ;;  %v9019_v27 = vadd.f32 1e-05, %v9003_v30  ;;  %v9004_v29 = vmul.f32 0.03125, %v8968_v3 }
0x12c7   :  { %10997 = vrsqrt.f32 %v9019_v27  ;;  %v9020_v15 = vadd.f32 1e-05, %v9004_v29 }
0x12c9   :  { %10999 = vrsqrt.f32 %v9020_v15 }
0x12cd   :  { %v10994_v16 = vpop.eup %10993 }
0x12ce   :  { %v9053_v48 = vmul.f32 %v10994_v16, %v13996_v39 }
0x12cf   :  { %v10996_v10 = vpop.eup %10995 }
0x12d0   :  { %v9075_v40 = vmul.f32 %v14070_v1, %v9053_v48  ;;  %v9054_v57 = vmul.f32 %v10996_v10, %v13999_v63 }
0x12d1   :  { %v10998_v55 = vpop.eup %10997 }
0x12d2   :  { %v9097_v50 = vadd.f32 %v14076_v46, %v9075_v40  ;;  %v9076_v8 = vmul.f32 %v14070_v1, %v9054_v57  ;;  %v9051_v41 = vmul.f32 %v10998_v55, %v14004_v11 }
0x12d3   :  { %v11000_v59 = vpop.eup %10999 }
0x12d4   :  { %9113 = vst.msk [vmem:[#allocation5 + $0x30] sm:$0xff] %vm130_vm0, %v9097_v50  ;;  %v9098_v19 = vadd.f32 %v14076_v46, %v9076_v8  ;;  %v9073_v13 = vmul.f32 %v14070_v1, %v9051_v41  ;;  %v9052_v39 = vmul.f32 %v11000_v59, %v14010_v25 }
0x12d6   :  { %9114 = vst.msk [vmem:[#allocation5 + $0x38] sm:$0xff] %vm130_vm0, %v9098_v19  ;;  %v9095_v63 = vadd.f32 %v14076_v46, %v9073_v13  ;;  %v9074_v60 = vmul.f32 %v14070_v1, %v9052_v39 }
0x12d8   :  { %9111 = vst.msk [vmem:[#allocation5 + $0x20] sm:$0xff] %vm130_vm0, %v9095_v63  ;;  %v9096_v12 = vadd.f32 %v14076_v46, %v9074_v60 }
0x12da   :  { %9112 = vst.msk [vmem:[#allocation5 + $0x28] sm:$0xff] %vm130_vm0, %v9096_v12 }
0x12f8   :  { %v8983_v11 = vpop.xlane.xlu1 %8982 }
0x12f9   :  { %v9009_v9 = vmul.f32 0.03125, %v8983_v11 }
0x12fa   :  { %v8986_v58 = vpop.xlane.xlu0 %8985 }
0x12fb   :  { %v9025_v2 = vadd.f32 1e-05, %v9009_v9  ;;  %v9010_v17 = vmul.f32 0.03125, %v8986_v58 }
0x12fc   :  { %v8977_v20 = vpop.xlane.xlu1 %8976 }
0x12fd   :  { %11001 = vrsqrt.f32 %v9025_v2  ;;  %v9026_v25 = vadd.f32 1e-05, %v9010_v17  ;;  %v9007_v61 = vmul.f32 0.03125, %v8977_v20 }
0x12fe   :  { %v8980_v34 = vpop.xlane.xlu0 %8979 }
0x12ff   :  { %11003 = vrsqrt.f32 %v9026_v25  ;;  %v9023_v53 = vadd.f32 1e-05, %v9007_v61  ;;  %v9008_v21 = vmul.f32 0.03125, %v8980_v34 }
0x1301   :  { %11005 = vrsqrt.f32 %v9023_v53  ;;  %v9024_v26 = vadd.f32 1e-05, %v9008_v21 }
0x1303   :  { %11007 = vrsqrt.f32 %v9024_v26 }
0x1307   :  { %v11002_v7 = vpop.eup %11001 }
0x1308   :  { %v9057_v56 = vmul.f32 %v11002_v7, %v14020_v54 }
0x1309   :  { %v11004_v0 = vpop.eup %11003  ;;  %v8989_v44 = vpop.xlane.xlu1 %8988 }
0x130a   :  { %v9079_v5 = vmul.f32 %v14070_v1, %v9057_v56  ;;  %v9058_v52 = vmul.f32 %v11004_v0, %v14023_v4  ;;  %v9011_v23 = vmul.f32 0.03125, %v8989_v44 }
0x130b   :  { %v11006_v28 = vpop.eup %11005  ;;  %v8992_v62 = vpop.xlane.xlu0 %8991 }
0x130c   :  { %v9101_v24 = vadd.f32 %v14076_v46, %v9079_v5  ;;  %v9080_v14 = vmul.f32 %v14070_v1, %v9058_v52  ;;  %v9055_v49 = vmul.f32 %v11006_v28, %v14028_v18  ;;  %v9027_v31 = vadd.f32 1e-05, %v9011_v23 }
0x130d   :  { %v11008_v51 = vpop.eup %11007  ;;  %v9012_v37 = vmul.f32 0.03125, %v8992_v62  ;;  %v8995_v33 = vpop.xlane.xlu1 %8994 }
0x130e   :  { %9117 = vst.msk [vmem:[#allocation5 + $0x50] sm:$0xff] %vm130_vm0, %v9101_v24  ;;  %v9102_v54 = vadd.f32 %v14076_v46, %v9080_v14  ;;  %v9077_v36 = vmul.f32 %v14070_v1, %v9055_v49  ;;  %v9056_v4 = vmul.f32 %v11008_v51, %v14034_v22  ;;  %11009 = vrsqrt.f32 %v9027_v31 }
0x130f   :  { %v9028_v42 = vadd.f32 1e-05, %v9012_v37  ;;  %v9013_v35 = vmul.f32 0.03125, %v8995_v33  ;;  %v8998_v6 = vpop.xlane.xlu0 %8997 }
0x1310   :  { %9118 = vst.msk [vmem:[#allocation5 + $0x58] sm:$0xff] %vm130_vm0, %v9102_v54  ;;  %v9099_v18 = vadd.f32 %v14076_v46, %v9077_v36  ;;  %v9078_v38 = vmul.f32 %v14070_v1, %v9056_v4  ;;  %v9014_v30 = vmul.f32 0.03125, %v8998_v6 }
0x1311   :  { %11011 = vrsqrt.f32 %v9028_v42  ;;  %v9029_v3 = vadd.f32 1e-05, %v9013_v35 }
0x1312   :  { %9115 = vst.msk [vmem:[#allocation5 + $0x40] sm:$0xff] %vm130_vm0, %v9099_v18  ;;  %v9100_v27 = vadd.f32 %v14076_v46, %v9078_v38  ;;  %v9030_v29 = vadd.f32 1e-05, %v9014_v30 }
0x1313   :  { %11013 = vrsqrt.f32 %v9029_v3 }
0x1314   :  { %9116 = vst.msk [vmem:[#allocation5 + $0x48] sm:$0xff] %vm130_vm0, %v9100_v27  ;;  %11015 = vrsqrt.f32 %v9030_v29 }
0x1318   :  { %v11010_v22 = vpop.eup %11009 }
0x1319   :  { %v9059_v15 = vmul.f32 %v11010_v22, %v14044_v45 }
0x131b   :  { %v11012_v16 = vpop.eup %11011  ;;  %v9081_v48 = vmul.f32 %v14070_v1, %v9059_v15 }
0x131c   :  { %v9060_v10 = vmul.f32 %v11012_v16, %v14047_v47 }
0x131d   :  { %v11014_v40 = vpop.eup %11013  ;;  %v9103_v57 = vadd.f32 %v14076_v46, %v9081_v48 }
0x131e   :  { %v11016_v55 = vpop.eup %11015  ;;  %v9082_v50 = vmul.f32 %v14070_v1, %v9060_v10  ;;  %v9061_v8 = vmul.f32 %v11014_v40, %v14052_v32 }
0x131f   :  { %9119 = vst.msk [vmem:[#allocation5 + $0x60] sm:$0xff] %vm130_vm0, %v9103_v57  ;;  %v9062_v41 = vmul.f32 %v11016_v55, %v14058_v43 }
0x1320   :  { %v9104_v59 = vadd.f32 %v14076_v46, %v9082_v50  ;;  %v9083_v45 = vmul.f32 %v14070_v1, %v9061_v8 }
0x1321   :  { %v9084_v47 = vmul.f32 %v14070_v1, %v9062_v41 }
0x1322   :  { %9120 = vst.msk [vmem:[#allocation5 + $0x68] sm:$0xff] %vm130_vm0, %v9104_v59  ;;  %v9105_v19 = vadd.f32 %v14076_v46, %v9083_v45 }
0x1323   :  { %v9106_v13 = vadd.f32 %v14076_v46, %v9084_v47 }
0x1324   :  { %9121 = vst.msk [vmem:[#allocation5 + $0x70] sm:$0xff] %vm130_vm0, %v9105_v19 }
0x1325   :  { %9122 = vst.msk [vmem:[#allocation5 + $0x78] sm:$0xff] %vm130_vm0, %v9106_v13 }
0x1326   :  { %11114 = shalt.err (!%p11111_p12)
}
0x1327   :  { %s11115_s0 = scalar_lea.hbm %s14170_s14, 2048 }
0x1328   :  { %p11116_p13 = scmp.ne.s32.totalorder %s14170_s14, %s11115_s0  ;;  %p11119_p0 = scmp.lt.u32.totalorder %s11115_s0, %s14170_s14 }
0x132a   :  { %p11121_p1 = pnand %p11119_p0, %p11116_p13 }
0x132c   :  { %11124 = shalt.err (!%p11121_p1)
}
0x132d   :  { %9134 = dma.vmem_to_hbm [thread:$0]  %s9129_s13, 2048, %s14170_s14, [#allocation4], %s11130_s23, %s11130_s23, %s11131_s24  }
0x132e   :  { %11127 = dma.done.wait [#allocation4], 2048  }
0x132f   :  { %11128 = vsyncadd [#allocation4], 4294965248 }
0x1330   :  { %9138 = vsyncpa [#allocation3], 1 }
0x1331   :  { %9139 = vsyncpa [#allocation4], 1 }

</bundles_post_ra>
